<compile_context>
chip_gen: v5e
topology: v5e:2x2
jax: 0.10.0
libtpu: 0.0.40
codegen_flags: <defaults>
</compile_context>

<pallas_src>
import functools
import math

import jax
import jax.numpy as jnp
import numpy as np
from jax.experimental import pallas as pl
from jax.experimental.pallas import tpu as pltpu


# ----------------------------------------------------------------------------
# Fused matmul kernel: out = act((x @ w) * scale + shift)
# ----------------------------------------------------------------------------
def _fused_matmul_kernel(x_ref, w_ref, scale_ref, shift_ref, o_ref, *, activation):
    acc = jnp.dot(x_ref[...], w_ref[...], preferred_element_type=jnp.float32)
    acc = acc * scale_ref[...] + shift_ref[...]
    if activation == "leaky_relu":
        acc = jnp.where(acc > 0, acc, 0.2 * acc)
    elif activation == "tanh":
        acc = jnp.tanh(acc)
    o_ref[...] = acc.astype(o_ref.dtype)


def _fused_matmul(x, w, scale, shift, *, activation, out_dtype):
    M, K = x.shape
    Kw, N = w.shape
    assert K == Kw
    tm = math.gcd(M, min(M, 512))          # full rows if small, else aligned divisor
    if tm != M and tm % 8 != 0:
        tm = M
    kernel = functools.partial(_fused_matmul_kernel, activation=activation)
    return pl.pallas_call(
        kernel,
        out_shape=jax.ShapeDtypeStruct((M, N), out_dtype),
        grid=(M // tm,),
        in_specs=[
            pl.BlockSpec((tm, K), lambda i: (i, 0)),   # activation rows, tiled
            pl.BlockSpec((K, N), lambda i: (0, 0)),    # weight pinned in VMEM
            pl.BlockSpec((1, N), lambda i: (0, 0)),    # folded BN scale
            pl.BlockSpec((1, N), lambda i: (0, 0)),    # folded BN shift
        ],
        out_specs=pl.BlockSpec((tm, N), lambda i: (i, 0)),
        compiler_params=pltpu.CompilerParams(dimension_semantics=("parallel",)),
    )(x, w, scale, shift)


# ----------------------------------------------------------------------------
# Layout helpers (XLA side): im2col, depth-to-space, one-time weight packing.
# ----------------------------------------------------------------------------
def _im2col_3x3(x):
    """[B, H, W, C] -> [B*H*W, 9*C]; 3x3 neighbourhood (zero padded), (di, dj, c) order."""
    B, H, W, C = x.shape
    xp = jnp.pad(x, ((0, 0), (1, 1), (1, 1), (0, 0)))
    cols = [xp[:, di:di + H, dj:dj + W, :] for di in range(3) for dj in range(3)]
    return jnp.concatenate(cols, axis=-1).reshape(B * H * W, 9 * C)


def _depth_to_space_2x(y, B, H, W):
    """[B*H*W, 4*C] with columns ordered (r, s, c) -> [B, 2H, 2W, C]."""
    C = y.shape[-1] // 4
    y = y.reshape(B, H, W, 2, 2, C)
    y = jnp.transpose(y, (0, 1, 3, 2, 4, 5))
    return y.reshape(B, 2 * H, 2 * W, C)


# (output parity r) -> ((im2col tap di, kernel row kh), ...); same mapping for columns.
_PARITY_TAPS = {0: ((1, 1), (0, 3)), 1: ((1, 2), (2, 0))}


def _pack_convT_s2(wt):
    """ConvTranspose2d(k=4, s=2, p=1) weight [Cin, Cout, 4, 4] -> [9*Cin, 4*Cout]."""
    cin, cout = wt.shape[0], wt.shape[1]
    wt_np = np.asarray(wt, np.float32)
    wb = np.zeros((3, 3, cin, 2, 2, cout), np.float32)
    for r, row_taps in _PARITY_TAPS.items():
        for di, kh in row_taps:
            for s, col_taps in _PARITY_TAPS.items():
                for dj, kw in col_taps:
                    wb[di, dj, :, r, s, :] = wt_np[:, :, kh, kw]
    return jnp.asarray(wb.reshape(9 * cin, 4 * cout))


def _pack_convT_first(wt):
    """ConvTranspose2d(k=4, s=1, p=0) on 1x1 input: [Cin, Cout, 4, 4] -> [Cin, 16*Cout]."""
    cin, cout = wt.shape[0], wt.shape[1]
    return jnp.transpose(wt, (0, 2, 3, 1)).reshape(cin, 16 * cout)


def _fold_bn(gamma, beta, mean, var, eps=1e-5):
    scale = gamma / jnp.sqrt(var + eps)
    shift = beta - mean * scale
    return scale, shift


# ----------------------------------------------------------------------------
# Parameters
# ----------------------------------------------------------------------------
def init_raw_params(key, nc, n_classes, nz, ngf):
    chans = [nz + n_classes, ngf * 8, ngf * 4, ngf * 4, ngf * 2, ngf * 2, nc]
    convs, bns = [], []
    for li in range(6):
        cin, cout = chans[li], chans[li + 1]
        key, kw = jax.random.split(key)
        std = 1.0 / np.sqrt(cin * 16)
        convs.append(std * jax.random.normal(kw, (cin, cout, 4, 4), jnp.float32))
        if li < 5:
            key, k1, k2, k3, k4 = jax.random.split(key, 5)
            bns.append((
                1.0 + 0.1 * jax.random.normal(k1, (cout,), jnp.float32),   # gamma
                0.1 * jax.random.normal(k2, (cout,), jnp.float32),         # beta
                0.1 * jax.random.normal(k3, (cout,), jnp.float32),         # running mean
                1.0 + 0.2 * jax.random.uniform(k4, (cout,), jnp.float32),  # running var
            ))
    return {"convs": convs, "bns": bns}


def prepare_params(raw):
    """One-time packing: bf16 matmul weights + folded f32 BN scale/shift per layer."""
    packed = []
    for li in range(6):
        wt = raw["convs"][li]
        cout = wt.shape[1]
        if li == 0:
            wmat, reps = _pack_convT_first(wt), 16
        else:
            wmat, reps = _pack_convT_s2(wt), 4
        if li < 5:
            scale, shift = _fold_bn(*raw["bns"][li])
        else:
            scale = jnp.ones((cout,), jnp.float32)
            shift = jnp.zeros((cout,), jnp.float32)
        packed.append((
            wmat.astype(jnp.bfloat16),
            jnp.tile(scale, reps).reshape(1, -1).astype(jnp.float32),
            jnp.tile(shift, reps).reshape(1, -1).astype(jnp.float32),
        ))
    return packed


# ----------------------------------------------------------------------------
# Forward pass
# ----------------------------------------------------------------------------
def mnist_generator_info(noise, label, packed):
    """noise [B, nz(,1,1)], label [B, n_classes(,1,1)] -> img [B, nc, 128, 128] (NCHW)."""
    B = noise.shape[0]
    z = jnp.concatenate(
        [noise.reshape(B, -1), label.reshape(B, -1)], axis=-1).astype(jnp.float32)

    # Layer 1: 1x1 -> 4x4 (pure matmul) + BN + LeakyReLU.
    w, sc, sh = packed[0]
    y = _fused_matmul(z.astype(jnp.bfloat16), w, sc, sh,
                      activation="leaky_relu", out_dtype=jnp.bfloat16)
    x = y.reshape(B, 4, 4, y.shape[-1] // 16)

    # Layers 2..6: stride-2 ConvTranspose via 3x3 im2col + parity-packed matmul.
    H = 4
    for li in range(1, 6):
        w, sc, sh = packed[li]
        last = li == 5
        y = _fused_matmul(
            _im2col_3x3(x), w, sc, sh,
            activation="tanh" if last else "leaky_relu",
            out_dtype=jnp.float32 if last else jnp.bfloat16)
        x = _depth_to_space_2x(y, B, H, H)
        H *= 2

    return jnp.transpose(x, (0, 3, 1, 2))   # NHWC -> NCHW (match PyTorch)


# ----------------------------------------------------------------------------
# Independent reference (XLA conv) used only for the in-script correctness check.
# ----------------------------------------------------------------------------
def _conv_transpose_ref(x_nhwc, wt, stride, pad):
    K = wt.shape[2]
    rhs = jnp.transpose(wt, (2, 3, 0, 1))[::-1, ::-1, :, :]   # flipped kernel, HWIO
    return jax.lax.conv_general_dilated(
        x_nhwc, rhs, window_strides=(1, 1),
        padding=[(K - 1 - pad, K - 1 - pad)] * 2,
        lhs_dilation=(stride, stride),
        dimension_numbers=("NHWC", "HWIO", "NHWC"))


def _q(x):   # mirror the kernel path's bf16 storage of weights / activations
    return x.astype(jnp.bfloat16).astype(jnp.float32)


def reference_forward(noise, label, raw):
    B = noise.shape[0]
    x = jnp.concatenate(
        [noise.reshape(B, -1), label.reshape(B, -1)], axis=-1).astype(jnp.float32)
    x = _q(x).reshape(B, 1, 1, -1)
    strides = [(1, 0)] + [(2, 1)] * 5
    for li in range(6):
        x = _conv_transpose_ref(x, _q(raw["convs"][li]), *strides[li])
        if li < 5:
            scale, shift = _fold_bn(*raw["bns"][li])
            x = x * scale + shift
            x = _q(jnp.where(x > 0, x, 0.2 * x))
        else:
            x = jnp.tanh(x)
    return jnp.transpose(x, (0, 3, 1, 2))


# ----------------------------------------------------------------------------
if __name__ == "__main__":
    key = jax.random.PRNGKey(0)
    k_param, k_noise, k_label = jax.random.split(key, 3)

    # Small config consistent with the module: channel=1, n_classes=10, nz=32, ngf=16.
    B, NC, N_CLASSES, NZ, NGF = 2, 1, 10, 32, 16

    raw = init_raw_params(k_param, NC, N_CLASSES, NZ, NGF)
    packed = prepare_params(raw)   # one-time bf16 packing; per-call path stays clean

    noise = jax.random.normal(k_noise, (B, NZ, 1, 1), jnp.float32)
    label = jax.nn.one_hot(
        jax.random.randint(k_label, (B,), 0, N_CLASSES), N_CLASSES, dtype=jnp.float32)

    fwd = jax.jit(mnist_generator_info)
    img = jax.block_until_ready(fwd(noise, label, packed))

    assert img.shape == (B, NC, 128, 128), img.shape
    assert bool(jnp.all(jnp.isfinite(img)))
    assert bool(jnp.all(jnp.abs(img) <= 1.0 + 1e-3))

    # Cross-check against an independent XLA conv-transpose reference.
    ref = jax.block_until_ready(reference_forward(noise, label, raw))
    max_err = float(jnp.max(jnp.abs(img - ref)))
    assert max_err < 2e-2, f"mismatch vs reference: {max_err}"

    print("KERNEL_OK")
</pallas_src>

<mosaic_0001>
module attributes {stable_mosaic.version = 11 : i64} {
  func.func @_fused_matmul_kernel(%arg0: i32, %arg1: memref<2x42xbf16, #tpu.memory_space<vmem>>, %arg2: memref<42x2048xbf16, #tpu.memory_space<vmem>>, %arg3: memref<1x2048xf32, #tpu.memory_space<vmem>>, %arg4: memref<1x2048xf32, #tpu.memory_space<vmem>>, %arg5: memref<2x2048xbf16, #tpu.memory_space<vmem>>) attributes {dimension_semantics = [#tpu.dimension_semantics<parallel>], iteration_bounds = array<i64: 1>, scalar_prefetch = 0 : i64, scratch_operands = 0 : i64, tpu.core_type = #tpu.core_type<tc>, window_params = [{transform_indices = @transform_0, window_bounds = array<i64: 2, 42>}, {pipeline_mode = #tpu.pipeline_mode<synchronous>, transform_indices = @transform_1, window_bounds = array<i64: 42, 2048>}, {pipeline_mode = #tpu.pipeline_mode<synchronous>, transform_indices = @transform_2, window_bounds = array<i64: 1, 2048>}, {pipeline_mode = #tpu.pipeline_mode<synchronous>, transform_indices = @transform_3, window_bounds = array<i64: 1, 2048>}, {transform_indices = @transform_4, window_bounds = array<i64: 2, 2048>}]} {
    %c0 = arith.constant 0 : index
    %c0_0 = arith.constant 0 : index
    %0 = vector.load %arg1[%c0, %c0_0] : memref<2x42xbf16, #tpu.memory_space<vmem>>, vector<2x42xbf16>
    %c0_1 = arith.constant 0 : index
    %c0_2 = arith.constant 0 : index
    %1 = vector.load %arg2[%c0_1, %c0_2] : memref<42x2048xbf16, #tpu.memory_space<vmem>>, vector<42x2048xbf16>
    %cst = arith.constant dense<0.000000e+00> : vector<2x2048xf32>
    %2 = tpu.matmul %0, %1, %cst {dimension_numbers = #tpu.dot_dimension_numbers<[1], [0], [0], [1], [0, 0, 1, 1], [], []>} : vector<2x42xbf16>, vector<42x2048xbf16>, vector<2x2048xf32> -> vector<2x2048xf32>
    %c0_3 = arith.constant 0 : index
    %c0_4 = arith.constant 0 : index
    %3 = vector.load %arg3[%c0_3, %c0_4] : memref<1x2048xf32, #tpu.memory_space<vmem>>, vector<1x2048xf32>
    %4 = vector.broadcast %3 : vector<1x2048xf32> to vector<2x2048xf32>
    %5 = arith.mulf %2, %4 : vector<2x2048xf32>
    %c0_5 = arith.constant 0 : index
    %c0_6 = arith.constant 0 : index
    %6 = vector.load %arg4[%c0_5, %c0_6] : memref<1x2048xf32, #tpu.memory_space<vmem>>, vector<1x2048xf32>
    %7 = vector.broadcast %6 : vector<1x2048xf32> to vector<2x2048xf32>
    %8 = arith.addf %5, %7 : vector<2x2048xf32>
    %cst_7 = arith.constant 0.000000e+00 : f32
    %9 = vector.broadcast %cst_7 : f32 to vector<2x2048xf32>
    %10 = arith.cmpf ogt, %8, %9 : vector<2x2048xf32>
    %cst_8 = arith.constant 2.000000e-01 : f32
    %11 = vector.broadcast %cst_8 : f32 to vector<2x2048xf32>
    %12 = arith.mulf %11, %8 : vector<2x2048xf32>
    %13 = arith.select %10, %8, %12 : vector<2x2048xi1>, vector<2x2048xf32>
    %14 = arith.truncf %13 : vector<2x2048xf32> to vector<2x2048xbf16>
    %c0_9 = arith.constant 0 : index
    %c0_10 = arith.constant 0 : index
    %15 = vector.load %arg5[%c0_9, %c0_10] : memref<2x2048xbf16, #tpu.memory_space<vmem>>, vector<2x2048xbf16>
    tpu.vector_store %arg5[%c0_9, %c0_10], %14 {strides = array<i32>} : memref<2x2048xbf16, #tpu.memory_space<vmem>>, vector<2x2048xbf16>,
    return
  }
  func.func @transform_0(%arg0: i32) -> (i32, i32) {
    %c0_i32 = arith.constant 0 : i32
    %c0_i32_0 = arith.constant 0 : i32
    return %arg0, %c0_i32 : i32, i32
  }
  func.func @transform_1(%arg0: i32) -> (i32, i32) {
    %c0_i32 = arith.constant 0 : i32
    %c0_i32_0 = arith.constant 0 : i32
    %c0_i32_1 = arith.constant 0 : i32
    return %c0_i32, %c0_i32_0 : i32, i32
  }
  func.func @transform_2(%arg0: i32) -> (i32, i32) {
    %c0_i32 = arith.constant 0 : i32
    %c0_i32_0 = arith.constant 0 : i32
    %c0_i32_1 = arith.constant 0 : i32
    return %c0_i32, %c0_i32_0 : i32, i32
  }
  func.func @transform_3(%arg0: i32) -> (i32, i32) {
    %c0_i32 = arith.constant 0 : i32
    %c0_i32_0 = arith.constant 0 : i32
    %c0_i32_1 = arith.constant 0 : i32
    return %c0_i32, %c0_i32_0 : i32, i32
  }
  func.func @transform_4(%arg0: i32) -> (i32, i32) {
    %c0_i32 = arith.constant 0 : i32
    %c0_i32_0 = arith.constant 0 : i32
    return %arg0, %c0_i32 : i32, i32
  }
}

module attributes {stable_mosaic.version = 11 : i64} {
  func.func @_fused_matmul_kernel(%arg0: i32, %arg1: memref<32x1152xbf16, #tpu.memory_space<vmem>>, %arg2: memref<1152x256xbf16, #tpu.memory_space<vmem>>, %arg3: memref<1x256xf32, #tpu.memory_space<vmem>>, %arg4: memref<1x256xf32, #tpu.memory_space<vmem>>, %arg5: memref<32x256xbf16, #tpu.memory_space<vmem>>) attributes {dimension_semantics = [#tpu.dimension_semantics<parallel>], iteration_bounds = array<i64: 1>, scalar_prefetch = 0 : i64, scratch_operands = 0 : i64, tpu.core_type = #tpu.core_type<tc>, window_params = [{transform_indices = @transform_0, window_bounds = array<i64: 32, 1152>}, {pipeline_mode = #tpu.pipeline_mode<synchronous>, transform_indices = @transform_1, window_bounds = array<i64: 1152, 256>}, {pipeline_mode = #tpu.pipeline_mode<synchronous>, transform_indices = @transform_2, window_bounds = array<i64: 1, 256>}, {pipeline_mode = #tpu.pipeline_mode<synchronous>, transform_indices = @transform_3, window_bounds = array<i64: 1, 256>}, {transform_indices = @transform_4, window_bounds = array<i64: 32, 256>}]} {
    %c0 = arith.constant 0 : index
    %c0_0 = arith.constant 0 : index
    %0 = vector.load %arg1[%c0, %c0_0] : memref<32x1152xbf16, #tpu.memory_space<vmem>>, vector<32x1152xbf16>
    %c0_1 = arith.constant 0 : index
    %c0_2 = arith.constant 0 : index
    %1 = vector.load %arg2[%c0_1, %c0_2] : memref<1152x256xbf16, #tpu.memory_space<vmem>>, vector<1152x256xbf16>
    %cst = arith.constant dense<0.000000e+00> : vector<32x256xf32>
    %2 = tpu.matmul %0, %1, %cst {dimension_numbers = #tpu.dot_dimension_numbers<[1], [0], [0], [1], [0, 0, 1, 1], [], []>} : vector<32x1152xbf16>, vector<1152x256xbf16>, vector<32x256xf32> -> vector<32x256xf32>
    %c0_3 = arith.constant 0 : index
    %c0_4 = arith.constant 0 : index
    %3 = vector.load %arg3[%c0_3, %c0_4] : memref<1x256xf32, #tpu.memory_space<vmem>>, vector<1x256xf32>
    %4 = vector.broadcast %3 : vector<1x256xf32> to vector<32x256xf32>
    %5 = arith.mulf %2, %4 : vector<32x256xf32>
    %c0_5 = arith.constant 0 : index
    %c0_6 = arith.constant 0 : index
    %6 = vector.load %arg4[%c0_5, %c0_6] : memref<1x256xf32, #tpu.memory_space<vmem>>, vector<1x256xf32>
    %7 = vector.broadcast %6 : vector<1x256xf32> to vector<32x256xf32>
    %8 = arith.addf %5, %7 : vector<32x256xf32>
    %cst_7 = arith.constant 0.000000e+00 : f32
    %9 = vector.broadcast %cst_7 : f32 to vector<32x256xf32>
    %10 = arith.cmpf ogt, %8, %9 : vector<32x256xf32>
    %cst_8 = arith.constant 2.000000e-01 : f32
    %11 = vector.broadcast %cst_8 : f32 to vector<32x256xf32>
    %12 = arith.mulf %11, %8 : vector<32x256xf32>
    %13 = arith.select %10, %8, %12 : vector<32x256xi1>, vector<32x256xf32>
    %14 = arith.truncf %13 : vector<32x256xf32> to vector<32x256xbf16>
    %c0_9 = arith.constant 0 : index
    %c0_10 = arith.constant 0 : index
    %15 = vector.load %arg5[%c0_9, %c0_10] : memref<32x256xbf16, #tpu.memory_space<vmem>>, vector<32x256xbf16>
    tpu.vector_store %arg5[%c0_9, %c0_10], %14 {strides = array<i32>} : memref<32x256xbf16, #tpu.memory_space<vmem>>, vector<32x256xbf16>,
    return
  }
  func.func @transform_0(%arg0: i32) -> (i32, i32) {
    %c0_i32 = arith.constant 0 : i32
    %c0_i32_0 = arith.constant 0 : i32
    return %arg0, %c0_i32 : i32, i32
  }
  func.func @transform_1(%arg0: i32) -> (i32, i32) {
    %c0_i32 = arith.constant 0 : i32
    %c0_i32_0 = arith.constant 0 : i32
    %c0_i32_1 = arith.constant 0 : i32
    return %c0_i32, %c0_i32_0 : i32, i32
  }
  func.func @transform_2(%arg0: i32) -> (i32, i32) {
    %c0_i32 = arith.constant 0 : i32
    %c0_i32_0 = arith.constant 0 : i32
    %c0_i32_1 = arith.constant 0 : i32
    return %c0_i32, %c0_i32_0 : i32, i32
  }
  func.func @transform_3(%arg0: i32) -> (i32, i32) {
    %c0_i32 = arith.constant 0 : i32
    %c0_i32_0 = arith.constant 0 : i32
    %c0_i32_1 = arith.constant 0 : i32
    return %c0_i32, %c0_i32_0 : i32, i32
  }
  func.func @transform_4(%arg0: i32) -> (i32, i32) {
    %c0_i32 = arith.constant 0 : i32
    %c0_i32_0 = arith.constant 0 : i32
    return %arg0, %c0_i32 : i32, i32
  }
}

module attributes {stable_mosaic.version = 11 : i64} {
  func.func @_fused_matmul_kernel(%arg0: i32, %arg1: memref<128x576xbf16, #tpu.memory_space<vmem>>, %arg2: memref<576x256xbf16, #tpu.memory_space<vmem>>, %arg3: memref<1x256xf32, #tpu.memory_space<vmem>>, %arg4: memref<1x256xf32, #tpu.memory_space<vmem>>, %arg5: memref<128x256xbf16, #tpu.memory_space<vmem>>) attributes {dimension_semantics = [#tpu.dimension_semantics<parallel>], iteration_bounds = array<i64: 1>, scalar_prefetch = 0 : i64, scratch_operands = 0 : i64, tpu.core_type = #tpu.core_type<tc>, window_params = [{transform_indices = @transform_0, window_bounds = array<i64: 128, 576>}, {pipeline_mode = #tpu.pipeline_mode<synchronous>, transform_indices = @transform_1, window_bounds = array<i64: 576, 256>}, {pipeline_mode = #tpu.pipeline_mode<synchronous>, transform_indices = @transform_2, window_bounds = array<i64: 1, 256>}, {pipeline_mode = #tpu.pipeline_mode<synchronous>, transform_indices = @transform_3, window_bounds = array<i64: 1, 256>}, {transform_indices = @transform_4, window_bounds = array<i64: 128, 256>}]} {
    %c0 = arith.constant 0 : index
    %c0_0 = arith.constant 0 : index
    %0 = vector.load %arg1[%c0, %c0_0] : memref<128x576xbf16, #tpu.memory_space<vmem>>, vector<128x576xbf16>
    %c0_1 = arith.constant 0 : index
    %c0_2 = arith.constant 0 : index
    %1 = vector.load %arg2[%c0_1, %c0_2] : memref<576x256xbf16, #tpu.memory_space<vmem>>, vector<576x256xbf16>
    %cst = arith.constant dense<0.000000e+00> : vector<128x256xf32>
    %2 = tpu.matmul %0, %1, %cst {dimension_numbers = #tpu.dot_dimension_numbers<[1], [0], [0], [1], [0, 0, 1, 1], [], []>} : vector<128x576xbf16>, vector<576x256xbf16>, vector<128x256xf32> -> vector<128x256xf32>
    %c0_3 = arith.constant 0 : index
    %c0_4 = arith.constant 0 : index
    %3 = vector.load %arg3[%c0_3, %c0_4] : memref<1x256xf32, #tpu.memory_space<vmem>>, vector<1x256xf32>
    %4 = vector.broadcast %3 : vector<1x256xf32> to vector<128x256xf32>
    %5 = arith.mulf %2, %4 : vector<128x256xf32>
    %c0_5 = arith.constant 0 : index
    %c0_6 = arith.constant 0 : index
    %6 = vector.load %arg4[%c0_5, %c0_6] : memref<1x256xf32, #tpu.memory_space<vmem>>, vector<1x256xf32>
    %7 = vector.broadcast %6 : vector<1x256xf32> to vector<128x256xf32>
    %8 = arith.addf %5, %7 : vector<128x256xf32>
    %cst_7 = arith.constant 0.000000e+00 : f32
    %9 = vector.broadcast %cst_7 : f32 to vector<128x256xf32>
    %10 = arith.cmpf ogt, %8, %9 : vector<128x256xf32>
    %cst_8 = arith.constant 2.000000e-01 : f32
    %11 = vector.broadcast %cst_8 : f32 to vector<128x256xf32>
    %12 = arith.mulf %11, %8 : vector<128x256xf32>
    %13 = arith.select %10, %8, %12 : vector<128x256xi1>, vector<128x256xf32>
    %14 = arith.truncf %13 : vector<128x256xf32> to vector<128x256xbf16>
    %c0_9 = arith.constant 0 : index
    %c0_10 = arith.constant 0 : index
    %15 = vector.load %arg5[%c0_9, %c0_10] : memref<128x256xbf16, #tpu.memory_space<vmem>>, vector<128x256xbf16>
    tpu.vector_store %arg5[%c0_9, %c0_10], %14 {strides = array<i32>} : memref<128x256xbf16, #tpu.memory_space<vmem>>, vector<128x256xbf16>,
    return
  }
  func.func @transform_0(%arg0: i32) -> (i32, i32) {
    %c0_i32 = arith.constant 0 : i32
    %c0_i32_0 = arith.constant 0 : i32
    return %arg0, %c0_i32 : i32, i32
  }
  func.func @transform_1(%arg0: i32) -> (i32, i32) {
    %c0_i32 = arith.constant 0 : i32
    %c0_i32_0 = arith.constant 0 : i32
    %c0_i32_1 = arith.constant 0 : i32
    return %c0_i32, %c0_i32_0 : i32, i32
  }
  func.func @transform_2(%arg0: i32) -> (i32, i32) {
    %c0_i32 = arith.constant 0 : i32
    %c0_i32_0 = arith.constant 0 : i32
    %c0_i32_1 = arith.constant 0 : i32
    return %c0_i32, %c0_i32_0 : i32, i32
  }
  func.func @transform_3(%arg0: i32) -> (i32, i32) {
    %c0_i32 = arith.constant 0 : i32
    %c0_i32_0 = arith.constant 0 : i32
    %c0_i32_1 = arith.constant 0 : i32
    return %c0_i32, %c0_i32_0 : i32, i32
  }
  func.func @transform_4(%arg0: i32) -> (i32, i32) {
    %c0_i32 = arith.constant 0 : i32
    %c0_i32_0 = arith.constant 0 : i32
    return %arg0, %c0_i32 : i32, i32
  }
}

module attributes {stable_mosaic.version = 11 : i64} {
  func.func @_fused_matmul_kernel(%arg0: i32, %arg1: memref<512x576xbf16, #tpu.memory_space<vmem>>, %arg2: memref<576x128xbf16, #tpu.memory_space<vmem>>, %arg3: memref<1x128xf32, #tpu.memory_space<vmem>>, %arg4: memref<1x128xf32, #tpu.memory_space<vmem>>, %arg5: memref<512x128xbf16, #tpu.memory_space<vmem>>) attributes {dimension_semantics = [#tpu.dimension_semantics<parallel>], iteration_bounds = array<i64: 1>, scalar_prefetch = 0 : i64, scratch_operands = 0 : i64, tpu.core_type = #tpu.core_type<tc>, window_params = [{transform_indices = @transform_0, window_bounds = array<i64: 512, 576>}, {pipeline_mode = #tpu.pipeline_mode<synchronous>, transform_indices = @transform_1, window_bounds = array<i64: 576, 128>}, {pipeline_mode = #tpu.pipeline_mode<synchronous>, transform_indices = @transform_2, window_bounds = array<i64: 1, 128>}, {pipeline_mode = #tpu.pipeline_mode<synchronous>, transform_indices = @transform_3, window_bounds = array<i64: 1, 128>}, {transform_indices = @transform_4, window_bounds = array<i64: 512, 128>}]} {
    %c0 = arith.constant 0 : index
    %c0_0 = arith.constant 0 : index
    %0 = vector.load %arg1[%c0, %c0_0] : memref<512x576xbf16, #tpu.memory_space<vmem>>, vector<512x576xbf16>
    %c0_1 = arith.constant 0 : index
    %c0_2 = arith.constant 0 : index
    %1 = vector.load %arg2[%c0_1, %c0_2] : memref<576x128xbf16, #tpu.memory_space<vmem>>, vector<576x128xbf16>
    %cst = arith.constant dense<0.000000e+00> : vector<512x128xf32>
    %2 = tpu.matmul %0, %1, %cst {dimension_numbers = #tpu.dot_dimension_numbers<[1], [0], [0], [1], [0, 0, 1, 1], [], []>} : vector<512x576xbf16>, vector<576x128xbf16>, vector<512x128xf32> -> vector<512x128xf32>
    %c0_3 = arith.constant 0 : index
    %c0_4 = arith.constant 0 : index
    %3 = vector.load %arg3[%c0_3, %c0_4] : memref<1x128xf32, #tpu.memory_space<vmem>>, vector<1x128xf32>
    %4 = vector.broadcast %3 : vector<1x128xf32> to vector<512x128xf32>
    %5 = arith.mulf %2, %4 : vector<512x128xf32>
    %c0_5 = arith.constant 0 : index
    %c0_6 = arith.constant 0 : index
    %6 = vector.load %arg4[%c0_5, %c0_6] : memref<1x128xf32, #tpu.memory_space<vmem>>, vector<1x128xf32>
    %7 = vector.broadcast %6 : vector<1x128xf32> to vector<512x128xf32>
    %8 = arith.addf %5, %7 : vector<512x128xf32>
    %cst_7 = arith.constant 0.000000e+00 : f32
    %9 = vector.broadcast %cst_7 : f32 to vector<512x128xf32>
    %10 = arith.cmpf ogt, %8, %9 : vector<512x128xf32>
    %cst_8 = arith.constant 2.000000e-01 : f32
    %11 = vector.broadcast %cst_8 : f32 to vector<512x128xf32>
    %12 = arith.mulf %11, %8 : vector<512x128xf32>
    %13 = arith.select %10, %8, %12 : vector<512x128xi1>, vector<512x128xf32>
    %14 = arith.truncf %13 : vector<512x128xf32> to vector<512x128xbf16>
    %c0_9 = arith.constant 0 : index
    %c0_10 = arith.constant 0 : index
    %15 = vector.load %arg5[%c0_9, %c0_10] : memref<512x128xbf16, #tpu.memory_space<vmem>>, vector<512x128xbf16>
    tpu.vector_store %arg5[%c0_9, %c0_10], %14 {strides = array<i32>} : memref<512x128xbf16, #tpu.memory_space<vmem>>, vector<512x128xbf16>,
    return
  }
  func.func @transform_0(%arg0: i32) -> (i32, i32) {
    %c0_i32 = arith.constant 0 : i32
    %c0_i32_0 = arith.constant 0 : i32
    return %arg0, %c0_i32 : i32, i32
  }
  func.func @transform_1(%arg0: i32) -> (i32, i32) {
    %c0_i32 = arith.constant 0 : i32
    %c0_i32_0 = arith.constant 0 : i32
    %c0_i32_1 = arith.constant 0 : i32
    return %c0_i32, %c0_i32_0 : i32, i32
  }
  func.func @transform_2(%arg0: i32) -> (i32, i32) {
    %c0_i32 = arith.constant 0 : i32
    %c0_i32_0 = arith.constant 0 : i32
    %c0_i32_1 = arith.constant 0 : i32
    return %c0_i32, %c0_i32_0 : i32, i32
  }
  func.func @transform_3(%arg0: i32) -> (i32, i32) {
    %c0_i32 = arith.constant 0 : i32
    %c0_i32_0 = arith.constant 0 : i32
    %c0_i32_1 = arith.constant 0 : i32
    return %c0_i32, %c0_i32_0 : i32, i32
  }
  func.func @transform_4(%arg0: i32) -> (i32, i32) {
    %c0_i32 = arith.constant 0 : i32
    %c0_i32_0 = arith.constant 0 : i32
    return %arg0, %c0_i32 : i32, i32
  }
}

module attributes {stable_mosaic.version = 11 : i64} {
  func.func @_fused_matmul_kernel(%arg0: i32, %arg1: memref<512x288xbf16, #tpu.memory_space<vmem>>, %arg2: memref<288x128xbf16, #tpu.memory_space<vmem>>, %arg3: memref<1x128xf32, #tpu.memory_space<vmem>>, %arg4: memref<1x128xf32, #tpu.memory_space<vmem>>, %arg5: memref<512x128xbf16, #tpu.memory_space<vmem>>) attributes {dimension_semantics = [#tpu.dimension_semantics<parallel>], iteration_bounds = array<i64: 4>, scalar_prefetch = 0 : i64, scratch_operands = 0 : i64, tpu.core_type = #tpu.core_type<tc>, window_params = [{transform_indices = @transform_0, window_bounds = array<i64: 512, 288>}, {pipeline_mode = #tpu.pipeline_mode<synchronous>, transform_indices = @transform_1, window_bounds = array<i64: 288, 128>}, {pipeline_mode = #tpu.pipeline_mode<synchronous>, transform_indices = @transform_2, window_bounds = array<i64: 1, 128>}, {pipeline_mode = #tpu.pipeline_mode<synchronous>, transform_indices = @transform_3, window_bounds = array<i64: 1, 128>}, {transform_indices = @transform_4, window_bounds = array<i64: 512, 128>}]} {
    %c0 = arith.constant 0 : index
    %c0_0 = arith.constant 0 : index
    %0 = vector.load %arg1[%c0, %c0_0] : memref<512x288xbf16, #tpu.memory_space<vmem>>, vector<512x288xbf16>
    %c0_1 = arith.constant 0 : index
    %c0_2 = arith.constant 0 : index
    %1 = vector.load %arg2[%c0_1, %c0_2] : memref<288x128xbf16, #tpu.memory_space<vmem>>, vector<288x128xbf16>
    %cst = arith.constant dense<0.000000e+00> : vector<512x128xf32>
    %2 = tpu.matmul %0, %1, %cst {dimension_numbers = #tpu.dot_dimension_numbers<[1], [0], [0], [1], [0, 0, 1, 1], [], []>} : vector<512x288xbf16>, vector<288x128xbf16>, vector<512x128xf32> -> vector<512x128xf32>
    %c0_3 = arith.constant 0 : index
    %c0_4 = arith.constant 0 : index
    %3 = vector.load %arg3[%c0_3, %c0_4] : memref<1x128xf32, #tpu.memory_space<vmem>>, vector<1x128xf32>
    %4 = vector.broadcast %3 : vector<1x128xf32> to vector<512x128xf32>
    %5 = arith.mulf %2, %4 : vector<512x128xf32>
    %c0_5 = arith.constant 0 : index
    %c0_6 = arith.constant 0 : index
    %6 = vector.load %arg4[%c0_5, %c0_6] : memref<1x128xf32, #tpu.memory_space<vmem>>, vector<1x128xf32>
    %7 = vector.broadcast %6 : vector<1x128xf32> to vector<512x128xf32>
    %8 = arith.addf %5, %7 : vector<512x128xf32>
    %cst_7 = arith.constant 0.000000e+00 : f32
    %9 = vector.broadcast %cst_7 : f32 to vector<512x128xf32>
    %10 = arith.cmpf ogt, %8, %9 : vector<512x128xf32>
    %cst_8 = arith.constant 2.000000e-01 : f32
    %11 = vector.broadcast %cst_8 : f32 to vector<512x128xf32>
    %12 = arith.mulf %11, %8 : vector<512x128xf32>
    %13 = arith.select %10, %8, %12 : vector<512x128xi1>, vector<512x128xf32>
    %14 = arith.truncf %13 : vector<512x128xf32> to vector<512x128xbf16>
    %c0_9 = arith.constant 0 : index
    %c0_10 = arith.constant 0 : index
    %15 = vector.load %arg5[%c0_9, %c0_10] : memref<512x128xbf16, #tpu.memory_space<vmem>>, vector<512x128xbf16>
    tpu.vector_store %arg5[%c0_9, %c0_10], %14 {strides = array<i32>} : memref<512x128xbf16, #tpu.memory_space<vmem>>, vector<512x128xbf16>,
    return
  }
  func.func @transform_0(%arg0: i32) -> (i32, i32) {
    %c0_i32 = arith.constant 0 : i32
    %c0_i32_0 = arith.constant 0 : i32
    return %arg0, %c0_i32 : i32, i32
  }
  func.func @transform_1(%arg0: i32) -> (i32, i32) {
    %c0_i32 = arith.constant 0 : i32
    %c0_i32_0 = arith.constant 0 : i32
    %c0_i32_1 = arith.constant 0 : i32
    return %c0_i32, %c0_i32_0 : i32, i32
  }
  func.func @transform_2(%arg0: i32) -> (i32, i32) {
    %c0_i32 = arith.constant 0 : i32
    %c0_i32_0 = arith.constant 0 : i32
    %c0_i32_1 = arith.constant 0 : i32
    return %c0_i32, %c0_i32_0 : i32, i32
  }
  func.func @transform_3(%arg0: i32) -> (i32, i32) {
    %c0_i32 = arith.constant 0 : i32
    %c0_i32_0 = arith.constant 0 : i32
    %c0_i32_1 = arith.constant 0 : i32
    return %c0_i32, %c0_i32_0 : i32, i32
  }
  func.func @transform_4(%arg0: i32) -> (i32, i32) {
    %c0_i32 = arith.constant 0 : i32
    %c0_i32_0 = arith.constant 0 : i32
    return %arg0, %c0_i32 : i32, i32
  }
}

module attributes {stable_mosaic.version = 11 : i64} {
  func.func @_fused_matmul_kernel(%arg0: i32, %arg1: memref<512x288xbf16, #tpu.memory_space<vmem>>, %arg2: memref<288x4xbf16, #tpu.memory_space<vmem>>, %arg3: memref<1x4xf32, #tpu.memory_space<vmem>>, %arg4: memref<1x4xf32, #tpu.memory_space<vmem>>, %arg5: memref<512x4xf32, #tpu.memory_space<vmem>>) attributes {dimension_semantics = [#tpu.dimension_semantics<parallel>], iteration_bounds = array<i64: 16>, scalar_prefetch = 0 : i64, scratch_operands = 0 : i64, tpu.core_type = #tpu.core_type<tc>, window_params = [{transform_indices = @transform_0, window_bounds = array<i64: 512, 288>}, {pipeline_mode = #tpu.pipeline_mode<synchronous>, transform_indices = @transform_1, window_bounds = array<i64: 288, 4>}, {pipeline_mode = #tpu.pipeline_mode<synchronous>, transform_indices = @transform_2, window_bounds = array<i64: 1, 4>}, {pipeline_mode = #tpu.pipeline_mode<synchronous>, transform_indices = @transform_3, window_bounds = array<i64: 1, 4>}, {transform_indices = @transform_4, window_bounds = array<i64: 512, 4>}]} {
    %c0 = arith.constant 0 : index
    %c0_0 = arith.constant 0 : index
    %0 = vector.load %arg1[%c0, %c0_0] : memref<512x288xbf16, #tpu.memory_space<vmem>>, vector<512x288xbf16>
    %c0_1 = arith.constant 0 : index
    %c0_2 = arith.constant 0 : index
    %1 = vector.load %arg2[%c0_1, %c0_2] : memref<288x4xbf16, #tpu.memory_space<vmem>>, vector<288x4xbf16>
    %cst = arith.constant dense<0.000000e+00> : vector<512x4xf32>
    %2 = tpu.matmul %0, %1, %cst {dimension_numbers = #tpu.dot_dimension_numbers<[1], [0], [0], [1], [0, 0, 1, 1], [], []>} : vector<512x288xbf16>, vector<288x4xbf16>, vector<512x4xf32> -> vector<512x4xf32>
    %c0_3 = arith.constant 0 : index
    %c0_4 = arith.constant 0 : index
    %3 = vector.load %arg3[%c0_3, %c0_4] : memref<1x4xf32, #tpu.memory_space<vmem>>, vector<1x4xf32>
    %4 = vector.broadcast %3 : vector<1x4xf32> to vector<512x4xf32>
    %5 = arith.mulf %2, %4 : vector<512x4xf32>
    %c0_5 = arith.constant 0 : index
    %c0_6 = arith.constant 0 : index
    %6 = vector.load %arg4[%c0_5, %c0_6] : memref<1x4xf32, #tpu.memory_space<vmem>>, vector<1x4xf32>
    %7 = vector.broadcast %6 : vector<1x4xf32> to vector<512x4xf32>
    %8 = arith.addf %5, %7 : vector<512x4xf32>
    %9 = math.tanh %8 : vector<512x4xf32>
    %c0_7 = arith.constant 0 : index
    %c0_8 = arith.constant 0 : index
    %10 = vector.load %arg5[%c0_7, %c0_8] : memref<512x4xf32, #tpu.memory_space<vmem>>, vector<512x4xf32>
    tpu.vector_store %arg5[%c0_7, %c0_8], %9 {strides = array<i32>} : memref<512x4xf32, #tpu.memory_space<vmem>>, vector<512x4xf32>,
    return
  }
  func.func @transform_0(%arg0: i32) -> (i32, i32) {
    %c0_i32 = arith.constant 0 : i32
    %c0_i32_0 = arith.constant 0 : i32
    return %arg0, %c0_i32 : i32, i32
  }
  func.func @transform_1(%arg0: i32) -> (i32, i32) {
    %c0_i32 = arith.constant 0 : i32
    %c0_i32_0 = arith.constant 0 : i32
    %c0_i32_1 = arith.constant 0 : i32
    return %c0_i32, %c0_i32_0 : i32, i32
  }
  func.func @transform_2(%arg0: i32) -> (i32, i32) {
    %c0_i32 = arith.constant 0 : i32
    %c0_i32_0 = arith.constant 0 : i32
    %c0_i32_1 = arith.constant 0 : i32
    return %c0_i32, %c0_i32_0 : i32, i32
  }
  func.func @transform_3(%arg0: i32) -> (i32, i32) {
    %c0_i32 = arith.constant 0 : i32
    %c0_i32_0 = arith.constant 0 : i32
    %c0_i32_1 = arith.constant 0 : i32
    return %c0_i32, %c0_i32_0 : i32, i32
  }
  func.func @transform_4(%arg0: i32) -> (i32, i32) {
    %c0_i32 = arith.constant 0 : i32
    %c0_i32_0 = arith.constant 0 : i32
    return %arg0, %c0_i32 : i32, i32
  }
}

</mosaic_0001>

<bundles_post_ra>
// kernel: mnist_generator_info.6
= control target key start
LH: loop header
LB: loop body
LE: loop exit
PB: predicated region body
PF: predicated region fallthrough
CT: control target
= control target key end

     0   :  { %9 = vsyncpa [#allocation3], 0  ;;  %s1283_s0 = inlined_call_operand.vmem [shape: bf16[2,42], index: 0, kind: input, shape index: {}]   ;;  %s1284_s1 = inlined_call_operand.hbm [shape: bf16[42,2048], index: 1, kind: input, shape index: {}]   ;;  %s1285_s2 = inlined_call_operand.hbm [shape: f32[1,2048], index: 2, kind: input, shape index: {}]   ;;  %s1286_s3 = inlined_call_operand.hbm [shape: f32[1,2048], index: 3, kind: input, shape index: {}]   ;;  %s1287_s4 = inlined_call_operand.vmem [shape: bf16[2,2048], index: 4, kind: output, shape index: {}]  }
   0x1   :  { %10 = vsyncpa [#allocation5], 0  ;;  %s31_s17 = sshll.u32 %s1285_s2, 4  ;;  %s1161_s18 = smov [#allocation4]   ;;  %s32_s17 = int_to_ptr.hbm [resolvable:$true] %s31_s17 }
   0x2   :  { %s33_s19 = sshll.u32 %s1161_s18, 4  ;;  %s17_s22 = sshll.u32 %s1284_s1, 4  ;;  %s34_s19 = int_to_ptr.vmem [resolvable:$true] %s33_s19  ;;  %s18_s22 = int_to_ptr.hbm [resolvable:$true] %s17_s22 }
   0x3   :  { %36 = dma.hbm_to_vmem [thread:$0]  %s32_s17, 256, %s34_s19, [#allocation5]  }
   0x4   :  { %s1162_s23 = smov [#allocation2]   ;;  %s1163_s25 = smov 1024  }
   0x5   :  { %s19_s24 = sshll.u32 %s1162_s23, 4  ;;  %s1164_s26 = smov 64   ;;  %s20_s24 = int_to_ptr.vmem [resolvable:$true] %s19_s24 }
   0x6   :  { %25 = dma.hbm_to_vmem [thread:$0]  %s18_s22, 6144, %s20_s24, [#allocation3], %s1163_s25, %s1163_s25, %s1164_s26  }
   0x7   :  { %s42_s2 = sshll.u32 %s1286_s3, 4  ;;  %s1165_s29 = smov [#allocation6]   ;;  %s43_s2 = int_to_ptr.hbm [resolvable:$true] %s42_s2 }
   0x8   :  { %s44_s30 = sshll.u32 %s1165_s29, 4  ;;  %s45_s30 = int_to_ptr.vmem [resolvable:$true] %s44_s30 }
   0x9   :  { %47 = dma.hbm_to_vmem [thread:$0]  %s43_s2, 256, %s45_s30, [#allocation5]  }
   0xa   :  { %1157 = dma.done.wait [#allocation3], 6144  }
   0xb   :  { %1158 = vsyncadd [#allocation3], 4294961152 }
   0xc   :  { %1159 = dma.done.wait [#allocation5], 512  }
   0xd   :  { %1160 = vsyncadd [#allocation5], 4294966784  ;;  %vm338_vm0 = vcmask 1044480   ;;  %v954_v0 = vld [vmem:[#allocation2 + $0x100] sm:$0xf]  ;;  %vm334_vm1 = vcmask 343040  }
   0xe   :  { %v1072_v1 = vld [vmem:[#allocation2 + $0x13c] sm:$0x10]  ;;  %v1064_v2 = vld [vmem:[#allocation2 + $0x104] sm:$0xf]  ;;  %v962_v5 = vld [vmem:[#allocation2 + $0x108] sm:$0xf] }
   0xf   :  { %v955_v3 = vor.u32 %v1072_v1, %v954_v0  ;;  %v956_v4 = vld [vmem:[#allocation2 + $0x140] sm:$0x10]  ;;  %v1073_v6 = vld [vmem:[#allocation2 + $0x144] sm:$0x10]  ;;  %v1065_v9 = vld [vmem:[#allocation2 + $0x10c] sm:$0xf] }
  0x10   :  { %v959_v7 = vor.u32 %v1064_v2, %v956_v4  ;;  %v963_v8 = vor.u32 %v1073_v6, %v962_v5  ;;  %v964_v10 = vld [vmem:[#allocation2 + $0x148] sm:$0x10]  ;;  %v890_v11 = vld [vmem:[#allocation2 + $0x80] sm:$0xf]  ;;  %v1048_v15 = vld [vmem:[#allocation2 + $0x84] sm:$0xf] }
  0x11   :  { %v340_v12 = vsel %vm338_vm0, %v955_v3, 0  ;;  %v967_v13 = vor.u32 %v1065_v9, %v964_v10  ;;  %v1056_v14 = vld [vmem:[#allocation2 + $0xbc] sm:$0xf0]  ;;  %v892_v19 = vld [vmem:[#allocation2 + $0xc0] sm:$0xf0]  ;;  %vm781_vm10 = vcmask 1042434  }
  0x12   :  { %392 = vmatpush.bf16.msra.mxu0 %v340_v12  ;;  %v343_v16 = vsel %vm338_vm0, %v959_v7, 0  ;;  %v346_v17 = vsel %vm338_vm0, %v963_v8, 0  ;;  %v891_v18 = vor.u32 %v1056_v14, %v890_v11  ;;  %v898_v20 = vld [vmem:[#allocation2 + $0x88] sm:$0xf]  ;;  %v895_v22 = vor.u32 %v1048_v15, %v892_v19  ;;  %v1049_v24 = vld [vmem:[#allocation2 + $0x8c] sm:$0xf] }
  0x13   :  { %405 = vmatpush.bf16.msra.mxu1 %v343_v16  ;;  %418 = vmatpush.bf16.msra.mxu2 %v346_v17  ;;  %v349_v21 = vsel %vm338_vm0, %v967_v13, 0  ;;  %v1057_v23 = vld [vmem:[#allocation2 + $0xc4] sm:$0xf0]  ;;  %v900_v26 = vld [vmem:[#allocation2 + $0xc8] sm:$0xf0]  ;;  %vm777_vm11 = vcmask 1040384  }
  0x14   :  { %431 = vmatpush.bf16.msra.mxu3 %v349_v21  ;;  %v899_v25 = vor.u32 %v1057_v23, %v898_v20  ;;  %v826_v27 = vld [vmem:[#allocation2] sm:$0xf]  ;;  %v903_v29 = vor.u32 %v1049_v24, %v900_v26  ;;  %v1032_v30 = vld [vmem:[#allocation2 + $0x4] sm:$0xf]  ;;  %v834_v32 = vld [vmem:[#allocation2 + $0x8] sm:$0xf] }
  0x15   :  { %v1040_v28 = vld [vmem:[#allocation2 + $0x3c] sm:$0xf0]  ;;  %v828_v31 = vld [vmem:[#allocation2 + $0x40] sm:$0xf0]  ;;  %v1041_v34 = vld [vmem:[#allocation2 + $0x44] sm:$0xf0] }
  0x16   :  { %393 = vmatpush.bf16.msra.mxu0 %v891_v18  ;;  %v827_v33 = vor.u32 %v1040_v28, %v826_v27  ;;  %v1033_v35 = vld [vmem:[#allocation2 + $0xc] sm:$0xf]  ;;  %v831_v37 = vor.u32 %v1032_v30, %v828_v31  ;;  %v835_v38 = vor.u32 %v1041_v34, %v834_v32  ;;  %v978_v39 = vld [vmem:[#allocation2 + $0x118] sm:$0xf]  ;;  %v1207_v42 = vld [vmem:[%s1283_s0] sm:$0x1] }
  0x17   :  { %v836_v36 = vld [vmem:[#allocation2 + $0x48] sm:$0xf0]  ;;  %406 = vmatpush.bf16.msra.mxu1 %v895_v22  ;;  %419 = vmatpush.bf16.msra.mxu2 %v899_v25  ;;  %v1075_v40 = vld [vmem:[#allocation2 + $0x154] sm:$0x10]  ;;  %v1067_v44 = vld [vmem:[#allocation2 + $0x11c] sm:$0xf] }
  0x18   :  { %432 = vmatpush.bf16.msra.mxu3 %v903_v29  ;;  %v839_v41 = vor.u32 %v1033_v35, %v836_v36  ;;  %v979_v43 = vor.u32 %v1075_v40, %v978_v39  ;;  %v980_v45 = vld [vmem:[#allocation2 + $0x158] sm:$0x10]  ;;  %v970_v46 = vld [vmem:[#allocation2 + $0x110] sm:$0xf]  ;;  %v1066_v49 = vld [vmem:[#allocation2 + $0x114] sm:$0xf] }
  0x19   :  { %v983_v47 = vor.u32 %v1067_v44, %v980_v45  ;;  %v1074_v48 = vld [vmem:[#allocation2 + $0x14c] sm:$0x10]  ;;  %v972_v50 = vld [vmem:[#allocation2 + $0x150] sm:$0x10]  ;;  %v914_v54 = vld [vmem:[#allocation2 + $0x98] sm:$0xf] }
  0x1a   :  { %394 = vmatpush.bf16.msra.mxu0 %v827_v33  ;;  %v358_v51 = vsel %vm338_vm0, %v979_v43, 0  ;;  %v971_v52 = vor.u32 %v1074_v48, %v970_v46  ;;  %v975_v53 = vor.u32 %v1066_v49, %v972_v50  ;;  %v1059_v55 = vld [vmem:[#allocation2 + $0xd4] sm:$0xf0]  ;;  %v1051_v57 = vld [vmem:[#allocation2 + $0x9c] sm:$0xf]  ;;  %vm785_vm12 = vcmask 1041408  }
  0x1b   :  { %407 = vmatpush.bf16.msra.mxu1 %v831_v37  ;;  %420 = vmatpush.bf16.msra.mxu2 %v835_v38  ;;  %v361_v56 = vsel %vm338_vm0, %v983_v47, 0  ;;  %v916_v58 = vld [vmem:[#allocation2 + $0xd8] sm:$0xf0]  ;;  %v915_v61 = vor.u32 %v1059_v55, %v914_v54  ;;  %v906_v62 = vld [vmem:[#allocation2 + $0x90] sm:$0xf]  ;;  %vm787_vm13 = vcmask 1044484  }
  0x1c   :  { %433 = vmatpush.bf16.msra.mxu3 %v839_v41  ;;  %v352_v59 = vsel %vm338_vm0, %v971_v52, 0  ;;  %v355_v60 = vsel %vm338_vm0, %v975_v53, 0  ;;  %v1058_v63 = vld [vmem:[#allocation2 + $0xcc] sm:$0xf0]  ;;  %v919_v0 = vor.u32 %v1051_v57, %v916_v58  ;;  %v1050_v1 = vld [vmem:[#allocation2 + $0x94] sm:$0xf] }
  0x1d   :  { %1016 = vmatmul.msk.bf16.vlgmr.msra.gmra.mxu0 %vm334_vm1, %v1207_v42  ;;  %v908_v2 = vld [vmem:[#allocation2 + $0xd0] sm:$0xf0]  ;;  %v850_v3 = vld [vmem:[#allocation2 + $0x18] sm:$0xf]  ;;  %v1035_v5 = vld [vmem:[#allocation2 + $0x1c] sm:$0xf]  ;;  %v907_v7 = vor.u32 %v1058_v63, %v906_v62 }
  0x1e   :  { %1017 = vmatmul.msk.bf16.vlgmr.msra.gmra.mxu1 %vm334_vm1, %v1207_v42  ;;  %1018 = vmatmul.msk.bf16.vlgmr.msra.gmra.mxu2 %vm334_vm1, %v1207_v42  ;;  %v1043_v4 = vld [vmem:[#allocation2 + $0x54] sm:$0xf0]  ;;  %v852_v6 = vld [vmem:[#allocation2 + $0x58] sm:$0xf0]  ;;  %v842_v8 = vld [vmem:[#allocation2 + $0x10] sm:$0xf]  ;;  %v911_v11 = vor.u32 %v1050_v1, %v908_v2 }
  0x1f   :  { %470 = vmatpush.bf16.msrb.mxu2 %v358_v51  ;;  %1019 = vmatmul.msk.bf16.vlgmr.msra.gmra.mxu3 %vm334_vm1, %v1207_v42  ;;  %v1042_v9 = vld [vmem:[#allocation2 + $0x4c] sm:$0xf0]  ;;  %v1034_v10 = vld [vmem:[#allocation2 + $0x14] sm:$0xf]  ;;  %v851_v12 = vor.u32 %v1043_v4, %v850_v3  ;;  %v994_v14 = vld [vmem:[#allocation2 + $0x128] sm:$0xf]  ;;  %v855_v16 = vor.u32 %v1035_v5, %v852_v6 }
  0x20   :  { %483 = vmatpush.bf16.msrb.mxu3 %v361_v56  ;;  %444 = vmatpush.bf16.msrb.mxu0 %v352_v59  ;;  %v844_v13 = vld [vmem:[#allocation2 + $0x50] sm:$0xf0]  ;;  %v1077_v15 = vld [vmem:[#allocation2 + $0x164] sm:$0x10]  ;;  %v1069_v18 = vld [vmem:[#allocation2 + $0x12c] sm:$0xf]  ;;  %v843_v25 = vor.u32 %v1042_v9, %v842_v8 }
  0x21   :  { %457 = vmatpush.bf16.msrb.mxu1 %v355_v60  ;;  %v995_v17 = vor.u32 %v1077_v15, %v994_v14  ;;  %v996_v19 = vld [vmem:[#allocation2 + $0x168] sm:$0x10]  ;;  %v986_v20 = vld [vmem:[#allocation2 + $0x120] sm:$0xf]  ;;  %v1068_v23 = vld [vmem:[#allocation2 + $0x124] sm:$0xf]  ;;  %v847_v31 = vor.u32 %v1034_v10, %v844_v13 }
  0x22   :  { %v999_v21 = vor.u32 %v1069_v18, %v996_v19  ;;  %v1076_v22 = vld [vmem:[#allocation2 + $0x15c] sm:$0x10]  ;;  %v988_v24 = vld [vmem:[#allocation2 + $0x160] sm:$0x10]  ;;  %v930_v29 = vld [vmem:[#allocation2 + $0xa8] sm:$0xf] }
  0x23   :  { %471 = vmatpush.bf16.msrb.mxu2 %v915_v61  ;;  %v370_v26 = vsel %vm338_vm0, %v995_v17, 0  ;;  %v987_v27 = vor.u32 %v1076_v22, %v986_v20  ;;  %v991_v28 = vor.u32 %v1068_v23, %v988_v24  ;;  %v1061_v30 = vld [vmem:[#allocation2 + $0xe4] sm:$0xf0]  ;;  %v1053_v33 = vld [vmem:[#allocation2 + $0xac] sm:$0xf]  ;;  %vm791_vm14 = vcmask 1046534  }
  0x24   :  { %484 = vmatpush.bf16.msrb.mxu3 %v919_v0  ;;  %445 = vmatpush.bf16.msrb.mxu0 %v907_v7  ;;  %v373_v32 = vsel %vm338_vm0, %v999_v21, 0  ;;  %v932_v34 = vld [vmem:[#allocation2 + $0xe8] sm:$0xf0]  ;;  %v931_v37 = vor.u32 %v1061_v30, %v930_v29  ;;  %v922_v38 = vld [vmem:[#allocation2 + $0xa0] sm:$0xf]  ;;  %vm795_vm15 = vcmask 1045508  }
  0x25   :  { %458 = vmatpush.bf16.msrb.mxu1 %v911_v11  ;;  %v364_v35 = vsel %vm338_vm0, %v987_v27, 0  ;;  %v367_v36 = vsel %vm338_vm0, %v991_v28, 0  ;;  %v1060_v39 = vld [vmem:[#allocation2 + $0xdc] sm:$0xf0]  ;;  %v935_v40 = vor.u32 %v1053_v33, %v932_v34  ;;  %v1052_v41 = vld [vmem:[#allocation2 + $0xa4] sm:$0xf] }
  0x26   :  { %v924_v43 = vld [vmem:[#allocation2 + $0xe0] sm:$0xf0]  ;;  %v866_v44 = vld [vmem:[#allocation2 + $0x28] sm:$0xf]  ;;  %v1037_v46 = vld [vmem:[#allocation2 + $0x2c] sm:$0xf]  ;;  %v923_v48 = vor.u32 %v1060_v39, %v922_v38 }
  0x27   :  { %472 = vmatpush.bf16.msrb.mxu2 %v851_v12  ;;  %v1045_v45 = vld [vmem:[#allocation2 + $0x64] sm:$0xf0]  ;;  %v868_v47 = vld [vmem:[#allocation2 + $0x68] sm:$0xf0]  ;;  %v858_v49 = vld [vmem:[#allocation2 + $0x20] sm:$0xf]  ;;  %v927_v52 = vor.u32 %v1052_v41, %v924_v43 }
  0x28   :  { %485 = vmatpush.bf16.msrb.mxu3 %v855_v16  ;;  %446 = vmatpush.bf16.msrb.mxu0 %v843_v25  ;;  %v1044_v50 = vld [vmem:[#allocation2 + $0x5c] sm:$0xf0]  ;;  %v1036_v51 = vld [vmem:[#allocation2 + $0x24] sm:$0xf]  ;;  %v1010_v54 = vld [vmem:[#allocation2 + $0x138] sm:$0xf]  ;;  %v867_v60 = vor.u32 %v1045_v45, %v866_v44  ;;  %v871_v1 = vor.u32 %v1037_v46, %v868_v47 }
  0x29   :  { %459 = vmatpush.bf16.msrb.mxu1 %v847_v31  ;;  %v860_v53 = vld [vmem:[#allocation2 + $0x60] sm:$0xf0]  ;;  %v1079_v55 = vld [vmem:[#allocation2 + $0x174] sm:$0x10]  ;;  %v1071_v57 = vld [vmem:[#allocation2 + $0x13c] sm:$0xf]  ;;  %v859_v2 = vor.u32 %v1044_v50, %v858_v49 }
  0x2a   :  { %v1011_v56 = vor.u32 %v1079_v55, %v1010_v54  ;;  %v1012_v58 = vld [vmem:[#allocation2 + $0x178] sm:$0x10]  ;;  %v1002_v59 = vld [vmem:[#allocation2 + $0x130] sm:$0xf]  ;;  %v1070_v63 = vld [vmem:[#allocation2 + $0x134] sm:$0xf]  ;;  %v863_v5 = vor.u32 %v1036_v51, %v860_v53 }
  0x2b   :  { %522 = vmatpush.bf16.msra.mxu2 %v370_v26  ;;  %v1015_v61 = vor.u32 %v1071_v57, %v1012_v58  ;;  %v1078_v62 = vld [vmem:[#allocation2 + $0x16c] sm:$0x10]  ;;  %v1004_v0 = vld [vmem:[#allocation2 + $0x170] sm:$0x10]  ;;  %v946_v7 = vld [vmem:[#allocation2 + $0xb8] sm:$0xf] }
  0x2c   :  { %535 = vmatpush.bf16.msra.mxu3 %v373_v32  ;;  %496 = vmatpush.bf16.msra.mxu0 %v364_v35  ;;  %v1003_v3 = vor.u32 %v1078_v62, %v1002_v59  ;;  %v1007_v4 = vor.u32 %v1070_v63, %v1004_v0  ;;  %v382_v6 = vsel %vm338_vm0, %v1011_v56, 0  ;;  %v1063_v8 = vld [vmem:[#allocation2 + $0xf4] sm:$0xf0]  ;;  %v1055_v9 = vld [vmem:[#allocation2 + $0xbc] sm:$0xf]  ;;  %v647_v44 = vld [vmem:[#allocation6] sm:$0xff] }
  0x2d   :  { %509 = vmatpush.bf16.msra.mxu1 %v367_v36  ;;  %1020 = vmatmul.msk.bf16.vlgmr.msrb.gmra.mxu0 %vm334_vm1, %v1207_v42  ;;  %v948_v10 = vld [vmem:[#allocation2 + $0xf8] sm:$0xf0]  ;;  %v385_v11 = vsel %vm338_vm0, %v1015_v61, 0  ;;  %v938_v13 = vld [vmem:[#allocation2 + $0xb0] sm:$0xf]  ;;  %v947_v18 = vor.u32 %v1063_v8, %v946_v7  ;;  %v595_v36 = vld [vmem:[#allocation4] sm:$0xff] }
  0x2e   :  { %1021 = vmatmul.msk.bf16.vlgmr.msrb.gmra.mxu1 %vm334_vm1, %v1207_v42  ;;  %1022 = vmatmul.msk.bf16.vlgmr.msrb.gmra.mxu2 %vm334_vm1, %v1207_v42  ;;  %v376_v12 = vsel %vm338_vm0, %v1003_v3, 0  ;;  %v1062_v14 = vld [vmem:[#allocation2 + $0xec] sm:$0xf0]  ;;  %v379_v15 = vsel %vm338_vm0, %v1007_v4, 0  ;;  %v1054_v16 = vld [vmem:[#allocation2 + $0xb4] sm:$0xf]  ;;  %v951_v19 = vor.u32 %v1055_v9, %v948_v10 }
  0x2f   :  { %523 = vmatpush.bf16.msra.mxu2 %v931_v37  ;;  %1023 = vmatmul.msk.bf16.vlgmr.msrb.gmra.mxu3 %vm334_vm1, %v1207_v42  ;;  %v940_v17 = vld [vmem:[#allocation2 + $0xf0] sm:$0xf0]  ;;  %v939_v20 = vor.u32 %v1062_v14, %v938_v13  ;;  %v882_v21 = vld [vmem:[#allocation2 + $0x38] sm:$0xf]  ;;  %v1039_v23 = vld [vmem:[#allocation2 + $0x3c] sm:$0xf] }
  0x30   :  { %536 = vmatpush.bf16.msra.mxu3 %v935_v40  ;;  %497 = vmatpush.bf16.msra.mxu0 %v923_v48  ;;  %v1047_v22 = vld [vmem:[#allocation2 + $0x74] sm:$0xf0]  ;;  %v943_v24 = vor.u32 %v1054_v16, %v940_v17  ;;  %v884_v25 = vld [vmem:[#allocation2 + $0x78] sm:$0xf0]  ;;  %v874_v26 = vld [vmem:[#allocation2 + $0x30] sm:$0xf] }
  0x31   :  { %510 = vmatpush.bf16.msra.mxu1 %v927_v52  ;;  %v1046_v27 = vld [vmem:[#allocation2 + $0x6c] sm:$0xf0]  ;;  %v1038_v28 = vld [vmem:[#allocation2 + $0x34] sm:$0xf]  ;;  %v883_v30 = vor.u32 %v1047_v22, %v882_v21  ;;  %v887_v31 = vor.u32 %v1039_v23, %v884_v25  ;;  %v601_v38 = vperm.slane %v595_v36, 2  ;;  %v602_v39 = vperm.slane %v595_v36, 3 }
  0x32   :  { %v876_v29 = vld [vmem:[#allocation2 + $0x70] sm:$0xf0]  ;;  %v875_v32 = vor.u32 %v1046_v27, %v874_v26  ;;  %v599_v40 = vperm.slane %v595_v36, 0  ;;  %v600_v45 = vperm.slane %v595_v36, 1  ;;  %v653_v48 = vperm.slane %v647_v44, 2 }
  0x33   :  { %524 = vmatpush.bf16.msra.mxu2 %v867_v60  ;;  %v879_v33 = vor.u32 %v1038_v28, %v876_v29  ;;  %v654_v50 = vperm.slane %v647_v44, 3  ;;  %v651_v52 = vperm.slane %v647_v44, 0  ;;  %v603_v54 = vperm.slane %v595_v36, 4 }
  0x34   :  { %537 = vmatpush.bf16.msra.mxu3 %v871_v1  ;;  %498 = vmatpush.bf16.msra.mxu0 %v859_v2  ;;  %v604_v55 = vperm.slane %v595_v36, 5  ;;  %v655_v59 = vperm.slane %v647_v44, 4  ;;  %v656_v63 = vperm.slane %v647_v44, 5  ;;  %v605_v4 = vperm.slane %v595_v36, 6 }
  0x35   :  { %511 = vmatpush.bf16.msra.mxu1 %v863_v5  ;;  %v606_v8 = vperm.slane %v595_v36, 7  ;;  %v657_v13 = vperm.slane %v647_v44, 6  ;;  %vm797_vm0 = vcmask 1043456  }
  0x37   :  { %574 = vmatpush.bf16.msrb.mxu2 %v382_v6 }
  0x38   :  { %587 = vmatpush.bf16.msrb.mxu3 %v385_v11  ;;  %548 = vmatpush.bf16.msrb.mxu0 %v376_v12 }
  0x39   :  { %561 = vmatpush.bf16.msrb.mxu1 %v379_v15 }
  0x3b   :  { %575 = vmatpush.bf16.msrb.mxu2 %v947_v18  ;;  %v658_v18 = vperm.slane %v647_v44, 7 }
  0x3c   :  { %588 = vmatpush.bf16.msrb.mxu3 %v951_v19  ;;  %549 = vmatpush.bf16.msrb.mxu0 %v939_v20 }
  0x3d   :  { %562 = vmatpush.bf16.msrb.mxu1 %v943_v24  ;;  %1024 = vmatmul.msk.bf16.vlgmr.msra.gmra.mxu0 %vm334_vm1, %v1207_v42 }
  0x3e   :  { %1025 = vmatmul.msk.bf16.vlgmr.msra.gmra.mxu1 %vm334_vm1, %v1207_v42  ;;  %1026 = vmatmul.msk.bf16.vlgmr.msra.gmra.mxu2 %vm334_vm1, %v1207_v42 }
  0x3f   :  { %576 = vmatpush.bf16.msrb.mxu2 %v883_v30  ;;  %1027 = vmatmul.msk.bf16.vlgmr.msra.gmra.mxu3 %vm334_vm1, %v1207_v42 }
  0x40   :  { %589 = vmatpush.bf16.msrb.mxu3 %v887_v31  ;;  %550 = vmatpush.bf16.msrb.mxu0 %v875_v32 }
  0x41   :  { %563 = vmatpush.bf16.msrb.mxu1 %v879_v33 }
  0x4d   :  { %1028 = vmatmul.msk.bf16.vlgmr.msrb.gmra.mxu0 %vm334_vm1, %v1207_v42 }
  0x4e   :  { %1029 = vmatmul.msk.bf16.vlgmr.msrb.gmra.mxu1 %vm334_vm1, %v1207_v42  ;;  %1030 = vmatmul.msk.bf16.vlgmr.msrb.gmra.mxu2 %vm334_vm1, %v1207_v42 }
  0x4f   :  { %1031 = vmatmul.msk.bf16.vlgmr.msrb.gmra.mxu3 %vm334_vm1, %v1207_v42  ;;  %v652_v42 = vperm.slane %v647_v44, 1 }
  0x9a   :  { %v396_v34 = vpop.f32.mrf.mxu0 }
  0x9b   :  { %v409_v35 = vpop.f32.mrf.mxu1  ;;  %v631_v51 = vmul.f32 %v599_v40, %v396_v34 }
  0x9c   :  { %v632_v53 = vmul.f32 %v600_v45, %v409_v35 }
  0x9d   :  { %v683_v60 = vadd.f32 %v651_v52, %v631_v51 }
  0x9e   :  { %v684_v0 = vadd.f32 %v652_v42, %v632_v53 }
  0x9f   :  { %v715_v9 = vmul.f32 0.2, %v683_v60  ;;  %vm699_vm4 = vcmp.gt.f32.partialorder %v683_v60, 0.0 }
  0xa0   :  { %v716_v11 = vmul.f32 0.2, %v684_v0  ;;  %vm700_vm5 = vcmp.gt.f32.partialorder %v684_v0, 0.0 }
  0xa1   :  { %v422_v37 = vpop.f32.mrf.mxu2  ;;  %v731_v19 = vsel %vm699_vm4, %v683_v60, %v715_v9 }
  0xa2   :  { %v435_v41 = vpop.f32.mrf.mxu3  ;;  %v398_v43 = vpop.f32.mrf.mxu0  ;;  %v633_v47 = vmul.f32 %v601_v38, %v422_v37  ;;  %v732_v23 = vsel %vm700_vm5, %v684_v0, %v716_v11 }
  0xa3   :  { %v411_v46 = vpop.f32.mrf.mxu1  ;;  %v634_v49 = vmul.f32 %v602_v39, %v435_v41  ;;  %v747_v31 = vpack.c.bf16 %v732_v23, %v731_v19 }
  0xa4   :  { %v685_v56 = vadd.f32 %v653_v48, %v633_v47 }
  0xa5   :  { %v686_v57 = vadd.f32 %v654_v50, %v634_v49  ;;  %v763_v40 = vrot.slane %v747_v31, 3 }
  0xa6   :  { %v717_v5 = vmul.f32 0.2, %v685_v56  ;;  %vm701_vm2 = vcmp.gt.f32.partialorder %v685_v56, 0.0 }
  0xa7   :  { %v718_v6 = vmul.f32 0.2, %v686_v57  ;;  %vm702_vm3 = vcmp.gt.f32.partialorder %v686_v57, 0.0  ;;  %v780_v51 = vsel %vm777_vm11, %v747_v31, %v763_v40 }
  0xa8   :  { %v733_v15 = vsel %vm701_vm2, %v685_v56, %v717_v5 }
  0xa9   :  { %v424_v58 = vpop.f32.mrf.mxu2  ;;  %v734_v16 = vsel %vm702_vm3, %v686_v57, %v718_v6 }
  0xaa   :  { %v437_v61 = vpop.f32.mrf.mxu3  ;;  %v448_v62 = vpop.f32.mrf.mxu0  ;;  %v748_v28 = vpack.c.bf16 %v734_v16, %v733_v15 }
  0xab   :  { %v635_v1 = vmul.f32 %v603_v54, %v448_v62  ;;  %v461_v2 = vpop.f32.mrf.mxu1 }
  0xac   :  { %v636_v3 = vmul.f32 %v604_v55, %v461_v2  ;;  %v764_v35 = vrot.slane %v748_v28, 6  ;;  %v765_v36 = vrot.slane %v748_v28, 1  ;;  %v1259_v55 = vld [vmem:[#allocation4 + $0x8] sm:$0xff] }
  0xad   :  { %v687_v7 = vadd.f32 %v655_v59, %v635_v1  ;;  %v609_v58 = vperm.slane %v1259_v55, 2  ;;  %v610_v59 = vperm.slane %v1259_v55, 3  ;;  %v607_v60 = vperm.slane %v1259_v55, 0 }
  0xae   :  { %v688_v10 = vadd.f32 %v656_v63, %v636_v3  ;;  %v784_v48 = vsel %vm781_vm10, %v764_v35, %v765_v36  ;;  %v648_v63 = vld [vmem:[#allocation6 + $0x8] sm:$0xff]  ;;  %v608_v0 = vperm.slane %v1259_v55, 1  ;;  %v612_v11 = vperm.slane %v1259_v55, 5 }
  0xaf   :  { %v719_v12 = vmul.f32 0.2, %v687_v7  ;;  %vm703_vm6 = vcmp.gt.f32.partialorder %v687_v7, 0.0  ;;  %v786_v42 = vsel %vm785_vm12, %v780_v51, %v784_v48  ;;  %v661_v3 = vperm.slane %v648_v63, 2 }
  0xb0   :  { %vm704_vm7 = vcmp.gt.f32.partialorder %v688_v10, 0.0  ;;  %v720_v14 = vmul.f32 0.2, %v688_v10  ;;  %v662_v5 = vperm.slane %v648_v63, 3  ;;  %v660_v9 = vperm.slane %v648_v63, 1 }
  0xb1   :  { %v474_v17 = vpop.f32.mrf.mxu2  ;;  %v735_v24 = vsel %vm703_vm6, %v687_v7, %v719_v12  ;;  %v659_v7 = vperm.slane %v648_v63, 0  ;;  %v663_v15 = vperm.slane %v648_v63, 4  ;;  %v664_v19 = vperm.slane %v648_v63, 5 }
  0xb2   :  { %v637_v20 = vmul.f32 %v605_v4, %v474_v17  ;;  %v487_v21 = vpop.f32.mrf.mxu3  ;;  %v450_v22 = vpop.f32.mrf.mxu0  ;;  %v736_v25 = vsel %vm704_vm7, %v688_v10, %v720_v14  ;;  %v611_v10 = vperm.slane %v1259_v55, 4  ;;  %v614_v28 = vperm.slane %v1259_v55, 7 }
  0xb3   :  { %v638_v26 = vmul.f32 %v606_v8, %v487_v21  ;;  %v463_v27 = vpop.f32.mrf.mxu1  ;;  %v749_v32 = vpack.c.bf16 %v736_v25, %v735_v24  ;;  %v613_v24 = vperm.slane %v1259_v55, 6 }
  0xb4   :  { %v689_v29 = vadd.f32 %v657_v13, %v637_v20 }
  0xb5   :  { %v690_v30 = vadd.f32 %v658_v18, %v638_v26  ;;  %v766_v41 = vrot.slane %v749_v32, 4  ;;  %v767_v43 = vrot.slane %v749_v32, 7 }
  0xb6   :  { %vm705_vm8 = vcmp.gt.f32.partialorder %v689_v29, 0.0  ;;  %v721_v33 = vmul.f32 0.2, %v689_v29 }
  0xb7   :  { %vm706_vm9 = vcmp.gt.f32.partialorder %v690_v30, 0.0  ;;  %v722_v34 = vmul.f32 0.2, %v690_v30  ;;  %v790_v52 = vsel %vm787_vm13, %v766_v41, %v767_v43 }
  0xb8   :  { %v737_v37 = vsel %vm705_vm8, %v689_v29, %v721_v33  ;;  %v665_v33 = vperm.slane %v648_v63, 6 }
  0xb9   :  { %v738_v38 = vsel %vm706_vm9, %v690_v30, %v722_v34  ;;  %v476_v39 = vpop.f32.mrf.mxu2 }
  0xba   :  { %v750_v44 = vpack.c.bf16 %v738_v38, %v737_v37  ;;  %v489_v45 = vpop.f32.mrf.mxu3  ;;  %v500_v46 = vpop.f32.mrf.mxu0  ;;  %v666_v38 = vperm.slane %v648_v63, 7 }
  0xbb   :  { %v513_v47 = vpop.f32.mrf.mxu1  ;;  %v639_v6 = vmul.f32 %v607_v60, %v500_v46 }
  0xbc   :  { %v768_v49 = vrot.slane %v750_v44, 2  ;;  %v769_v50 = vrot.slane %v750_v44, 5  ;;  %v640_v8 = vmul.f32 %v608_v0, %v513_v47 }
  0xbd   :  { %v691_v16 = vadd.f32 %v659_v7, %v639_v6 }
  0xbe   :  { %v794_v53 = vsel %vm791_vm14, %v768_v49, %v769_v50  ;;  %v692_v20 = vadd.f32 %v660_v9, %v640_v8 }
  0xbf   :  { %v796_v54 = vsel %vm795_vm15, %v790_v52, %v794_v53  ;;  %v723_v29 = vmul.f32 0.2, %v691_v16  ;;  %vm707_vm3 = vcmp.gt.f32.partialorder %v691_v16, 0.0 }
  0xc0   :  { %v798_v56 = vsel %vm797_vm0, %v786_v42, %v796_v54  ;;  %v724_v31 = vmul.f32 0.2, %v692_v20  ;;  %vm708_vm4 = vcmp.gt.f32.partialorder %v692_v20, 0.0 }
  0xc1   :  { %816 = vst [vmem:[%s1287_s4] sm:$0xff] %v798_v56  ;;  %v526_v57 = vpop.f32.mrf.mxu2  ;;  %v739_v39 = vsel %vm707_vm3, %v691_v16, %v723_v29 }
  0xc2   :  { %v539_v61 = vpop.f32.mrf.mxu3  ;;  %v502_v62 = vpop.f32.mrf.mxu0  ;;  %v641_v2 = vmul.f32 %v609_v58, %v526_v57  ;;  %v740_v44 = vsel %vm708_vm4, %v692_v20, %v724_v31 }
  0xc3   :  { %v515_v1 = vpop.f32.mrf.mxu1  ;;  %v642_v4 = vmul.f32 %v610_v59, %v539_v61  ;;  %v751_v52 = vpack.c.bf16 %v740_v44, %v739_v39 }
  0xc4   :  { %v693_v12 = vadd.f32 %v661_v3, %v641_v2 }
  0xc5   :  { %v694_v13 = vadd.f32 %v662_v5, %v642_v4  ;;  %v770_v60 = vrot.slane %v751_v52, 3 }
  0xc6   :  { %v725_v25 = vmul.f32 0.2, %v693_v12  ;;  %vm709_vm1 = vcmp.gt.f32.partialorder %v693_v12, 0.0 }
  0xc7   :  { %v726_v26 = vmul.f32 0.2, %v694_v13  ;;  %vm710_vm2 = vcmp.gt.f32.partialorder %v694_v13, 0.0  ;;  %v801_v4 = vsel %vm777_vm11, %v751_v52, %v770_v60 }
  0xc8   :  { %v741_v35 = vsel %vm709_vm1, %v693_v12, %v725_v25 }
  0xc9   :  { %v528_v14 = vpop.f32.mrf.mxu2  ;;  %v742_v36 = vsel %vm710_vm2, %v694_v13, %v726_v26 }
  0xca   :  { %v541_v17 = vpop.f32.mrf.mxu3  ;;  %v552_v18 = vpop.f32.mrf.mxu0  ;;  %v752_v49 = vpack.c.bf16 %v742_v36, %v741_v35 }
  0xcb   :  { %v643_v21 = vmul.f32 %v611_v10, %v552_v18  ;;  %v565_v22 = vpop.f32.mrf.mxu1 }
  0xcc   :  { %v644_v23 = vmul.f32 %v612_v11, %v565_v22  ;;  %v771_v55 = vrot.slane %v752_v49, 6  ;;  %v772_v56 = vrot.slane %v752_v49, 1 }
  0xcd   :  { %v695_v27 = vadd.f32 %v663_v15, %v643_v21 }
  0xce   :  { %v696_v30 = vadd.f32 %v664_v19, %v644_v23  ;;  %v804_v1 = vsel %vm781_vm10, %v771_v55, %v772_v56 }
  0xcf   :  { %v727_v32 = vmul.f32 0.2, %v695_v27  ;;  %vm711_vm5 = vcmp.gt.f32.partialorder %v695_v27, 0.0  ;;  %v805_v7 = vsel %vm785_vm12, %v801_v4, %v804_v1 }
  0xd0   :  { %vm712_vm6 = vcmp.gt.f32.partialorder %v696_v30, 0.0  ;;  %v728_v34 = vmul.f32 0.2, %v696_v30 }
  0xd1   :  { %v578_v37 = vpop.f32.mrf.mxu2  ;;  %v743_v45 = vsel %vm711_vm5, %v695_v27, %v727_v32 }
  0xd2   :  { %v645_v40 = vmul.f32 %v613_v24, %v578_v37  ;;  %v591_v41 = vpop.f32.mrf.mxu3  ;;  %v554_v43 = vpop.f32.mrf.mxu0  ;;  %v744_v46 = vsel %vm712_vm6, %v696_v30, %v728_v34 }
  0xd3   :  { %v646_v47 = vmul.f32 %v614_v28, %v591_v41  ;;  %v567_v48 = vpop.f32.mrf.mxu1  ;;  %v753_v53 = vpack.c.bf16 %v744_v46, %v743_v45 }
  0xd4   :  { %v697_v50 = vadd.f32 %v665_v33, %v645_v40 }
  0xd5   :  { %v698_v51 = vadd.f32 %v666_v38, %v646_v47  ;;  %v773_v61 = vrot.slane %v753_v53, 4  ;;  %v774_v62 = vrot.slane %v753_v53, 7 }
  0xd6   :  { %vm713_vm7 = vcmp.gt.f32.partialorder %v697_v50, 0.0  ;;  %v729_v42 = vmul.f32 0.2, %v697_v50 }
  0xd7   :  { %vm714_vm8 = vcmp.gt.f32.partialorder %v698_v51, 0.0  ;;  %v730_v54 = vmul.f32 0.2, %v698_v51  ;;  %v808_v5 = vsel %vm787_vm13, %v773_v61, %v774_v62 }
  0xd8   :  { %v745_v57 = vsel %vm713_vm7, %v697_v50, %v729_v42 }
  0xd9   :  { %v746_v58 = vsel %vm714_vm8, %v698_v51, %v730_v54  ;;  %v580_v59 = vpop.f32.mrf.mxu2 }
  0xda   :  { %v754_v63 = vpack.c.bf16 %v746_v58, %v745_v57  ;;  %v593_v0 = vpop.f32.mrf.mxu3 }
  0xdc   :  { %v775_v2 = vrot.slane %v754_v63, 2  ;;  %v776_v3 = vrot.slane %v754_v63, 5 }
  0xde   :  { %v811_v6 = vsel %vm791_vm14, %v775_v2, %v776_v3 }
  0xdf   :  { %v812_v8 = vsel %vm795_vm15, %v808_v5, %v811_v6 }
  0xe0   :  { %v813_v9 = vsel %vm797_vm0, %v805_v7, %v812_v8 }
  0xe1   :  { %817 = vst [vmem:[%s1287_s4 + $0x8] sm:$0xff] %v813_v9 }
  0xe2   :  { %822 = vsyncpa [#allocation3], 1 }
  0xe3   :  { %823 = vsyncpa [#allocation5], 1 }

// kernel: mnist_generator_info.7
= control target key start
LH: loop header
LB: loop body
LE: loop exit
PB: predicated region body
PF: predicated region fallthrough
CT: control target
= control target key end

     0   :  { %9 = vsyncpa [#allocation3], 0  ;;  %s2600_s0 = inlined_call_operand.vmem [shape: bf16[32,1152], index: 0, kind: input, shape index: {}]   ;;  %s2601_s1 = inlined_call_operand.hbm [shape: bf16[1152,256], index: 1, kind: input, shape index: {}]   ;;  %s2602_s2 = inlined_call_operand.hbm [shape: f32[1,256], index: 2, kind: input, shape index: {}]   ;;  %s2603_s3 = inlined_call_operand.hbm [shape: f32[1,256], index: 3, kind: input, shape index: {}]   ;;  %s2604_s4 = inlined_call_operand.vmem [shape: bf16[32,256], index: 4, kind: output, shape index: {}]  }
   0x1   :  { %10 = vsyncpa [#allocation5], 0  ;;  %s31_s17 = sshll.u32 %s2602_s2, 4  ;;  %s2351_s18 = smov [#allocation4]   ;;  %s32_s17 = int_to_ptr.hbm [resolvable:$true] %s31_s17 }
   0x2   :  { %s33_s19 = sshll.u32 %s2351_s18, 4  ;;  %s17_s22 = sshll.u32 %s2601_s1, 4  ;;  %s34_s19 = int_to_ptr.vmem [resolvable:$true] %s33_s19  ;;  %s18_s22 = int_to_ptr.hbm [resolvable:$true] %s17_s22 }
   0x3   :  { %36 = dma.hbm_to_vmem [thread:$0]  %s32_s17, 32, %s34_s19, [#allocation5]  }
   0x4   :  { %s2352_s23 = smov [#allocation2]   ;;  %s2353_s25 = smov 128  }
   0x5   :  { %s19_s24 = sshll.u32 %s2352_s23, 4  ;;  %s2354_s26 = smov 8   ;;  %s20_s24 = int_to_ptr.vmem [resolvable:$true] %s19_s24 }
   0x6   :  { %25 = dma.hbm_to_vmem [thread:$0]  %s18_s22, 18432, %s20_s24, [#allocation3], %s2353_s25, %s2353_s25, %s2354_s26  }
   0x7   :  { %s42_s2 = sshll.u32 %s2603_s3, 4  ;;  %s2355_s29 = smov [#allocation6]   ;;  %s43_s2 = int_to_ptr.hbm [resolvable:$true] %s42_s2 }
   0x8   :  { %s44_s30 = sshll.u32 %s2355_s29, 4  ;;  %s45_s30 = int_to_ptr.vmem [resolvable:$true] %s44_s30 }
   0x9   :  { %47 = dma.hbm_to_vmem [thread:$0]  %s43_s2, 32, %s45_s30, [#allocation5]  }
   0xa   :  { %2347 = dma.done.wait [#allocation3], 18432  }
   0xb   :  { %2348 = vsyncadd [#allocation3], 4294948864 }
   0xc   :  { %2349 = dma.done.wait [#allocation5], 64  }
   0xd   :  { %2350 = vsyncadd [#allocation5], 4294967232  ;;  %v1574_v0 = vld [vmem:[#allocation2 + $0x70] sm:$0xf]  ;;  %v2125_v1 = vld [vmem:[#allocation2 + $0x74] sm:$0xf0] }
   0xe   :  { %v1638_v2 = vld [vmem:[#allocation2 + $0xf0] sm:$0xf]  ;;  %v1575_v3 = vor.u32 %v2125_v1, %v1574_v0  ;;  %v2141_v4 = vld [vmem:[#allocation2 + $0xf4] sm:$0xf0]  ;;  %v1566_v11 = vld [vmem:[#allocation2 + $0x60] sm:$0xf] }
   0xf   :  { %v1702_v5 = vld [vmem:[#allocation2 + $0x170] sm:$0xf]  ;;  %v2157_v6 = vld [vmem:[#allocation2 + $0x174] sm:$0xf0]  ;;  %v1639_v7 = vor.u32 %v2141_v4, %v1638_v2  ;;  %v2123_v13 = vld [vmem:[#allocation2 + $0x64] sm:$0xf0] }
  0x10   :  { %v1703_v8 = vor.u32 %v2157_v6, %v1702_v5  ;;  %v1766_v9 = vld [vmem:[#allocation2 + $0x1f0] sm:$0xf]  ;;  %v2173_v10 = vld [vmem:[#allocation2 + $0x1f4] sm:$0xf0]  ;;  %1036 = vmatpush.bf16.msra.mxu0 %v1575_v3  ;;  %v1630_v14 = vld [vmem:[#allocation2 + $0xe0] sm:$0xf]  ;;  %v1567_v16 = vor.u32 %v2123_v13, %v1566_v11 }
  0x11   :  { %v1767_v12 = vor.u32 %v2173_v10, %v1766_v9  ;;  %v2139_v15 = vld [vmem:[#allocation2 + $0xe4] sm:$0xf0]  ;;  %1055 = vmatpush.bf16.msra.mxu1 %v1639_v7  ;;  %v1694_v18 = vld [vmem:[#allocation2 + $0x160] sm:$0xf]  ;;  %v1558_v23 = vld [vmem:[#allocation2 + $0x50] sm:$0xf] }
  0x12   :  { %1074 = vmatpush.bf16.msra.mxu2 %v1703_v8  ;;  %v1631_v17 = vor.u32 %v2139_v15, %v1630_v14  ;;  %v2155_v19 = vld [vmem:[#allocation2 + $0x164] sm:$0xf0]  ;;  %v1758_v20 = vld [vmem:[#allocation2 + $0x1e0] sm:$0xf]  ;;  %v2121_v24 = vld [vmem:[#allocation2 + $0x54] sm:$0xf0] }
  0x13   :  { %1093 = vmatpush.bf16.msra.mxu3 %v1767_v12  ;;  %v1695_v21 = vor.u32 %v2155_v19, %v1694_v18  ;;  %v2171_v22 = vld [vmem:[#allocation2 + $0x1e4] sm:$0xf0]  ;;  %v1622_v26 = vld [vmem:[#allocation2 + $0xd0] sm:$0xf]  ;;  %v2137_v27 = vld [vmem:[#allocation2 + $0xd4] sm:$0xf0]  ;;  %v1559_v29 = vor.u32 %v2121_v24, %v1558_v23 }
  0x14   :  { %v1759_v25 = vor.u32 %v2171_v22, %v1758_v20  ;;  %v1686_v28 = vld [vmem:[#allocation2 + $0x150] sm:$0xf]  ;;  %1037 = vmatpush.bf16.msra.mxu0 %v1567_v16  ;;  %v2153_v30 = vld [vmem:[#allocation2 + $0x154] sm:$0xf0]  ;;  %v1623_v33 = vor.u32 %v2137_v27, %v1622_v26  ;;  %v1550_v35 = vld [vmem:[#allocation2 + $0x40] sm:$0xf] }
  0x15   :  { %v1750_v31 = vld [vmem:[#allocation2 + $0x1d0] sm:$0xf]  ;;  %v2169_v32 = vld [vmem:[#allocation2 + $0x1d4] sm:$0xf0]  ;;  %1056 = vmatpush.bf16.msra.mxu1 %v1631_v17  ;;  %v1687_v34 = vor.u32 %v2153_v30, %v1686_v28  ;;  %v2119_v36 = vld [vmem:[#allocation2 + $0x44] sm:$0xf0] }
  0x16   :  { %1075 = vmatpush.bf16.msra.mxu2 %v1695_v21  ;;  %v1614_v37 = vld [vmem:[#allocation2 + $0xc0] sm:$0xf]  ;;  %v1751_v38 = vor.u32 %v2169_v32, %v1750_v31  ;;  %v2135_v39 = vld [vmem:[#allocation2 + $0xc4] sm:$0xf0]  ;;  %v1551_v44 = vor.u32 %v2119_v36, %v1550_v35  ;;  %v1542_v47 = vld [vmem:[#allocation2 + $0x30] sm:$0xf] }
  0x17   :  { %1094 = vmatpush.bf16.msra.mxu3 %v1759_v25  ;;  %v1678_v40 = vld [vmem:[#allocation2 + $0x140] sm:$0xf]  ;;  %v2151_v41 = vld [vmem:[#allocation2 + $0x144] sm:$0xf0]  ;;  %v1615_v45 = vor.u32 %v2135_v39, %v1614_v37  ;;  %v2117_v48 = vld [vmem:[#allocation2 + $0x34] sm:$0xf0] }
  0x18   :  { %v1742_v42 = vld [vmem:[#allocation2 + $0x1c0] sm:$0xf]  ;;  %v2167_v43 = vld [vmem:[#allocation2 + $0x1c4] sm:$0xf0]  ;;  %1038 = vmatpush.bf16.msra.mxu0 %v1559_v29  ;;  %v1679_v46 = vor.u32 %v2151_v41, %v1678_v40  ;;  %v1606_v49 = vld [vmem:[#allocation2 + $0xb0] sm:$0xf]  ;;  %v1543_v56 = vor.u32 %v2117_v48, %v1542_v47 }
  0x19   :  { %1057 = vmatpush.bf16.msra.mxu1 %v1623_v33  ;;  %v1743_v50 = vor.u32 %v2167_v43, %v1742_v42  ;;  %v2133_v51 = vld [vmem:[#allocation2 + $0xb4] sm:$0xf0]  ;;  %v1670_v52 = vld [vmem:[#allocation2 + $0x130] sm:$0xf]  ;;  %v1534_v59 = vld [vmem:[#allocation2 + $0x20] sm:$0xf] }
  0x1a   :  { %1076 = vmatpush.bf16.msra.mxu2 %v1687_v34  ;;  %v2149_v53 = vld [vmem:[#allocation2 + $0x134] sm:$0xf0]  ;;  %v1734_v54 = vld [vmem:[#allocation2 + $0x1b0] sm:$0xf]  ;;  %v1607_v57 = vor.u32 %v2133_v51, %v1606_v49  ;;  %v2115_v60 = vld [vmem:[#allocation2 + $0x24] sm:$0xf0] }
  0x1b   :  { %1095 = vmatpush.bf16.msra.mxu3 %v1751_v38  ;;  %v2165_v55 = vld [vmem:[#allocation2 + $0x1b4] sm:$0xf0]  ;;  %v1671_v58 = vor.u32 %v2149_v53, %v1670_v52  ;;  %v1598_v61 = vld [vmem:[#allocation2 + $0xa0] sm:$0xf]  ;;  %v2131_v63 = vld [vmem:[#allocation2 + $0xa4] sm:$0xf0]  ;;  %v1535_v4 = vor.u32 %v2115_v60, %v1534_v59 }
  0x1c   :  { %1039 = vmatpush.bf16.msra.mxu0 %v1551_v44  ;;  %v1735_v62 = vor.u32 %v2165_v55, %v1734_v54  ;;  %v1662_v0 = vld [vmem:[#allocation2 + $0x120] sm:$0xf]  ;;  %v2147_v1 = vld [vmem:[#allocation2 + $0x124] sm:$0xf0]  ;;  %v1599_v5 = vor.u32 %v2131_v63, %v1598_v61  ;;  %v1526_v7 = vld [vmem:[#allocation2 + $0x10] sm:$0xf] }
  0x1d   :  { %1058 = vmatpush.bf16.msra.mxu1 %v1615_v45  ;;  %v1726_v2 = vld [vmem:[#allocation2 + $0x1a0] sm:$0xf]  ;;  %v2163_v3 = vld [vmem:[#allocation2 + $0x1a4] sm:$0xf0]  ;;  %v1663_v6 = vor.u32 %v2147_v1, %v1662_v0  ;;  %v2113_v8 = vld [vmem:[#allocation2 + $0x14] sm:$0xf0] }
  0x1e   :  { %1077 = vmatpush.bf16.msra.mxu2 %v1679_v46  ;;  %v1590_v9 = vld [vmem:[#allocation2 + $0x90] sm:$0xf]  ;;  %v1727_v10 = vor.u32 %v2163_v3, %v1726_v2  ;;  %v2129_v11 = vld [vmem:[#allocation2 + $0x94] sm:$0xf0]  ;;  %v1518_v16 = vld [vmem:[#allocation2] sm:$0xf]  ;;  %v1527_v17 = vor.u32 %v2113_v8, %v1526_v7 }
  0x1f   :  { %1096 = vmatpush.bf16.msra.mxu3 %v1743_v50  ;;  %v1654_v12 = vld [vmem:[#allocation2 + $0x110] sm:$0xf]  ;;  %v2145_v13 = vld [vmem:[#allocation2 + $0x114] sm:$0xf0]  ;;  %v2111_v18 = vld [vmem:[#allocation2 + $0x4] sm:$0xf0]  ;;  %v1591_v21 = vor.u32 %v2129_v11, %v1590_v9 }
  0x20   :  { %1040 = vmatpush.bf16.msra.mxu0 %v1543_v56  ;;  %v1718_v14 = vld [vmem:[#allocation2 + $0x190] sm:$0xf]  ;;  %v2161_v15 = vld [vmem:[#allocation2 + $0x194] sm:$0xf0]  ;;  %v1582_v19 = vld [vmem:[#allocation2 + $0x80] sm:$0xf]  ;;  %v1655_v22 = vor.u32 %v2145_v13, %v1654_v12  ;;  %v1519_v34 = vor.u32 %v2111_v18, %v1518_v16 }
  0x21   :  { %1059 = vmatpush.bf16.msra.mxu1 %v1607_v57  ;;  %v2127_v20 = vld [vmem:[#allocation2 + $0x84] sm:$0xf0]  ;;  %v1646_v23 = vld [vmem:[#allocation2 + $0x100] sm:$0xf]  ;;  %v1719_v26 = vor.u32 %v2161_v15, %v1718_v14  ;;  %v2096_v29 = vld [vmem:[%s2600_s0 + $0x20] sm:$0xf0] }
  0x22   :  { %1078 = vmatpush.bf16.msra.mxu2 %v1671_v58  ;;  %v2143_v24 = vld [vmem:[#allocation2 + $0x104] sm:$0xf0]  ;;  %v1710_v25 = vld [vmem:[#allocation2 + $0x180] sm:$0xf]  ;;  %v2092_v30 = vld [vmem:[%s2600_s0 + $0x4] sm:$0xf]  ;;  %v1583_v38 = vor.u32 %v2127_v20, %v1582_v19 }
  0x23   :  { %1097 = vmatpush.bf16.msra.mxu3 %v1735_v62  ;;  %v2159_v27 = vld [vmem:[#allocation2 + $0x184] sm:$0xf0]  ;;  %v1446_v28 = vld [vmem:[%s2600_s0] sm:$0xf]  ;;  %v1958_v32 = vld [vmem:[#allocation2 + $0x370] sm:$0xf]  ;;  %v1647_v39 = vor.u32 %v2143_v24, %v1646_v23 }
  0x24   :  { %1041 = vmatpush.bf16.msra.mxu0 %v1535_v4  ;;  %v1448_v31 = vld [vmem:[%s2600_s0 + $0x24] sm:$0xf0]  ;;  %v2221_v33 = vld [vmem:[#allocation2 + $0x374] sm:$0xf0]  ;;  %v1894_v36 = vld [vmem:[#allocation2 + $0x2f0] sm:$0xf]  ;;  %v1711_v43 = vor.u32 %v2159_v27, %v1710_v25  ;;  %v2414_v48 = vor.u32 %v2096_v29, %v1446_v28 }
  0x25   :  { %1060 = vmatpush.bf16.msra.mxu1 %v1599_v5  ;;  %v1454_v35 = vld [vmem:[%s2600_s0 + $0x8] sm:$0xf]  ;;  %v2205_v37 = vld [vmem:[#allocation2 + $0x2f4] sm:$0xf0]  ;;  %v2097_v40 = vld [vmem:[%s2600_s0 + $0x28] sm:$0xf0]  ;;  %v1959_v44 = vor.u32 %v2221_v33, %v1958_v32  ;;  %v2416_v53 = vor.u32 %v2092_v30, %v1448_v31 }
  0x26   :  { %1079 = vmatpush.bf16.msra.mxu2 %v1663_v6  ;;  %v2093_v41 = vld [vmem:[%s2600_s0 + $0xc] sm:$0xf]  ;;  %v1456_v42 = vld [vmem:[%s2600_s0 + $0x2c] sm:$0xf0]  ;;  %v2189_v46 = vld [vmem:[#allocation2 + $0x274] sm:$0xf0]  ;;  %v1895_v49 = vor.u32 %v2205_v37, %v1894_v36  ;;  %v2418_v54 = vor.u32 %v2097_v40, %v1454_v35 }
  0x27   :  { %1098 = vmatpush.bf16.msra.mxu3 %v1727_v10  ;;  %v1830_v45 = vld [vmem:[#allocation2 + $0x270] sm:$0xf]  ;;  %v2237_v50 = vld [vmem:[#allocation2 + $0x3f4] sm:$0xf0]  ;;  %v1950_v51 = vld [vmem:[#allocation2 + $0x360] sm:$0xf]  ;;  %v2420_v57 = vor.u32 %v2093_v41, %v1456_v42 }
  0x28   :  { %1042 = vmatpush.bf16.msra.mxu0 %v1527_v17  ;;  %v2022_v47 = vld [vmem:[#allocation2 + $0x3f0] sm:$0xf]  ;;  %v2219_v52 = vld [vmem:[#allocation2 + $0x364] sm:$0xf0]  ;;  %v1886_v55 = vld [vmem:[#allocation2 + $0x2e0] sm:$0xf]  ;;  %v1831_v58 = vor.u32 %v2189_v46, %v1830_v45 }
  0x29   :  { %1061 = vmatpush.bf16.msra.mxu1 %v1591_v21  ;;  %v2203_v56 = vld [vmem:[#allocation2 + $0x2e4] sm:$0xf0]  ;;  %v2023_v59 = vor.u32 %v2237_v50, %v2022_v47  ;;  %v1951_v60 = vor.u32 %v2219_v52, %v1950_v51  ;;  %v1822_v61 = vld [vmem:[#allocation2 + $0x260] sm:$0xf]  ;;  %v1942_v2 = vld [vmem:[#allocation2 + $0x350] sm:$0xf] }
  0x2a   :  { %1080 = vmatpush.bf16.msra.mxu2 %v1655_v22  ;;  %v2187_v62 = vld [vmem:[#allocation2 + $0x264] sm:$0xf0]  ;;  %v2014_v63 = vld [vmem:[#allocation2 + $0x3e0] sm:$0xf]  ;;  %v1887_v0 = vor.u32 %v2203_v56, %v1886_v55  ;;  %v2217_v3 = vld [vmem:[#allocation2 + $0x354] sm:$0xf0] }
  0x2b   :  { %1099 = vmatpush.bf16.msra.mxu3 %v1719_v26  ;;  %v2235_v1 = vld [vmem:[#allocation2 + $0x3e4] sm:$0xf0]  ;;  %v1878_v4 = vld [vmem:[#allocation2 + $0x2d0] sm:$0xf]  ;;  %v2201_v5 = vld [vmem:[#allocation2 + $0x2d4] sm:$0xf0]  ;;  %v1823_v6 = vor.u32 %v2187_v62, %v1822_v61  ;;  %v1943_v8 = vor.u32 %v2217_v3, %v1942_v2 }
  0x2c   :  { %1043 = vmatpush.bf16.msra.mxu0 %v1519_v34  ;;  %v2015_v7 = vor.u32 %v2235_v1, %v2014_v63  ;;  %v1814_v9 = vld [vmem:[#allocation2 + $0x250] sm:$0xf]  ;;  %v2185_v10 = vld [vmem:[#allocation2 + $0x254] sm:$0xf0]  ;;  %v1879_v12 = vor.u32 %v2201_v5, %v1878_v4  ;;  %v1934_v14 = vld [vmem:[#allocation2 + $0x340] sm:$0xf] }
  0x2d   :  { %1062 = vmatpush.bf16.msra.mxu1 %v1583_v38  ;;  %v2006_v11 = vld [vmem:[#allocation2 + $0x3d0] sm:$0xf]  ;;  %v2233_v13 = vld [vmem:[#allocation2 + $0x3d4] sm:$0xf0]  ;;  %v2215_v15 = vld [vmem:[#allocation2 + $0x344] sm:$0xf0]  ;;  %v1815_v18 = vor.u32 %v2185_v10, %v1814_v9 }
  0x2e   :  { %1081 = vmatpush.bf16.msra.mxu2 %v1647_v39  ;;  %v1870_v16 = vld [vmem:[#allocation2 + $0x2c0] sm:$0xf]  ;;  %v2199_v17 = vld [vmem:[#allocation2 + $0x2c4] sm:$0xf0]  ;;  %v2007_v22 = vor.u32 %v2233_v13, %v2006_v11  ;;  %v1935_v23 = vor.u32 %v2215_v15, %v1934_v14  ;;  %v2105_v26 = vld [vmem:[%s2600_s0 + $0x68] sm:$0xf0] }
  0x2f   :  { %1100 = vmatpush.bf16.msra.mxu3 %v1711_v43  ;;  %1044 = vmatmul.bf16.vlgmr.msra.gmra.mxu0 %v2414_v48  ;;  %v1806_v19 = vld [vmem:[#allocation2 + $0x240] sm:$0xf]  ;;  %v2183_v20 = vld [vmem:[#allocation2 + $0x244] sm:$0xf0]  ;;  %v1871_v27 = vor.u32 %v2199_v17, %v1870_v16  ;;  %v2101_v28 = vld [vmem:[%s2600_s0 + $0x4c] sm:$0xf] }
  0x30   :  { %1063 = vmatmul.bf16.vlgmr.msra.gmra.mxu1 %v2416_v53  ;;  %1112 = vmatpush.bf16.msrb.mxu0 %v1831_v58  ;;  %v1998_v21 = vld [vmem:[#allocation2 + $0x3c0] sm:$0xf]  ;;  %v2231_v24 = vld [vmem:[#allocation2 + $0x3c4] sm:$0xf0]  ;;  %v1484_v29 = vld [vmem:[%s2600_s0 + $0x6c] sm:$0xf0]  ;;  %v1807_v35 = vor.u32 %v2183_v20, %v1806_v19 }
  0x31   :  { %1131 = vmatpush.bf16.msrb.mxu1 %v1895_v49  ;;  %1082 = vmatmul.bf16.vlgmr.msra.gmra.mxu2 %v2418_v54  ;;  %v1482_v25 = vld [vmem:[%s2600_s0 + $0x48] sm:$0xf]  ;;  %v1926_v30 = vld [vmem:[#allocation2 + $0x330] sm:$0xf]  ;;  %v2213_v31 = vld [vmem:[#allocation2 + $0x334] sm:$0xf0]  ;;  %v1999_v39 = vor.u32 %v2231_v24, %v1998_v21  ;;  %v2452_v50 = vor.u32 %v2101_v28, %v1484_v29 }
  0x32   :  { %1150 = vmatpush.bf16.msrb.mxu2 %v1959_v44  ;;  %1101 = vmatmul.bf16.vlgmr.msra.gmra.mxu3 %v2420_v57  ;;  %v1490_v32 = vld [vmem:[%s2600_s0 + $0x50] sm:$0xf]  ;;  %v2197_v34 = vld [vmem:[#allocation2 + $0x2b4] sm:$0xf0]  ;;  %v2106_v36 = vld [vmem:[%s2600_s0 + $0x70] sm:$0xf0]  ;;  %v1927_v40 = vor.u32 %v2213_v31, %v1926_v30  ;;  %v2450_v44 = vor.u32 %v2105_v26, %v1482_v25 }
  0x33   :  { %1169 = vmatpush.bf16.msrb.mxu3 %v2023_v59  ;;  %v1862_v33 = vld [vmem:[#allocation2 + $0x2b0] sm:$0xf]  ;;  %v2102_v37 = vld [vmem:[%s2600_s0 + $0x54] sm:$0xf]  ;;  %v1492_v38 = vld [vmem:[%s2600_s0 + $0x74] sm:$0xf0]  ;;  %v2454_v51 = vor.u32 %v2106_v36, %v1490_v32 }
  0x34   :  { %1113 = vmatpush.bf16.msrb.mxu0 %v1823_v6  ;;  %v1798_v41 = vld [vmem:[#allocation2 + $0x230] sm:$0xf]  ;;  %v2181_v42 = vld [vmem:[#allocation2 + $0x234] sm:$0xf0]  ;;  %v1863_v45 = vor.u32 %v2197_v34, %v1862_v33  ;;  %v1918_v47 = vld [vmem:[#allocation2 + $0x320] sm:$0xf]  ;;  %v2456_v56 = vor.u32 %v2102_v37, %v1492_v38 }
  0x35   :  { %1132 = vmatpush.bf16.msrb.mxu1 %v1887_v0  ;;  %v1990_v43 = vld [vmem:[#allocation2 + $0x3b0] sm:$0xf]  ;;  %v2229_v46 = vld [vmem:[#allocation2 + $0x3b4] sm:$0xf0]  ;;  %v2211_v49 = vld [vmem:[#allocation2 + $0x324] sm:$0xf0]  ;;  %v1799_v58 = vor.u32 %v2181_v42, %v1798_v41 }
  0x36   :  { %1151 = vmatpush.bf16.msrb.mxu2 %v1951_v60  ;;  %v1854_v52 = vld [vmem:[#allocation2 + $0x2a0] sm:$0xf]  ;;  %v2195_v55 = vld [vmem:[#allocation2 + $0x2a4] sm:$0xf0]  ;;  %v1991_v59 = vor.u32 %v2229_v46, %v1990_v43  ;;  %v1919_v60 = vor.u32 %v2211_v49, %v1918_v47  ;;  %v1910_v2 = vld [vmem:[#allocation2 + $0x310] sm:$0xf] }
  0x37   :  { %1170 = vmatpush.bf16.msrb.mxu3 %v2015_v7  ;;  %v1790_v61 = vld [vmem:[#allocation2 + $0x220] sm:$0xf]  ;;  %v2179_v62 = vld [vmem:[#allocation2 + $0x224] sm:$0xf0]  ;;  %v1855_v0 = vor.u32 %v2195_v55, %v1854_v52  ;;  %v2209_v3 = vld [vmem:[#allocation2 + $0x314] sm:$0xf0] }
  0x38   :  { %1114 = vmatpush.bf16.msrb.mxu0 %v1815_v18  ;;  %v1982_v63 = vld [vmem:[#allocation2 + $0x3a0] sm:$0xf]  ;;  %v2227_v1 = vld [vmem:[#allocation2 + $0x3a4] sm:$0xf0]  ;;  %v1846_v4 = vld [vmem:[#allocation2 + $0x290] sm:$0xf]  ;;  %v1791_v6 = vor.u32 %v2179_v62, %v1790_v61  ;;  %v1911_v9 = vor.u32 %v2209_v3, %v1910_v2 }
  0x39   :  { %1133 = vmatpush.bf16.msrb.mxu1 %v1879_v12  ;;  %v2193_v5 = vld [vmem:[#allocation2 + $0x294] sm:$0xf0]  ;;  %v1782_v7 = vld [vmem:[#allocation2 + $0x210] sm:$0xf]  ;;  %v1902_v14 = vld [vmem:[#allocation2 + $0x300] sm:$0xf] }
  0x3a   :  { %1152 = vmatpush.bf16.msrb.mxu2 %v1943_v8  ;;  %v1983_v8 = vor.u32 %v2227_v1, %v1982_v63  ;;  %v2177_v10 = vld [vmem:[#allocation2 + $0x214] sm:$0xf0]  ;;  %v1974_v11 = vld [vmem:[#allocation2 + $0x390] sm:$0xf]  ;;  %v1847_v13 = vor.u32 %v2193_v5, %v1846_v4  ;;  %v2207_v15 = vld [vmem:[#allocation2 + $0x304] sm:$0xf0] }
  0x3b   :  { %1171 = vmatpush.bf16.msrb.mxu3 %v2007_v22  ;;  %v2225_v12 = vld [vmem:[#allocation2 + $0x394] sm:$0xf0]  ;;  %v1838_v16 = vld [vmem:[#allocation2 + $0x280] sm:$0xf]  ;;  %v2191_v17 = vld [vmem:[#allocation2 + $0x284] sm:$0xf0]  ;;  %v1783_v20 = vor.u32 %v2177_v10, %v1782_v7  ;;  %v1903_v25 = vor.u32 %v2207_v15, %v1902_v14 }
  0x3c   :  { %1115 = vmatpush.bf16.msrb.mxu0 %v1807_v35  ;;  %v2140_v18 = vld [vmem:[#allocation2 + $0xf4] sm:$0xf]  ;;  %v1640_v19 = vld [vmem:[#allocation2 + $0xf8] sm:$0xf0]  ;;  %v1774_v21 = vld [vmem:[#allocation2 + $0x200] sm:$0xf]  ;;  %v1975_v24 = vor.u32 %v2225_v12, %v1974_v11  ;;  %v1839_v29 = vor.u32 %v2191_v17, %v1838_v16 }
  0x3d   :  { %1134 = vmatpush.bf16.msrb.mxu1 %v1871_v27  ;;  %v2124_v22 = vld [vmem:[#allocation2 + $0x74] sm:$0xf]  ;;  %v2175_v26 = vld [vmem:[#allocation2 + $0x204] sm:$0xf0]  ;;  %v1966_v27 = vld [vmem:[#allocation2 + $0x380] sm:$0xf]  ;;  %v1643_v34 = vor.u32 %v2140_v18, %v1640_v19 }
  0x3e   :  { %1153 = vmatpush.bf16.msrb.mxu2 %v1935_v23  ;;  %v1576_v23 = vld [vmem:[#allocation2 + $0x78] sm:$0xf0]  ;;  %v2223_v28 = vld [vmem:[#allocation2 + $0x384] sm:$0xf0]  ;;  %v1462_v30 = vld [vmem:[%s2600_s0 + $0x10] sm:$0xf]  ;;  %v1775_v42 = vor.u32 %v2175_v26, %v1774_v21 }
  0x3f   :  { %1172 = vmatpush.bf16.msrb.mxu3 %v1999_v39  ;;  %1049 = vmatmul.bf16.gmra.mxu0 %v2450_v44  ;;  %v2098_v31 = vld [vmem:[%s2600_s0 + $0x30] sm:$0xf0]  ;;  %v1464_v33 = vld [vmem:[%s2600_s0 + $0x34] sm:$0xf0]  ;;  %v2086_v35 = vld [vmem:[#allocation2 + $0x470] sm:$0xf]  ;;  %v1579_v38 = vor.u32 %v2124_v22, %v1576_v23  ;;  %v1967_v47 = vor.u32 %v2223_v28, %v1966_v27 }
  0x40   :  { %1068 = vmatmul.bf16.gmra.mxu1 %v2452_v50  ;;  %1116 = vmatpush.bf16.msrb.mxu0 %v1799_v58  ;;  %v2094_v32 = vld [vmem:[%s2600_s0 + $0x14] sm:$0xf]  ;;  %v2253_v36 = vld [vmem:[#allocation2 + $0x474] sm:$0xf0]  ;;  %v1704_v39 = vld [vmem:[#allocation2 + $0x178] sm:$0xf0] }
  0x41   :  { %1135 = vmatpush.bf16.msrb.mxu1 %v1863_v45  ;;  %1087 = vmatmul.bf16.gmra.mxu2 %v2454_v51  ;;  %v2156_v37 = vld [vmem:[#allocation2 + $0x174] sm:$0xf]  ;;  %v1632_v41 = vld [vmem:[#allocation2 + $0xe8] sm:$0xf0]  ;;  %v1470_v43 = vld [vmem:[%s2600_s0 + $0x18] sm:$0xf]  ;;  %v2087_v52 = vor.u32 %v2253_v36, %v2086_v35  ;;  %v2488_v1 = vor.u32 %v2094_v32, %v1464_v33 }
  0x42   :  { %1154 = vmatpush.bf16.msrb.mxu2 %v1927_v40  ;;  %1106 = vmatmul.bf16.gmra.mxu3 %v2456_v56  ;;  %v2138_v40 = vld [vmem:[#allocation2 + $0xe4] sm:$0xf]  ;;  %v2099_v45 = vld [vmem:[%s2600_s0 + $0x38] sm:$0xf0]  ;;  %v1472_v49 = vld [vmem:[%s2600_s0 + $0x3c] sm:$0xf0] }
  0x43   :  { %1173 = vmatpush.bf16.msrb.mxu3 %v1991_v59  ;;  %v2095_v46 = vld [vmem:[%s2600_s0 + $0x1c] sm:$0xf]  ;;  %v2078_v55 = vld [vmem:[#allocation2 + $0x460] sm:$0xf]  ;;  %v2251_v58 = vld [vmem:[#allocation2 + $0x464] sm:$0xf0]  ;;  %v1707_v59 = vor.u32 %v2156_v37, %v1704_v39  ;;  %v2490_v5 = vor.u32 %v2099_v45, %v1470_v43 }
  0x44   :  { %1117 = vmatpush.bf16.msrb.mxu0 %v1791_v6  ;;  %v2122_v61 = vld [vmem:[#allocation2 + $0x64] sm:$0xf]  ;;  %v1568_v62 = vld [vmem:[#allocation2 + $0x68] sm:$0xf0]  ;;  %v2136_v3 = vld [vmem:[#allocation2 + $0xd4] sm:$0xf]  ;;  %v2492_v6 = vor.u32 %v2095_v46, %v1472_v49  ;;  %v2079_v7 = vor.u32 %v2251_v58, %v2078_v55 }
  0x45   :  { %1136 = vmatpush.bf16.msrb.mxu1 %v1855_v0  ;;  %v2154_v63 = vld [vmem:[#allocation2 + $0x164] sm:$0xf]  ;;  %v2486_v0 = vor.u32 %v2098_v31, %v1462_v30  ;;  %v1696_v2 = vld [vmem:[#allocation2 + $0x168] sm:$0xf0]  ;;  %v1624_v4 = vld [vmem:[#allocation2 + $0xd8] sm:$0xf0] }
  0x46   :  { %1155 = vmatpush.bf16.msrb.mxu2 %v1919_v60  ;;  %v1635_v60 = vor.u32 %v2138_v40, %v1632_v41  ;;  %v2249_v10 = vld [vmem:[#allocation2 + $0x454] sm:$0xf0]  ;;  %v1699_v11 = vor.u32 %v2154_v63, %v1696_v2  ;;  %v1627_v12 = vor.u32 %v2136_v3, %v1624_v4  ;;  %v1560_v14 = vld [vmem:[#allocation2 + $0x58] sm:$0xf0]  ;;  %v2152_v15 = vld [vmem:[#allocation2 + $0x154] sm:$0xf] }
  0x47   :  { %1174 = vmatpush.bf16.msrb.mxu3 %v1983_v8  ;;  %v1571_v8 = vor.u32 %v2122_v61, %v1568_v62  ;;  %v1688_v16 = vld [vmem:[#allocation2 + $0x158] sm:$0xf0]  ;;  %v2134_v17 = vld [vmem:[#allocation2 + $0xc4] sm:$0xf]  ;;  %v1616_v18 = vld [vmem:[#allocation2 + $0xc8] sm:$0xf0] }
  0x48   :  { %1118 = vmatpush.bf16.msrb.mxu0 %v1783_v20  ;;  %v2062_v21 = vld [vmem:[#allocation2 + $0x440] sm:$0xf]  ;;  %v2247_v22 = vld [vmem:[#allocation2 + $0x444] sm:$0xf0]  ;;  %v1691_v23 = vor.u32 %v2152_v15, %v1688_v16  ;;  %v1552_v26 = vld [vmem:[#allocation2 + $0x48] sm:$0xf0] }
  0x49   :  { %1137 = vmatpush.bf16.msrb.mxu1 %v1847_v13  ;;  %v2120_v13 = vld [vmem:[#allocation2 + $0x54] sm:$0xf]  ;;  %v2150_v27 = vld [vmem:[#allocation2 + $0x144] sm:$0xf]  ;;  %v1680_v28 = vld [vmem:[#allocation2 + $0x148] sm:$0xf0]  ;;  %v2063_v31 = vor.u32 %v2247_v22, %v2062_v21 }
  0x4a   :  { %1156 = vmatpush.bf16.msrb.mxu2 %v1911_v9  ;;  %v2070_v9 = vld [vmem:[#allocation2 + $0x450] sm:$0xf]  ;;  %v1563_v20 = vor.u32 %v2120_v13, %v1560_v14  ;;  %v1608_v30 = vld [vmem:[#allocation2 + $0xb8] sm:$0xf0]  ;;  %v1683_v35 = vor.u32 %v2150_v27, %v1680_v28  ;;  %v1498_v36 = vld [vmem:[%s2600_s0 + $0x58] sm:$0xf] }
  0x4b   :  { %1175 = vmatpush.bf16.msrb.mxu3 %v1975_v24  ;;  %v2071_v19 = vor.u32 %v2249_v10, %v2070_v9  ;;  %v1619_v24 = vor.u32 %v2134_v17, %v1616_v18  ;;  %v2054_v33 = vld [vmem:[#allocation2 + $0x430] sm:$0xf]  ;;  %v2107_v37 = vld [vmem:[%s2600_s0 + $0x78] sm:$0xf0]  ;;  %v1500_v39 = vld [vmem:[%s2600_s0 + $0x7c] sm:$0xf0] }
  0x4c   :  { %1119 = vmatpush.bf16.msrb.mxu0 %v1775_v42  ;;  %v2116_v41 = vld [vmem:[#allocation2 + $0x34] sm:$0xf]  ;;  %v1544_v42 = vld [vmem:[#allocation2 + $0x38] sm:$0xf0]  ;;  %v2130_v46 = vld [vmem:[#allocation2 + $0xa4] sm:$0xf] }
  0x4d   :  { %1138 = vmatpush.bf16.msrb.mxu1 %v1839_v29  ;;  %v2132_v29 = vld [vmem:[#allocation2 + $0xb4] sm:$0xf]  ;;  %v1672_v45 = vld [vmem:[#allocation2 + $0x138] sm:$0xf0]  ;;  %v1506_v49 = vld [vmem:[%s2600_s0 + $0x60] sm:$0xf] }
  0x4e   :  { %1157 = vmatpush.bf16.msrb.mxu2 %v1903_v25  ;;  %v2118_v25 = vld [vmem:[#allocation2 + $0x44] sm:$0xf]  ;;  %v1611_v40 = vor.u32 %v2132_v29, %v1608_v30  ;;  %v2148_v43 = vld [vmem:[#allocation2 + $0x134] sm:$0xf]  ;;  %v1508_v58 = vld [vmem:[%s2600_s0 + $0x84] sm:$0xf0] }
  0x4f   :  { %1176 = vmatpush.bf16.msrb.mxu3 %v1967_v47  ;;  %1120 = vmatmul.bf16.vlgmr.msrb.gmra.mxu0 %v2486_v0  ;;  %v1555_v32 = vor.u32 %v2118_v25, %v1552_v26  ;;  %v1600_v47 = vld [vmem:[#allocation2 + $0xa8] sm:$0xf0]  ;;  %v2104_v55 = vld [vmem:[%s2600_s0 + $0x64] sm:$0xf]  ;;  %v2046_v61 = vld [vmem:[#allocation2 + $0x420] sm:$0xf]  ;;  %v1675_v63 = vor.u32 %v2148_v43, %v1672_v45 }
  0x50   :  { %1188 = vmatpush.bf16.msra.mxu0 %v2087_v52  ;;  %1139 = vmatmul.bf16.vlgmr.msrb.gmra.mxu1 %v2488_v1  ;;  %v2108_v52 = vld [vmem:[%s2600_s0 + $0x80] sm:$0xf0]  ;;  %v2243_v62 = vld [vmem:[#allocation2 + $0x424] sm:$0xf0]  ;;  %v1603_v2 = vor.u32 %v2130_v46, %v1600_v47  ;;  %v1536_v4 = vld [vmem:[#allocation2 + $0x28] sm:$0xf0]  ;;  %v2528_v14 = vor.u32 %v2104_v55, %v1508_v58 }
  0x51   :  { %1207 = vmatpush.bf16.msra.mxu1 %v1579_v38  ;;  %1158 = vmatmul.bf16.vlgmr.msrb.gmra.mxu2 %v2490_v5  ;;  %v2103_v38 = vld [vmem:[%s2600_s0 + $0x5c] sm:$0xf]  ;;  %v2114_v3 = vld [vmem:[#allocation2 + $0x24] sm:$0xf]  ;;  %v1664_v10 = vld [vmem:[#allocation2 + $0x128] sm:$0xf0]  ;;  %v2526_v13 = vor.u32 %v2108_v52, %v1506_v49  ;;  %v2047_v15 = vor.u32 %v2243_v62, %v2046_v61 }
  0x52   :  { %1226 = vmatpush.bf16.msra.mxu2 %v1643_v34  ;;  %1177 = vmatmul.bf16.vlgmr.msrb.gmra.mxu3 %v2492_v6  ;;  %v2245_v34 = vld [vmem:[#allocation2 + $0x434] sm:$0xf0]  ;;  %v2524_v9 = vor.u32 %v2103_v38, %v1500_v39  ;;  %v1539_v16 = vor.u32 %v2114_v3, %v1536_v4  ;;  %v2038_v17 = vld [vmem:[#allocation2 + $0x410] sm:$0xf]  ;;  %v2112_v21 = vld [vmem:[#allocation2 + $0x14] sm:$0xf] }
  0x53   :  { %1245 = vmatpush.bf16.msra.mxu3 %v1707_v59  ;;  %v2055_v59 = vor.u32 %v2245_v34, %v2054_v33  ;;  %v2241_v18 = vld [vmem:[#allocation2 + $0x414] sm:$0xf0]  ;;  %v1528_v22 = vld [vmem:[#allocation2 + $0x18] sm:$0xf0]  ;;  %v2126_v25 = vld [vmem:[#allocation2 + $0x84] sm:$0xf] }
  0x54   :  { %1189 = vmatpush.bf16.msra.mxu0 %v2079_v7  ;;  %v2146_v7 = vld [vmem:[#allocation2 + $0x124] sm:$0xf]  ;;  %v1584_v26 = vld [vmem:[#allocation2 + $0x88] sm:$0xf0]  ;;  %v2204_v27 = vld [vmem:[#allocation2 + $0x2f4] sm:$0xf]  ;;  %v2039_v29 = vor.u32 %v2241_v18, %v2038_v17  ;;  %v1531_v30 = vor.u32 %v2112_v21, %v1528_v22 }
  0x55   :  { %1208 = vmatpush.bf16.msra.mxu1 %v1571_v8  ;;  %v2522_v8 = vor.u32 %v2107_v37, %v1498_v36  ;;  %v1896_v28 = vld [vmem:[#allocation2 + $0x2f8] sm:$0xf0]  ;;  %v2110_v33 = vld [vmem:[#allocation2 + $0x4] sm:$0xf]  ;;  %v1520_v36 = vld [vmem:[#allocation2 + $0x8] sm:$0xf0] }
  0x56   :  { %1227 = vmatpush.bf16.msra.mxu2 %v1635_v60  ;;  %v1547_v60 = vor.u32 %v2116_v41, %v1544_v42  ;;  %v2142_v37 = vld [vmem:[#allocation2 + $0x104] sm:$0xf]  ;;  %v1648_v38 = vld [vmem:[#allocation2 + $0x108] sm:$0xf0]  ;;  %v1899_v39 = vor.u32 %v2204_v27, %v1896_v28  ;;  %v1768_v41 = vld [vmem:[#allocation2 + $0x1f8] sm:$0xf0]  ;;  %v1523_v49 = vor.u32 %v2110_v33, %v1520_v36 }
  0x57   :  { %1246 = vmatpush.bf16.msra.mxu3 %v1699_v11  ;;  %v2128_v11 = vld [vmem:[#allocation2 + $0x94] sm:$0xf]  ;;  %v1832_v43 = vld [vmem:[#allocation2 + $0x278] sm:$0xf0]  ;;  %v2202_v52 = vld [vmem:[#allocation2 + $0x2e4] sm:$0xf]  ;;  %v1651_v58 = vor.u32 %v2142_v37, %v1648_v38 }
  0x58   :  { %1190 = vmatpush.bf16.msra.mxu0 %v2071_v19  ;;  %v1667_v19 = vor.u32 %v2146_v7, %v1664_v10  ;;  %v2188_v42 = vld [vmem:[#allocation2 + $0x274] sm:$0xf]  ;;  %v1960_v46 = vld [vmem:[#allocation2 + $0x378] sm:$0xf0]  ;;  %v1888_v55 = vld [vmem:[#allocation2 + $0x2e8] sm:$0xf0] }
  0x59   :  { %1209 = vmatpush.bf16.msra.mxu1 %v1563_v20  ;;  %v2220_v45 = vld [vmem:[#allocation2 + $0x374] sm:$0xf]  ;;  %v2170_v62 = vld [vmem:[#allocation2 + $0x1e4] sm:$0xf]  ;;  %v1891_v4 = vor.u32 %v2202_v52, %v1888_v55  ;;  %v1824_v10 = vld [vmem:[#allocation2 + $0x268] sm:$0xf0] }
  0x5a   :  { %1228 = vmatpush.bf16.msra.mxu2 %v1627_v12  ;;  %v1592_v12 = vld [vmem:[#allocation2 + $0x98] sm:$0xf0]  ;;  %v1963_v61 = vor.u32 %v2220_v45, %v1960_v46  ;;  %v2100_v3 = vld [vmem:[%s2600_s0 + $0x40] sm:$0xf0]  ;;  %v2216_v27 = vld [vmem:[#allocation2 + $0x354] sm:$0xf] }
  0x5b   :  { %1247 = vmatpush.bf16.msra.mxu3 %v1691_v23  ;;  %v1595_v20 = vor.u32 %v2128_v11, %v1592_v12  ;;  %v2144_v23 = vld [vmem:[#allocation2 + $0x114] sm:$0xf]  ;;  %v2186_v7 = vld [vmem:[#allocation2 + $0x264] sm:$0xf]  ;;  %v1880_v18 = vld [vmem:[#allocation2 + $0x2d8] sm:$0xf0] }
  0x5c   :  { %1191 = vmatpush.bf16.msra.mxu0 %v2063_v31  ;;  %v2030_v31 = vld [vmem:[#allocation2 + $0x400] sm:$0xf]  ;;  %v2218_v12 = vld [vmem:[#allocation2 + $0x364] sm:$0xf]  ;;  %v1827_v21 = vor.u32 %v2186_v7, %v1824_v10  ;;  %v1944_v28 = vld [vmem:[#allocation2 + $0x358] sm:$0xf0] }
  0x5d   :  { %1210 = vmatpush.bf16.msra.mxu1 %v1555_v32  ;;  %v2239_v32 = vld [vmem:[#allocation2 + $0x404] sm:$0xf0]  ;;  %v1808_v36 = vld [vmem:[#allocation2 + $0x248] sm:$0xf0]  ;;  %v2180_v45 = vld [vmem:[#allocation2 + $0x234] sm:$0xf] }
  0x5e   :  { %1229 = vmatpush.bf16.msra.mxu2 %v1619_v24  ;;  %v1656_v24 = vld [vmem:[#allocation2 + $0x118] sm:$0xf0]  ;;  %v2031_v47 = vor.u32 %v2239_v32, %v2030_v31  ;;  %v2166_v31 = vld [vmem:[#allocation2 + $0x1c4] sm:$0xf]  ;;  %v1744_v32 = vld [vmem:[#allocation2 + $0x1c8] sm:$0xf0] }
  0x5f   :  { %1248 = vmatpush.bf16.msra.mxu3 %v1683_v35  ;;  %1125 = vmatmul.bf16.gmra.mxu0 %v2522_v8  ;;  %v1659_v34 = vor.u32 %v2144_v23, %v1656_v24  ;;  %v1587_v35 = vor.u32 %v2126_v25, %v1584_v26  ;;  %v2184_v23 = vld [vmem:[#allocation2 + $0x254] sm:$0xf]  ;;  %v1816_v24 = vld [vmem:[#allocation2 + $0x258] sm:$0xf0]  ;;  %v1747_v38 = vor.u32 %v2166_v31, %v1744_v32  ;;  %v1792_v7 = vld [vmem:[#allocation2 + $0x228] sm:$0xf0] }
  0x60   :  { %1192 = vmatpush.bf16.msra.mxu0 %v2055_v59  ;;  %1144 = vmatmul.bf16.gmra.mxu1 %v2524_v9  ;;  %v1819_v33 = vor.u32 %v2184_v23, %v1816_v24  ;;  %v1800_v46 = vld [vmem:[#allocation2 + $0x238] sm:$0xf0]  ;;  %v2212_v52 = vld [vmem:[#allocation2 + $0x334] sm:$0xf]  ;;  %v1840_v31 = vld [vmem:[#allocation2 + $0x288] sm:$0xf0] }
  0x61   :  { %1211 = vmatpush.bf16.msra.mxu1 %v1547_v60  ;;  %1163 = vmatmul.bf16.gmra.mxu2 %v2526_v13  ;;  %v1835_v60 = vor.u32 %v2188_v42, %v1832_v43  ;;  %v2164_v42 = vld [vmem:[#allocation2 + $0x1b4] sm:$0xf]  ;;  %v1736_v43 = vld [vmem:[#allocation2 + $0x1b8] sm:$0xf0]  ;;  %v2158_v32 = vld [vmem:[#allocation2 + $0x184] sm:$0xf] }
  0x62   :  { %1230 = vmatpush.bf16.msra.mxu2 %v1611_v40  ;;  %1182 = vmatmul.bf16.gmra.mxu3 %v2528_v14  ;;  %v2172_v40 = vld [vmem:[#allocation2 + $0x1f4] sm:$0xf]  ;;  %v1928_v55 = vld [vmem:[#allocation2 + $0x338] sm:$0xf0] }
  0x63   :  { %1249 = vmatpush.bf16.msra.mxu3 %v1675_v63  ;;  %v1771_v59 = vor.u32 %v2172_v40, %v1768_v41  ;;  %v1760_v63 = vld [vmem:[#allocation2 + $0x1e8] sm:$0xf0]  ;;  %v1864_v41 = vld [vmem:[#allocation2 + $0x2b8] sm:$0xf0]  ;;  %v2176_v24 = vld [vmem:[#allocation2 + $0x214] sm:$0xf] }
  0x64   :  { %1193 = vmatpush.bf16.msra.mxu0 %v2047_v15  ;;  %v1763_v11 = vor.u32 %v2170_v62, %v1760_v63  ;;  %v1952_v15 = vld [vmem:[#allocation2 + $0x368] sm:$0xf0]  ;;  %v1514_v62 = vld [vmem:[%s2600_s0 + $0x68] sm:$0xf] }
  0x65   :  { %1212 = vmatpush.bf16.msra.mxu1 %v1539_v16  ;;  %v2200_v16 = vld [vmem:[#allocation2 + $0x2d4] sm:$0xf]  ;;  %v1955_v22 = vor.u32 %v2218_v12, %v1952_v15  ;;  %v1936_v40 = vld [vmem:[#allocation2 + $0x348] sm:$0xf0]  ;;  %v2210_v12 = vld [vmem:[#allocation2 + $0x324] sm:$0xf] }
  0x66   :  { %1231 = vmatpush.bf16.msra.mxu2 %v1603_v2  ;;  %v1478_v2 = vld [vmem:[%s2600_s0 + $0x20] sm:$0xf]  ;;  %v1883_v25 = vor.u32 %v2200_v16, %v1880_v18  ;;  %v2109_v63 = vld [vmem:[%s2600_s0 + $0x88] sm:$0xf0]  ;;  %v2192_v16 = vld [vmem:[#allocation2 + $0x294] sm:$0xf] }
  0x67   :  { %1250 = vmatpush.bf16.msra.mxu3 %v1667_v19  ;;  %v2540_v17 = vor.u32 %v2100_v3, %v1478_v2  ;;  %v2168_v19 = vld [vmem:[#allocation2 + $0x1d4] sm:$0xf]  ;;  %v1803_v2 = vor.u32 %v2180_v45, %v1800_v46  ;;  %v1931_v3 = vor.u32 %v2212_v52, %v1928_v55  ;;  %v1920_v15 = vld [vmem:[#allocation2 + $0x328] sm:$0xf0]  ;;  %v2552_v18 = vor.u32 %v2109_v63, %v1514_v62 }
  0x68   :  { %1194 = vmatpush.bf16.msra.mxu0 %v2039_v29  ;;  %v2198_v29 = vld [vmem:[#allocation2 + $0x2c4] sm:$0xf]  ;;  %v1923_v23 = vor.u32 %v2210_v12, %v1920_v15  ;;  %v2080_v52 = vld [vmem:[#allocation2 + $0x468] sm:$0xf0]  ;;  %v2228_v12 = vld [vmem:[#allocation2 + $0x3b4] sm:$0xf] }
  0x69   :  { %1213 = vmatpush.bf16.msra.mxu1 %v1531_v30  ;;  %v1872_v30 = vld [vmem:[#allocation2 + $0x2c8] sm:$0xf0]  ;;  %v1992_v15 = vld [vmem:[#allocation2 + $0x3b8] sm:$0xf0] }
  0x6a   :  { %1232 = vmatpush.bf16.msra.mxu2 %v1595_v20  ;;  %v1752_v20 = vld [vmem:[#allocation2 + $0x1d8] sm:$0xf0]  ;;  %v1875_v37 = vor.u32 %v2198_v29, %v1872_v30  ;;  %v2190_v30 = vld [vmem:[#allocation2 + $0x284] sm:$0xf] }
  0x6b   :  { %1251 = vmatpush.bf16.msra.mxu3 %v1659_v34  ;;  %v1755_v26 = vor.u32 %v2168_v19, %v1752_v20  ;;  %v1947_v34 = vor.u32 %v2216_v27, %v1944_v28  ;;  %v1848_v19 = vld [vmem:[#allocation2 + $0x298] sm:$0xf0]  ;;  %v2160_v20 = vld [vmem:[#allocation2 + $0x194] sm:$0xf] }
  0x6c   :  { %1195 = vmatpush.bf16.msra.mxu0 %v2031_v47  ;;  %v2208_v28 = vld [vmem:[#allocation2 + $0x314] sm:$0xf]  ;;  %v1912_v29 = vld [vmem:[#allocation2 + $0x318] sm:$0xf0] }
  0x6d   :  { %1214 = vmatpush.bf16.msra.mxu1 %v1523_v49  ;;  %v1739_v49 = vor.u32 %v2164_v42, %v1736_v43  ;;  %v2252_v43 = vld [vmem:[#allocation2 + $0x474] sm:$0xf] }
  0x6e   :  { %1233 = vmatpush.bf16.msra.mxu2 %v1587_v35  ;;  %v2182_v35 = vld [vmem:[#allocation2 + $0x244] sm:$0xf] }
  0x6f   :  { %1252 = vmatpush.bf16.msra.mxu3 %v1651_v58  ;;  %1196 = vmatmul.bf16.vlgmr.msra.gmra.mxu0 %v2540_v17  ;;  %v2194_v58 = vld [vmem:[#allocation2 + $0x2a4] sm:$0xf] }
  0x70   :  { %1264 = vmatpush.bf16.msrb.mxu0 %v1771_v59  ;;  %1215 = vmatmul.bf16.vlgmr.msra.gmra.mxu1 %v2414_v48  ;;  %v2196_v48 = vld [vmem:[#allocation2 + $0x2b4] sm:$0xf]  ;;  %v1856_v59 = vld [vmem:[#allocation2 + $0x2a8] sm:$0xf0] }
  0x71   :  { %1283 = vmatpush.bf16.msrb.mxu1 %v1835_v60  ;;  %1234 = vmatmul.bf16.vlgmr.msra.gmra.mxu2 %v2416_v53  ;;  %v1811_v53 = vor.u32 %v2182_v35, %v1808_v36  ;;  %v1867_v47 = vor.u32 %v2196_v48, %v1864_v41  ;;  %v2162_v60 = vld [vmem:[#allocation2 + $0x1a4] sm:$0xf]  ;;  %v1859_v10 = vor.u32 %v2194_v58, %v1856_v59  ;;  %v2024_v35 = vld [vmem:[#allocation2 + $0x3f8] sm:$0xf0]  ;;  %v1776_v48 = vld [vmem:[#allocation2 + $0x208] sm:$0xf0] }
  0x72   :  { %1302 = vmatpush.bf16.msrb.mxu2 %v1899_v39  ;;  %1253 = vmatmul.bf16.vlgmr.msra.gmra.mxu3 %v2418_v54  ;;  %v2214_v39 = vld [vmem:[#allocation2 + $0x344] sm:$0xf]  ;;  %v1904_v41 = vld [vmem:[#allocation2 + $0x308] sm:$0xf0]  ;;  %v2232_v58 = vld [vmem:[#allocation2 + $0x3d4] sm:$0xf] }
  0x73   :  { %1321 = vmatpush.bf16.msrb.mxu3 %v1963_v61  ;;  %v1939_v54 = vor.u32 %v2214_v39, %v1936_v40  ;;  %v1728_v61 = vld [vmem:[#allocation2 + $0x1a8] sm:$0xf0]  ;;  %v1843_v39 = vor.u32 %v2190_v30, %v1840_v31  ;;  %v2008_v59 = vld [vmem:[#allocation2 + $0x3d8] sm:$0xf0]  ;;  %v2222_v30 = vld [vmem:[#allocation2 + $0x384] sm:$0xf] }
  0x74   :  { %1265 = vmatpush.bf16.msrb.mxu0 %v1763_v11  ;;  %v1731_v11 = vor.u32 %v2162_v60, %v1728_v61  ;;  %v2248_v60 = vld [vmem:[#allocation2 + $0x454] sm:$0xf]  ;;  %v2072_v61 = vld [vmem:[#allocation2 + $0x458] sm:$0xf0]  ;;  %v2011_v62 = vor.u32 %v2232_v58, %v2008_v59  ;;  %v1968_v31 = vld [vmem:[#allocation2 + $0x388] sm:$0xf0] }
  0x75   :  { %1284 = vmatpush.bf16.msrb.mxu1 %v1827_v21  ;;  %v1720_v21 = vld [vmem:[#allocation2 + $0x198] sm:$0xf0]  ;;  %v2075_v63 = vor.u32 %v2248_v60, %v2072_v61 }
  0x76   :  { %1303 = vmatpush.bf16.msrb.mxu2 %v1891_v4  ;;  %v2178_v4 = vld [vmem:[#allocation2 + $0x224] sm:$0xf]  ;;  %v1723_v27 = vor.u32 %v2160_v20, %v1720_v21 }
  0x77   :  { %1322 = vmatpush.bf16.msrb.mxu3 %v1955_v22  ;;  %v1795_v22 = vor.u32 %v2178_v4, %v1792_v7  ;;  %v2246_v4 = vld [vmem:[#allocation2 + $0x444] sm:$0xf]  ;;  %v2064_v7 = vld [vmem:[#allocation2 + $0x448] sm:$0xf0] }
  0x78   :  { %1266 = vmatpush.bf16.msrb.mxu0 %v1755_v26  ;;  %v1851_v26 = vor.u32 %v2192_v16, %v1848_v19  ;;  %v2244_v16 = vld [vmem:[#allocation2 + $0x434] sm:$0xf]  ;;  %v2056_v19 = vld [vmem:[#allocation2 + $0x438] sm:$0xf0]  ;;  %v2226_v20 = vld [vmem:[#allocation2 + $0x3a4] sm:$0xf] }
  0x79   :  { %1285 = vmatpush.bf16.msrb.mxu1 %v1819_v33  ;;  %v1712_v33 = vld [vmem:[#allocation2 + $0x188] sm:$0xf0]  ;;  %v2242_v21 = vld [vmem:[#allocation2 + $0x424] sm:$0xf] }
  0x7a   :  { %1304 = vmatpush.bf16.msrb.mxu2 %v1883_v25  ;;  %v1784_v25 = vld [vmem:[#allocation2 + $0x218] sm:$0xf0]  ;;  %v1715_v40 = vor.u32 %v2158_v32, %v1712_v33  ;;  %v2238_v32 = vld [vmem:[#allocation2 + $0x404] sm:$0xf]  ;;  %v2032_v33 = vld [vmem:[#allocation2 + $0x408] sm:$0xf0] }
  0x7b   :  { %1323 = vmatpush.bf16.msrb.mxu3 %v1947_v34  ;;  %v2236_v34 = vld [vmem:[#allocation2 + $0x3f4] sm:$0xf]  ;;  %v1787_v36 = vor.u32 %v2176_v24, %v1784_v25  ;;  %v1976_v25 = vld [vmem:[#allocation2 + $0x398] sm:$0xf0] }
  0x7c   :  { %1267 = vmatpush.bf16.msrb.mxu0 %v1747_v38  ;;  %v2174_v38 = vld [vmem:[#allocation2 + $0x204] sm:$0xf]  ;;  %v2027_v42 = vor.u32 %v2236_v34, %v2024_v35  ;;  %v2224_v24 = vld [vmem:[#allocation2 + $0x394] sm:$0xf]  ;;  %v1971_v34 = vor.u32 %v2222_v30, %v1968_v31  ;;  %v2035_v35 = vor.u32 %v2238_v32, %v2032_v33 }
  0x7d   :  { %1286 = vmatpush.bf16.msrb.mxu1 %v1811_v53  ;;  %v2088_v53 = vld [vmem:[#allocation2 + $0x478] sm:$0xf0] }
  0x7e   :  { %1305 = vmatpush.bf16.msrb.mxu2 %v1875_v37  ;;  %v1915_v37 = vor.u32 %v2208_v28, %v1912_v29  ;;  %v2091_v46 = vor.u32 %v2252_v43, %v2088_v53  ;;  %v1979_v28 = vor.u32 %v2224_v24, %v1976_v25 }
  0x7f   :  { %1324 = vmatpush.bf16.msrb.mxu3 %v1939_v54  ;;  %1201 = vmatmul.bf16.gmra.mxu0 %v2552_v18  ;;  %v2016_v54 = vld [vmem:[#allocation2 + $0x3e8] sm:$0xf0] }
  0x80   :  { %1268 = vmatpush.bf16.msrb.mxu0 %v1739_v49  ;;  %1220 = vmatmul.bf16.gmra.mxu1 %v2450_v44  ;;  %v2206_v44 = vld [vmem:[#allocation2 + $0x304] sm:$0xf] }
  0x81   :  { %1287 = vmatpush.bf16.msrb.mxu1 %v1803_v2  ;;  %1239 = vmatmul.bf16.gmra.mxu2 %v2452_v50  ;;  %v2234_v50 = vld [vmem:[#allocation2 + $0x3e4] sm:$0xf]  ;;  %v1907_v45 = vor.u32 %v2206_v44, %v1904_v41 }
  0x82   :  { %1306 = vmatpush.bf16.msrb.mxu2 %v1867_v47  ;;  %1258 = vmatmul.bf16.gmra.mxu3 %v2454_v51  ;;  %v1779_v51 = vor.u32 %v2174_v38, %v1776_v48  ;;  %v2019_v47 = vor.u32 %v2234_v50, %v2016_v54  ;;  %v2250_v49 = vld [vmem:[#allocation2 + $0x464] sm:$0xf] }
  0x83   :  { %1325 = vmatpush.bf16.msrb.mxu3 %v1931_v3  ;;  %v2083_v55 = vor.u32 %v2250_v49, %v2080_v52  ;;  %v2230_v2 = vld [vmem:[#allocation2 + $0x3c4] sm:$0xf]  ;;  %v2000_v3 = vld [vmem:[#allocation2 + $0x3c8] sm:$0xf0] }
  0x84   :  { %1269 = vmatpush.bf16.msrb.mxu0 %v1731_v11  ;;  %v2067_v11 = vor.u32 %v2246_v4, %v2064_v7 }
  0x85   :  { %1288 = vmatpush.bf16.msrb.mxu1 %v1795_v22 }
  0x86   :  { %1307 = vmatpush.bf16.msrb.mxu2 %v1859_v10  ;;  %v2003_v10 = vor.u32 %v2230_v2, %v2000_v3 }
  0x87   :  { %1326 = vmatpush.bf16.msrb.mxu3 %v1923_v23 }
  0x88   :  { %1270 = vmatpush.bf16.msrb.mxu0 %v1723_v27  ;;  %v2040_v27 = vld [vmem:[#allocation2 + $0x418] sm:$0xf0] }
  0x89   :  { %1289 = vmatpush.bf16.msrb.mxu1 %v1787_v36 }
  0x8a   :  { %1308 = vmatpush.bf16.msrb.mxu2 %v1851_v26  ;;  %v2240_v26 = vld [vmem:[#allocation2 + $0x414] sm:$0xf] }
  0x8b   :  { %1327 = vmatpush.bf16.msrb.mxu3 %v1915_v37  ;;  %v2043_v29 = vor.u32 %v2240_v26, %v2040_v27 }
  0x8c   :  { %1271 = vmatpush.bf16.msrb.mxu0 %v1715_v40 }
  0x8d   :  { %1290 = vmatpush.bf16.msrb.mxu1 %v1779_v51 }
  0x8e   :  { %1309 = vmatpush.bf16.msrb.mxu2 %v1843_v39 }
  0x8f   :  { %1328 = vmatpush.bf16.msrb.mxu3 %v1907_v45  ;;  %1272 = vmatmul.bf16.vlgmr.msrb.gmra.mxu0 %v2420_v57  ;;  %v1995_v57 = vor.u32 %v2228_v12, %v1992_v15 }
  0x90   :  { %1340 = vmatpush.bf16.msra.mxu0 %v2027_v42  ;;  %1291 = vmatmul.bf16.vlgmr.msrb.gmra.mxu1 %v2486_v0  ;;  %v2059_v0 = vor.u32 %v2244_v16, %v2056_v19 }
  0x91   :  { %1359 = vmatpush.bf16.msra.mxu1 %v2091_v46  ;;  %1310 = vmatmul.bf16.vlgmr.msrb.gmra.mxu2 %v2488_v1  ;;  %v1984_v1 = vld [vmem:[#allocation2 + $0x3a8] sm:$0xf0] }
  0x92   :  { %2254 = vmatpush.bf16.msra.mxu2 %v2027_v42  ;;  %1329 = vmatmul.bf16.vlgmr.msrb.gmra.mxu3 %v2490_v5  ;;  %v2048_v5 = vld [vmem:[#allocation2 + $0x428] sm:$0xf0]  ;;  %v1987_v22 = vor.u32 %v2226_v20, %v1984_v1 }
  0x93   :  { %2262 = vmatpush.bf16.msra.mxu3 %v2091_v46  ;;  %v2051_v23 = vor.u32 %v2242_v21, %v2048_v5 }
  0x94   :  { %1341 = vmatpush.bf16.msra.mxu0 %v2019_v47 }
  0x95   :  { %1360 = vmatpush.bf16.msra.mxu1 %v2083_v55 }
  0x96   :  { %2255 = vmatpush.bf16.msra.mxu2 %v2019_v47 }
  0x97   :  { %2263 = vmatpush.bf16.msra.mxu3 %v2083_v55 }
  0x98   :  { %1342 = vmatpush.bf16.msra.mxu0 %v2011_v62 }
  0x99   :  { %1361 = vmatpush.bf16.msra.mxu1 %v2075_v63 }
  0x9a   :  { %2256 = vmatpush.bf16.msra.mxu2 %v2011_v62 }
  0x9b   :  { %2264 = vmatpush.bf16.msra.mxu3 %v2075_v63 }
  0x9c   :  { %1343 = vmatpush.bf16.msra.mxu0 %v2003_v10 }
  0x9d   :  { %1362 = vmatpush.bf16.msra.mxu1 %v2067_v11 }
  0x9e   :  { %2257 = vmatpush.bf16.msra.mxu2 %v2003_v10 }
  0x9f   :  { %2265 = vmatpush.bf16.msra.mxu3 %v2067_v11  ;;  %1277 = vmatmul.bf16.gmra.mxu0 %v2456_v56 }
  0xa0   :  { %1344 = vmatpush.bf16.msra.mxu0 %v1995_v57  ;;  %1296 = vmatmul.bf16.gmra.mxu1 %v2522_v8 }
  0xa1   :  { %1363 = vmatpush.bf16.msra.mxu1 %v2059_v0  ;;  %1315 = vmatmul.bf16.gmra.mxu2 %v2524_v9 }
  0xa2   :  { %2258 = vmatpush.bf16.msra.mxu2 %v1995_v57  ;;  %1334 = vmatmul.bf16.gmra.mxu3 %v2526_v13 }
  0xa3   :  { %2266 = vmatpush.bf16.msra.mxu3 %v2059_v0 }
  0xa4   :  { %1345 = vmatpush.bf16.msra.mxu0 %v1987_v22 }
  0xa5   :  { %1364 = vmatpush.bf16.msra.mxu1 %v2051_v23 }
  0xa6   :  { %2259 = vmatpush.bf16.msra.mxu2 %v1987_v22 }
  0xa7   :  { %2267 = vmatpush.bf16.msra.mxu3 %v2051_v23 }
  0xa8   :  { %1346 = vmatpush.bf16.msra.mxu0 %v1979_v28 }
  0xa9   :  { %1365 = vmatpush.bf16.msra.mxu1 %v2043_v29 }
  0xaa   :  { %2260 = vmatpush.bf16.msra.mxu2 %v1979_v28 }
  0xab   :  { %2268 = vmatpush.bf16.msra.mxu3 %v2043_v29 }
  0xac   :  { %1347 = vmatpush.bf16.msra.mxu0 %v1971_v34  ;;  %v1045_v36 = vpop.f32.mrf.mxu0 }
  0xad   :  { %1366 = vmatpush.bf16.msra.mxu1 %v2035_v35  ;;  %v1064_v56 = vpop.f32.mrf.mxu1 }
  0xae   :  { %2261 = vmatpush.bf16.msra.mxu2 %v1971_v34  ;;  %v1065_v37 = vadd.f32 %v1064_v56, %v1045_v36 }
  0xaf   :  { %2269 = vmatpush.bf16.msra.mxu3 %v2035_v35  ;;  %1348 = vmatmul.bf16.vlgmr.msra.gmra.mxu0 %v2492_v6 }
  0xb0   :  { %1367 = vmatmul.bf16.vlgmr.msra.gmra.mxu1 %v2540_v17 }
  0xb1   :  { %1353 = vmatmul.bf16.vlgmr.msra.gmra.mxu2 %v2528_v14 }
  0xb2   :  { %1372 = vmatmul.bf16.vlgmr.msra.gmra.mxu3 %v2552_v18 }
  0xb4   :  { %v1083_v8 = vpop.f32.mrf.mxu2  ;;  %v1047_v38 = vpop.f32.mrf.mxu0 }
  0xb5   :  { %v1084_v9 = vadd.f32 %v1083_v8, %v1065_v37  ;;  %v1102_v13 = vpop.f32.mrf.mxu3  ;;  %v1066_v39 = vpop.f32.mrf.mxu1 }
  0xb6   :  { %v1067_v48 = vadd.f32 %v1066_v39, %v1047_v38 }
  0xb7   :  { %v1103_v40 = vadd.f32 %v1102_v13, %v1084_v9 }
  0xbc   :  { %v1085_v44 = vpop.f32.mrf.mxu2  ;;  %v1050_v43 = vpop.f32.mrf.mxu0 }
  0xbd   :  { %v1086_v41 = vadd.f32 %v1085_v44, %v1067_v48  ;;  %v1104_v42 = vpop.f32.mrf.mxu3  ;;  %v1069_v53 = vpop.f32.mrf.mxu1 }
  0xbe   :  { %v1070_v6 = vadd.f32 %v1069_v53, %v1050_v43 }
  0xbf   :  { %v1105_v50 = vadd.f32 %v1104_v42, %v1086_v41 }
  0xc4   :  { %v1088_v54 = vpop.f32.mrf.mxu2  ;;  %v1052_v14 = vpop.f32.mrf.mxu0 }
  0xc5   :  { %v1089_v17 = vadd.f32 %v1088_v54, %v1070_v6  ;;  %v1107_v51 = vpop.f32.mrf.mxu3  ;;  %v1071_v45 = vpop.f32.mrf.mxu1 }
  0xc6   :  { %v1072_v46 = vadd.f32 %v1071_v45, %v1052_v14 }
  0xc7   :  { %v1108_v18 = vadd.f32 %v1107_v51, %v1089_v17 }
  0xcc   :  { %v1090_v47 = vpop.f32.mrf.mxu2  ;;  %v1121_v55 = vpop.f32.mrf.mxu0 }
  0xcd   :  { %v1091_v49 = vadd.f32 %v1090_v47, %v1072_v46  ;;  %v1109_v52 = vpop.f32.mrf.mxu3  ;;  %v1140_v58 = vpop.f32.mrf.mxu1  ;;  %v1122_v60 = vadd.f32 %v1121_v55, %v1103_v40 }
  0xcf   :  { %v1110_v59 = vadd.f32 %v1109_v52, %v1091_v49  ;;  %v1141_v61 = vadd.f32 %v1140_v58, %v1122_v60 }
  0xd4   :  { %v1159_v62 = vpop.f32.mrf.mxu2  ;;  %v1123_v3 = vpop.f32.mrf.mxu0 }
  0xd5   :  { %v1178_v63 = vpop.f32.mrf.mxu3  ;;  %v1160_v2 = vadd.f32 %v1159_v62, %v1141_v61  ;;  %v1142_v4 = vpop.f32.mrf.mxu1  ;;  %v1124_v7 = vadd.f32 %v1123_v3, %v1105_v50  ;;  %v1378_v61 = vld [vmem:[#allocation4] sm:$0x3] }
  0xd7   :  { %v1179_v10 = vadd.f32 %v1178_v63, %v1160_v2  ;;  %v1143_v11 = vadd.f32 %v1142_v4, %v1124_v7  ;;  %v1380_v4 = vperm.slane %v1378_v61, 0 }
  0xdc   :  { %v1161_v12 = vpop.f32.mrf.mxu2  ;;  %v1126_v19 = vpop.f32.mrf.mxu0 }
  0xdd   :  { %v1180_v15 = vpop.f32.mrf.mxu3  ;;  %v1162_v16 = vadd.f32 %v1161_v12, %v1143_v11  ;;  %v1145_v57 = vpop.f32.mrf.mxu1  ;;  %v1127_v0 = vadd.f32 %v1126_v19, %v1108_v18  ;;  %v1392_v11 = vld [vmem:[#allocation6] sm:$0x3] }
  0xdf   :  { %v1181_v20 = vadd.f32 %v1180_v15, %v1162_v16  ;;  %v1146_v1 = vadd.f32 %v1145_v57, %v1127_v0  ;;  %v2578_v57 = vperm.slane %v1392_v11, 0 }
  0xe4   :  { %v1164_v21 = vpop.f32.mrf.mxu2  ;;  %v1128_v23 = vpop.f32.mrf.mxu0 }
  0xe5   :  { %v1183_v5 = vpop.f32.mrf.mxu3  ;;  %v1165_v22 = vadd.f32 %v1164_v21, %v1146_v1  ;;  %v1147_v24 = vpop.f32.mrf.mxu1  ;;  %v1129_v25 = vadd.f32 %v1128_v23, %v1110_v59 }
  0xe7   :  { %v2570_v26 = vadd.f32 %v1183_v5, %v1165_v22  ;;  %v1148_v27 = vadd.f32 %v1147_v24, %v1129_v25  ;;  %v1381_v25 = vperm.slane %v1378_v61, 1 }
  0xec   :  { %v1166_v28 = vpop.f32.mrf.mxu2  ;;  %v1197_v31 = vpop.f32.mrf.mxu0 }
  0xed   :  { %v1185_v29 = vpop.f32.mrf.mxu3  ;;  %v1167_v30 = vadd.f32 %v1166_v28, %v1148_v27  ;;  %v1216_v32 = vpop.f32.mrf.mxu1  ;;  %v1198_v33 = vadd.f32 %v1197_v31, %v1179_v10 }
  0xef   :  { %v2572_v34 = vadd.f32 %v1185_v29, %v1167_v30  ;;  %v1384_v19 = vmul.f32 %v1380_v4, %v1198_v33  ;;  %v1395_v33 = vperm.slane %v1392_v11, 1 }
  0xf1   :  { %v1398_v30 = vadd.f32 %v2578_v57, %v1384_v19 }
  0xf3   :  { %vm1406_vm0 = vcmp.gt.f32.partialorder %v1398_v30, 0.0 }
  0xf4   :  { %v1235_v35 = vpop.f32.mrf.mxu2  ;;  %v1199_v56 = vpop.f32.mrf.mxu0 }
  0xf5   :  { %v1254_v36 = vpop.f32.mrf.mxu3  ;;  %v1218_v37 = vpop.f32.mrf.mxu1  ;;  %v2574_v8 = vadd.f32 %v1199_v56, %v1181_v20  ;;  %v1236_v14 = vadd.f32 %v1235_v35, %v1216_v32 }
  0xf7   :  { %v1255_v49 = vadd.f32 %v1254_v36, %v1236_v14 }
  0xfc   :  { %v1237_v9 = vpop.f32.mrf.mxu2  ;;  %v1202_v38 = vpop.f32.mrf.mxu0 }
  0xfd   :  { %v1256_v13 = vpop.f32.mrf.mxu3  ;;  %v1221_v39 = vpop.f32.mrf.mxu1  ;;  %v1238_v58 = vadd.f32 %v1237_v9, %v1218_v37  ;;  %v1203_v27 = vadd.f32 %v1202_v38, %v2570_v26  ;;  %v1414_v9 = vmul.f32 0.2, %v1398_v30 }
  0xff   :  { %v1257_v7 = vadd.f32 %v1256_v13, %v1238_v58  ;;  %v1388_v56 = vmul.f32 %v1380_v4, %v1203_v27  ;;  %v1386_v13 = vmul.f32 %v1380_v4, %v2574_v8  ;;  %v1422_v8 = vsel %vm1406_vm0, %v1398_v30, %v1414_v9 }
 0x101   :  { %v1400_v14 = vadd.f32 %v2578_v57, %v1386_v13 }
 0x103   :  { %vm1408_vm3 = vcmp.gt.f32.partialorder %v1400_v14, 0.0 }
 0x104   :  { %v1240_v40 = vpop.f32.mrf.mxu2  ;;  %v2576_v44 = vpop.f32.mrf.mxu0 }
 0x105   :  { %v1259_v48 = vpop.f32.mrf.mxu3  ;;  %v1223_v41 = vpop.f32.mrf.mxu1  ;;  %v1241_v55 = vadd.f32 %v1240_v40, %v1221_v39 }
 0x107   :  { %v1260_v3 = vadd.f32 %v1259_v48, %v1241_v55 }
 0x10c   :  { %v1242_v42 = vpop.f32.mrf.mxu2  ;;  %v1273_v53 = vpop.f32.mrf.mxu0 }
 0x10d   :  { %v1261_v43 = vpop.f32.mrf.mxu3  ;;  %v1292_v50 = vpop.f32.mrf.mxu1  ;;  %v1274_v52 = vadd.f32 %v1273_v53, %v1255_v49  ;;  %v1243_v16 = vadd.f32 %v1242_v42, %v1223_v41 }
 0x10f   :  { %v1293_v2 = vadd.f32 %v1292_v50, %v1274_v52  ;;  %v1262_v28 = vadd.f32 %v1261_v43, %v1243_v16  ;;  %v1402_v50 = vadd.f32 %v2578_v57, %v1388_v56 }
 0x111   :  { %v1418_v52 = vmul.f32 0.2, %v1402_v50  ;;  %vm1410_vm2 = vcmp.gt.f32.partialorder %v1402_v50, 0.0 }
 0x114   :  { %v1311_v6 = vpop.f32.mrf.mxu2  ;;  %v1275_v17 = vpop.f32.mrf.mxu0 }
 0x115   :  { %v1330_v54 = vpop.f32.mrf.mxu3  ;;  %v1294_v51 = vpop.f32.mrf.mxu1  ;;  %v1312_v10 = vadd.f32 %v1311_v6, %v1293_v2  ;;  %v1276_v15 = vadd.f32 %v1275_v17, %v1257_v7  ;;  %v1205_v6 = vadd.f32 %v2576_v44, %v2572_v34  ;;  %v1416_v34 = vmul.f32 0.2, %v1400_v14 }
 0x117   :  { %v1331_v0 = vadd.f32 %v1330_v54, %v1312_v10  ;;  %v1295_v23 = vadd.f32 %v1294_v51, %v1276_v15  ;;  %v1390_v55 = vmul.f32 %v1380_v4, %v1205_v6  ;;  %v1424_v11 = vsel %vm1408_vm3, %v1400_v14, %v1416_v34 }
 0x119   :  { %v1404_v4 = vadd.f32 %v2578_v57, %v1390_v55 }
 0x11b   :  { %vm1412_vm6 = vcmp.gt.f32.partialorder %v1404_v4, 0.0 }
 0x11c   :  { %v1313_v45 = vpop.f32.mrf.mxu2  ;;  %v1278_v46 = vpop.f32.mrf.mxu0 }
 0x11d   :  { %v1332_v18 = vpop.f32.mrf.mxu3  ;;  %v1297_v47 = vpop.f32.mrf.mxu1  ;;  %v1279_v12 = vadd.f32 %v1278_v46, %v1260_v3  ;;  %v1314_v31 = vadd.f32 %v1313_v45, %v1295_v23  ;;  %v1426_v3 = vsel %vm1410_vm2, %v1402_v50, %v1418_v52 }
 0x11f   :  { %v1298_v21 = vadd.f32 %v1297_v47, %v1279_v12  ;;  %v1333_v39 = vadd.f32 %v1332_v18, %v1314_v31 }
 0x124   :  { %v1316_v59 = vpop.f32.mrf.mxu2  ;;  %v1280_v62 = vpop.f32.mrf.mxu0 }
 0x125   :  { %v1335_v60 = vpop.f32.mrf.mxu3  ;;  %v1299_v63 = vpop.f32.mrf.mxu1  ;;  %v1317_v29 = vadd.f32 %v1316_v59, %v1298_v21  ;;  %v1281_v35 = vadd.f32 %v1280_v62, %v1262_v28 }
 0x127   :  { %v1336_v37 = vadd.f32 %v1335_v60, %v1317_v29  ;;  %v1300_v26 = vadd.f32 %v1299_v63, %v1281_v35 }
 0x12c   :  { %v1318_v20 = vpop.f32.mrf.mxu2  ;;  %v1349_v5 = vpop.f32.mrf.mxu0 }
 0x12d   :  { %v1337_v1 = vpop.f32.mrf.mxu3  ;;  %v1368_v22 = vpop.f32.mrf.mxu1  ;;  %v1350_v24 = vadd.f32 %v1349_v5, %v1331_v0  ;;  %v1319_v54 = vadd.f32 %v1318_v20, %v1300_v26  ;;  %v1420_v0 = vmul.f32 0.2, %v1404_v4 }
 0x12f   :  { %v1369_v32 = vadd.f32 %v1368_v22, %v1350_v24  ;;  %v1338_v58 = vadd.f32 %v1337_v1, %v1319_v54  ;;  %v1428_v1 = vsel %vm1412_vm6, %v1404_v4, %v1420_v0 }
 0x131   :  { %v1385_v36 = vmul.f32 %v1381_v25, %v1369_v32 }
 0x133   :  { %v1399_v40 = vadd.f32 %v1395_v33, %v1385_v36 }
 0x134   :  { %v1354_v48 = vpop.f32.mrf.mxu2  ;;  %v1351_v42 = vpop.f32.mrf.mxu0 }
 0x135   :  { %v1373_v41 = vpop.f32.mrf.mxu3  ;;  %v1355_v38 = vadd.f32 %v1354_v48, %v1336_v37  ;;  %vm1407_vm1 = vcmp.gt.f32.partialorder %v1399_v40, 0.0  ;;  %v1415_v43 = vmul.f32 0.2, %v1399_v40  ;;  %v1352_v53 = vadd.f32 %v1351_v42, %v1333_v39  ;;  %v1370_v51 = vpop.f32.mrf.mxu1 }
 0x137   :  { %v1374_v17 = vadd.f32 %v1373_v41, %v1355_v38  ;;  %v1423_v45 = vsel %vm1407_vm1, %v1399_v40, %v1415_v43  ;;  %v1371_v18 = vadd.f32 %v1370_v51, %v1352_v53 }
 0x138   :  { %v1430_v46 = vpack.c.bf16 %v1423_v45, %v1422_v8 }
 0x139   :  { %v1389_v47 = vmul.f32 %v1381_v25, %v1374_v17  ;;  %v1387_v49 = vmul.f32 %v1381_v25, %v1371_v18 }
 0x13a   :  { %1434 = vst [vmem:[%s2604_s4] sm:$0xff] %v1430_v46 }
 0x13b   :  { %v1403_v59 = vadd.f32 %v1395_v33, %v1389_v47  ;;  %v1401_v44 = vadd.f32 %v1395_v33, %v1387_v49 }
 0x13c   :  { %v1356_v60 = vpop.f32.mrf.mxu2 }
 0x13d   :  { %vm1411_vm4 = vcmp.gt.f32.partialorder %v1403_v59, 0.0  ;;  %v1419_v61 = vmul.f32 0.2, %v1403_v59  ;;  %v1357_v62 = vadd.f32 %v1356_v60, %v1338_v58  ;;  %vm1409_vm5 = vcmp.gt.f32.partialorder %v1401_v44, 0.0  ;;  %v1375_v2 = vpop.f32.mrf.mxu3 }
 0x13e   :  { %v1417_v63 = vmul.f32 0.2, %v1401_v44 }
 0x13f   :  { %v1427_v7 = vsel %vm1411_vm4, %v1403_v59, %v1419_v61  ;;  %v1376_v10 = vadd.f32 %v1375_v2, %v1357_v62 }
 0x140   :  { %v1432_v12 = vpack.c.bf16 %v1427_v7, %v1426_v3  ;;  %v1425_v15 = vsel %vm1409_vm5, %v1401_v44, %v1417_v63 }
 0x141   :  { %v1431_v16 = vpack.c.bf16 %v1425_v15, %v1424_v11  ;;  %v1391_v19 = vmul.f32 %v1381_v25, %v1376_v10 }
 0x142   :  { %1436 = vst [vmem:[%s2604_s4 + $0x10] sm:$0xff] %v1432_v12 }
 0x143   :  { %1435 = vst [vmem:[%s2604_s4 + $0x8] sm:$0xff] %v1431_v16  ;;  %v1405_v20 = vadd.f32 %v1395_v33, %v1391_v19 }
 0x145   :  { %vm1413_vm7 = vcmp.gt.f32.partialorder %v1405_v20, 0.0  ;;  %v1421_v57 = vmul.f32 0.2, %v1405_v20 }
 0x147   :  { %v1429_v21 = vsel %vm1413_vm7, %v1405_v20, %v1421_v57 }
 0x148   :  { %v1433_v5 = vpack.c.bf16 %v1429_v21, %v1428_v1 }
 0x14a   :  { %1437 = vst [vmem:[%s2604_s4 + $0x18] sm:$0xff] %v1433_v5 }
 0x14b   :  { %1442 = vsyncpa [#allocation3], 1 }
 0x14c   :  { %1443 = vsyncpa [#allocation5], 1 }

// kernel: mnist_generator_info.8
= control target key start
LH: loop header
LB: loop body
LE: loop exit
PB: predicated region body
PF: predicated region fallthrough
CT: control target
= control target key end

     0   :  { %9 = vsyncpa [#allocation3], 0  ;;  %s2858_s0 = inlined_call_operand.vmem [shape: bf16[128,576], index: 0, kind: input, shape index: {}]   ;;  %s2859_s1 = inlined_call_operand.hbm [shape: bf16[576,256], index: 1, kind: input, shape index: {}]   ;;  %s2860_s2 = inlined_call_operand.hbm [shape: f32[1,256], index: 2, kind: input, shape index: {}]   ;;  %s2861_s3 = inlined_call_operand.hbm [shape: f32[1,256], index: 3, kind: input, shape index: {}]   ;;  %s2862_s4 = inlined_call_operand.vmem [shape: bf16[128,256], index: 4, kind: output, shape index: {}]  }
   0x1   :  { %10 = vsyncpa [#allocation5], 0  ;;  %s31_s17 = sshll.u32 %s2860_s2, 4  ;;  %s2139_s18 = smov [#allocation4]   ;;  %s32_s17 = int_to_ptr.hbm [resolvable:$true] %s31_s17 }
   0x2   :  { %s33_s19 = sshll.u32 %s2139_s18, 4  ;;  %s17_s22 = sshll.u32 %s2859_s1, 4  ;;  %s34_s19 = int_to_ptr.vmem [resolvable:$true] %s33_s19  ;;  %s18_s22 = int_to_ptr.hbm [resolvable:$true] %s17_s22 }
   0x3   :  { %36 = dma.hbm_to_vmem [thread:$0]  %s32_s17, 32, %s34_s19, [#allocation5]  }
   0x4   :  { %s2140_s23 = smov [#allocation2]   ;;  %s2141_s25 = smov 128  }
   0x5   :  { %s19_s24 = sshll.u32 %s2140_s23, 4  ;;  %s2142_s26 = smov 8   ;;  %s20_s24 = int_to_ptr.vmem [resolvable:$true] %s19_s24 }
   0x6   :  { %25 = dma.hbm_to_vmem [thread:$0]  %s18_s22, 9216, %s20_s24, [#allocation3], %s2141_s25, %s2141_s25, %s2142_s26  }
   0x7   :  { %s42_s2 = sshll.u32 %s2861_s3, 4  ;;  %s2143_s29 = smov [#allocation6]   ;;  %s43_s2 = int_to_ptr.hbm [resolvable:$true] %s42_s2 }
   0x8   :  { %s44_s30 = sshll.u32 %s2143_s29, 4  ;;  %s45_s30 = int_to_ptr.vmem [resolvable:$true] %s44_s30 }
   0x9   :  { %47 = dma.hbm_to_vmem [thread:$0]  %s43_s2, 32, %s45_s30, [#allocation5]  }
   0xa   :  { %2135 = dma.done.wait [#allocation3], 9216  }
   0xb   :  { %2136 = vsyncadd [#allocation3], 4294958080 }
   0xc   :  { %2137 = dma.done.wait [#allocation5], 64  }
   0xd   :  { %2138 = vsyncadd [#allocation5], 4294967232  ;;  %v1684_v0 = vld [vmem:[#allocation2 + $0x70] sm:$0xf]  ;;  %v1985_v1 = vld [vmem:[#allocation2 + $0x74] sm:$0xf0] }
   0xe   :  { %v1748_v2 = vld [vmem:[#allocation2 + $0xf0] sm:$0xf]  ;;  %v1685_v3 = vor.u32 %v1985_v1, %v1684_v0  ;;  %v2001_v4 = vld [vmem:[#allocation2 + $0xf4] sm:$0xf0]  ;;  %v1676_v5 = vld [vmem:[#allocation2 + $0x60] sm:$0xf] }
   0xf   :  { %v1983_v6 = vld [vmem:[#allocation2 + $0x64] sm:$0xf0]  ;;  %v1749_v7 = vor.u32 %v2001_v4, %v1748_v2  ;;  %v1740_v8 = vld [vmem:[#allocation2 + $0xe0] sm:$0xf]  ;;  %v1668_v12 = vld [vmem:[#allocation2 + $0x50] sm:$0xf] }
  0x10   :  { %v1999_v9 = vld [vmem:[#allocation2 + $0xe4] sm:$0xf0]  ;;  %2042 = vmatpush.bf16.msra.mxu2 %v1685_v3  ;;  %766 = vmatpush.bf16.msra.mxu0 %v1685_v3  ;;  %v1677_v10 = vor.u32 %v1983_v6, %v1676_v5  ;;  %v1981_v13 = vld [vmem:[#allocation2 + $0x54] sm:$0xf0]  ;;  %v1732_v14 = vld [vmem:[#allocation2 + $0xd0] sm:$0xf] }
  0x11   :  { %2050 = vmatpush.bf16.msra.mxu3 %v1749_v7  ;;  %815 = vmatpush.bf16.msra.mxu1 %v1749_v7  ;;  %v1741_v11 = vor.u32 %v1999_v9, %v1740_v8  ;;  %v1997_v15 = vld [vmem:[#allocation2 + $0xd4] sm:$0xf0]  ;;  %v1669_v16 = vor.u32 %v1981_v13, %v1668_v12  ;;  %v1660_v18 = vld [vmem:[#allocation2 + $0x40] sm:$0xf]  ;;  %v1979_v19 = vld [vmem:[#allocation2 + $0x44] sm:$0xf0] }
  0x12   :  { %v1733_v17 = vor.u32 %v1997_v15, %v1732_v14  ;;  %v1724_v20 = vld [vmem:[#allocation2 + $0xc0] sm:$0xf]  ;;  %v1995_v21 = vld [vmem:[#allocation2 + $0xc4] sm:$0xf0]  ;;  %v1661_v22 = vor.u32 %v1979_v19, %v1660_v18  ;;  %v1652_v24 = vld [vmem:[#allocation2 + $0x30] sm:$0xf] }
  0x13   :  { %v1725_v23 = vor.u32 %v1995_v21, %v1724_v20  ;;  %v1977_v25 = vld [vmem:[#allocation2 + $0x34] sm:$0xf0]  ;;  %v1716_v26 = vld [vmem:[#allocation2 + $0xb0] sm:$0xf]  ;;  %v1644_v30 = vld [vmem:[#allocation2 + $0x20] sm:$0xf] }
  0x14   :  { %2043 = vmatpush.bf16.msra.mxu2 %v1677_v10  ;;  %767 = vmatpush.bf16.msra.mxu0 %v1677_v10  ;;  %v1993_v27 = vld [vmem:[#allocation2 + $0xb4] sm:$0xf0]  ;;  %v1653_v28 = vor.u32 %v1977_v25, %v1652_v24  ;;  %v1975_v31 = vld [vmem:[#allocation2 + $0x24] sm:$0xf0]  ;;  %v1708_v32 = vld [vmem:[#allocation2 + $0xa0] sm:$0xf] }
  0x15   :  { %2051 = vmatpush.bf16.msra.mxu3 %v1741_v11  ;;  %816 = vmatpush.bf16.msra.mxu1 %v1741_v11  ;;  %v1717_v29 = vor.u32 %v1993_v27, %v1716_v26  ;;  %v1991_v33 = vld [vmem:[#allocation2 + $0xa4] sm:$0xf0]  ;;  %v1645_v34 = vor.u32 %v1975_v31, %v1644_v30  ;;  %v1636_v36 = vld [vmem:[#allocation2 + $0x10] sm:$0xf]  ;;  %v1973_v37 = vld [vmem:[#allocation2 + $0x14] sm:$0xf0] }
  0x16   :  { %v1709_v35 = vor.u32 %v1991_v33, %v1708_v32  ;;  %v1700_v38 = vld [vmem:[#allocation2 + $0x90] sm:$0xf]  ;;  %v1989_v39 = vld [vmem:[#allocation2 + $0x94] sm:$0xf0]  ;;  %v1637_v40 = vor.u32 %v1973_v37, %v1636_v36  ;;  %v1628_v41 = vld [vmem:[#allocation2] sm:$0xf] }
  0x17   :  { %v1701_v42 = vor.u32 %v1989_v39, %v1700_v38  ;;  %v1971_v43 = vld [vmem:[#allocation2 + $0x4] sm:$0xf0]  ;;  %v1692_v44 = vld [vmem:[#allocation2 + $0x80] sm:$0xf]  ;;  %v1952_v47 = vld [vmem:[%s2858_s0 + $0xb0] sm:$0xf0] }
  0x18   :  { %2044 = vmatpush.bf16.msra.mxu2 %v1669_v16  ;;  %768 = vmatpush.bf16.msra.mxu0 %v1669_v16  ;;  %v1987_v45 = vld [vmem:[#allocation2 + $0x84] sm:$0xf0]  ;;  %v1548_v46 = vld [vmem:[%s2858_s0 + $0xa0] sm:$0xf]  ;;  %v1812_v48 = vld [vmem:[#allocation2 + $0x170] sm:$0xf]  ;;  %v1629_v54 = vor.u32 %v1971_v43, %v1628_v41 }
  0x19   :  { %2052 = vmatpush.bf16.msra.mxu3 %v1733_v17  ;;  %817 = vmatpush.bf16.msra.mxu1 %v1733_v17  ;;  %v1950_v49 = vld [vmem:[%s2858_s0 + $0xa4] sm:$0xf]  ;;  %v1550_v50 = vld [vmem:[%s2858_s0 + $0xb4] sm:$0xf0]  ;;  %v1876_v52 = vld [vmem:[#allocation2 + $0x1f0] sm:$0xf]  ;;  %v1693_v58 = vor.u32 %v1987_v45, %v1692_v44  ;;  %v2202_v3 = vor.u32 %v1952_v47, %v1548_v46 }
  0x1a   :  { %v2017_v51 = vld [vmem:[#allocation2 + $0x174] sm:$0xf0]  ;;  %v1468_v55 = vld [vmem:[%s2858_s0] sm:$0xf]  ;;  %v1932_v56 = vld [vmem:[%s2858_s0 + $0x10] sm:$0xf0]  ;;  %v2206_v8 = vor.u32 %v1950_v49, %v1550_v50 }
  0x1b   :  { %v2033_v53 = vld [vmem:[#allocation2 + $0x1f4] sm:$0xf0]  ;;  %v1930_v57 = vld [vmem:[%s2858_s0 + $0x4] sm:$0xf]  ;;  %v1804_v60 = vld [vmem:[#allocation2 + $0x160] sm:$0xf]  ;;  %v1813_v62 = vor.u32 %v2017_v51, %v1812_v48  ;;  %v2204_v4 = vor.u32 %v1932_v56, %v1468_v55 }
  0x1c   :  { %2045 = vmatpush.bf16.msra.mxu2 %v1661_v22  ;;  %769 = vmatpush.bf16.msra.mxu0 %v1661_v22  ;;  %v1470_v59 = vld [vmem:[%s2858_s0 + $0x14] sm:$0xf0]  ;;  %v1908_v61 = vld [vmem:[#allocation2 + $0x230] sm:$0xf]  ;;  %v1877_v63 = vor.u32 %v2033_v53, %v1876_v52  ;;  %v1984_v1 = vld [vmem:[#allocation2 + $0x74] sm:$0xf] }
  0x1d   :  { %2053 = vmatpush.bf16.msra.mxu3 %v1725_v23  ;;  %818 = vmatpush.bf16.msra.mxu1 %v1725_v23  ;;  %v2041_v0 = vld [vmem:[#allocation2 + $0x234] sm:$0xf0]  ;;  %v1686_v2 = vld [vmem:[#allocation2 + $0x78] sm:$0xf0]  ;;  %v2015_v5 = vld [vmem:[#allocation2 + $0x164] sm:$0xf0]  ;;  %v2208_v9 = vor.u32 %v1930_v57, %v1470_v59 }
  0x1e   :  { %v1868_v6 = vld [vmem:[#allocation2 + $0x1e0] sm:$0xf]  ;;  %v2031_v7 = vld [vmem:[#allocation2 + $0x1e4] sm:$0xf0]  ;;  %v1909_v10 = vor.u32 %v2041_v0, %v1908_v61  ;;  %v1689_v11 = vor.u32 %v1984_v1, %v1686_v2  ;;  %v1796_v12 = vld [vmem:[#allocation2 + $0x150] sm:$0xf]  ;;  %v1805_v14 = vor.u32 %v2015_v5, %v1804_v60 }
  0x1f   :  { %v1982_v13 = vld [vmem:[#allocation2 + $0x64] sm:$0xf]  ;;  %v1869_v15 = vor.u32 %v2031_v7, %v1868_v6  ;;  %v1678_v16 = vld [vmem:[#allocation2 + $0x68] sm:$0xf0]  ;;  %v1900_v17 = vld [vmem:[#allocation2 + $0x220] sm:$0xf] }
  0x20   :  { %2046 = vmatpush.bf16.msra.mxu2 %v1653_v28  ;;  %770 = vmatpush.bf16.msra.mxu0 %v1653_v28  ;;  %v2039_v18 = vld [vmem:[#allocation2 + $0x224] sm:$0xf0]  ;;  %v2013_v19 = vld [vmem:[#allocation2 + $0x154] sm:$0xf0]  ;;  %v1860_v20 = vld [vmem:[#allocation2 + $0x1d0] sm:$0xf]  ;;  %v1681_v22 = vor.u32 %v1982_v13, %v1678_v16 }
  0x21   :  { %2054 = vmatpush.bf16.msra.mxu3 %v1717_v29  ;;  %819 = vmatpush.bf16.msra.mxu1 %v1717_v29  ;;  %v2029_v21 = vld [vmem:[#allocation2 + $0x1d4] sm:$0xf0]  ;;  %v1788_v23 = vld [vmem:[#allocation2 + $0x140] sm:$0xf]  ;;  %v1901_v24 = vor.u32 %v2039_v18, %v1900_v17  ;;  %v1797_v25 = vor.u32 %v2013_v19, %v1796_v12  ;;  %v2011_v27 = vld [vmem:[#allocation2 + $0x144] sm:$0xf0] }
  0x22   :  { %v1861_v26 = vor.u32 %v2029_v21, %v1860_v20  ;;  %v1980_v28 = vld [vmem:[#allocation2 + $0x54] sm:$0xf]  ;;  %v1670_v29 = vld [vmem:[#allocation2 + $0x58] sm:$0xf0]  ;;  %v1852_v30 = vld [vmem:[#allocation2 + $0x1c0] sm:$0xf]  ;;  %v1789_v38 = vor.u32 %v2011_v27, %v1788_v23 }
  0x23   :  { %v2027_v31 = vld [vmem:[#allocation2 + $0x1c4] sm:$0xf0]  ;;  %v1892_v32 = vld [vmem:[#allocation2 + $0x210] sm:$0xf]  ;;  %v2037_v33 = vld [vmem:[#allocation2 + $0x214] sm:$0xf0] }
  0x24   :  { %2047 = vmatpush.bf16.msra.mxu2 %v1645_v34  ;;  %771 = vmatpush.bf16.msra.mxu0 %v1645_v34  ;;  %v1673_v34 = vor.u32 %v1980_v28, %v1670_v29  ;;  %v1568_v36 = vld [vmem:[%s2858_s0 + $0xc8] sm:$0xf]  ;;  %v1957_v37 = vld [vmem:[%s2858_s0 + $0xd8] sm:$0xf0]  ;;  %v1853_v39 = vor.u32 %v2027_v31, %v1852_v30  ;;  %v1978_v41 = vld [vmem:[#allocation2 + $0x44] sm:$0xf] }
  0x25   :  { %2055 = vmatpush.bf16.msra.mxu3 %v1709_v35  ;;  %820 = vmatpush.bf16.msra.mxu1 %v1709_v35  ;;  %v1893_v35 = vor.u32 %v2037_v33, %v1892_v32  ;;  %v2009_v43 = vld [vmem:[#allocation2 + $0x134] sm:$0xf0]  ;;  %v1844_v44 = vld [vmem:[#allocation2 + $0x1b0] sm:$0xf]  ;;  %v1955_v46 = vld [vmem:[%s2858_s0 + $0xcc] sm:$0xf] }
  0x26   :  { %v2025_v45 = vld [vmem:[#allocation2 + $0x1b4] sm:$0xf0]  ;;  %v1488_v47 = vld [vmem:[%s2858_s0 + $0x28] sm:$0xf]  ;;  %v1937_v48 = vld [vmem:[%s2858_s0 + $0x38] sm:$0xf0] }
  0x27   :  { %v1570_v49 = vld [vmem:[%s2858_s0 + $0xdc] sm:$0xf0]  ;;  %v1935_v50 = vld [vmem:[%s2858_s0 + $0x2c] sm:$0xf]  ;;  %v1976_v56 = vld [vmem:[#allocation2 + $0x34] sm:$0xf]  ;;  %v2240_v59 = vor.u32 %v1937_v48, %v1488_v47 }
  0x28   :  { %2048 = vmatpush.bf16.msra.mxu2 %v1637_v40  ;;  %772 = vmatpush.bf16.msra.mxu0 %v1637_v40  ;;  %v1780_v40 = vld [vmem:[#allocation2 + $0x130] sm:$0xf]  ;;  %v1490_v51 = vld [vmem:[%s2858_s0 + $0x3c] sm:$0xf0]  ;;  %v1654_v57 = vld [vmem:[#allocation2 + $0x38] sm:$0xf0] }
  0x29   :  { %2056 = vmatpush.bf16.msra.mxu3 %v1701_v42  ;;  %821 = vmatpush.bf16.msra.mxu1 %v1701_v42  ;;  %v1662_v42 = vld [vmem:[#allocation2 + $0x48] sm:$0xf0]  ;;  %v1781_v53 = vor.u32 %v2009_v43, %v1780_v40  ;;  %v1772_v55 = vld [vmem:[#allocation2 + $0x120] sm:$0xf]  ;;  %v2007_v60 = vld [vmem:[#allocation2 + $0x124] sm:$0xf0]  ;;  %v2244_v0 = vor.u32 %v1935_v50, %v1490_v51  ;;  %v1657_v1 = vor.u32 %v1976_v56, %v1654_v57 }
  0x2a   :  { %v1665_v52 = vor.u32 %v1978_v41, %v1662_v42  ;;  %v1836_v61 = vld [vmem:[#allocation2 + $0x1a0] sm:$0xf]  ;;  %v1773_v2 = vor.u32 %v2007_v60, %v1772_v55  ;;  %v1764_v6 = vld [vmem:[#allocation2 + $0x110] sm:$0xf]  ;;  %v2005_v7 = vld [vmem:[#allocation2 + $0x114] sm:$0xf0] }
  0x2b   :  { %v1974_v12 = vld [vmem:[#allocation2 + $0x24] sm:$0xf]  ;;  %v1765_v13 = vor.u32 %v2005_v7, %v1764_v6  ;;  %v1756_v16 = vld [vmem:[#allocation2 + $0x100] sm:$0xf]  ;;  %v2003_v17 = vld [vmem:[#allocation2 + $0x104] sm:$0xf0] }
  0x2c   :  { %2049 = vmatpush.bf16.msra.mxu2 %v1629_v54  ;;  %773 = vmatpush.bf16.msra.mxu0 %v1629_v54  ;;  %v1845_v54 = vor.u32 %v2025_v45, %v1844_v44  ;;  %v1820_v19 = vld [vmem:[#allocation2 + $0x180] sm:$0xf]  ;;  %v2019_v20 = vld [vmem:[#allocation2 + $0x184] sm:$0xf0]  ;;  %v1972_v23 = vld [vmem:[#allocation2 + $0x14] sm:$0xf]  ;;  %v1757_v27 = vor.u32 %v2003_v17, %v1756_v16 }
  0x2d   :  { %2057 = vmatpush.bf16.msra.mxu3 %v1693_v58  ;;  %822 = vmatpush.bf16.msra.mxu1 %v1693_v58  ;;  %v2238_v58 = vor.u32 %v1957_v37, %v1568_v36  ;;  %v1884_v21 = vld [vmem:[#allocation2 + $0x200] sm:$0xf]  ;;  %v1821_v28 = vor.u32 %v2019_v20, %v1820_v19  ;;  %v1588_v29 = vld [vmem:[%s2858_s0 + $0xf0] sm:$0xf]  ;;  %v1962_v30 = vld [vmem:[%s2858_s0 + $0x100] sm:$0xf0] }
  0x2e   :  { %v1960_v31 = vld [vmem:[%s2858_s0 + $0xf4] sm:$0xf]  ;;  %v1508_v32 = vld [vmem:[%s2858_s0 + $0x50] sm:$0xf]  ;;  %v1942_v33 = vld [vmem:[%s2858_s0 + $0x60] sm:$0xf0]  ;;  %v2274_v37 = vor.u32 %v1962_v30, %v1588_v29 }
  0x2f   :  { %794 = vmatmul.bf16.vlgmr.msra.gmra.mxu2 %v2202_v3  ;;  %774 = vmatmul.bf16.vlgmr.msra.gmra.mxu0 %v2204_v4  ;;  %v1510_v36 = vld [vmem:[%s2858_s0 + $0x64] sm:$0xf0]  ;;  %v1970_v41 = vld [vmem:[#allocation2 + $0x4] sm:$0xf]  ;;  %v1630_v42 = vld [vmem:[#allocation2 + $0x8] sm:$0xf0] }
  0x30   :  { %864 = vmatpush.bf16.msrb.mxu2 %v1813_v62  ;;  %843 = vmatmul.bf16.vlgmr.msra.gmra.mxu3 %v2206_v8  ;;  %v2023_v62 = vld [vmem:[#allocation2 + $0x1a4] sm:$0xf0]  ;;  %v1633_v43 = vor.u32 %v1970_v41, %v1630_v42  ;;  %v2000_v44 = vld [vmem:[#allocation2 + $0xf4] sm:$0xf]  ;;  %v1750_v45 = vld [vmem:[#allocation2 + $0xf8] sm:$0xf0] }
  0x31   :  { %913 = vmatpush.bf16.msrb.mxu3 %v1877_v63  ;;  %823 = vmatmul.bf16.vlgmr.msra.gmra.mxu1 %v2208_v9  ;;  %v2242_v63 = vor.u32 %v1955_v46, %v1570_v49  ;;  %v1837_v5 = vor.u32 %v2023_v62, %v1836_v61  ;;  %v1753_v46 = vor.u32 %v2000_v44, %v1750_v45  ;;  %v2016_v47 = vld [vmem:[#allocation2 + $0x174] sm:$0xf]  ;;  %v1814_v48 = vld [vmem:[#allocation2 + $0x178] sm:$0xf0]  ;;  %v1608_v56 = vld [vmem:[%s2858_s0 + $0x118] sm:$0xf] }
  0x32   :  { %966 = vmatpush.bf16.msrb.mxu0 %v1909_v10  ;;  %1011 = vmatpush.bf16.msrb.mxu1 %v1689_v11  ;;  %v1828_v10 = vld [vmem:[#allocation2 + $0x190] sm:$0xf]  ;;  %v2021_v11 = vld [vmem:[#allocation2 + $0x194] sm:$0xf0]  ;;  %v2032_v49 = vld [vmem:[#allocation2 + $0x1f4] sm:$0xf]  ;;  %v1817_v50 = vor.u32 %v2016_v47, %v1814_v48 }
  0x33   :  { %v1878_v51 = vld [vmem:[#allocation2 + $0x1f8] sm:$0xf0]  ;;  %v1967_v57 = vld [vmem:[%s2858_s0 + $0x128] sm:$0xf0]  ;;  %v1528_v61 = vld [vmem:[%s2858_s0 + $0x78] sm:$0xf] }
  0x34   :  { %865 = vmatpush.bf16.msrb.mxu2 %v1805_v14  ;;  %v1829_v14 = vor.u32 %v2021_v11, %v1828_v10  ;;  %v1965_v60 = vld [vmem:[%s2858_s0 + $0x11c] sm:$0xf]  ;;  %v1947_v62 = vld [vmem:[%s2858_s0 + $0x88] sm:$0xf0]  ;;  %v2310_v6 = vor.u32 %v1967_v57, %v1608_v56  ;;  %v2030_v17 = vld [vmem:[#allocation2 + $0x1e4] sm:$0xf] }
  0x35   :  { %914 = vmatpush.bf16.msrb.mxu3 %v1869_v15  ;;  %v1646_v15 = vld [vmem:[#allocation2 + $0x28] sm:$0xf0]  ;;  %v2312_v7 = vor.u32 %v1947_v62, %v1528_v61  ;;  %vm741_vm0 = vcmask 523264   ;;  %v1996_v30 = vld [vmem:[#allocation2 + $0xd4] sm:$0xf] }
  0x36   :  { %1012 = vmatpush.bf16.msrb.mxu1 %v1681_v22  ;;  %967 = vmatpush.bf16.msrb.mxu0 %v1901_v24  ;;  %v1649_v18 = vor.u32 %v1974_v12, %v1646_v15  ;;  %v2035_v22 = vld [vmem:[#allocation2 + $0x204] sm:$0xf0]  ;;  %v1638_v24 = vld [vmem:[#allocation2 + $0x18] sm:$0xf0]  ;;  %v1998_v12 = vld [vmem:[#allocation2 + $0xe4] sm:$0xf] }
  0x37   :  { %v1806_v16 = vld [vmem:[#allocation2 + $0x168] sm:$0xf0]  ;;  %v1504_v47 = vld [vmem:[%s2858_s0 + $0x38] sm:$0xf]  ;;  %v2010_v56 = vld [vmem:[#allocation2 + $0x144] sm:$0xf] }
  0x38   :  { %866 = vmatpush.bf16.msrb.mxu2 %v1797_v25  ;;  %v1885_v25 = vor.u32 %v2035_v22, %v1884_v21  ;;  %v1476_v21 = vld [vmem:[%s2858_s0 + $0x8] sm:$0xf]  ;;  %v1933_v22 = vld [vmem:[%s2858_s0 + $0x18] sm:$0xf0]  ;;  %v1902_v44 = vld [vmem:[#allocation2 + $0x228] sm:$0xf0] }
  0x39   :  { %915 = vmatpush.bf16.msrb.mxu3 %v1861_v26  ;;  %v1641_v26 = vor.u32 %v1972_v23, %v1638_v24  ;;  %v1484_v23 = vld [vmem:[%s2858_s0 + $0x10] sm:$0xf]  ;;  %v1934_v24 = vld [vmem:[%s2858_s0 + $0x20] sm:$0xf0]  ;;  %v1939_v48 = vld [vmem:[%s2858_s0 + $0x48] sm:$0xf0] }
  0x3a   :  { %1013 = vmatpush.bf16.msrb.mxu1 %v1673_v34  ;;  %968 = vmatpush.bf16.msrb.mxu0 %v1893_v35  ;;  %v1590_v34 = vld [vmem:[%s2858_s0 + $0x104] sm:$0xf0]  ;;  %v1940_v35 = vld [vmem:[%s2858_s0 + $0x54] sm:$0xf]  ;;  %v2026_v61 = vld [vmem:[#allocation2 + $0x1c4] sm:$0xf] }
  0x3b   :  { %v2280_v40 = vor.u32 %v1940_v35, %v1510_v36  ;;  %v2028_v35 = vld [vmem:[#allocation2 + $0x1d4] sm:$0xf]  ;;  %v1862_v36 = vld [vmem:[#allocation2 + $0x1d8] sm:$0xf0]  ;;  %v1854_v62 = vld [vmem:[#allocation2 + $0x1c8] sm:$0xf0] }
  0x3c   :  { %867 = vmatpush.bf16.msrb.mxu2 %v1789_v38  ;;  %v2276_v38 = vor.u32 %v1942_v33, %v1508_v32  ;;  %v2012_v32 = vld [vmem:[#allocation2 + $0x154] sm:$0xf]  ;;  %v1865_v42 = vor.u32 %v2028_v35, %v1862_v36  ;;  %v1538_v35 = vld [vmem:[%s2858_s0 + $0x94] sm:$0xf0] }
  0x3d   :  { %916 = vmatpush.bf16.msrb.mxu3 %v1853_v39  ;;  %v2278_v39 = vor.u32 %v1960_v31, %v1590_v34  ;;  %v1734_v31 = vld [vmem:[#allocation2 + $0xd8] sm:$0xf0] }
  0x3e   :  { %1014 = vmatpush.bf16.msrb.mxu1 %v1665_v52  ;;  %969 = vmatpush.bf16.msrb.mxu0 %v1885_v25  ;;  %v2040_v52 = vld [vmem:[#allocation2 + $0x234] sm:$0xf]  ;;  %v1931_v25 = vld [vmem:[%s2858_s0 + $0xc] sm:$0xf]  ;;  %v1737_v33 = vor.u32 %v1996_v30, %v1734_v31  ;;  %v1798_v34 = vld [vmem:[#allocation2 + $0x158] sm:$0xf0] }
  0x3f   :  { %799 = vmatmul.bf16.gmra.mxu2 %v2238_v58  ;;  %779 = vmatmul.bf16.gmra.mxu0 %v2240_v59  ;;  %v1801_v41 = vor.u32 %v2012_v32, %v1798_v34  ;;  %v1536_v30 = vld [vmem:[%s2858_s0 + $0x80] sm:$0xf]  ;;  %v1948_v32 = vld [vmem:[%s2858_s0 + $0x90] sm:$0xf0]  ;;  %v1946_v34 = vld [vmem:[%s2858_s0 + $0x84] sm:$0xf] }
  0x40   :  { %868 = vmatpush.bf16.msrb.mxu2 %v1781_v53  ;;  %848 = vmatmul.bf16.gmra.mxu3 %v2242_v63  ;;  %v1910_v53 = vld [vmem:[#allocation2 + $0x238] sm:$0xf0]  ;;  %v2427_v36 = vor.u32 %v1948_v32, %v1536_v30 }
  0x41   :  { %917 = vmatpush.bf16.msrb.mxu3 %v1845_v54  ;;  %828 = vmatmul.bf16.gmra.mxu1 %v2244_v0  ;;  %v1881_v54 = vor.u32 %v2032_v49, %v1878_v51  ;;  %v1913_v55 = vor.u32 %v2040_v52, %v1910_v53  ;;  %v1936_v49 = vld [vmem:[%s2858_s0 + $0x34] sm:$0xf]  ;;  %v2371_v52 = vor.u32 %v1939_v48, %v1504_v47  ;;  %v2006_v47 = vld [vmem:[#allocation2 + $0x124] sm:$0xf] }
  0x42   :  { %1015 = vmatpush.bf16.msrb.mxu1 %v1657_v1  ;;  %v1610_v1 = vld [vmem:[%s2858_s0 + $0x12c] sm:$0xf0] }
  0x43   :  { %1158 = vmatpush.bf16.msra.mxu0 %v1881_v54  ;;  %v2314_v10 = vor.u32 %v1965_v60, %v1610_v1  ;;  %v1994_v54 = vld [vmem:[#allocation2 + $0xc4] sm:$0xf]  ;;  %v1790_v60 = vld [vmem:[#allocation2 + $0x148] sm:$0xf0] }
  0x44   :  { %869 = vmatpush.bf16.msrb.mxu2 %v1773_v2  ;;  %v1945_v2 = vld [vmem:[%s2858_s0 + $0x7c] sm:$0xf]  ;;  %v1793_v1 = vor.u32 %v2010_v56, %v1790_v60  ;;  %v1556_v56 = vld [vmem:[%s2858_s0 + $0xa8] sm:$0xf]  ;;  %v1564_v60 = vld [vmem:[%s2858_s0 + $0xb0] sm:$0xf] }
  0x45   :  { %918 = vmatpush.bf16.msrb.mxu3 %v1837_v5  ;;  %v1530_v5 = vld [vmem:[%s2858_s0 + $0x8c] sm:$0xf0] }
  0x46   :  { %1016 = vmatpush.bf16.msrb.mxu1 %v1649_v18  ;;  %v2316_v11 = vor.u32 %v1945_v2, %v1530_v5  ;;  %v1870_v18 = vld [vmem:[#allocation2 + $0x1e8] sm:$0xf0]  ;;  %v1857_v2 = vor.u32 %v2026_v61, %v1854_v62  ;;  %v1516_v5 = vld [vmem:[%s2858_s0 + $0x58] sm:$0xf]  ;;  %v1954_v61 = vld [vmem:[%s2858_s0 + $0xc0] sm:$0xf0] }
  0x47   :  { %v1873_v20 = vor.u32 %v2030_v17, %v1870_v18  ;;  %v1951_v62 = vld [vmem:[%s2858_s0 + $0xac] sm:$0xf] }
  0x48   :  { %870 = vmatpush.bf16.msrb.mxu2 %v1765_v13  ;;  %v1742_v13 = vld [vmem:[#allocation2 + $0xe8] sm:$0xf0] }
  0x49   :  { %919 = vmatpush.bf16.msrb.mxu3 %v1829_v14  ;;  %v2014_v14 = vld [vmem:[#allocation2 + $0x164] sm:$0xf]  ;;  %v1745_v15 = vor.u32 %v1998_v12, %v1742_v13  ;;  %1159 = vmatpush.bf16.msra.mxu0 %v1873_v20  ;;  %v1524_v12 = vld [vmem:[%s2858_s0 + $0x60] sm:$0xf]  ;;  %v1944_v13 = vld [vmem:[%s2858_s0 + $0x70] sm:$0xf0] }
  0x4a   :  { %1017 = vmatpush.bf16.msrb.mxu1 %v1641_v26  ;;  %v1809_v19 = vor.u32 %v2014_v14, %v1806_v16  ;;  %v1478_v26 = vld [vmem:[%s2858_s0 + $0x1c] sm:$0xf0]  ;;  %v1941_v14 = vld [vmem:[%s2858_s0 + $0x5c] sm:$0xf]  ;;  %v2400_v17 = vor.u32 %v1944_v13, %v1524_v12 }
  0x4b   :  { %v2344_v29 = vor.u32 %v1931_v25, %v1478_v26  ;;  %v1718_v20 = vld [vmem:[#allocation2 + $0xb8] sm:$0xf0]  ;;  %v2024_v25 = vld [vmem:[#allocation2 + $0x1b4] sm:$0xf] }
  0x4c   :  { %871 = vmatpush.bf16.msrb.mxu2 %v1757_v27  ;;  %v2340_v27 = vor.u32 %v1933_v22, %v1476_v21  ;;  %v2008_v21 = vld [vmem:[#allocation2 + $0x134] sm:$0xf]  ;;  %v1846_v26 = vld [vmem:[#allocation2 + $0x1b8] sm:$0xf0] }
  0x4d   :  { %920 = vmatpush.bf16.msrb.mxu3 %v1821_v28  ;;  %v2342_v28 = vor.u32 %v1934_v24, %v1484_v23  ;;  %1160 = vmatpush.bf16.msra.mxu0 %v1865_v42  ;;  %v1782_v23 = vld [vmem:[#allocation2 + $0x138] sm:$0xf0]  ;;  %v1849_v31 = vor.u32 %v2024_v25, %v1846_v26  ;;  %v2431_v42 = vor.u32 %v1946_v34, %v1538_v35  ;;  %v1958_v35 = vld [vmem:[%s2858_s0 + $0xe0] sm:$0xf0] }
  0x4e   :  { %1018 = vmatpush.bf16.msrb.mxu1 %v1633_v43  ;;  %v2038_v43 = vld [vmem:[#allocation2 + $0x224] sm:$0xf]  ;;  %v1785_v24 = vor.u32 %v2008_v21, %v1782_v23 }
  0x4f   :  { %804 = vmatmul.bf16.gmra.mxu2 %v2274_v37  ;;  %784 = vmatmul.bf16.gmra.mxu0 %v2276_v38  ;;  %v1905_v45 = vor.u32 %v2038_v43, %v1902_v44  ;;  %v2036_v43 = vld [vmem:[#allocation2 + $0x214] sm:$0xf]  ;;  %v1894_v44 = vld [vmem:[#allocation2 + $0x218] sm:$0xf0] }
  0x50   :  { %853 = vmatmul.bf16.gmra.mxu3 %v2278_v39  ;;  %1060 = vmatpush.bf16.msra.mxu2 %v1753_v46  ;;  %v1938_v46 = vld [vmem:[%s2858_s0 + $0x40] sm:$0xf0] }
  0x51   :  { %833 = vmatmul.bf16.gmra.mxu1 %v2280_v40  ;;  %1109 = vmatpush.bf16.msra.mxu3 %v1817_v50  ;;  %v1498_v50 = vld [vmem:[%s2858_s0 + $0x44] sm:$0xf0] }
  0x52   :  { %1211 = vmatpush.bf16.msra.mxu1 %v1913_v55  ;;  %v2373_v53 = vor.u32 %v1936_v49, %v1498_v50  ;;  %v1726_v55 = vld [vmem:[#allocation2 + $0xc8] sm:$0xf0]  ;;  %1161 = vmatpush.bf16.msra.mxu0 %v1857_v2 }
  0x53   :  { %v1729_v57 = vor.u32 %v1994_v54, %v1726_v55  ;;  %v1774_v49 = vld [vmem:[#allocation2 + $0x128] sm:$0xf0]  ;;  %v2022_v54 = vld [vmem:[#allocation2 + $0x1a4] sm:$0xf] }
  0x54   :  { %1061 = vmatpush.bf16.msra.mxu2 %v1745_v15  ;;  %v1518_v15 = vld [vmem:[%s2858_s0 + $0x6c] sm:$0xf0]  ;;  %v1777_v50 = vor.u32 %v2006_v47, %v1774_v49  ;;  %v1838_v55 = vld [vmem:[#allocation2 + $0x1a8] sm:$0xf0] }
  0x55   :  { %1110 = vmatpush.bf16.msra.mxu3 %v1809_v19  ;;  %v2402_v18 = vor.u32 %v1941_v14, %v1518_v15  ;;  %v1992_v19 = vld [vmem:[#allocation2 + $0xb4] sm:$0xf] }
  0x56   :  { %1212 = vmatpush.bf16.msra.mxu1 %v1905_v45  ;;  %v1721_v22 = vor.u32 %v1992_v19, %v1718_v20  ;;  %1162 = vmatpush.bf16.msra.mxu0 %v1849_v31  ;;  %v1897_v45 = vor.u32 %v2036_v43, %v1894_v44  ;;  %v1988_v15 = vld [vmem:[#allocation2 + $0x94] sm:$0xf]  ;;  %v1702_v19 = vld [vmem:[#allocation2 + $0x98] sm:$0xf0]  ;;  %v1584_v43 = vld [vmem:[%s2858_s0 + $0xd8] sm:$0xf] }
  0x57   :  { %v2004_v20 = vld [vmem:[#allocation2 + $0x114] sm:$0xf]  ;;  %v1705_v21 = vor.u32 %v1988_v15, %v1702_v19  ;;  %v1959_v44 = vld [vmem:[%s2858_s0 + $0xe8] sm:$0xf0] }
  0x58   :  { %1062 = vmatpush.bf16.msra.mxu2 %v1737_v33  ;;  %v1949_v33 = vld [vmem:[%s2858_s0 + $0x98] sm:$0xf0]  ;;  %v2493_v49 = vor.u32 %v1959_v44, %v1584_v43  ;;  %v1758_v15 = vld [vmem:[#allocation2 + $0x108] sm:$0xf0]  ;;  %v1598_v43 = vld [vmem:[%s2858_s0 + $0x10c] sm:$0xf0] }
  0x59   :  { %1111 = vmatpush.bf16.msra.mxu3 %v1801_v41 }
  0x5a   :  { %1213 = vmatpush.bf16.msra.mxu1 %v1897_v45  ;;  %v1956_v45 = vld [vmem:[%s2858_s0 + $0xd4] sm:$0xf] }
  0x5c   :  { %1063 = vmatpush.bf16.msra.mxu2 %v1729_v57  ;;  %v1841_v57 = vor.u32 %v2022_v54, %v1838_v55 }
  0x5d   :  { %1112 = vmatpush.bf16.msra.mxu3 %v1793_v1  ;;  %v1558_v1 = vld [vmem:[%s2858_s0 + $0xbc] sm:$0xf0] }
  0x5e   :  { %1163 = vmatpush.bf16.msra.mxu0 %v1841_v57  ;;  %v2460_v12 = vor.u32 %v1951_v62, %v1558_v1  ;;  %v1886_v57 = vld [vmem:[#allocation2 + $0x208] sm:$0xf0]  ;;  %v1986_v62 = vld [vmem:[#allocation2 + $0x84] sm:$0xf] }
  0x5f   :  { %809 = vmatmul.bf16.gmra.mxu2 %v2310_v6  ;;  %789 = vmatmul.bf16.gmra.mxu0 %v2312_v7  ;;  %v1694_v1 = vld [vmem:[#allocation2 + $0x88] sm:$0xf0] }
  0x60   :  { %858 = vmatmul.bf16.gmra.mxu3 %v2314_v10  ;;  %1064 = vmatpush.bf16.msra.mxu2 %v1721_v22  ;;  %v1766_v22 = vld [vmem:[#allocation2 + $0x118] sm:$0xf0] }
  0x61   :  { %838 = vmatmul.bf16.gmra.mxu1 %v2316_v11  ;;  %1113 = vmatpush.bf16.msra.mxu3 %v1785_v24  ;;  %v1769_v24 = vor.u32 %v2004_v20, %v1766_v22 }
  0x65   :  { %1114 = vmatpush.bf16.msra.mxu3 %v1777_v50 }
  0x69   :  { %1115 = vmatpush.bf16.msra.mxu3 %v1769_v24 }
  0x6f   :  { %872 = vmatmul.bf16.vlgmr.msrb.gmra.mxu2 %v2340_v27  ;;  %1914 = vmatmul.msk.bf16.vlgmr.msrb.gmra.mxu0 %vm741_vm0, %v2342_v28 }
  0x70   :  { %921 = vmatmul.bf16.vlgmr.msrb.gmra.mxu3 %v2344_v29 }
  0x71   :  { %1019 = vmatmul.bf16.vlgmr.msrb.gmra.mxu1 %v2204_v4  ;;  %v1496_v4 = vld [vmem:[%s2858_s0 + $0x30] sm:$0xf] }
  0x72   :  { %v2369_v51 = vor.u32 %v1938_v46, %v1496_v4  ;;  %v1990_v4 = vld [vmem:[#allocation2 + $0xa4] sm:$0xf]  ;;  %v1710_v46 = vld [vmem:[#allocation2 + $0xa8] sm:$0xf0] }
  0x73   :  { %v1713_v48 = vor.u32 %v1990_v4, %v1710_v46  ;;  %v1578_v4 = vld [vmem:[%s2858_s0 + $0xe4] sm:$0xf0] }
  0x74   :  { %v2497_v55 = vor.u32 %v1956_v45, %v1578_v4 }
  0x75   :  { %1065 = vmatpush.bf16.msra.mxu2 %v1713_v48 }
  0x79   :  { %1066 = vmatpush.bf16.msra.mxu2 %v1705_v21 }
  0x7f   :  { %877 = vmatmul.bf16.gmra.mxu2 %v2369_v51  ;;  %1915 = vmatmul.msk.bf16.gmra.mxu0 %vm741_vm0, %v2371_v52 }
  0x80   :  { %926 = vmatmul.bf16.gmra.mxu3 %v2373_v53 }
  0x81   :  { %1024 = vmatmul.bf16.gmra.mxu1 %v2240_v59  ;;  %v1943_v59 = vld [vmem:[%s2858_s0 + $0x68] sm:$0xf0] }
  0x82   :  { %v2398_v16 = vor.u32 %v1943_v59, %v1516_v5  ;;  %v2458_v5 = vor.u32 %v1954_v61, %v1564_v60 }
  0x8f   :  { %882 = vmatmul.bf16.gmra.mxu2 %v2398_v16  ;;  %1916 = vmatmul.msk.bf16.gmra.mxu0 %vm741_vm0, %v2400_v17 }
  0x90   :  { %931 = vmatmul.bf16.gmra.mxu3 %v2402_v18 }
  0x91   :  { %1029 = vmatmul.bf16.gmra.mxu1 %v2276_v38  ;;  %v1544_v38 = vld [vmem:[%s2858_s0 + $0x88] sm:$0xf] }
  0x92   :  { %v2429_v41 = vor.u32 %v1949_v33, %v1544_v38  ;;  %v2020_v38 = vld [vmem:[#allocation2 + $0x194] sm:$0xf]  ;;  %v1830_v33 = vld [vmem:[#allocation2 + $0x198] sm:$0xf0] }
  0x93   :  { %v1833_v34 = vor.u32 %v2020_v38, %v1830_v33  ;;  %v1963_v33 = vld [vmem:[%s2858_s0 + $0x108] sm:$0xf0] }
  0x95   :  { %1164 = vmatpush.bf16.msra.mxu0 %v1833_v34  ;;  %v1964_v34 = vld [vmem:[%s2858_s0 + $0x110] sm:$0xf0] }
  0x9f   :  { %887 = vmatmul.bf16.gmra.mxu2 %v2427_v36  ;;  %1917 = vmatmul.msk.bf16.gmra.mxu0 %vm741_vm0, %v2429_v41 }
  0xa0   :  { %936 = vmatmul.bf16.gmra.mxu3 %v2431_v42 }
  0xa1   :  { %1034 = vmatmul.bf16.gmra.mxu1 %v2312_v7  ;;  %v1953_v7 = vld [vmem:[%s2858_s0 + $0xb8] sm:$0xf0] }
  0xa2   :  { %v2456_v2 = vor.u32 %v1953_v7, %v1556_v56  ;;  %v2034_v56 = vld [vmem:[#allocation2 + $0x204] sm:$0xf] }
  0xa3   :  { %v1889_v60 = vor.u32 %v2034_v56, %v1886_v57 }
  0xa5   :  { %1214 = vmatpush.bf16.msra.mxu1 %v1889_v60 }
  0xac   :  { %v775_v59 = vpop.f32.mrf.mxu0 }
  0xae   :  { %v824_v13 = vpop.f32.mrf.mxu1 }
  0xaf   :  { %v2462_v14 = vadd.f32 %v824_v13, %v775_v59  ;;  %892 = vmatmul.bf16.gmra.mxu2 %v2456_v2  ;;  %1918 = vmatmul.msk.bf16.gmra.mxu0 %vm741_vm0, %v2458_v5  ;;  %v2002_v59 = vld [vmem:[#allocation2 + $0x104] sm:$0xf]  ;;  %v1697_v13 = vor.u32 %v1986_v62, %v1694_v1 }
  0xb0   :  { %941 = vmatmul.bf16.gmra.mxu3 %v2460_v12  ;;  %v1761_v20 = vor.u32 %v2002_v59, %v1758_v15 }
  0xb1   :  { %1039 = vmatmul.bf16.gmra.mxu1 %v2202_v3  ;;  %v1576_v3 = vld [vmem:[%s2858_s0 + $0xd0] sm:$0xf]  ;;  %1067 = vmatpush.bf16.msra.mxu2 %v1697_v13 }
  0xb2   :  { %v795_v23 = vpop.f32.mrf.mxu2  ;;  %v2491_v48 = vor.u32 %v1958_v35, %v1576_v3  ;;  %1116 = vmatpush.bf16.msra.mxu3 %v1761_v20  ;;  %v1604_v3 = vld [vmem:[%s2858_s0 + $0x100] sm:$0xf]  ;;  %v1961_v35 = vld [vmem:[%s2858_s0 + $0xfc] sm:$0xf]  ;;  %v1968_v20 = vld [vmem:[%s2858_s0 + $0x130] sm:$0xf0] }
  0xb3   :  { %v844_v25 = vpop.f32.mrf.mxu3  ;;  %v2534_v56 = vor.u32 %v1961_v35, %v1598_v43 }
  0xb4   :  { %v2469_v26 = vadd.f32 %v844_v25, %v795_v23  ;;  %v777_v30 = vpop.f32.mrf.mxu0 }
  0xb6   :  { %v826_v31 = vpop.f32.mrf.mxu1 }
  0xb7   :  { %v2471_v32 = vadd.f32 %v826_v31, %v777_v30  ;;  %v2018_v30 = vld [vmem:[#allocation2 + $0x184] sm:$0xf]  ;;  %v1822_v31 = vld [vmem:[#allocation2 + $0x188] sm:$0xf0] }
  0xb8   :  { %v1825_v38 = vor.u32 %v2018_v30, %v1822_v31 }
  0xba   :  { %v797_v46 = vpop.f32.mrf.mxu2  ;;  %1165 = vmatpush.bf16.msra.mxu0 %v1825_v38 }
  0xbb   :  { %v846_v47 = vpop.f32.mrf.mxu3 }
  0xbc   :  { %v2495_v50 = vadd.f32 %v846_v47, %v797_v46  ;;  %v780_v54 = vpop.f32.mrf.mxu0  ;;  %v2530_v46 = vor.u32 %v1964_v34, %v1604_v3 }
  0xbe   :  { %v829_v7 = vpop.f32.mrf.mxu1 }
  0xbf   :  { %v2499_v61 = vadd.f32 %v829_v7, %v780_v54  ;;  %897 = vmatmul.bf16.gmra.mxu2 %v2491_v48  ;;  %1919 = vmatmul.msk.bf16.gmra.mxu0 %vm741_vm0, %v2493_v49 }
  0xc0   :  { %946 = vmatmul.bf16.gmra.mxu3 %v2497_v55 }
  0xc1   :  { %1044 = vmatmul.bf16.gmra.mxu1 %v2238_v58  ;;  %v1596_v58 = vld [vmem:[%s2858_s0 + $0xf8] sm:$0xf] }
  0xc2   :  { %v800_v19 = vpop.f32.mrf.mxu2  ;;  %v2528_v4 = vor.u32 %v1963_v33, %v1596_v58 }
  0xc3   :  { %v849_v21 = vpop.f32.mrf.mxu3 }
  0xc4   :  { %v2506_v22 = vadd.f32 %v849_v21, %v800_v19  ;;  %v782_v23 = vpop.f32.mrf.mxu0  ;;  %v1616_v19 = vld [vmem:[%s2858_s0 + $0x120] sm:$0xf]  ;;  %v1969_v21 = vld [vmem:[%s2858_s0 + $0x138] sm:$0xf0] }
  0xc5   :  { %v2565_v58 = vor.u32 %v1968_v20, %v1616_v19 }
  0xc6   :  { %v831_v24 = vpop.f32.mrf.mxu1 }
  0xc7   :  { %v2508_v25 = vadd.f32 %v831_v24, %v782_v23  ;;  %v1966_v23 = vld [vmem:[%s2858_s0 + $0x124] sm:$0xf]  ;;  %v1618_v24 = vld [vmem:[%s2858_s0 + $0x134] sm:$0xf0] }
  0xc8   :  { %v2571_v34 = vor.u32 %v1966_v23, %v1618_v24 }
  0xca   :  { %v802_v44 = vpop.f32.mrf.mxu2 }
  0xcb   :  { %v851_v45 = vpop.f32.mrf.mxu3 }
  0xcc   :  { %v2532_v47 = vadd.f32 %v851_v45, %v802_v44  ;;  %v785_v54 = vpop.f32.mrf.mxu0 }
  0xce   :  { %v834_v57 = vpop.f32.mrf.mxu1 }
  0xcf   :  { %v2536_v7 = vadd.f32 %v834_v57, %v785_v54  ;;  %902 = vmatmul.bf16.gmra.mxu2 %v2528_v4  ;;  %1920 = vmatmul.msk.bf16.gmra.mxu0 %vm741_vm0, %v2530_v46 }
  0xd0   :  { %951 = vmatmul.bf16.gmra.mxu3 %v2534_v56 }
  0xd1   :  { %1049 = vmatmul.bf16.gmra.mxu1 %v2274_v37  ;;  %v1624_v37 = vld [vmem:[%s2858_s0 + $0x128] sm:$0xf] }
  0xd2   :  { %v805_v60 = vpop.f32.mrf.mxu2  ;;  %v2567_v38 = vor.u32 %v1969_v21, %v1624_v37 }
  0xd3   :  { %v854_v62 = vpop.f32.mrf.mxu3 }
  0xd4   :  { %v2543_v1 = vadd.f32 %v854_v62, %v805_v60  ;;  %v787_v59 = vpop.f32.mrf.mxu0 }
  0xd6   :  { %v836_v13 = vpop.f32.mrf.mxu1 }
  0xd7   :  { %v2545_v15 = vadd.f32 %v836_v13, %v787_v59 }
  0xda   :  { %v807_v30 = vpop.f32.mrf.mxu2 }
  0xdb   :  { %v856_v31 = vpop.f32.mrf.mxu3 }
  0xdc   :  { %v2569_v33 = vadd.f32 %v856_v31, %v807_v30  ;;  %v790_v3 = vpop.f32.mrf.mxu0 }
  0xde   :  { %v839_v35 = vpop.f32.mrf.mxu1 }
  0xdf   :  { %v2573_v43 = vadd.f32 %v839_v35, %v790_v3  ;;  %907 = vmatmul.bf16.gmra.mxu2 %v2565_v58  ;;  %1921 = vmatmul.msk.bf16.gmra.mxu0 %vm741_vm0, %v2567_v38 }
  0xe0   :  { %956 = vmatmul.bf16.gmra.mxu3 %v2571_v34 }
  0xe1   :  { %1054 = vmatmul.bf16.gmra.mxu1 %v2310_v6 }
  0xe2   :  { %v810_v44 = vpop.f32.mrf.mxu2 }
  0xe3   :  { %v859_v45 = vpop.f32.mrf.mxu3 }
  0xe4   :  { %v2580_v54 = vadd.f32 %v859_v45, %v810_v44  ;;  %v792_v57 = vpop.f32.mrf.mxu0 }
  0xe6   :  { %v841_v60 = vpop.f32.mrf.mxu1 }
  0xe7   :  { %v2582_v62 = vadd.f32 %v841_v60, %v792_v57 }
  0xea   :  { %v812_v59 = vpop.f32.mrf.mxu2 }
  0xeb   :  { %v861_v13 = vpop.f32.mrf.mxu3 }
  0xec   :  { %v2584_v19 = vadd.f32 %v861_v13, %v812_v59  ;;  %v971_v20 = vpop.f32.mrf.mxu0 }
  0xee   :  { %v2586_v37 = vpop.f32.mrf.mxu1 }
  0xef   :  { %1068 = vmatmul.bf16.vlgmr.msra.gmra.mxu2 %v2208_v9  ;;  %1166 = vmatmul.bf16.vlgmr.msra.gmra.mxu0 %v2344_v29 }
  0xf0   :  { %1117 = vmatmul.bf16.vlgmr.msra.gmra.mxu3 %v2340_v27 }
  0xf1   :  { %1922 = vmatmul.msk.bf16.vlgmr.msra.gmra.mxu1 %vm741_vm0, %v2342_v28 }
  0xf2   :  { %v873_v6 = vpop.f32.mrf.mxu2 }
  0xf3   :  { %v874_v21 = vadd.f32 %v873_v6, %v2462_v14  ;;  %v922_v23 = vpop.f32.mrf.mxu3 }
  0xf4   :  { %v973_v24 = vpop.f32.mrf.mxu0 }
  0xf5   :  { %v923_v30 = vadd.f32 %v922_v23, %v874_v21 }
  0xf6   :  { %v2594_v31 = vpop.f32.mrf.mxu1 }
  0xf7   :  { %v2596_v3 = vadd.f32 %v971_v20, %v923_v30 }
  0xfa   :  { %v875_v35 = vpop.f32.mrf.mxu2 }
  0xfb   :  { %v876_v9 = vadd.f32 %v875_v35, %v2471_v32  ;;  %v924_v44 = vpop.f32.mrf.mxu3 }
  0xfc   :  { %v976_v29 = vpop.f32.mrf.mxu0 }
  0xfd   :  { %v925_v45 = vadd.f32 %v924_v44, %v876_v9 }
  0xfe   :  { %v2599_v27 = vpop.f32.mrf.mxu1 }
  0xff   :  { %v2601_v57 = vadd.f32 %v973_v24, %v925_v45  ;;  %1073 = vmatmul.bf16.gmra.mxu2 %v2244_v0  ;;  %1171 = vmatmul.bf16.gmra.mxu0 %v2373_v53 }
 0x100   :  { %1122 = vmatmul.bf16.gmra.mxu3 %v2369_v51 }
 0x101   :  { %1923 = vmatmul.msk.bf16.gmra.mxu1 %vm741_vm0, %v2371_v52 }
 0x102   :  { %v878_v28 = vpop.f32.mrf.mxu2 }
 0x103   :  { %v879_v14 = vadd.f32 %v878_v28, %v2499_v61  ;;  %v927_v32 = vpop.f32.mrf.mxu3 }
 0x104   :  { %v978_v60 = vpop.f32.mrf.mxu0 }
 0x105   :  { %v928_v59 = vadd.f32 %v927_v32, %v879_v14 }
 0x106   :  { %v2609_v13 = vpop.f32.mrf.mxu1 }
 0x107   :  { %v2611_v20 = vadd.f32 %v976_v29, %v928_v59 }
 0x10a   :  { %v880_v6 = vpop.f32.mrf.mxu2 }
 0x10b   :  { %v881_v0 = vadd.f32 %v880_v6, %v2508_v25  ;;  %v929_v21 = vpop.f32.mrf.mxu3 }
 0x10c   :  { %v981_v53 = vpop.f32.mrf.mxu0 }
 0x10d   :  { %v930_v23 = vadd.f32 %v929_v21, %v881_v0 }
 0x10e   :  { %v2614_v51 = vpop.f32.mrf.mxu1 }
 0x10f   :  { %v2616_v24 = vadd.f32 %v978_v60, %v930_v23  ;;  %1078 = vmatmul.bf16.gmra.mxu2 %v2280_v40  ;;  %1176 = vmatmul.bf16.gmra.mxu0 %v2402_v18 }
 0x110   :  { %1127 = vmatmul.bf16.gmra.mxu3 %v2398_v16 }
 0x111   :  { %1924 = vmatmul.msk.bf16.gmra.mxu1 %vm741_vm0, %v2400_v17 }
 0x112   :  { %v883_v52 = vpop.f32.mrf.mxu2 }
 0x113   :  { %v884_v61 = vadd.f32 %v883_v52, %v2536_v7  ;;  %v932_v25 = vpop.f32.mrf.mxu3 }
 0x114   :  { %v983_v30 = vpop.f32.mrf.mxu0 }
 0x115   :  { %v933_v35 = vadd.f32 %v932_v25, %v884_v61 }
 0x116   :  { %v2624_v9 = vpop.f32.mrf.mxu1 }
 0x117   :  { %v2626_v44 = vadd.f32 %v981_v53, %v933_v35 }
 0x11a   :  { %v885_v29 = vpop.f32.mrf.mxu2 }
 0x11b   :  { %v886_v40 = vadd.f32 %v885_v29, %v2545_v15  ;;  %v934_v45 = vpop.f32.mrf.mxu3 }
 0x11c   :  { %v986_v18 = vpop.f32.mrf.mxu0 }
 0x11d   :  { %v935_v28 = vadd.f32 %v934_v45, %v886_v40 }
 0x11e   :  { %v2629_v16 = vpop.f32.mrf.mxu1 }
 0x11f   :  { %v2631_v14 = vadd.f32 %v983_v30, %v935_v28  ;;  %1083 = vmatmul.bf16.gmra.mxu2 %v2316_v11  ;;  %1181 = vmatmul.bf16.gmra.mxu0 %v2431_v42 }
 0x120   :  { %1132 = vmatmul.bf16.gmra.mxu3 %v2427_v36 }
 0x121   :  { %1925 = vmatmul.msk.bf16.gmra.mxu1 %vm741_vm0, %v2429_v41 }
 0x122   :  { %v888_v17 = vpop.f32.mrf.mxu2 }
 0x123   :  { %v889_v7 = vadd.f32 %v888_v17, %v2573_v43  ;;  %v937_v15 = vpop.f32.mrf.mxu3 }
 0x124   :  { %v988_v32 = vpop.f32.mrf.mxu0 }
 0x125   :  { %v938_v60 = vadd.f32 %v937_v15, %v889_v7 }
 0x126   :  { %v2639_v59 = vpop.f32.mrf.mxu1 }
 0x127   :  { %v2641_v6 = vadd.f32 %v986_v18, %v938_v60 }
 0x12a   :  { %v890_v0 = vpop.f32.mrf.mxu2 }
 0x12b   :  { %v891_v11 = vadd.f32 %v890_v0, %v2582_v62  ;;  %v939_v21 = vpop.f32.mrf.mxu3 }
 0x12c   :  { %v991_v42 = vpop.f32.mrf.mxu0 }
 0x12d   :  { %v940_v53 = vadd.f32 %v939_v21, %v891_v11 }
 0x12e   :  { %v2644_v36 = vpop.f32.mrf.mxu1 }
 0x12f   :  { %v2646_v23 = vadd.f32 %v988_v32, %v940_v53  ;;  %1088 = vmatmul.bf16.gmra.mxu2 %v2206_v8  ;;  %1186 = vmatmul.bf16.gmra.mxu0 %v2460_v12 }
 0x130   :  { %1137 = vmatmul.bf16.gmra.mxu3 %v2456_v2 }
 0x131   :  { %1926 = vmatmul.msk.bf16.gmra.mxu1 %vm741_vm0, %v2458_v5 }
 0x132   :  { %v893_v41 = vpop.f32.mrf.mxu2 }
 0x133   :  { %v894_v43 = vadd.f32 %v893_v41, %v2469_v26  ;;  %v942_v62 = vpop.f32.mrf.mxu3 }
 0x134   :  { %v993_v52 = vpop.f32.mrf.mxu0 }
 0x135   :  { %v943_v61 = vadd.f32 %v942_v62, %v894_v43 }
 0x136   :  { %v2654_v25 = vpop.f32.mrf.mxu1 }
 0x137   :  { %v2656_v30 = vadd.f32 %v991_v42, %v943_v61 }
 0x13a   :  { %v895_v35 = vpop.f32.mrf.mxu2 }
 0x13b   :  { %v896_v8 = vadd.f32 %v895_v35, %v2495_v50  ;;  %v944_v29 = vpop.f32.mrf.mxu3 }
 0x13c   :  { %v996_v12 = vpop.f32.mrf.mxu0 }
 0x13d   :  { %v945_v40 = vadd.f32 %v944_v29, %v896_v8 }
 0x13e   :  { %v2659_v2 = vpop.f32.mrf.mxu1 }
 0x13f   :  { %v2661_v45 = vadd.f32 %v993_v52, %v945_v40  ;;  %1093 = vmatmul.bf16.gmra.mxu2 %v2242_v63  ;;  %1191 = vmatmul.bf16.gmra.mxu0 %v2497_v55 }
 0x140   :  { %1142 = vmatmul.bf16.gmra.mxu3 %v2491_v48 }
 0x141   :  { %1927 = vmatmul.msk.bf16.gmra.mxu1 %vm741_vm0, %v2493_v49 }
 0x142   :  { %v898_v5 = vpop.f32.mrf.mxu2 }
 0x143   :  { %v899_v26 = vadd.f32 %v898_v5, %v2506_v22  ;;  %v947_v50 = vpop.f32.mrf.mxu3 }
 0x144   :  { %v998_v18 = vpop.f32.mrf.mxu0 }
 0x145   :  { %v948_v28 = vadd.f32 %v947_v50, %v899_v26  ;;  %v1256_v26 = vld [vmem:[#allocation4] sm:$0x3] }
 0x146   :  { %v2669_v17 = vpop.f32.mrf.mxu1 }
 0x147   :  { %v2671_v7 = vadd.f32 %v996_v12, %v948_v28 }
 0x14a   :  { %v900_v15 = vpop.f32.mrf.mxu2 }
 0x14b   :  { %v901_v63 = vadd.f32 %v900_v15, %v2532_v47  ;;  %v949_v32 = vpop.f32.mrf.mxu3 }
 0x14c   :  { %v1001_v55 = vpop.f32.mrf.mxu0 }
 0x14d   :  { %v950_v60 = vadd.f32 %v949_v32, %v901_v63 }
 0x14e   :  { %v2674_v48 = vpop.f32.mrf.mxu1 }
 0x14f   :  { %v2676_v0 = vadd.f32 %v998_v18, %v950_v60  ;;  %1098 = vmatmul.bf16.gmra.mxu2 %v2278_v39  ;;  %1196 = vmatmul.bf16.gmra.mxu0 %v2534_v56 }
 0x150   :  { %1147 = vmatmul.bf16.gmra.mxu3 %v2528_v4 }
 0x151   :  { %1928 = vmatmul.msk.bf16.gmra.mxu1 %vm741_vm0, %v2530_v46 }
 0x152   :  { %v903_v49 = vpop.f32.mrf.mxu2 }
 0x153   :  { %v904_v22 = vadd.f32 %v903_v49, %v2543_v1  ;;  %v952_v47 = vpop.f32.mrf.mxu3 }
 0x154   :  { %v1003_v11 = vpop.f32.mrf.mxu0 }
 0x155   :  { %v953_v21 = vadd.f32 %v952_v47, %v904_v22  ;;  %v2713_v22 = vperm.slane %v1256_v26, 1 }
 0x156   :  { %v2684_v42 = vpop.f32.mrf.mxu1 }
 0x157   :  { %v2686_v53 = vadd.f32 %v1001_v55, %v953_v21 }
 0x15a   :  { %v905_v41 = vpop.f32.mrf.mxu2 }
 0x15b   :  { %v906_v39 = vadd.f32 %v905_v41, %v2569_v33  ;;  %v954_v43 = vpop.f32.mrf.mxu3 }
 0x15c   :  { %v1006_v56 = vpop.f32.mrf.mxu0 }
 0x15d   :  { %v955_v62 = vadd.f32 %v954_v43, %v906_v39 }
 0x15e   :  { %v2689_v4 = vpop.f32.mrf.mxu1 }
 0x15f   :  { %v2691_v52 = vadd.f32 %v1003_v11, %v955_v62  ;;  %1103 = vmatmul.bf16.gmra.mxu2 %v2314_v10  ;;  %1201 = vmatmul.bf16.gmra.mxu0 %v2571_v34 }
 0x160   :  { %1152 = vmatmul.bf16.gmra.mxu3 %v2565_v58 }
 0x161   :  { %1929 = vmatmul.msk.bf16.gmra.mxu1 %vm741_vm0, %v2567_v38  ;;  %v2706_v38 = vperm.slane %v1256_v26, 0 }
 0x162   :  { %v908_v46 = vpop.f32.mrf.mxu2 }
 0x163   :  { %v909_v1 = vadd.f32 %v908_v46, %v2580_v54  ;;  %v957_v33 = vpop.f32.mrf.mxu3  ;;  %v1294_v54 = vld [vmem:[#allocation6] sm:$0x3]  ;;  %v1262_v32 = vmul.f32 %v2706_v38, %v2596_v3  ;;  %v1264_v62 = vmul.f32 %v2706_v38, %v2601_v57 }
 0x164   :  { %v1008_v61 = vpop.f32.mrf.mxu0  ;;  %v2711_v55 = vperm.slane %v1294_v54, 0  ;;  %v2716_v21 = vperm.slane %v1294_v54, 1 }
 0x165   :  { %v958_v35 = vadd.f32 %v957_v33, %v909_v1 }
 0x166   :  { %v2699_v8 = vpop.f32.mrf.mxu1  ;;  %v1300_v47 = vadd.f32 %v2711_v55, %v1262_v32 }
 0x167   :  { %v2701_v29 = vadd.f32 %v1006_v56, %v958_v35 }
 0x168   :  { %v1364_v3 = vmul.f32 0.2, %v1300_v47  ;;  %vm1332_vm1 = vcmp.gt.f32.partialorder %v1300_v47, 0.0 }
 0x16a   :  { %v910_v12 = vpop.f32.mrf.mxu2 }
 0x16b   :  { %v911_v10 = vadd.f32 %v910_v12, %v2584_v19  ;;  %v959_v40 = vpop.f32.mrf.mxu3  ;;  %v1396_v12 = vsel %vm1332_vm1, %v1300_v47, %v1364_v3 }
 0x16c   :  { %v1167_v34 = vpop.f32.mrf.mxu0 }
 0x16d   :  { %v960_v5 = vadd.f32 %v959_v40, %v911_v10  ;;  %v1302_v10 = vadd.f32 %v2711_v55, %v1264_v62 }
 0x16e   :  { %v1216_v58 = vpop.f32.mrf.mxu1 }
 0x16f   :  { %v2704_v50 = vadd.f32 %v1008_v61, %v960_v5  ;;  %vm1334_vm3 = vcmp.gt.f32.partialorder %v1302_v10, 0.0 }
 0x172   :  { %v1069_v18 = vpop.f32.mrf.mxu2 }
 0x173   :  { %v1070_v28 = vadd.f32 %v1069_v18, %v2586_v37  ;;  %v1118_v15 = vpop.f32.mrf.mxu3  ;;  %v1366_v18 = vmul.f32 0.2, %v1302_v10 }
 0x174   :  { %v1169_v63 = vpop.f32.mrf.mxu0 }
 0x175   :  { %v1119_v19 = vadd.f32 %v1118_v15, %v1070_v28  ;;  %v1266_v28 = vmul.f32 %v2706_v38, %v2611_v20 }
 0x176   :  { %v1218_v60 = vpop.f32.mrf.mxu1 }
 0x177   :  { %v1168_v49 = vadd.f32 %v1167_v34, %v1119_v19 }
 0x179   :  { %v1217_v11 = vadd.f32 %v1216_v58, %v1168_v49  ;;  %v1398_v49 = vsel %vm1334_vm3, %v1302_v10, %v1366_v18 }
 0x17a   :  { %v1071_v41 = vpop.f32.mrf.mxu2 }
 0x17b   :  { %v1263_v37 = vmul.f32 %v2713_v22, %v1217_v11  ;;  %v1072_v39 = vadd.f32 %v1071_v41, %v2594_v31  ;;  %v1120_v43 = vpop.f32.mrf.mxu3 }
 0x17c   :  { %v1172_v56 = vpop.f32.mrf.mxu0 }
 0x17d   :  { %v1301_v46 = vadd.f32 %v2716_v21, %v1263_v37  ;;  %v1121_v1 = vadd.f32 %v1120_v43, %v1072_v39 }
 0x17e   :  { %v1221_v33 = vpop.f32.mrf.mxu1 }
 0x17f   :  { %vm1333_vm2 = vcmp.gt.f32.partialorder %v1301_v46, 0.0  ;;  %v1365_v61 = vmul.f32 0.2, %v1301_v46  ;;  %v1170_v35 = vadd.f32 %v1169_v63, %v1121_v1 }
 0x181   :  { %v1397_v40 = vsel %vm1333_vm2, %v1301_v46, %v1365_v61  ;;  %v1219_v34 = vadd.f32 %v1218_v60, %v1170_v35 }
 0x182   :  { %v1428_v31 = vpack.c.bf16 %v1397_v40, %v1396_v12  ;;  %v1074_v5 = vpop.f32.mrf.mxu2 }
 0x183   :  { %v1265_v58 = vmul.f32 %v2713_v22, %v1219_v34  ;;  %v1075_v26 = vadd.f32 %v1074_v5, %v2599_v27  ;;  %v1123_v57 = vpop.f32.mrf.mxu3  ;;  %v1304_v27 = vadd.f32 %v2711_v55, %v1266_v28 }
 0x184   :  { %1444 = vst [vmem:[%s2862_s4] sm:$0xff] %v1428_v31  ;;  %v1174_v54 = vpop.f32.mrf.mxu0 }
 0x185   :  { %v1303_v15 = vadd.f32 %v2716_v21, %v1265_v58  ;;  %v1124_v63 = vadd.f32 %v1123_v57, %v1075_v26  ;;  %v1368_v62 = vmul.f32 0.2, %v1304_v27  ;;  %vm1336_vm5 = vcmp.gt.f32.partialorder %v1304_v27, 0.0 }
 0x186   :  { %v1223_v32 = vpop.f32.mrf.mxu1 }
 0x187   :  { %vm1335_vm4 = vcmp.gt.f32.partialorder %v1303_v15, 0.0  ;;  %v1367_v19 = vmul.f32 0.2, %v1303_v15  ;;  %v1173_v60 = vadd.f32 %v1172_v56, %v1124_v63  ;;  %v1268_v56 = vmul.f32 %v2706_v38, %v2616_v24 }
 0x188   :  { %v1400_v12 = vsel %vm1336_vm5, %v1304_v27, %v1368_v62 }
 0x189   :  { %v1399_v47 = vsel %vm1335_vm4, %v1303_v15, %v1367_v19  ;;  %v1222_v11 = vadd.f32 %v1221_v33, %v1173_v60 }
 0x18a   :  { %v1429_v41 = vpack.c.bf16 %v1399_v47, %v1398_v49  ;;  %v1076_v37 = vpop.f32.mrf.mxu2 }
 0x18b   :  { %v1267_v39 = vmul.f32 %v2713_v22, %v1222_v11  ;;  %v1077_v43 = vadd.f32 %v1076_v37, %v2609_v13  ;;  %v1125_v20 = vpop.f32.mrf.mxu3  ;;  %v1306_v13 = vadd.f32 %v2711_v55, %v1268_v56 }
 0x18c   :  { %1445 = vst [vmem:[%s2862_s4 + $0x8] sm:$0xff] %v1429_v41  ;;  %v1177_v3 = vpop.f32.mrf.mxu0 }
 0x18d   :  { %v1305_v46 = vadd.f32 %v2716_v21, %v1267_v39  ;;  %v1126_v1 = vadd.f32 %v1125_v20, %v1077_v43  ;;  %v1370_v57 = vmul.f32 0.2, %v1306_v13  ;;  %vm1338_vm7 = vcmp.gt.f32.partialorder %v1306_v13, 0.0 }
 0x18e   :  { %v1226_v33 = vpop.f32.mrf.mxu1  ;;  %v1272_v43 = vmul.f32 %v2706_v38, %v2631_v14 }
 0x18f   :  { %vm1337_vm6 = vcmp.gt.f32.partialorder %v1305_v46, 0.0  ;;  %v1369_v61 = vmul.f32 0.2, %v1305_v46  ;;  %v1175_v35 = vadd.f32 %v1174_v54, %v1126_v1  ;;  %v1270_v54 = vmul.f32 %v2706_v38, %v2626_v44 }
 0x190   :  { %v1402_v19 = vsel %vm1338_vm7, %v1306_v13, %v1370_v57 }
 0x191   :  { %v1401_v10 = vsel %vm1337_vm6, %v1305_v46, %v1369_v61  ;;  %v1224_v40 = vadd.f32 %v1223_v32, %v1175_v35 }
 0x192   :  { %v1430_v34 = vpack.c.bf16 %v1401_v10, %v1400_v12  ;;  %v1079_v31 = vpop.f32.mrf.mxu2 }
 0x193   :  { %v1269_v5 = vmul.f32 %v2713_v22, %v1224_v40  ;;  %v1080_v58 = vadd.f32 %v1079_v31, %v2614_v51  ;;  %v1128_v24 = vpop.f32.mrf.mxu3  ;;  %v1308_v51 = vadd.f32 %v2711_v55, %v1270_v54  ;;  %v1274_v31 = vmul.f32 %v2706_v38, %v2641_v6 }
 0x194   :  { %1446 = vst [vmem:[%s2862_s4 + $0x10] sm:$0xff] %v1430_v34  ;;  %v1179_v26 = vpop.f32.mrf.mxu0 }
 0x195   :  { %v1307_v18 = vadd.f32 %v2716_v21, %v1269_v5  ;;  %v1129_v28 = vadd.f32 %v1128_v24, %v1080_v58  ;;  %v1372_v39 = vmul.f32 0.2, %v1308_v51  ;;  %vm1340_vm9 = vcmp.gt.f32.partialorder %v1308_v51, 0.0 }
 0x196   :  { %v1228_v15 = vpop.f32.mrf.mxu1 }
 0x197   :  { %vm1339_vm8 = vcmp.gt.f32.partialorder %v1307_v18, 0.0  ;;  %v1371_v63 = vmul.f32 0.2, %v1307_v18  ;;  %v1178_v32 = vadd.f32 %v1177_v3, %v1129_v28  ;;  %v1404_v1 = vsel %vm1340_vm9, %v1308_v51, %v1372_v39 }
 0x199   :  { %v1403_v60 = vsel %vm1339_vm8, %v1307_v18, %v1371_v63  ;;  %v1227_v49 = vadd.f32 %v1226_v33, %v1178_v32 }
 0x19a   :  { %v1431_v27 = vpack.c.bf16 %v1403_v60, %v1402_v19  ;;  %v1081_v47 = vpop.f32.mrf.mxu2 }
 0x19b   :  { %v1271_v11 = vmul.f32 %v2713_v22, %v1227_v49  ;;  %v1082_v41 = vadd.f32 %v1081_v47, %v2624_v9  ;;  %v1130_v44 = vpop.f32.mrf.mxu3  ;;  %v1310_v9 = vadd.f32 %v2711_v55, %v1272_v43  ;;  %v1276_v49 = vmul.f32 %v2706_v38, %v2646_v23 }
 0x19c   :  { %1447 = vst [vmem:[%s2862_s4 + $0x18] sm:$0xff] %v1431_v27  ;;  %v1182_v37 = vpop.f32.mrf.mxu0 }
 0x19d   :  { %v1309_v20 = vadd.f32 %v2716_v21, %v1271_v11  ;;  %v1131_v3 = vadd.f32 %v1130_v44, %v1082_v41  ;;  %v1374_v34 = vmul.f32 0.2, %v1310_v9  ;;  %vm1342_vm11 = vcmp.gt.f32.partialorder %v1310_v9, 0.0 }
 0x19e   :  { %v1231_v62 = vpop.f32.mrf.mxu1 }
 0x19f   :  { %vm1341_vm10 = vcmp.gt.f32.partialorder %v1309_v20, 0.0  ;;  %v1373_v56 = vmul.f32 0.2, %v1309_v20  ;;  %v1180_v46 = vadd.f32 %v1179_v26, %v1131_v3  ;;  %v1406_v54 = vsel %vm1342_vm11, %v1310_v9, %v1374_v34 }
 0x1a0   :  { %v1278_v9 = vmul.f32 %v2706_v38, %v2656_v30 }
 0x1a1   :  { %v1405_v33 = vsel %vm1341_vm10, %v1309_v20, %v1373_v56  ;;  %v1229_v61 = vadd.f32 %v1228_v15, %v1180_v46 }
 0x1a2   :  { %v1432_v35 = vpack.c.bf16 %v1405_v33, %v1404_v1  ;;  %v1084_v12 = vpop.f32.mrf.mxu2 }
 0x1a3   :  { %v1273_v13 = vmul.f32 %v2713_v22, %v1229_v61  ;;  %v1085_v10 = vadd.f32 %v1084_v12, %v2629_v16  ;;  %v1133_v14 = vpop.f32.mrf.mxu3  ;;  %v1312_v16 = vadd.f32 %v2711_v55, %v1274_v31 }
 0x1a4   :  { %1448 = vst [vmem:[%s2862_s4 + $0x20] sm:$0xff] %v1432_v35  ;;  %v1184_v40 = vpop.f32.mrf.mxu0 }
 0x1a5   :  { %v1311_v5 = vadd.f32 %v2716_v21, %v1273_v13  ;;  %v1134_v58 = vadd.f32 %v1133_v14, %v1085_v10  ;;  %v1376_v60 = vmul.f32 0.2, %v1312_v16  ;;  %vm1344_vm13 = vcmp.gt.f32.partialorder %v1312_v16, 0.0 }
 0x1a6   :  { %v1233_v24 = vpop.f32.mrf.mxu1 }
 0x1a7   :  { %vm1343_vm12 = vcmp.gt.f32.partialorder %v1311_v5, 0.0  ;;  %v1375_v26 = vmul.f32 0.2, %v1311_v5  ;;  %v1183_v57 = vadd.f32 %v1182_v37, %v1134_v58  ;;  %v1408_v37 = vsel %vm1344_vm13, %v1312_v16, %v1376_v60 }
 0x1a9   :  { %v1407_v18 = vsel %vm1343_vm12, %v1311_v5, %v1375_v26  ;;  %v1232_v28 = vadd.f32 %v1231_v62, %v1183_v57  ;;  %v1280_v57 = vmul.f32 %v2706_v38, %v2661_v45 }
 0x1aa   :  { %v1433_v15 = vpack.c.bf16 %v1407_v18, %v1406_v54  ;;  %v1086_v63 = vpop.f32.mrf.mxu2 }
 0x1ab   :  { %v1275_v32 = vmul.f32 %v2713_v22, %v1232_v28  ;;  %v1087_v19 = vadd.f32 %v1086_v63, %v2639_v59  ;;  %v1135_v6 = vpop.f32.mrf.mxu3  ;;  %v1314_v59 = vadd.f32 %v2711_v55, %v1276_v49 }
 0x1ac   :  { %1449 = vst [vmem:[%s2862_s4 + $0x28] sm:$0xff] %v1433_v15  ;;  %v1187_v51 = vpop.f32.mrf.mxu0 }
 0x1ad   :  { %v1313_v27 = vadd.f32 %v2716_v21, %v1275_v32  ;;  %v1136_v47 = vadd.f32 %v1135_v6, %v1087_v19  ;;  %v1378_v1 = vmul.f32 0.2, %v1314_v59  ;;  %vm1346_vm15 = vcmp.gt.f32.partialorder %v1314_v59, 0.0 }
 0x1ae   :  { %v1236_v11 = vpop.f32.mrf.mxu1 }
 0x1af   :  { %vm1345_vm14 = vcmp.gt.f32.partialorder %v1313_v27, 0.0  ;;  %v1377_v41 = vmul.f32 0.2, %v1313_v27  ;;  %v1185_v44 = vadd.f32 %v1184_v40, %v1136_v47  ;;  %v1410_v10 = vsel %vm1346_vm15, %v1314_v59, %v1378_v1 }
 0x1b0   :  { %v1282_v47 = vmul.f32 %v2706_v38, %v2671_v7 }
 0x1b1   :  { %v1409_v39 = vsel %vm1345_vm14, %v1313_v27, %v1377_v41  ;;  %v1234_v43 = vadd.f32 %v1233_v24, %v1185_v44 }
 0x1b2   :  { %v1434_v20 = vpack.c.bf16 %v1409_v39, %v1408_v37  ;;  %v1089_v3 = vpop.f32.mrf.mxu2 }
 0x1b3   :  { %v1277_v62 = vmul.f32 %v2713_v22, %v1234_v43  ;;  %v1090_v56 = vadd.f32 %v1089_v3, %v2644_v36  ;;  %v1138_v23 = vpop.f32.mrf.mxu3  ;;  %v1316_v36 = vadd.f32 %v2711_v55, %v1278_v9  ;;  %v1284_v9 = vmul.f32 %v2706_v38, %v2676_v0 }
 0x1b4   :  { %1450 = vst [vmem:[%s2862_s4 + $0x30] sm:$0xff] %v1434_v20  ;;  %v1189_v46 = vpop.f32.mrf.mxu0 }
 0x1b5   :  { %v1315_v33 = vadd.f32 %v2716_v21, %v1277_v62  ;;  %v1139_v61 = vadd.f32 %v1138_v23, %v1090_v56  ;;  %v1380_v26 = vmul.f32 0.2, %v1316_v36  ;;  %vm1348_vm1 = vcmp.gt.f32.partialorder %v1316_v36, 0.0 }
 0x1b6   :  { %v1238_v35 = vpop.f32.mrf.mxu1 }
 0x1b7   :  { %vm1347_vm0 = vcmp.gt.f32.partialorder %v1315_v33, 0.0  ;;  %v1379_v12 = vmul.f32 0.2, %v1315_v33  ;;  %v1188_v13 = vadd.f32 %v1187_v51, %v1139_v61  ;;  %v1412_v63 = vsel %vm1348_vm1, %v1316_v36, %v1380_v26 }
 0x1b9   :  { %v1411_v14 = vsel %vm1347_vm0, %v1315_v33, %v1379_v12  ;;  %v1237_v40 = vadd.f32 %v1236_v11, %v1188_v13 }
 0x1ba   :  { %v1435_v34 = vpack.c.bf16 %v1411_v14, %v1410_v10  ;;  %v1091_v31 = vpop.f32.mrf.mxu2 }
 0x1bb   :  { %v1279_v5 = vmul.f32 %v2713_v22, %v1237_v40  ;;  %v1092_v58 = vadd.f32 %v1091_v31, %v2654_v25  ;;  %v1140_v30 = vpop.f32.mrf.mxu3  ;;  %v1318_v25 = vadd.f32 %v2711_v55, %v1280_v57 }
 0x1bc   :  { %1451 = vst [vmem:[%s2862_s4 + $0x38] sm:$0xff] %v1435_v34  ;;  %v1192_v24 = vpop.f32.mrf.mxu0 }
 0x1bd   :  { %v1317_v54 = vadd.f32 %v2716_v21, %v1279_v5  ;;  %v1141_v16 = vadd.f32 %v1140_v30, %v1092_v58  ;;  %v1382_v27 = vmul.f32 0.2, %v1318_v25  ;;  %vm1350_vm3 = vcmp.gt.f32.partialorder %v1318_v25, 0.0 }
 0x1be   :  { %v1241_v18 = vpop.f32.mrf.mxu1 }
 0x1bf   :  { %vm1349_vm2 = vcmp.gt.f32.partialorder %v1317_v54, 0.0  ;;  %v1381_v28 = vmul.f32 0.2, %v1317_v54  ;;  %v1190_v15 = vadd.f32 %v1189_v46, %v1141_v16  ;;  %v1414_v43 = vsel %vm1350_vm3, %v1318_v25, %v1382_v27 }
 0x1c1   :  { %v1413_v32 = vsel %vm1349_vm2, %v1317_v54, %v1381_v28  ;;  %v1239_v19 = vadd.f32 %v1238_v35, %v1190_v15 }
 0x1c2   :  { %v1436_v6 = vpack.c.bf16 %v1413_v32, %v1412_v63  ;;  %v1094_v51 = vpop.f32.mrf.mxu2 }
 0x1c3   :  { %v1281_v60 = vmul.f32 %v2713_v22, %v1239_v19  ;;  %v1095_v49 = vadd.f32 %v1094_v51, %v2659_v2  ;;  %v1143_v45 = vpop.f32.mrf.mxu3  ;;  %v1320_v2 = vadd.f32 %v2711_v55, %v1282_v47 }
 0x1c4   :  { %1452 = vst [vmem:[%s2862_s4 + $0x40] sm:$0xff] %v1436_v6  ;;  %v1194_v44 = vpop.f32.mrf.mxu0 }
 0x1c5   :  { %v1319_v11 = vadd.f32 %v2716_v21, %v1281_v60  ;;  %v1144_v41 = vadd.f32 %v1143_v45, %v1095_v49  ;;  %v1384_v1 = vmul.f32 0.2, %v1320_v2  ;;  %vm1352_vm5 = vcmp.gt.f32.partialorder %v1320_v2, 0.0 }
 0x1c6   :  { %v1243_v39 = vpop.f32.mrf.mxu1  ;;  %v1288_v49 = vmul.f32 %v2706_v38, %v2691_v52 }
 0x1c7   :  { %vm1351_vm4 = vcmp.gt.f32.partialorder %v1319_v11, 0.0  ;;  %v1383_v37 = vmul.f32 0.2, %v1319_v11  ;;  %v1193_v59 = vadd.f32 %v1192_v24, %v1144_v41  ;;  %v1416_v10 = vsel %vm1352_vm5, %v1320_v2, %v1384_v1 }
 0x1c8   :  { %v1286_v24 = vmul.f32 %v2706_v38, %v2686_v53 }
 0x1c9   :  { %v1415_v20 = vsel %vm1351_vm4, %v1319_v11, %v1383_v37  ;;  %v1242_v3 = vadd.f32 %v1241_v18, %v1193_v59 }
 0x1ca   :  { %v1437_v62 = vpack.c.bf16 %v1415_v20, %v1414_v43  ;;  %v1096_v56 = vpop.f32.mrf.mxu2  ;;  %v1324_v28 = vadd.f32 %v2711_v55, %v1286_v24 }
 0x1cb   :  { %v1283_v23 = vmul.f32 %v2713_v22, %v1242_v3  ;;  %v1097_v7 = vadd.f32 %v1096_v56, %v2669_v17  ;;  %v1145_v46 = vpop.f32.mrf.mxu3  ;;  %v1322_v17 = vadd.f32 %v2711_v55, %v1284_v9 }
 0x1cc   :  { %1453 = vst [vmem:[%s2862_s4 + $0x48] sm:$0xff] %v1437_v62  ;;  %v1197_v13 = vpop.f32.mrf.mxu0  ;;  %v1388_v60 = vmul.f32 0.2, %v1324_v28  ;;  %vm1356_vm9 = vcmp.gt.f32.partialorder %v1324_v28, 0.0  ;;  %v1290_v62 = vmul.f32 %v2706_v38, %v2701_v29 }
 0x1cd   :  { %v1321_v33 = vadd.f32 %v2716_v21, %v1283_v23  ;;  %v1146_v61 = vadd.f32 %v1145_v46, %v1097_v7  ;;  %v1386_v30 = vmul.f32 0.2, %v1322_v17  ;;  %vm1354_vm7 = vcmp.gt.f32.partialorder %v1322_v17, 0.0 }
 0x1ce   :  { %v1246_v34 = vpop.f32.mrf.mxu1  ;;  %v1420_v41 = vsel %vm1356_vm9, %v1324_v28, %v1388_v60 }
 0x1cf   :  { %vm1353_vm6 = vcmp.gt.f32.partialorder %v1321_v33, 0.0  ;;  %v1385_v35 = vmul.f32 0.2, %v1321_v33  ;;  %v1195_v12 = vadd.f32 %v1194_v44, %v1146_v61  ;;  %v1418_v18 = vsel %vm1354_vm7, %v1322_v17, %v1386_v30 }
 0x1d1   :  { %v1417_v36 = vsel %vm1353_vm6, %v1321_v33, %v1385_v35  ;;  %v1244_v14 = vadd.f32 %v1243_v39, %v1195_v12 }
 0x1d2   :  { %v1438_v40 = vpack.c.bf16 %v1417_v36, %v1416_v10  ;;  %v1099_v31 = vpop.f32.mrf.mxu2  ;;  %v1292_v36 = vmul.f32 %v2706_v38, %v2704_v50 }
 0x1d3   :  { %v1285_v5 = vmul.f32 %v2713_v22, %v1244_v14  ;;  %v1100_v0 = vadd.f32 %v1099_v31, %v2674_v48  ;;  %v1148_v58 = vpop.f32.mrf.mxu3 }
 0x1d4   :  { %1454 = vst [vmem:[%s2862_s4 + $0x50] sm:$0xff] %v1438_v40  ;;  %v1199_v25 = vpop.f32.mrf.mxu0 }
 0x1d5   :  { %v1323_v26 = vadd.f32 %v2716_v21, %v1285_v5  ;;  %v1149_v57 = vadd.f32 %v1148_v58, %v1100_v0 }
 0x1d6   :  { %v1248_v51 = vpop.f32.mrf.mxu1 }
 0x1d7   :  { %vm1355_vm8 = vcmp.gt.f32.partialorder %v1323_v26, 0.0  ;;  %v1387_v54 = vmul.f32 0.2, %v1323_v26  ;;  %v1198_v16 = vadd.f32 %v1197_v13, %v1149_v57 }
 0x1d9   :  { %v1419_v48 = vsel %vm1355_vm8, %v1323_v26, %v1387_v54  ;;  %v1247_v15 = vadd.f32 %v1246_v34, %v1198_v16 }
 0x1da   :  { %v1439_v63 = vpack.c.bf16 %v1419_v48, %v1418_v18  ;;  %v1101_v32 = vpop.f32.mrf.mxu2 }
 0x1db   :  { %v1287_v19 = vmul.f32 %v2713_v22, %v1247_v15  ;;  %v1102_v6 = vadd.f32 %v1101_v32, %v2684_v42  ;;  %v1150_v53 = vpop.f32.mrf.mxu3  ;;  %v1326_v42 = vadd.f32 %v2711_v55, %v1288_v49 }
 0x1dc   :  { %1455 = vst [vmem:[%s2862_s4 + $0x58] sm:$0xff] %v1439_v63  ;;  %v1202_v52 = vpop.f32.mrf.mxu0 }
 0x1dd   :  { %v1325_v45 = vadd.f32 %v2716_v21, %v1287_v19  ;;  %v1151_v27 = vadd.f32 %v1150_v53, %v1102_v6  ;;  %v1390_v3 = vmul.f32 0.2, %v1326_v42  ;;  %vm1358_vm11 = vcmp.gt.f32.partialorder %v1326_v42, 0.0 }
 0x1de   :  { %v1251_v7 = vpop.f32.mrf.mxu1 }
 0x1df   :  { %vm1357_vm10 = vcmp.gt.f32.partialorder %v1325_v45, 0.0  ;;  %v1389_v47 = vmul.f32 0.2, %v1325_v45  ;;  %v1200_v11 = vadd.f32 %v1199_v25, %v1151_v27  ;;  %v1422_v9 = vsel %vm1358_vm11, %v1326_v42, %v1390_v3 }
 0x1e1   :  { %v1421_v44 = vsel %vm1357_vm10, %v1325_v45, %v1389_v47  ;;  %v1249_v37 = vadd.f32 %v1248_v51, %v1200_v11 }
 0x1e2   :  { %v1440_v59 = vpack.c.bf16 %v1421_v44, %v1420_v41  ;;  %v1104_v39 = vpop.f32.mrf.mxu2 }
 0x1e3   :  { %v1289_v43 = vmul.f32 %v2713_v22, %v1249_v37  ;;  %v1105_v2 = vadd.f32 %v1104_v39, %v2689_v4  ;;  %v1153_v20 = vpop.f32.mrf.mxu3  ;;  %v1328_v4 = vadd.f32 %v2711_v55, %v1290_v62 }
 0x1e4   :  { %1456 = vst [vmem:[%s2862_s4 + $0x60] sm:$0xff] %v1440_v59  ;;  %v1204_v34 = vpop.f32.mrf.mxu0 }
 0x1e5   :  { %v1327_v56 = vadd.f32 %v2716_v21, %v1289_v43  ;;  %v1154_v23 = vadd.f32 %v1153_v20, %v1105_v2  ;;  %v1392_v17 = vmul.f32 0.2, %v1328_v4  ;;  %vm1360_vm13 = vcmp.gt.f32.partialorder %v1328_v4, 0.0 }
 0x1e6   :  { %v1253_v0 = vpop.f32.mrf.mxu1 }
 0x1e7   :  { %vm1359_vm12 = vcmp.gt.f32.partialorder %v1327_v56, 0.0  ;;  %v1391_v46 = vmul.f32 0.2, %v1327_v56  ;;  %v1203_v1 = vadd.f32 %v1202_v52, %v1154_v23  ;;  %v1424_v58 = vsel %vm1360_vm13, %v1328_v4, %v1392_v17 }
 0x1e9   :  { %v1423_v33 = vsel %vm1359_vm12, %v1327_v56, %v1391_v46  ;;  %v1252_v61 = vadd.f32 %v1251_v7, %v1203_v1 }
 0x1ea   :  { %v1441_v35 = vpack.c.bf16 %v1423_v33, %v1422_v9  ;;  %v1106_v12 = vpop.f32.mrf.mxu2 }
 0x1eb   :  { %v1291_v13 = vmul.f32 %v2713_v22, %v1252_v61  ;;  %v1107_v10 = vadd.f32 %v1106_v12, %v2699_v8  ;;  %v1155_v29 = vpop.f32.mrf.mxu3  ;;  %v1330_v8 = vadd.f32 %v2711_v55, %v1292_v36 }
 0x1ec   :  { %1457 = vst [vmem:[%s2862_s4 + $0x68] sm:$0xff] %v1441_v35 }
 0x1ed   :  { %v1329_v14 = vadd.f32 %v2716_v21, %v1291_v13  ;;  %v1156_v40 = vadd.f32 %v1155_v29, %v1107_v10  ;;  %v1394_v50 = vmul.f32 0.2, %v1330_v8  ;;  %vm1362_vm15 = vcmp.gt.f32.partialorder %v1330_v8, 0.0 }
 0x1ef   :  { %vm1361_vm14 = vcmp.gt.f32.partialorder %v1329_v14, 0.0  ;;  %v1393_v31 = vmul.f32 0.2, %v1329_v14  ;;  %v1205_v5 = vadd.f32 %v1204_v34, %v1156_v40  ;;  %v1426_v16 = vsel %vm1362_vm15, %v1330_v8, %v1394_v50 }
 0x1f1   :  { %v1425_v30 = vsel %vm1361_vm14, %v1329_v14, %v1393_v31  ;;  %v1254_v24 = vadd.f32 %v1253_v0, %v1205_v5 }
 0x1f2   :  { %v1442_v26 = vpack.c.bf16 %v1425_v30, %v1424_v58 }
 0x1f3   :  { %v1293_v57 = vmul.f32 %v2713_v22, %v1254_v24 }
 0x1f4   :  { %1458 = vst [vmem:[%s2862_s4 + $0x70] sm:$0xff] %v1442_v26 }
 0x1f5   :  { %v1331_v38 = vadd.f32 %v2716_v21, %v1293_v57 }
 0x1f7   :  { %vm1363_vm0 = vcmp.gt.f32.partialorder %v1331_v38, 0.0  ;;  %v1395_v54 = vmul.f32 0.2, %v1331_v38 }
 0x1f9   :  { %v1427_v18 = vsel %vm1363_vm0, %v1331_v38, %v1395_v54 }
 0x1fa   :  { %v1443_v28 = vpack.c.bf16 %v1427_v18, %v1426_v16 }
 0x1fc   :  { %1459 = vst [vmem:[%s2862_s4 + $0x78] sm:$0xff] %v1443_v28 }
 0x1fd   :  { %1464 = vsyncpa [#allocation3], 1 }
 0x1fe   :  { %1465 = vsyncpa [#allocation5], 1 }

// kernel: mnist_generator_info.9
= control target key start
LH: loop header
LB: loop body
LE: loop exit
PB: predicated region body
PF: predicated region fallthrough
CT: control target
= control target key end

     0   :  { %vm1298_vm0 = vcmask 523264   ;;  %s5504_s1 = inlined_call_operand.vmem [shape: bf16[576,128], index: 1, kind: input, shape index: {}]   ;;  %s5505_s0 = inlined_call_operand.vmem [shape: bf16[512,576], index: 0, kind: input, shape index: {}]   ;;  %s5506_s2 = inlined_call_operand.vmem [shape: f32[1,128], index: 2, kind: input, shape index: {}]   ;;  %s5507_s3 = inlined_call_operand.vmem [shape: f32[1,128], index: 3, kind: input, shape index: {}]   ;;  %s5508_s4 = inlined_call_operand.vmem [shape: bf16[512,128], index: 4, kind: output, shape index: {}]  }
   0x1   :  { %v3683_v0 = vld [vmem:[%s5504_s1 + $0x38] sm:$0xff]  ;;  %v3682_v1 = vld [vmem:[%s5504_s1 + $0x30] sm:$0xff]  ;;  %v3681_v2 = vld [vmem:[%s5504_s1 + $0x28] sm:$0xff] }
   0x2   :  { %3903 = vmatpush.bf16.msra.mxu1 %v3683_v0  ;;  %3904 = vmatpush.bf16.msra.mxu2 %v3683_v0  ;;  %v3680_v3 = vld [vmem:[%s5504_s1 + $0x20] sm:$0xff]  ;;  %v3679_v4 = vld [vmem:[%s5504_s1 + $0x18] sm:$0xff]  ;;  %v3678_v5 = vld [vmem:[%s5504_s1 + $0x10] sm:$0xff] }
   0x3   :  { %3905 = vmatpush.bf16.msra.mxu3 %v3683_v0  ;;  %1395 = vmatpush.bf16.msra.mxu0 %v3683_v0  ;;  %v3677_v6 = vld [vmem:[%s5504_s1 + $0x8] sm:$0xff]  ;;  %v3676_v7 = vld [vmem:[%s5504_s1] sm:$0xff]  ;;  %v3558_v9 = vld [vmem:[%s5505_s0 + $0x150] sm:$0xf0] }
   0x4   :  { %v2862_v8 = vld [vmem:[%s5505_s0 + $0x140] sm:$0xf]  ;;  %v3598_v11 = vld [vmem:[%s5505_s0 + $0x290] sm:$0xf0]  ;;  %v3699_v16 = vld [vmem:[%s5504_s1 + $0xb8] sm:$0xff] }
   0x5   :  { %v3022_v10 = vld [vmem:[%s5505_s0 + $0x280] sm:$0xf]  ;;  %v3638_v13 = vld [vmem:[%s5505_s0 + $0x3d0] sm:$0xf0]  ;;  %v3707_v17 = vld [vmem:[%s5504_s1 + $0xf8] sm:$0xff]  ;;  %v2863_v18 = vor.u32 %v3558_v9, %v2862_v8 }
   0x6   :  { %3906 = vmatpush.bf16.msra.mxu1 %v3682_v1  ;;  %3907 = vmatpush.bf16.msra.mxu2 %v3682_v1  ;;  %v3182_v12 = vld [vmem:[%s5505_s0 + $0x3c0] sm:$0xf]  ;;  %v3518_v15 = vld [vmem:[%s5505_s0 + $0x10] sm:$0xf0]  ;;  %v3023_v19 = vor.u32 %v3598_v11, %v3022_v10  ;;  %v3691_v22 = vld [vmem:[%s5504_s1 + $0x78] sm:$0xff] }
   0x7   :  { %3908 = vmatpush.bf16.msra.mxu3 %v3682_v1  ;;  %1396 = vmatpush.bf16.msra.mxu0 %v3682_v1  ;;  %v2702_v14 = vld [vmem:[%s5505_s0] sm:$0xf]  ;;  %v3183_v20 = vor.u32 %v3638_v13, %v3182_v12  ;;  %v3711_v23 = vld [vmem:[%s5504_s1 + $0x118] sm:$0xff]  ;;  %v3698_v24 = vld [vmem:[%s5504_s1 + $0xb0] sm:$0xff] }
   0x8   :  { %v2703_v21 = vor.u32 %v3518_v15, %v2702_v14  ;;  %v3706_v25 = vld [vmem:[%s5504_s1 + $0xf0] sm:$0xff]  ;;  %v3697_v28 = vld [vmem:[%s5504_s1 + $0xa8] sm:$0xff]  ;;  %v3563_v32 = vld [vmem:[%s5505_s0 + $0x178] sm:$0xf0] }
   0x9   :  { %v3690_v26 = vld [vmem:[%s5504_s1 + $0x70] sm:$0xff]  ;;  %v3705_v29 = vld [vmem:[%s5504_s1 + $0xe8] sm:$0xff]  ;;  %v3603_v34 = vld [vmem:[%s5505_s0 + $0x2b8] sm:$0xf0] }
   0xa   :  { %3909 = vmatpush.bf16.msra.mxu1 %v3681_v2  ;;  %3910 = vmatpush.bf16.msra.mxu2 %v3681_v2  ;;  %v3710_v27 = vld [vmem:[%s5504_s1 + $0x110] sm:$0xff]  ;;  %v3689_v30 = vld [vmem:[%s5504_s1 + $0x68] sm:$0xff]  ;;  %v3643_v36 = vld [vmem:[%s5505_s0 + $0x3f8] sm:$0xf0] }
   0xb   :  { %3911 = vmatpush.bf16.msra.mxu3 %v3681_v2  ;;  %1397 = vmatpush.bf16.msra.mxu0 %v3681_v2  ;;  %v2882_v31 = vld [vmem:[%s5505_s0 + $0x168] sm:$0xf]  ;;  %v3523_v38 = vld [vmem:[%s5505_s0 + $0x38] sm:$0xf0]  ;;  %v3696_v43 = vld [vmem:[%s5504_s1 + $0xa0] sm:$0xff] }
   0xc   :  { %v3042_v33 = vld [vmem:[%s5505_s0 + $0x2a8] sm:$0xf]  ;;  %v2883_v39 = vor.u32 %v3563_v32, %v2882_v31  ;;  %v3704_v44 = vld [vmem:[%s5504_s1 + $0xe0] sm:$0xff]  ;;  %v2902_v46 = vld [vmem:[%s5505_s0 + $0x190] sm:$0xf] }
   0xd   :  { %v3202_v35 = vld [vmem:[%s5505_s0 + $0x3e8] sm:$0xf]  ;;  %v3043_v40 = vor.u32 %v3603_v34, %v3042_v33  ;;  %v3688_v45 = vld [vmem:[%s5504_s1 + $0x60] sm:$0xff]  ;;  %v3062_v48 = vld [vmem:[%s5505_s0 + $0x2d0] sm:$0xf] }
   0xe   :  { %3912 = vmatpush.bf16.msra.mxu1 %v3680_v3  ;;  %3913 = vmatpush.bf16.msra.mxu2 %v3680_v3  ;;  %v2722_v37 = vld [vmem:[%s5505_s0 + $0x28] sm:$0xf]  ;;  %v3203_v41 = vor.u32 %v3643_v36, %v3202_v35  ;;  %v3568_v47 = vld [vmem:[%s5505_s0 + $0x1a0] sm:$0xf0]  ;;  %v3222_v50 = vld [vmem:[%s5505_s0 + $0x410] sm:$0xf] }
   0xf   :  { %3914 = vmatpush.bf16.msra.mxu3 %v3680_v3  ;;  %1398 = vmatpush.bf16.msra.mxu0 %v3680_v3  ;;  %v2723_v42 = vor.u32 %v3523_v38, %v2722_v37  ;;  %v3608_v49 = vld [vmem:[%s5505_s0 + $0x2e0] sm:$0xf0]  ;;  %v2742_v52 = vld [vmem:[%s5505_s0 + $0x50] sm:$0xf]  ;;  %v2903_v54 = vor.u32 %v3568_v47, %v2902_v46  ;;  %v3695_v58 = vld [vmem:[%s5504_s1 + $0x98] sm:$0xff] }
  0x10   :  { %v3648_v51 = vld [vmem:[%s5505_s0 + $0x420] sm:$0xf0]  ;;  %v3063_v55 = vor.u32 %v3608_v49, %v3062_v48  ;;  %v3703_v59 = vld [vmem:[%s5504_s1 + $0xd8] sm:$0xff]  ;;  %v3709_v61 = vld [vmem:[%s5504_s1 + $0x108] sm:$0xff] }
  0x11   :  { %v3528_v53 = vld [vmem:[%s5505_s0 + $0x60] sm:$0xf0]  ;;  %v3223_v56 = vor.u32 %v3648_v51, %v3222_v50  ;;  %v3687_v60 = vld [vmem:[%s5504_s1 + $0x58] sm:$0xff]  ;;  %v3573_v63 = vld [vmem:[%s5505_s0 + $0x1c8] sm:$0xf0] }
  0x12   :  { %3915 = vmatpush.bf16.msra.mxu1 %v3679_v4  ;;  %3916 = vmatpush.bf16.msra.mxu2 %v3679_v4  ;;  %v2743_v57 = vor.u32 %v3528_v53, %v2742_v52  ;;  %v2922_v62 = vld [vmem:[%s5505_s0 + $0x1b8] sm:$0xf]  ;;  %v3613_v1 = vld [vmem:[%s5505_s0 + $0x308] sm:$0xf0]  ;;  %v3694_v10 = vld [vmem:[%s5504_s1 + $0x90] sm:$0xff] }
  0x13   :  { %3917 = vmatpush.bf16.msra.mxu3 %v3679_v4  ;;  %1399 = vmatpush.bf16.msra.mxu0 %v3679_v4  ;;  %v3082_v0 = vld [vmem:[%s5505_s0 + $0x2f8] sm:$0xf]  ;;  %v3653_v3 = vld [vmem:[%s5505_s0 + $0x448] sm:$0xf0]  ;;  %v3702_v11 = vld [vmem:[%s5504_s1 + $0xd0] sm:$0xff] }
  0x14   :  { %v3242_v2 = vld [vmem:[%s5505_s0 + $0x438] sm:$0xf]  ;;  %v3686_v12 = vld [vmem:[%s5504_s1 + $0x50] sm:$0xff]  ;;  %v2942_v13 = vld [vmem:[%s5505_s0 + $0x1e0] sm:$0xf] }
  0x15   :  { %v2762_v4 = vld [vmem:[%s5505_s0 + $0x78] sm:$0xf]  ;;  %v3243_v8 = vor.u32 %v3653_v3, %v3242_v2  ;;  %v3578_v14 = vld [vmem:[%s5505_s0 + $0x1f0] sm:$0xf0]  ;;  %v3102_v15 = vld [vmem:[%s5505_s0 + $0x320] sm:$0xf] }
  0x16   :  { %3918 = vmatpush.bf16.msra.mxu1 %v3678_v5  ;;  %3919 = vmatpush.bf16.msra.mxu2 %v3678_v5  ;;  %v3122_v31 = vld [vmem:[%s5505_s0 + $0x348] sm:$0xf]  ;;  %v3623_v32 = vld [vmem:[%s5505_s0 + $0x358] sm:$0xf0]  ;;  %v3142_v46 = vld [vmem:[%s5505_s0 + $0x370] sm:$0xf] }
  0x17   :  { %3920 = vmatpush.bf16.msra.mxu3 %v3678_v5  ;;  %1400 = vmatpush.bf16.msra.mxu0 %v3678_v5  ;;  %v3533_v5 = vld [vmem:[%s5505_s0 + $0x88] sm:$0xf0]  ;;  %v3282_v33 = vld [vmem:[%s5505_s0 + $0x488] sm:$0xf]  ;;  %v3663_v34 = vld [vmem:[%s5505_s0 + $0x498] sm:$0xf0]  ;;  %v3123_v38 = vor.u32 %v3623_v32, %v3122_v31 }
  0x18   :  { %v2763_v9 = vor.u32 %v3533_v5, %v2762_v4  ;;  %v2802_v35 = vld [vmem:[%s5505_s0 + $0xc8] sm:$0xf]  ;;  %v3543_v36 = vld [vmem:[%s5505_s0 + $0xd8] sm:$0xf0]  ;;  %v3628_v47 = vld [vmem:[%s5505_s0 + $0x380] sm:$0xf0] }
  0x19   :  { %v3302_v48 = vld [vmem:[%s5505_s0 + $0x4b0] sm:$0xf]  ;;  %v3668_v49 = vld [vmem:[%s5505_s0 + $0x4c0] sm:$0xf0]  ;;  %v3143_v53 = vor.u32 %v3628_v47, %v3142_v46  ;;  %v2704_v5 = vld [vmem:[%s5505_s0 + $0x14] sm:$0xf0] }
  0x1a   :  { %3921 = vmatpush.bf16.msra.mxu1 %v3677_v6  ;;  %3922 = vmatpush.bf16.msra.mxu2 %v3677_v6  ;;  %v2822_v50 = vld [vmem:[%s5505_s0 + $0xf0] sm:$0xf]  ;;  %v3548_v51 = vld [vmem:[%s5505_s0 + $0x100] sm:$0xf0]  ;;  %v3527_v46 = vld [vmem:[%s5505_s0 + $0x5c] sm:$0xf] }
  0x1b   :  { %3923 = vmatpush.bf16.msra.mxu3 %v3677_v6  ;;  %1401 = vmatpush.bf16.msra.mxu0 %v3677_v6  ;;  %v2923_v6 = vor.u32 %v3573_v63, %v2922_v62  ;;  %v2842_v62 = vld [vmem:[%s5505_s0 + $0x118] sm:$0xf]  ;;  %v3553_v63 = vld [vmem:[%s5505_s0 + $0x128] sm:$0xf0]  ;;  %v3516_v4 = vld [vmem:[%s5505_s0 + $0x4] sm:$0xf] }
  0x1c   :  { %v2843_v3 = vor.u32 %v3553_v63, %v2842_v62  ;;  %v2752_v47 = vld [vmem:[%s5505_s0 + $0x6c] sm:$0xf0]  ;;  %v3531_v62 = vld [vmem:[%s5505_s0 + $0x7c] sm:$0xf] }
  0x1d   :  { %v2764_v63 = vld [vmem:[%s5505_s0 + $0x8c] sm:$0xf0] }
  0x1e   :  { %3924 = vmatpush.bf16.msra.mxu1 %v3676_v7  ;;  %3925 = vmatpush.bf16.msra.mxu2 %v3676_v7 }
  0x1f   :  { %3926 = vmatpush.bf16.msra.mxu3 %v3676_v7  ;;  %1402 = vmatpush.bf16.msra.mxu0 %v3676_v7  ;;  %v3083_v7 = vor.u32 %v3613_v1, %v3082_v0 }
  0x21   :  { %1443 = vmatmul.bf16.vlgmr.msra.gmra.mxu1 %v2863_v18  ;;  %1483 = vmatmul.bf16.vlgmr.msra.gmra.mxu2 %v3023_v19  ;;  %v3658_v18 = vld [vmem:[%s5505_s0 + $0x470] sm:$0xf0]  ;;  %v2782_v19 = vld [vmem:[%s5505_s0 + $0xa0] sm:$0xf] }
  0x22   :  { %1733 = vmatpush.bf16.msrb.mxu2 %v3699_v16  ;;  %1523 = vmatmul.bf16.vlgmr.msra.gmra.mxu3 %v3183_v20  ;;  %v3618_v16 = vld [vmem:[%s5505_s0 + $0x330] sm:$0xf0] }
  0x23   :  { %1902 = vmatpush.bf16.msrb.mxu3 %v3707_v17  ;;  %1403 = vmatmul.bf16.vlgmr.msra.gmra.mxu0 %v2703_v21  ;;  %v3262_v17 = vld [vmem:[%s5505_s0 + $0x460] sm:$0xf]  ;;  %v3538_v20 = vld [vmem:[%s5505_s0 + $0xb0] sm:$0xf0]  ;;  %v2943_v21 = vor.u32 %v3578_v14, %v2942_v13 }
  0x24   :  { %1564 = vmatpush.bf16.msrb.mxu1 %v3691_v22  ;;  %2075 = vmatpush.bf16.msrb.mxu0 %v3711_v23  ;;  %v3103_v22 = vor.u32 %v3618_v16, %v3102_v15  ;;  %v3263_v23 = vor.u32 %v3658_v18, %v3262_v17 }
  0x26   :  { %1734 = vmatpush.bf16.msrb.mxu2 %v3698_v24  ;;  %v2783_v24 = vor.u32 %v3538_v20, %v2782_v19 }
  0x27   :  { %1903 = vmatpush.bf16.msrb.mxu3 %v3706_v25  ;;  %v3693_v25 = vld [vmem:[%s5504_s1 + $0x88] sm:$0xff] }
  0x28   :  { %1565 = vmatpush.bf16.msrb.mxu1 %v3690_v26  ;;  %2076 = vmatpush.bf16.msrb.mxu0 %v3710_v27  ;;  %v3701_v26 = vld [vmem:[%s5504_s1 + $0xc8] sm:$0xff] }
  0x29   :  { %v3685_v27 = vld [vmem:[%s5504_s1 + $0x48] sm:$0xff] }
  0x2a   :  { %1735 = vmatpush.bf16.msrb.mxu2 %v3697_v28  ;;  %v3708_v28 = vld [vmem:[%s5504_s1 + $0x100] sm:$0xff] }
  0x2b   :  { %1904 = vmatpush.bf16.msrb.mxu3 %v3705_v29  ;;  %v2962_v29 = vld [vmem:[%s5505_s0 + $0x208] sm:$0xf] }
  0x2c   :  { %1566 = vmatpush.bf16.msrb.mxu1 %v3689_v30  ;;  %2077 = vmatpush.bf16.msrb.mxu0 %v3709_v61  ;;  %v3583_v30 = vld [vmem:[%s5505_s0 + $0x218] sm:$0xf0]  ;;  %v3673_v61 = vld [vmem:[%s5505_s0 + $0x4e8] sm:$0xf0] }
  0x2d   :  { %v2963_v37 = vor.u32 %v3583_v30, %v2962_v29  ;;  %v3525_v29 = vld [vmem:[%s5505_s0 + $0x48] sm:$0xf0] }
  0x2e   :  { %1736 = vmatpush.bf16.msrb.mxu2 %v3696_v43  ;;  %v3684_v43 = vld [vmem:[%s5504_s1 + $0x40] sm:$0xff] }
  0x2f   :  { %1905 = vmatpush.bf16.msrb.mxu3 %v3704_v44  ;;  %v2982_v44 = vld [vmem:[%s5505_s0 + $0x230] sm:$0xf] }
  0x30   :  { %1567 = vmatpush.bf16.msrb.mxu1 %v3688_v45  ;;  %2078 = vmatpush.bf16.msrb.mxu0 %v3708_v28  ;;  %v3588_v45 = vld [vmem:[%s5505_s0 + $0x240] sm:$0xf0]  ;;  %v2738_v28 = vld [vmem:[%s5505_s0 + $0x38] sm:$0xf] }
  0x31   :  { %1448 = vmatmul.bf16.gmra.mxu1 %v2883_v39  ;;  %1488 = vmatmul.bf16.gmra.mxu2 %v3043_v40  ;;  %v3283_v39 = vor.u32 %v3663_v34, %v3282_v33  ;;  %v2803_v40 = vor.u32 %v3543_v36, %v2802_v35  ;;  %v2983_v52 = vor.u32 %v3588_v45, %v2982_v44  ;;  %v2750_v44 = vld [vmem:[%s5505_s0 + $0x58] sm:$0xf]  ;;  %v3529_v45 = vld [vmem:[%s5505_s0 + $0x68] sm:$0xf0] }
  0x32   :  { %1528 = vmatmul.bf16.gmra.mxu3 %v3203_v41  ;;  %1737 = vmatpush.bf16.msrb.mxu2 %v3695_v58  ;;  %v3692_v41 = vld [vmem:[%s5504_s1 + $0x80] sm:$0xff]  ;;  %v3162_v58 = vld [vmem:[%s5505_s0 + $0x398] sm:$0xf]  ;;  %v2739_v36 = vor.u32 %v3525_v29, %v2738_v28  ;;  %v3537_v28 = vld [vmem:[%s5505_s0 + $0xac] sm:$0xf] }
  0x33   :  { %1408 = vmatmul.bf16.gmra.mxu0 %v2723_v42  ;;  %1906 = vmatpush.bf16.msrb.mxu3 %v3703_v59  ;;  %v3700_v42 = vld [vmem:[%s5504_s1 + $0xc0] sm:$0xff]  ;;  %v3633_v59 = vld [vmem:[%s5505_s0 + $0x3a8] sm:$0xf0] }
  0x34   :  { %1568 = vmatpush.bf16.msrb.mxu1 %v3687_v60  ;;  %v3322_v60 = vld [vmem:[%s5505_s0 + $0x4d8] sm:$0xf]  ;;  %v3163_v1 = vor.u32 %v3633_v59, %v3162_v58  ;;  %v2792_v29 = vld [vmem:[%s5505_s0 + $0xbc] sm:$0xf0] }
  0x35   :  { %v3323_v2 = vor.u32 %v3673_v61, %v3322_v60 }
  0x36   :  { %1738 = vmatpush.bf16.msrb.mxu2 %v3694_v10  ;;  %v2718_v10 = vld [vmem:[%s5505_s0 + $0x10] sm:$0xf] }
  0x37   :  { %1907 = vmatpush.bf16.msrb.mxu3 %v3702_v11  ;;  %v3520_v11 = vld [vmem:[%s5505_s0 + $0x20] sm:$0xf0] }
  0x38   :  { %1569 = vmatpush.bf16.msrb.mxu1 %v3686_v12  ;;  %v2707_v12 = vor.u32 %v3516_v4, %v2704_v5  ;;  %v2719_v16 = vor.u32 %v3520_v11, %v2718_v10  ;;  %v2778_v4 = vld [vmem:[%s5505_s0 + $0x88] sm:$0xf]  ;;  %v3535_v5 = vld [vmem:[%s5505_s0 + $0x98] sm:$0xf0] }
  0x3a   :  { %1739 = vmatpush.bf16.msrb.mxu2 %v3693_v25  ;;  %v3524_v25 = vld [vmem:[%s5505_s0 + $0x40] sm:$0xf0] }
  0x3b   :  { %1908 = vmatpush.bf16.msrb.mxu3 %v3701_v26  ;;  %v3522_v26 = vld [vmem:[%s5505_s0 + $0x34] sm:$0xf] }
  0x3c   :  { %1570 = vmatpush.bf16.msrb.mxu1 %v3685_v27  ;;  %v2732_v27 = vld [vmem:[%s5505_s0 + $0x44] sm:$0xf0] }
  0x3d   :  { %v2735_v35 = vor.u32 %v3522_v26, %v2732_v27  ;;  %v2790_v26 = vld [vmem:[%s5505_s0 + $0xa8] sm:$0xf]  ;;  %v3539_v27 = vld [vmem:[%s5505_s0 + $0xb8] sm:$0xf0] }
  0x3e   :  { %1740 = vmatpush.bf16.msrb.mxu2 %v3692_v41 }
  0x3f   :  { %1909 = vmatpush.bf16.msrb.mxu3 %v3700_v42  ;;  %v3526_v42 = vld [vmem:[%s5505_s0 + $0x54] sm:$0xf] }
  0x40   :  { %1571 = vmatpush.bf16.msrb.mxu1 %v3684_v43  ;;  %v2744_v43 = vld [vmem:[%s5505_s0 + $0x64] sm:$0xf0] }
  0x41   :  { %1453 = vmatmul.bf16.gmra.mxu1 %v2903_v54  ;;  %1493 = vmatmul.bf16.gmra.mxu2 %v3063_v55  ;;  %v3303_v54 = vor.u32 %v3668_v49, %v3302_v48  ;;  %v2823_v55 = vor.u32 %v3548_v51, %v2822_v50  ;;  %v2758_v48 = vld [vmem:[%s5505_s0 + $0x60] sm:$0xf]  ;;  %v3530_v49 = vld [vmem:[%s5505_s0 + $0x70] sm:$0xf0] }
  0x42   :  { %1533 = vmatmul.bf16.gmra.mxu3 %v3223_v56  ;;  %v3002_v56 = vld [vmem:[%s5505_s0 + $0x258] sm:$0xf] }
  0x43   :  { %1413 = vmatmul.bf16.gmra.mxu0 %v2743_v57  ;;  %v3593_v57 = vld [vmem:[%s5505_s0 + $0x268] sm:$0xf0] }
  0x44   :  { %v3003_v0 = vor.u32 %v3593_v57, %v3002_v56  ;;  %v2759_v56 = vor.u32 %v3530_v49, %v2758_v48 }
  0x51   :  { %1458 = vmatmul.bf16.gmra.mxu1 %v2923_v6  ;;  %1498 = vmatmul.bf16.gmra.mxu2 %v3083_v7  ;;  %v2710_v6 = vld [vmem:[%s5505_s0 + $0x8] sm:$0xf]  ;;  %v3519_v7 = vld [vmem:[%s5505_s0 + $0x18] sm:$0xf0] }
  0x52   :  { %1538 = vmatmul.bf16.gmra.mxu3 %v3243_v8  ;;  %v3517_v8 = vld [vmem:[%s5505_s0 + $0xc] sm:$0xf]  ;;  %v2711_v13 = vor.u32 %v3519_v7, %v2710_v6 }
  0x53   :  { %1418 = vmatmul.bf16.gmra.mxu0 %v2763_v9  ;;  %v2712_v9 = vld [vmem:[%s5505_s0 + $0x1c] sm:$0xf0] }
  0x54   :  { %v2715_v15 = vor.u32 %v3517_v8, %v2712_v9  ;;  %v2767_v8 = vor.u32 %v3531_v62, %v2764_v63  ;;  %v2810_v62 = vld [vmem:[%s5505_s0 + $0xd0] sm:$0xf]  ;;  %v3544_v63 = vld [vmem:[%s5505_s0 + $0xe0] sm:$0xf0] }
  0x61   :  { %1463 = vmatmul.bf16.gmra.mxu1 %v2943_v21  ;;  %1503 = vmatmul.bf16.gmra.mxu2 %v3103_v22  ;;  %v3521_v22 = vld [vmem:[%s5505_s0 + $0x2c] sm:$0xf] }
  0x62   :  { %1543 = vmatmul.bf16.gmra.mxu3 %v3263_v23  ;;  %v2724_v23 = vld [vmem:[%s5505_s0 + $0x3c] sm:$0xf0] }
  0x63   :  { %1423 = vmatmul.bf16.gmra.mxu0 %v2783_v24  ;;  %v2730_v24 = vld [vmem:[%s5505_s0 + $0x30] sm:$0xf]  ;;  %v2727_v32 = vor.u32 %v3521_v22, %v2724_v23 }
  0x64   :  { %v2731_v33 = vor.u32 %v3524_v25, %v2730_v24  ;;  %v3536_v24 = vld [vmem:[%s5505_s0 + $0xa4] sm:$0xf]  ;;  %v2784_v25 = vld [vmem:[%s5505_s0 + $0xb4] sm:$0xf0] }
  0x71   :  { %1468 = vmatmul.bf16.gmra.mxu1 %v2963_v37  ;;  %1508 = vmatmul.bf16.gmra.mxu2 %v3123_v38 }
  0x72   :  { %1548 = vmatmul.bf16.gmra.mxu3 %v3283_v39 }
  0x73   :  { %1428 = vmatmul.bf16.gmra.mxu0 %v2803_v40 }
  0x81   :  { %1473 = vmatmul.bf16.gmra.mxu1 %v2983_v52  ;;  %1513 = vmatmul.bf16.gmra.mxu2 %v3143_v53  ;;  %v2747_v52 = vor.u32 %v3526_v42, %v2744_v43  ;;  %v2751_v53 = vor.u32 %v3529_v45, %v2750_v44  ;;  %v2787_v42 = vor.u32 %v3536_v24, %v2784_v25 }
  0x82   :  { %1553 = vmatmul.bf16.gmra.mxu3 %v3303_v54  ;;  %v2791_v43 = vor.u32 %v3539_v27, %v2790_v26  ;;  %v2795_v45 = vor.u32 %v3537_v28, %v2792_v29 }
  0x83   :  { %1433 = vmatmul.bf16.gmra.mxu0 %v2823_v55  ;;  %v2755_v55 = vor.u32 %v3527_v46, %v2752_v47 }
  0x91   :  { %1478 = vmatmul.bf16.gmra.mxu1 %v3003_v0  ;;  %1518 = vmatmul.bf16.gmra.mxu2 %v3163_v1  ;;  %v2770_v0 = vld [vmem:[%s5505_s0 + $0x80] sm:$0xf]  ;;  %v3534_v1 = vld [vmem:[%s5505_s0 + $0x90] sm:$0xf0] }
  0x92   :  { %1558 = vmatmul.bf16.gmra.mxu3 %v3323_v2  ;;  %v3532_v2 = vld [vmem:[%s5505_s0 + $0x84] sm:$0xf]  ;;  %v2771_v9 = vor.u32 %v3534_v1, %v2770_v0  ;;  %v3542_v0 = vld [vmem:[%s5505_s0 + $0xd4] sm:$0xf]  ;;  %v2812_v1 = vld [vmem:[%s5505_s0 + $0xe4] sm:$0xf0] }
  0x93   :  { %1438 = vmatmul.bf16.gmra.mxu0 %v2843_v3  ;;  %v2772_v3 = vld [vmem:[%s5505_s0 + $0x94] sm:$0xf0] }
  0x94   :  { %v2775_v11 = vor.u32 %v3532_v2, %v2772_v3  ;;  %v2818_v2 = vld [vmem:[%s5505_s0 + $0xd8] sm:$0xf]  ;;  %v3545_v3 = vld [vmem:[%s5505_s0 + $0xe8] sm:$0xf0] }
  0x95   :  { %v2819_v24 = vor.u32 %v3545_v3, %v2818_v2 }
  0x9e   :  { %v4282_v14 = vpop.f32.mrf.mxu1 }
  0xa0   :  { %v4284_v17 = vpop.f32.mrf.mxu0 }
  0xa1   :  { %1572 = vmatmul.bf16.vlgmr.msrb.gmra.mxu1 %v2707_v12  ;;  %1741 = vmatmul.bf16.vlgmr.msrb.gmra.mxu2 %v2711_v13  ;;  %v2779_v12 = vor.u32 %v3535_v5, %v2778_v4 }
  0xa2   :  { %1910 = vmatmul.bf16.vlgmr.msrb.gmra.mxu3 %v2715_v15 }
  0xa3   :  { %3484 = vmatmul.msk.bf16.vlgmr.msrb.gmra.mxu0 %vm1298_vm0, %v2719_v16 }
  0xa4   :  { %v4287_v18 = vpop.f32.mrf.mxu2 }
  0xa5   :  { %v4289_v19 = vpop.f32.mrf.mxu3 }
  0xa6   :  { %5509 = vst [vmem:[#allocation2_spill] sm:$0xff] %v4289_v19  ;;  %v4291_v20 = vpop.f32.mrf.mxu1 }
  0xa8   :  { %v4293_v21 = vpop.f32.mrf.mxu0 }
  0xac   :  { %v4319_v30 = vpop.f32.mrf.mxu2 }
  0xad   :  { %v4321_v31 = vpop.f32.mrf.mxu3 }
  0xae   :  { %5510 = vst [vmem:[#allocation3_spill] sm:$0xff] %v4321_v31  ;;  %v4323_v34 = vpop.f32.mrf.mxu1 }
  0xb0   :  { %v4325_v37 = vpop.f32.mrf.mxu0 }
  0xb1   :  { %1577 = vmatmul.bf16.gmra.mxu1 %v2727_v32  ;;  %1746 = vmatmul.bf16.gmra.mxu2 %v2731_v33  ;;  %v2798_v32 = vld [vmem:[%s5505_s0 + $0xb0] sm:$0xf]  ;;  %v3540_v33 = vld [vmem:[%s5505_s0 + $0xc0] sm:$0xf0] }
  0xb2   :  { %1915 = vmatmul.bf16.gmra.mxu3 %v2735_v35  ;;  %v2799_v46 = vor.u32 %v3540_v33, %v2798_v32  ;;  %v3546_v32 = vld [vmem:[%s5505_s0 + $0xf4] sm:$0xf]  ;;  %v2824_v33 = vld [vmem:[%s5505_s0 + $0x104] sm:$0xf0] }
  0xb3   :  { %3485 = vmatmul.msk.bf16.gmra.mxu0 %vm1298_vm0, %v2739_v36 }
  0xb4   :  { %v4328_v38 = vpop.f32.mrf.mxu2 }
  0xb5   :  { %v4330_v39 = vpop.f32.mrf.mxu3 }
  0xb6   :  { %5511 = vst [vmem:[#allocation4_spill] sm:$0xff] %v4330_v39  ;;  %v4332_v40 = vpop.f32.mrf.mxu1 }
  0xb8   :  { %v4334_v41 = vpop.f32.mrf.mxu0 }
  0xbc   :  { %v4360_v50 = vpop.f32.mrf.mxu2 }
  0xbd   :  { %v4362_v51 = vpop.f32.mrf.mxu3 }
  0xbe   :  { %5512 = vst [vmem:[#allocation5_spill] sm:$0xff] %v4362_v51  ;;  %v4364_v54 = vpop.f32.mrf.mxu1 }
  0xc0   :  { %v4366_v57 = vpop.f32.mrf.mxu0 }
  0xc1   :  { %1582 = vmatmul.bf16.gmra.mxu1 %v2747_v52  ;;  %1751 = vmatmul.bf16.gmra.mxu2 %v2751_v53 }
  0xc2   :  { %1920 = vmatmul.bf16.gmra.mxu3 %v2755_v55  ;;  %v3541_v55 = vld [vmem:[%s5505_s0 + $0xcc] sm:$0xf] }
  0xc3   :  { %3486 = vmatmul.msk.bf16.gmra.mxu0 %vm1298_vm0, %v2759_v56  ;;  %v2804_v56 = vld [vmem:[%s5505_s0 + $0xdc] sm:$0xf0] }
  0xc4   :  { %v4369_v58 = vpop.f32.mrf.mxu2 }
  0xc5   :  { %v4371_v59 = vpop.f32.mrf.mxu3 }
  0xc6   :  { %5513 = vst [vmem:[#allocation6_spill] sm:$0xff] %v4371_v59  ;;  %v4373_v60 = vpop.f32.mrf.mxu1 }
  0xc8   :  { %v4375_v61 = vpop.f32.mrf.mxu0 }
  0xcc   :  { %v4401_v6 = vpop.f32.mrf.mxu2 }
  0xcd   :  { %v4403_v7 = vpop.f32.mrf.mxu3 }
  0xce   :  { %5514 = vst [vmem:[#allocation7_spill] sm:$0xff] %v4403_v7  ;;  %v4405_v10 = vpop.f32.mrf.mxu1 }
  0xd0   :  { %v4407_v13 = vpop.f32.mrf.mxu0 }
  0xd1   :  { %1587 = vmatmul.bf16.gmra.mxu1 %v2767_v8  ;;  %1756 = vmatmul.bf16.gmra.mxu2 %v2771_v9  ;;  %v2807_v8 = vor.u32 %v3541_v55, %v2804_v56  ;;  %v2811_v9 = vor.u32 %v3544_v63, %v2810_v62  ;;  %v2838_v55 = vld [vmem:[%s5505_s0 + $0x100] sm:$0xf]  ;;  %v3550_v56 = vld [vmem:[%s5505_s0 + $0x110] sm:$0xf0] }
  0xd2   :  { %1925 = vmatmul.bf16.gmra.mxu3 %v2775_v11 }
  0xd3   :  { %3487 = vmatmul.msk.bf16.gmra.mxu0 %vm1298_vm0, %v2779_v12  ;;  %v2815_v12 = vor.u32 %v3542_v0, %v2812_v1  ;;  %v2827_v0 = vor.u32 %v3546_v32, %v2824_v33  ;;  %v3551_v32 = vld [vmem:[%s5505_s0 + $0x11c] sm:$0xf]  ;;  %v2844_v33 = vld [vmem:[%s5505_s0 + $0x12c] sm:$0xf0] }
  0xd4   :  { %v4410_v15 = vpop.f32.mrf.mxu2 }
  0xd5   :  { %v4412_v16 = vpop.f32.mrf.mxu3 }
  0xd6   :  { %5515 = vst [vmem:[#allocation8_spill] sm:$0xff] %v4412_v16  ;;  %v4414_v22 = vpop.f32.mrf.mxu1 }
  0xd8   :  { %v4416_v23 = vpop.f32.mrf.mxu0 }
  0xdc   :  { %v4442_v35 = vpop.f32.mrf.mxu2 }
  0xdd   :  { %v4444_v36 = vpop.f32.mrf.mxu3 }
  0xde   :  { %5516 = vst [vmem:[#allocation9_spill] sm:$0xff] %v4444_v36  ;;  %v4446_v44 = vpop.f32.mrf.mxu1 }
  0xe0   :  { %v4448_v47 = vpop.f32.mrf.mxu0 }
  0xe1   :  { %1592 = vmatmul.bf16.gmra.mxu1 %v2787_v42  ;;  %1761 = vmatmul.bf16.gmra.mxu2 %v2791_v43  ;;  %v2830_v42 = vld [vmem:[%s5505_s0 + $0xf8] sm:$0xf]  ;;  %v3549_v43 = vld [vmem:[%s5505_s0 + $0x108] sm:$0xf0] }
  0xe2   :  { %1930 = vmatmul.bf16.gmra.mxu3 %v2795_v45  ;;  %v3547_v45 = vld [vmem:[%s5505_s0 + $0xfc] sm:$0xf]  ;;  %v2831_v1 = vor.u32 %v3549_v43, %v2830_v42  ;;  %v2850_v42 = vld [vmem:[%s5505_s0 + $0x120] sm:$0xf]  ;;  %v3554_v43 = vld [vmem:[%s5505_s0 + $0x130] sm:$0xf0] }
  0xe3   :  { %3488 = vmatmul.msk.bf16.gmra.mxu0 %vm1298_vm0, %v2799_v46  ;;  %v2832_v46 = vld [vmem:[%s5505_s0 + $0x10c] sm:$0xf0] }
  0xe4   :  { %v4451_v48 = vpop.f32.mrf.mxu2  ;;  %v2835_v3 = vor.u32 %v3547_v45, %v2832_v46  ;;  %v3552_v45 = vld [vmem:[%s5505_s0 + $0x124] sm:$0xf]  ;;  %v2852_v46 = vld [vmem:[%s5505_s0 + $0x134] sm:$0xf0] }
  0xe5   :  { %5517 = vst [vmem:[#allocation10_spill] sm:$0xff] %v4451_v48  ;;  %v4453_v49 = vpop.f32.mrf.mxu3 }
  0xe6   :  { %5518 = vst [vmem:[#allocation11_spill] sm:$0xff] %v4453_v49  ;;  %v4455_v52 = vpop.f32.mrf.mxu1 }
  0xe8   :  { %v4457_v53 = vpop.f32.mrf.mxu0 }
  0xec   :  { %v4483_v4 = vpop.f32.mrf.mxu2 }
  0xed   :  { %5519 = vst [vmem:[#allocation12_spill] sm:$0xff] %v4483_v4  ;;  %v4485_v5 = vpop.f32.mrf.mxu3 }
  0xee   :  { %5520 = vst [vmem:[#allocation13_spill] sm:$0xff] %v4485_v5  ;;  %v4487_v11 = vpop.f32.mrf.mxu1  ;;  %v2855_v5 = vor.u32 %v3552_v45, %v2852_v46  ;;  %v2878_v45 = vld [vmem:[%s5505_s0 + $0x150] sm:$0xf]  ;;  %v3560_v46 = vld [vmem:[%s5505_s0 + $0x160] sm:$0xf0] }
  0xef   :  { %v2879_v39 = vor.u32 %v3560_v46, %v2878_v45 }
  0xf0   :  { %v4489_v25 = vpop.f32.mrf.mxu0 }
  0xf1   :  { %1597 = vmatmul.bf16.gmra.mxu1 %v2807_v8  ;;  %1766 = vmatmul.bf16.gmra.mxu2 %v2811_v9  ;;  %v2839_v8 = vor.u32 %v3550_v56, %v2838_v55  ;;  %v2858_v55 = vld [vmem:[%s5505_s0 + $0x128] sm:$0xf]  ;;  %v3555_v56 = vld [vmem:[%s5505_s0 + $0x138] sm:$0xf0] }
  0xf2   :  { %1935 = vmatmul.bf16.gmra.mxu3 %v2815_v12  ;;  %v2859_v49 = vor.u32 %v3555_v56, %v2858_v55 }
  0xf3   :  { %3489 = vmatmul.msk.bf16.gmra.mxu0 %vm1298_vm0, %v2819_v24 }
  0xf4   :  { %v4492_v26 = vpop.f32.mrf.mxu2 }
  0xf5   :  { %5521 = vst [vmem:[#allocation14_spill] sm:$0xff] %v4492_v26  ;;  %v4494_v27 = vpop.f32.mrf.mxu3 }
  0xf6   :  { %5522 = vst [vmem:[#allocation15_spill] sm:$0xff] %v4494_v27  ;;  %v4496_v28 = vpop.f32.mrf.mxu1 }
  0xf8   :  { %v4498_v29 = vpop.f32.mrf.mxu0 }
  0xfc   :  { %v4524_v62 = vpop.f32.mrf.mxu2 }
  0xfd   :  { %5523 = vst [vmem:[#allocation16_spill] sm:$0xff] %v4524_v62  ;;  %v4526_v63 = vpop.f32.mrf.mxu3 }
  0xfe   :  { %5524 = vst [vmem:[#allocation17_spill] sm:$0xff] %v4526_v63  ;;  %v4528_v2 = vpop.f32.mrf.mxu1 }
 0x100   :  { %v4530_v9 = vpop.f32.mrf.mxu0 }
 0x101   :  { %1602 = vmatmul.bf16.gmra.mxu1 %v2827_v0  ;;  %1771 = vmatmul.bf16.gmra.mxu2 %v2831_v1 }
 0x102   :  { %1940 = vmatmul.bf16.gmra.mxu3 %v2835_v3  ;;  %v2847_v3 = vor.u32 %v3551_v32, %v2844_v33  ;;  %v3556_v32 = vld [vmem:[%s5505_s0 + $0x144] sm:$0xf]  ;;  %v2864_v33 = vld [vmem:[%s5505_s0 + $0x154] sm:$0xf0] }
 0x103   :  { %3490 = vmatmul.msk.bf16.gmra.mxu0 %vm1298_vm0, %v2839_v8  ;;  %v2851_v8 = vor.u32 %v3554_v43, %v2850_v42  ;;  %v3557_v42 = vld [vmem:[%s5505_s0 + $0x14c] sm:$0xf]  ;;  %v2872_v43 = vld [vmem:[%s5505_s0 + $0x15c] sm:$0xf0] }
 0x104   :  { %v4533_v12 = vpop.f32.mrf.mxu2  ;;  %v2875_v51 = vor.u32 %v3557_v42, %v2872_v43 }
 0x105   :  { %5525 = vst [vmem:[#allocation18_spill] sm:$0xff] %v4533_v12  ;;  %v4535_v24 = vpop.f32.mrf.mxu3 }
 0x106   :  { %5526 = vst [vmem:[#allocation19_spill] sm:$0xff] %v4535_v24  ;;  %v4537_v27 = vpop.f32.mrf.mxu1 }
 0x108   :  { %v4539_v63 = vpop.f32.mrf.mxu0 }
 0x10c   :  { %v4565_v0 = vpop.f32.mrf.mxu2 }
 0x10d   :  { %5527 = vst [vmem:[#allocation20_spill] sm:$0xff] %v4565_v0  ;;  %v4567_v1 = vpop.f32.mrf.mxu3 }
 0x10e   :  { %5528 = vst [vmem:[#allocation21_spill] sm:$0xff] %v4567_v1  ;;  %v4569_v24 = vpop.f32.mrf.mxu1 }
 0x110   :  { %v4571_v36 = vpop.f32.mrf.mxu0 }
 0x111   :  { %1607 = vmatmul.bf16.gmra.mxu1 %v2847_v3  ;;  %1776 = vmatmul.bf16.gmra.mxu2 %v2851_v8  ;;  %v2867_v3 = vor.u32 %v3556_v32, %v2864_v33  ;;  %v4615_v32 = vld [vmem:[%s5506_s2] ss:$0 sm:$0xff] }
 0x112   :  { %1945 = vmatmul.bf16.gmra.mxu3 %v2855_v5  ;;  %v3559_v5 = vld [vmem:[%s5505_s0 + $0x158] sm:$0xf0] }
 0x113   :  { %3491 = vmatmul.msk.bf16.gmra.mxu0 %vm1298_vm0, %v2859_v49  ;;  %v2870_v49 = vld [vmem:[%s5505_s0 + $0x148] sm:$0xf] }
 0x114   :  { %v4574_v16 = vpop.f32.mrf.mxu2  ;;  %v2871_v8 = vor.u32 %v3559_v5, %v2870_v49  ;;  %v4646_v5 = vld [vmem:[%s5507_s3] ss:$0 sm:$0xff] }
 0x115   :  { %5529 = vst [vmem:[#allocation22_spill] sm:$0xff] %v4574_v16  ;;  %v4576_v7 = vpop.f32.mrf.mxu3 }
 0x116   :  { %5530 = vst [vmem:[#allocation23_spill] sm:$0xff] %v4576_v7  ;;  %v4578_v59 = vpop.f32.mrf.mxu1 }
 0x118   :  { %v4580_v1 = vpop.f32.mrf.mxu0 }
 0x11c   :  { %v4606_v55 = vpop.f32.mrf.mxu2 }
 0x11d   :  { %5531 = vst [vmem:[#allocation24_spill] sm:$0xff] %v4606_v55  ;;  %v4608_v56 = vpop.f32.mrf.mxu3 }
 0x11e   :  { %5532 = vst [vmem:[#allocation25_spill] sm:$0xff] %v4608_v56  ;;  %v1573_v7 = vpop.f32.mrf.mxu1 }
 0x11f   :  { %v1574_v19 = vadd.f32 %v1573_v7, %v4284_v17  ;;  %v2884_v17 = vld [vmem:[%s5505_s0 + $0x17c] sm:$0xf0] }
 0x120   :  { %v2080_v31 = vpop.f32.mrf.mxu0 }
 0x121   :  { %1612 = vmatmul.bf16.gmra.mxu1 %v2867_v3  ;;  %1781 = vmatmul.bf16.gmra.mxu2 %v2871_v8 }
 0x122   :  { %1950 = vmatmul.bf16.gmra.mxu3 %v2875_v51  ;;  %v3561_v51 = vld [vmem:[%s5505_s0 + $0x16c] sm:$0xf] }
 0x123   :  { %3492 = vmatmul.msk.bf16.gmra.mxu0 %vm1298_vm0, %v2879_v39  ;;  %v3562_v39 = vld [vmem:[%s5505_s0 + $0x174] sm:$0xf]  ;;  %v2887_v42 = vor.u32 %v3561_v51, %v2884_v17 }
 0x124   :  { %v1742_v16 = vpop.f32.mrf.mxu2 }
 0x125   :  { %v1743_v0 = vadd.f32 %v1742_v16, %v1574_v19  ;;  %v1911_v12 = vpop.f32.mrf.mxu3  ;;  %v2890_v19 = vld [vmem:[%s5505_s0 + $0x170] sm:$0xf]  ;;  %v2892_v16 = vld [vmem:[%s5505_s0 + $0x184] sm:$0xf0] }
 0x126   :  { %v1575_v62 = vpop.f32.mrf.mxu1  ;;  %v2895_v46 = vor.u32 %v3562_v39, %v2892_v16 }
 0x127   :  { %v1912_v55 = vadd.f32 %v1911_v12, %v1743_v0  ;;  %v1576_v7 = vadd.f32 %v1575_v62, %v4293_v21  ;;  %v2898_v12 = vld [vmem:[%s5505_s0 + $0x178] sm:$0xf]  ;;  %v3565_v0 = vld [vmem:[%s5505_s0 + $0x188] sm:$0xf0] }
 0x128   :  { %v2082_v26 = vpop.f32.mrf.mxu0 }
 0x129   :  { %v2081_v56 = vadd.f32 %v2080_v31, %v1912_v55  ;;  %v3564_v31 = vld [vmem:[%s5505_s0 + $0x180] sm:$0xf0]  ;;  %v2899_v55 = vor.u32 %v3565_v0, %v2898_v12 }
 0x12a   :  { %v2891_v43 = vor.u32 %v3564_v31, %v2890_v19 }
 0x12b   :  { %v2244_v49 = vmul.f32 %v4615_v32, %v2081_v56 }
 0x12c   :  { %v1744_v33 = vpop.f32.mrf.mxu2 }
 0x12d   :  { %v1745_v21 = vadd.f32 %v1744_v33, %v1576_v7  ;;  %v1913_v62 = vpop.f32.mrf.mxu3  ;;  %v2312_v4 = vadd.f32 %v4646_v5, %v2244_v49 }
 0x12e   :  { %v1578_v45 = vpop.f32.mrf.mxu1 }
 0x12f   :  { %v1914_v3 = vadd.f32 %v1913_v62, %v1745_v21  ;;  %v1579_v7 = vadd.f32 %v1578_v45, %v4325_v37  ;;  %v2440_v51 = vmul.f32 0.2, %v2312_v4  ;;  %vm2376_vm1 = vcmp.gt.f32.partialorder %v2312_v4, 0.0  ;;  %v2904_v37 = vld [vmem:[%s5505_s0 + $0x1a4] sm:$0xf0] }
 0x130   :  { %v2085_v8 = vpop.f32.mrf.mxu0 }
 0x131   :  { %v2083_v48 = vadd.f32 %v2082_v26, %v1914_v3  ;;  %1617 = vmatmul.bf16.gmra.mxu1 %v2887_v42  ;;  %1786 = vmatmul.bf16.gmra.mxu2 %v2891_v43  ;;  %v2504_v0 = vsel %vm2376_vm1, %v2312_v4, %v2440_v51  ;;  %v2910_v42 = vld [vmem:[%s5505_s0 + $0x198] sm:$0xf]  ;;  %v3569_v43 = vld [vmem:[%s5505_s0 + $0x1a8] sm:$0xf0]  ;;  %v3567_v4 = vld [vmem:[%s5505_s0 + $0x19c] sm:$0xf] }
 0x132   :  { %1955 = vmatmul.bf16.gmra.mxu3 %v2895_v46  ;;  %v2912_v46 = vld [vmem:[%s5505_s0 + $0x1ac] sm:$0xf0]  ;;  %v3570_v3 = vld [vmem:[%s5505_s0 + $0x1b0] sm:$0xf0]  ;;  %v2911_v51 = vor.u32 %v3569_v43, %v2910_v42 }
 0x133   :  { %3493 = vmatmul.msk.bf16.gmra.mxu0 %vm1298_vm0, %v2899_v55  ;;  %v2245_v56 = vmul.f32 %v4615_v32, %v2083_v48  ;;  %v3566_v48 = vld [vmem:[%s5505_s0 + $0x194] sm:$0xf]  ;;  %v2918_v55 = vld [vmem:[%s5505_s0 + $0x1a0] sm:$0xf] }
 0x134   :  { %v1747_v33 = vpop.f32.mrf.mxu2 }
 0x135   :  { %v2313_v17 = vadd.f32 %v4646_v5, %v2245_v56  ;;  %v1748_v19 = vadd.f32 %v1747_v33, %v1579_v7  ;;  %v1916_v31 = vpop.f32.mrf.mxu3  ;;  %v2907_v33 = vor.u32 %v3566_v48, %v2904_v37 }
 0x136   :  { %v1580_v39 = vpop.f32.mrf.mxu1 }
 0x137   :  { %vm2377_vm2 = vcmp.gt.f32.partialorder %v2313_v17, 0.0  ;;  %v2441_v16 = vmul.f32 0.2, %v2313_v17  ;;  %v1917_v26 = vadd.f32 %v1916_v31, %v1748_v19  ;;  %v1581_v45 = vadd.f32 %v1580_v39, %v4334_v41 }
 0x138   :  { %v2087_v12 = vpop.f32.mrf.mxu0  ;;  %v2915_v19 = vor.u32 %v3567_v4, %v2912_v46  ;;  %v2919_v31 = vor.u32 %v3570_v3, %v2918_v55 }
 0x139   :  { %v2505_v49 = vsel %vm2377_vm2, %v2313_v17, %v2441_v16  ;;  %v2086_v21 = vadd.f32 %v2085_v8, %v1917_v26 }
 0x13a   :  { %v3715_v62 = vpack.c.bf16 %v2505_v49, %v2504_v0 }
 0x13b   :  { %v2246_v56 = vmul.f32 %v4615_v32, %v2086_v21 }
 0x13c   :  { %3716 = vst [vmem:[%s5508_s4] sm:$0xff] %v3715_v62   ;;  %v1749_v8 = vpop.f32.mrf.mxu2 }
 0x13d   :  { %v1750_v41 = vadd.f32 %v1749_v8, %v1581_v45  ;;  %v1918_v7 = vpop.f32.mrf.mxu3  ;;  %v2314_v26 = vadd.f32 %v4646_v5, %v2246_v56  ;;  %v3571_v56 = vld [vmem:[%s5505_s0 + $0x1bc] sm:$0xf] }
 0x13e   :  { %v1583_v17 = vpop.f32.mrf.mxu1 }
 0x13f   :  { %v1919_v39 = vadd.f32 %v1918_v7, %v1750_v41  ;;  %v1584_v21 = vadd.f32 %v1583_v17, %v4366_v57  ;;  %v2442_v48 = vmul.f32 0.2, %v2314_v26  ;;  %vm2378_vm3 = vcmp.gt.f32.partialorder %v2314_v26, 0.0  ;;  %v2924_v57 = vld [vmem:[%s5505_s0 + $0x1cc] sm:$0xf0] }
 0x140   :  { %v2090_v16 = vpop.f32.mrf.mxu0  ;;  %v2930_v7 = vld [vmem:[%s5505_s0 + $0x1c0] sm:$0xf] }
 0x141   :  { %v2088_v0 = vadd.f32 %v2087_v12, %v1919_v39  ;;  %1622 = vmatmul.bf16.gmra.mxu1 %v2907_v33  ;;  %1791 = vmatmul.bf16.gmra.mxu2 %v2911_v51  ;;  %v2506_v55 = vsel %vm2378_vm3, %v2314_v26, %v2442_v48  ;;  %v3574_v33 = vld [vmem:[%s5505_s0 + $0x1d0] sm:$0xf0]  ;;  %v3572_v51 = vld [vmem:[%s5505_s0 + $0x1c4] sm:$0xf]  ;;  %v3575_v39 = vld [vmem:[%s5505_s0 + $0x1d8] sm:$0xf0] }
 0x142   :  { %1960 = vmatmul.bf16.gmra.mxu3 %v2915_v19  ;;  %v2932_v19 = vld [vmem:[%s5505_s0 + $0x1d4] sm:$0xf0] }
 0x143   :  { %3494 = vmatmul.msk.bf16.gmra.mxu0 %vm1298_vm0, %v2919_v31  ;;  %v2247_v49 = vmul.f32 %v4615_v32, %v2088_v0  ;;  %v2938_v31 = vld [vmem:[%s5505_s0 + $0x1c8] sm:$0xf]  ;;  %v2935_v48 = vor.u32 %v3572_v51, %v2932_v19 }
 0x144   :  { %v1752_v62 = vpop.f32.mrf.mxu2 }
 0x145   :  { %v2315_v37 = vadd.f32 %v4646_v5, %v2247_v49  ;;  %v1753_v42 = vadd.f32 %v1752_v62, %v1584_v21  ;;  %v1921_v43 = vpop.f32.mrf.mxu3  ;;  %v2927_v49 = vor.u32 %v3571_v56, %v2924_v57  ;;  %v2931_v21 = vor.u32 %v3574_v33, %v2930_v7 }
 0x146   :  { %v1585_v4 = vpop.f32.mrf.mxu1 }
 0x147   :  { %vm2379_vm4 = vcmp.gt.f32.partialorder %v2315_v37, 0.0  ;;  %v2443_v45 = vmul.f32 0.2, %v2315_v37  ;;  %v1922_v12 = vadd.f32 %v1921_v43, %v1753_v42  ;;  %v1586_v17 = vadd.f32 %v1585_v4, %v4375_v61 }
 0x148   :  { %v2092_v46 = vpop.f32.mrf.mxu0 }
 0x149   :  { %v2507_v3 = vsel %vm2379_vm4, %v2315_v37, %v2443_v45  ;;  %v2091_v8 = vadd.f32 %v2090_v16, %v1922_v12  ;;  %v2939_v37 = vor.u32 %v3575_v39, %v2938_v31  ;;  %v3576_v39 = vld [vmem:[%s5505_s0 + $0x1e4] sm:$0xf] }
 0x14a   :  { %v3720_v41 = vpack.c.bf16 %v2507_v3, %v2506_v55 }
 0x14b   :  { %v2248_v26 = vmul.f32 %v4615_v32, %v2091_v8 }
 0x14c   :  { %3872 = vst [vmem:[%s5508_s4 + $0x8] sm:$0xff] %v3720_v41   ;;  %v1754_v16 = vpop.f32.mrf.mxu2 }
 0x14d   :  { %v1755_v61 = vadd.f32 %v1754_v16, %v1586_v17  ;;  %v1923_v0 = vpop.f32.mrf.mxu3  ;;  %v2316_v4 = vadd.f32 %v4646_v5, %v2248_v26  ;;  %v2950_v26 = vld [vmem:[%s5505_s0 + $0x1e8] sm:$0xf] }
 0x14e   :  { %v1588_v62 = vpop.f32.mrf.mxu1 }
 0x14f   :  { %v1924_v42 = vadd.f32 %v1923_v0, %v1755_v61  ;;  %v1589_v55 = vadd.f32 %v1588_v62, %v4407_v13  ;;  %v2444_v8 = vmul.f32 0.2, %v2316_v4  ;;  %vm2380_vm5 = vcmp.gt.f32.partialorder %v2316_v4, 0.0  ;;  %v2944_v13 = vld [vmem:[%s5505_s0 + $0x1f4] sm:$0xf0] }
 0x150   :  { %v2095_v43 = vpop.f32.mrf.mxu0  ;;  %v3579_v61 = vld [vmem:[%s5505_s0 + $0x1f8] sm:$0xf0]  ;;  %v3577_v0 = vld [vmem:[%s5505_s0 + $0x1ec] sm:$0xf]  ;;  %v2958_v62 = vld [vmem:[%s5505_s0 + $0x1f0] sm:$0xf] }
 0x151   :  { %v2093_v45 = vadd.f32 %v2092_v46, %v1924_v42  ;;  %1627 = vmatmul.bf16.gmra.mxu1 %v2927_v49  ;;  %1796 = vmatmul.bf16.gmra.mxu2 %v2931_v21  ;;  %v2508_v17 = vsel %vm2380_vm5, %v2316_v4, %v2444_v8  ;;  %v2952_v21 = vld [vmem:[%s5505_s0 + $0x1fc] sm:$0xf0]  ;;  %v2947_v4 = vor.u32 %v3576_v39, %v2944_v13 }
 0x152   :  { %1965 = vmatmul.bf16.gmra.mxu3 %v2935_v48  ;;  %v3580_v48 = vld [vmem:[%s5505_s0 + $0x200] sm:$0xf0] }
 0x153   :  { %3495 = vmatmul.msk.bf16.gmra.mxu0 %vm1298_vm0, %v2939_v37  ;;  %v2249_v12 = vmul.f32 %v4615_v32, %v2093_v45  ;;  %v2951_v45 = vor.u32 %v3579_v61, %v2950_v26 }
 0x154   :  { %v1757_v3 = vpop.f32.mrf.mxu2 }
 0x155   :  { %v2317_v56 = vadd.f32 %v4646_v5, %v2249_v12  ;;  %v1758_v57 = vadd.f32 %v1757_v3, %v1589_v55  ;;  %v1926_v41 = vpop.f32.mrf.mxu3  ;;  %v2955_v55 = vor.u32 %v3577_v0, %v2952_v21  ;;  %v2959_v3 = vor.u32 %v3580_v48, %v2958_v62  ;;  %v3581_v21 = vld [vmem:[%s5505_s0 + $0x20c] sm:$0xf]  ;;  %v2970_v48 = vld [vmem:[%s5505_s0 + $0x210] sm:$0xf] }
 0x156   :  { %v1590_v7 = vpop.f32.mrf.mxu1 }
 0x157   :  { %vm2381_vm6 = vcmp.gt.f32.partialorder %v2317_v56, 0.0  ;;  %v2445_v33 = vmul.f32 0.2, %v2317_v56  ;;  %v1927_v46 = vadd.f32 %v1926_v41, %v1758_v57  ;;  %v1591_v49 = vadd.f32 %v1590_v7, %v4416_v23 }
 0x158   :  { %v2097_v51 = vpop.f32.mrf.mxu0 }
 0x159   :  { %v2509_v19 = vsel %vm2381_vm6, %v2317_v56, %v2445_v33  ;;  %v2096_v31 = vadd.f32 %v2095_v43, %v1927_v46 }
 0x15a   :  { %v3725_v16 = vpack.c.bf16 %v2509_v19, %v2508_v17 }
 0x15b   :  { %v2250_v42 = vmul.f32 %v4615_v32, %v2096_v31 }
 0x15c   :  { %3873 = vst [vmem:[%s5508_s4 + $0x10] sm:$0xff] %v3725_v16   ;;  %v1759_v37 = vpop.f32.mrf.mxu2 }
 0x15d   :  { %v1760_v23 = vadd.f32 %v1759_v37, %v1591_v49  ;;  %v1928_v43 = vpop.f32.mrf.mxu3  ;;  %v2318_v57 = vadd.f32 %v4646_v5, %v2250_v42  ;;  %v3584_v37 = vld [vmem:[%s5505_s0 + $0x220] sm:$0xf0]  ;;  %v3582_v42 = vld [vmem:[%s5505_s0 + $0x214] sm:$0xf] }
 0x15e   :  { %v1593_v12 = vpop.f32.mrf.mxu1 }
 0x15f   :  { %v1929_v8 = vadd.f32 %v1928_v43, %v1760_v23  ;;  %v1594_v33 = vadd.f32 %v1593_v12, %v4448_v47  ;;  %v2446_v17 = vmul.f32 0.2, %v2318_v57  ;;  %vm2382_vm7 = vcmp.gt.f32.partialorder %v2318_v57, 0.0  ;;  %v2964_v47 = vld [vmem:[%s5505_s0 + $0x21c] sm:$0xf0] }
 0x160   :  { %v2100_v56 = vpop.f32.mrf.mxu0  ;;  %v2972_v43 = vld [vmem:[%s5505_s0 + $0x224] sm:$0xf0] }
 0x161   :  { %v2098_v41 = vadd.f32 %v2097_v51, %v1929_v8  ;;  %1632 = vmatmul.bf16.gmra.mxu1 %v2947_v4  ;;  %1801 = vmatmul.bf16.gmra.mxu2 %v2951_v45  ;;  %v2510_v61 = vsel %vm2382_vm7, %v2318_v57, %v2446_v17  ;;  %v2978_v4 = vld [vmem:[%s5505_s0 + $0x218] sm:$0xf]  ;;  %v3585_v45 = vld [vmem:[%s5505_s0 + $0x228] sm:$0xf0]  ;;  %v2967_v8 = vor.u32 %v3581_v21, %v2964_v47 }
 0x162   :  { %1970 = vmatmul.bf16.gmra.mxu3 %v2955_v55 }
 0x163   :  { %3496 = vmatmul.msk.bf16.gmra.mxu0 %vm1298_vm0, %v2959_v3  ;;  %v2251_v7 = vmul.f32 %v4615_v32, %v2098_v41  ;;  %v2975_v41 = vor.u32 %v3582_v42, %v2972_v43  ;;  %v3586_v42 = vld [vmem:[%s5505_s0 + $0x234] sm:$0xf]  ;;  %v2990_v43 = vld [vmem:[%s5505_s0 + $0x238] sm:$0xf] }
 0x164   :  { %v1762_v46 = vpop.f32.mrf.mxu2 }
 0x165   :  { %v2319_v19 = vadd.f32 %v4646_v5, %v2251_v7  ;;  %v1763_v31 = vadd.f32 %v1762_v46, %v1594_v33  ;;  %v1931_v39 = vpop.f32.mrf.mxu3  ;;  %v2979_v7 = vor.u32 %v3585_v45, %v2978_v4  ;;  %v3589_v4 = vld [vmem:[%s5505_s0 + $0x248] sm:$0xf0]  ;;  %v3587_v45 = vld [vmem:[%s5505_s0 + $0x23c] sm:$0xf] }
 0x166   :  { %v1595_v13 = vpop.f32.mrf.mxu1 }
 0x167   :  { %vm2383_vm8 = vcmp.gt.f32.partialorder %v2319_v19, 0.0  ;;  %v2447_v16 = vmul.f32 0.2, %v2319_v19  ;;  %v1932_v51 = vadd.f32 %v1931_v39, %v1763_v31  ;;  %v1596_v23 = vadd.f32 %v1595_v13, %v4457_v53 }
 0x168   :  { %v2102_v26 = vpop.f32.mrf.mxu0 }
 0x169   :  { %v2511_v0 = vsel %vm2383_vm8, %v2319_v19, %v2447_v16  ;;  %v2101_v49 = vadd.f32 %v2100_v56, %v1932_v51  ;;  %v2971_v56 = vor.u32 %v3584_v37, %v2970_v48 }
 0x16a   :  { %v3730_v62 = vpack.c.bf16 %v2511_v0, %v2510_v61 }
 0x16b   :  { %v2252_v55 = vmul.f32 %v4615_v32, %v2101_v49 }
 0x16c   :  { %3874 = vst [vmem:[%s5508_s4 + $0x18] sm:$0xff] %v3730_v62   ;;  %v1764_v12 = vpop.f32.mrf.mxu2 }
 0x16d   :  { %v1765_v53 = vadd.f32 %v1764_v12, %v1596_v23  ;;  %v1933_v3 = vpop.f32.mrf.mxu3  ;;  %v2320_v17 = vadd.f32 %v4646_v5, %v2252_v55  ;;  %v2992_v55 = vld [vmem:[%s5505_s0 + $0x24c] sm:$0xf0] }
 0x16e   :  { %v1598_v57 = vpop.f32.mrf.mxu1 }
 0x16f   :  { %v1934_v33 = vadd.f32 %v1933_v3, %v1765_v53  ;;  %v1599_v39 = vadd.f32 %v1598_v57, %v4489_v25  ;;  %v2448_v16 = vmul.f32 0.2, %v2320_v17  ;;  %vm2384_vm9 = vcmp.gt.f32.partialorder %v2320_v17, 0.0  ;;  %v2984_v25 = vld [vmem:[%s5505_s0 + $0x244] sm:$0xf0] }
 0x170   :  { %v2105_v46 = vpop.f32.mrf.mxu0  ;;  %v2998_v53 = vld [vmem:[%s5505_s0 + $0x240] sm:$0xf]  ;;  %v3590_v3 = vld [vmem:[%s5505_s0 + $0x250] sm:$0xf0] }
 0x171   :  { %v2103_v19 = vadd.f32 %v2102_v26, %v1934_v33  ;;  %1637 = vmatmul.bf16.gmra.mxu1 %v2967_v8  ;;  %1806 = vmatmul.bf16.gmra.mxu2 %v2971_v56  ;;  %v2512_v62 = vsel %vm2384_vm9, %v2320_v17, %v2448_v16  ;;  %v2999_v17 = vor.u32 %v3590_v3, %v2998_v53  ;;  %v3012_v3 = vld [vmem:[%s5505_s0 + $0x274] sm:$0xf0] }
 0x172   :  { %1975 = vmatmul.bf16.gmra.mxu3 %v2975_v41  ;;  %v2987_v41 = vor.u32 %v3586_v42, %v2984_v25 }
 0x173   :  { %3497 = vmatmul.msk.bf16.gmra.mxu0 %vm1298_vm0, %v2979_v7  ;;  %v2253_v31 = vmul.f32 %v4615_v32, %v2103_v19  ;;  %v2991_v7 = vor.u32 %v3589_v4, %v2990_v43  ;;  %v3591_v43 = vld [vmem:[%s5505_s0 + $0x25c] sm:$0xf] }
 0x174   :  { %v1767_v13 = vpop.f32.mrf.mxu2 }
 0x175   :  { %v2321_v51 = vadd.f32 %v4646_v5, %v2253_v31  ;;  %v1768_v61 = vadd.f32 %v1767_v13, %v1599_v39  ;;  %v1936_v0 = vpop.f32.mrf.mxu3 }
 0x176   :  { %v1600_v49 = vpop.f32.mrf.mxu1 }
 0x177   :  { %vm2385_vm10 = vcmp.gt.f32.partialorder %v2321_v51, 0.0  ;;  %v2449_v21 = vmul.f32 0.2, %v2321_v51  ;;  %v1937_v26 = vadd.f32 %v1936_v0, %v1768_v61  ;;  %v1601_v12 = vadd.f32 %v1600_v49, %v4498_v29 }
 0x178   :  { %v2107_v47 = vpop.f32.mrf.mxu0 }
 0x179   :  { %v2513_v48 = vsel %vm2385_vm10, %v2321_v51, %v2449_v21  ;;  %v2106_v37 = vadd.f32 %v2105_v46, %v1937_v26  ;;  %v2995_v46 = vor.u32 %v3587_v45, %v2992_v55  ;;  %v3010_v45 = vld [vmem:[%s5505_s0 + $0x260] sm:$0xf]  ;;  %v3592_v55 = vld [vmem:[%s5505_s0 + $0x264] sm:$0xf] }
 0x17a   :  { %v3735_v23 = vpack.c.bf16 %v2513_v48, %v2512_v62 }
 0x17b   :  { %v2254_v56 = vmul.f32 %v4615_v32, %v2106_v37 }
 0x17c   :  { %3875 = vst [vmem:[%s5508_s4 + $0x20] sm:$0xff] %v3735_v23   ;;  %v1769_v8 = vpop.f32.mrf.mxu2 }
 0x17d   :  { %v1770_v29 = vadd.f32 %v1769_v8, %v1601_v12  ;;  %v1938_v57 = vpop.f32.mrf.mxu3  ;;  %v2322_v39 = vadd.f32 %v4646_v5, %v2254_v56  ;;  %v3594_v12 = vld [vmem:[%s5505_s0 + $0x270] sm:$0xf0]  ;;  %v3018_v8 = vld [vmem:[%s5505_s0 + $0x268] sm:$0xf]  ;;  %v3595_v56 = vld [vmem:[%s5505_s0 + $0x278] sm:$0xf0] }
 0x17e   :  { %v1603_v33 = vpop.f32.mrf.mxu1 }
 0x17f   :  { %v1939_v19 = vadd.f32 %v1938_v57, %v1770_v29  ;;  %v1604_v51 = vadd.f32 %v1603_v33, %v4530_v9  ;;  %v2450_v0 = vmul.f32 0.2, %v2322_v39  ;;  %vm2386_vm11 = vcmp.gt.f32.partialorder %v2322_v39, 0.0  ;;  %v3004_v9 = vld [vmem:[%s5505_s0 + $0x26c] sm:$0xf0] }
 0x180   :  { %v2110_v31 = vpop.f32.mrf.mxu0  ;;  %v3011_v33 = vor.u32 %v3594_v12, %v3010_v45  ;;  %v3030_v45 = vld [vmem:[%s5505_s0 + $0x288] sm:$0xf]  ;;  %v3599_v12 = vld [vmem:[%s5505_s0 + $0x298] sm:$0xf0] }
 0x181   :  { %v2108_v13 = vadd.f32 %v2107_v47, %v1939_v19  ;;  %1642 = vmatmul.bf16.gmra.mxu1 %v2987_v41  ;;  %1811 = vmatmul.bf16.gmra.mxu2 %v2991_v7  ;;  %v2514_v42 = vsel %vm2386_vm11, %v2322_v39, %v2450_v0  ;;  %v3007_v7 = vor.u32 %v3591_v43, %v3004_v9  ;;  %v3596_v9 = vld [vmem:[%s5505_s0 + $0x284] sm:$0xf] }
 0x182   :  { %1980 = vmatmul.bf16.gmra.mxu3 %v2995_v46  ;;  %v3019_v19 = vor.u32 %v3595_v56, %v3018_v8  ;;  %v3038_v8 = vld [vmem:[%s5505_s0 + $0x290] sm:$0xf]  ;;  %v3600_v56 = vld [vmem:[%s5505_s0 + $0x2a0] sm:$0xf0] }
 0x183   :  { %3498 = vmatmul.msk.bf16.gmra.mxu0 %vm1298_vm0, %v2999_v17  ;;  %v2255_v16 = vmul.f32 %v4615_v32, %v2108_v13  ;;  %v3015_v17 = vor.u32 %v3592_v55, %v3012_v3  ;;  %v3597_v55 = vld [vmem:[%s5505_s0 + $0x28c] sm:$0xf]  ;;  %v3032_v3 = vld [vmem:[%s5505_s0 + $0x29c] sm:$0xf0] }
 0x184   :  { %v1772_v61 = vpop.f32.mrf.mxu2 }
 0x185   :  { %v2323_v49 = vadd.f32 %v4646_v5, %v2255_v16  ;;  %v1773_v21 = vadd.f32 %v1772_v61, %v1604_v51  ;;  %v1941_v26 = vpop.f32.mrf.mxu3 }
 0x186   :  { %v1605_v62 = vpop.f32.mrf.mxu1 }
 0x187   :  { %vm2387_vm12 = vcmp.gt.f32.partialorder %v2323_v49, 0.0  ;;  %v2451_v48 = vmul.f32 0.2, %v2323_v49  ;;  %v1942_v47 = vadd.f32 %v1941_v26, %v1773_v21  ;;  %v1606_v53 = vadd.f32 %v1605_v62, %v4539_v63 }
 0x188   :  { %v2112_v37 = vpop.f32.mrf.mxu0 }
 0x189   :  { %v2515_v25 = vsel %vm2387_vm12, %v2323_v49, %v2451_v48  ;;  %v2111_v23 = vadd.f32 %v2110_v31, %v1942_v47 }
 0x18a   :  { %v3740_v4 = vpack.c.bf16 %v2515_v25, %v2514_v42 }
 0x18b   :  { %v2256_v57 = vmul.f32 %v4615_v32, %v2111_v23 }
 0x18c   :  { %3876 = vst [vmem:[%s5508_s4 + $0x28] sm:$0xff] %v3740_v4   ;;  %v1774_v29 = vpop.f32.mrf.mxu2 }
 0x18d   :  { %v1775_v63 = vadd.f32 %v1774_v29, %v1606_v53  ;;  %v1943_v41 = vpop.f32.mrf.mxu3  ;;  %v2324_v13 = vadd.f32 %v4646_v5, %v2256_v57 }
 0x18e   :  { %v1608_v46 = vpop.f32.mrf.mxu1 }
 0x18f   :  { %v1944_v31 = vadd.f32 %v1943_v41, %v1775_v63  ;;  %v1609_v61 = vadd.f32 %v1608_v46, %v4571_v36  ;;  %v2452_v49 = vmul.f32 0.2, %v2324_v13  ;;  %vm2388_vm13 = vcmp.gt.f32.partialorder %v2324_v13, 0.0  ;;  %v3024_v36 = vld [vmem:[%s5505_s0 + $0x294] sm:$0xf0] }
 0x190   :  { %v2115_v39 = vpop.f32.mrf.mxu0  ;;  %v3027_v41 = vor.u32 %v3596_v9, %v3024_v36  ;;  %v3035_v46 = vor.u32 %v3597_v55, %v3032_v3  ;;  %v3050_v36 = vld [vmem:[%s5505_s0 + $0x2b0] sm:$0xf]  ;;  %v3052_v55 = vld [vmem:[%s5505_s0 + $0x2c4] sm:$0xf0]  ;;  %v3605_v3 = vld [vmem:[%s5505_s0 + $0x2c8] sm:$0xf0] }
 0x191   :  { %v2113_v16 = vadd.f32 %v2112_v37, %v1944_v31  ;;  %1647 = vmatmul.bf16.gmra.mxu1 %v3007_v7  ;;  %1816 = vmatmul.bf16.gmra.mxu2 %v3011_v33  ;;  %v2516_v25 = vsel %vm2388_vm13, %v2324_v13, %v2452_v49  ;;  %v3031_v7 = vor.u32 %v3599_v12, %v3030_v45  ;;  %v3602_v45 = vld [vmem:[%s5505_s0 + $0x2b4] sm:$0xf] }
 0x192   :  { %1985 = vmatmul.bf16.gmra.mxu3 %v3015_v17  ;;  %v3039_v17 = vor.u32 %v3600_v56, %v3038_v8 }
 0x193   :  { %3499 = vmatmul.msk.bf16.gmra.mxu0 %vm1298_vm0, %v3019_v19  ;;  %v2257_v51 = vmul.f32 %v4615_v32, %v2113_v16 }
 0x194   :  { %v1777_v0 = vpop.f32.mrf.mxu2 }
 0x195   :  { %v2325_v21 = vadd.f32 %v4646_v5, %v2257_v51  ;;  %v1778_v26 = vadd.f32 %v1777_v0, %v1609_v61  ;;  %v1946_v62 = vpop.f32.mrf.mxu3 }
 0x196   :  { %v1610_v48 = vpop.f32.mrf.mxu1 }
 0x197   :  { %vm2389_vm14 = vcmp.gt.f32.partialorder %v2325_v21, 0.0  ;;  %v2453_v47 = vmul.f32 0.2, %v2325_v21  ;;  %v1947_v37 = vadd.f32 %v1946_v62, %v1778_v26  ;;  %v1611_v53 = vadd.f32 %v1610_v48, %v4580_v1 }
 0x198   :  { %v2117_v42 = vpop.f32.mrf.mxu0 }
 0x199   :  { %v2517_v23 = vsel %vm2389_vm14, %v2325_v21, %v2453_v47  ;;  %v2116_v43 = vadd.f32 %v2115_v39, %v1947_v37 }
 0x19a   :  { %v3745_v4 = vpack.c.bf16 %v2517_v23, %v2516_v25 }
 0x19b   :  { %v2258_v57 = vmul.f32 %v4615_v32, %v2116_v43  ;;  %v3601_v43 = vld [vmem:[%s5505_s0 + $0x2ac] sm:$0xf] }
 0x19c   :  { %3877 = vst [vmem:[%s5508_s4 + $0x30] sm:$0xff] %v3745_v4   ;;  %v1779_v29 = vpop.f32.mrf.mxu2  ;;  %v3604_v4 = vld [vmem:[%s5505_s0 + $0x2c0] sm:$0xf0] }
 0x19d   :  { %v1780_v1 = vadd.f32 %v1779_v29, %v1611_v53  ;;  %v1948_v63 = vpop.f32.mrf.mxu3  ;;  %v2326_v39 = vadd.f32 %v4646_v5, %v2258_v57  ;;  %v3058_v53 = vld [vmem:[%s5505_s0 + $0x2b8] sm:$0xf] }
 0x19e   :  { %v1613_v33 = vpop.f32.mrf.mxu1 }
 0x19f   :  { %v1949_v19 = vadd.f32 %v1948_v63, %v1780_v1  ;;  %v1614_v51 = vadd.f32 %v1613_v33, %v4282_v14  ;;  %v2454_v0 = vmul.f32 0.2, %v2326_v39  ;;  %vm2390_vm15 = vcmp.gt.f32.partialorder %v2326_v39, 0.0  ;;  %v3044_v14 = vld [vmem:[%s5505_s0 + $0x2bc] sm:$0xf0] }
 0x1a0   :  { %v2120_v31 = vpop.f32.mrf.mxu0  ;;  %v3047_v57 = vor.u32 %v3601_v43, %v3044_v14  ;;  %v3051_v1 = vor.u32 %v3604_v4, %v3050_v36  ;;  %v3609_v43 = vld [vmem:[%s5505_s0 + $0x2e8] sm:$0xf0]  ;;  %v3607_v14 = vld [vmem:[%s5505_s0 + $0x2dc] sm:$0xf]  ;;  %v3072_v36 = vld [vmem:[%s5505_s0 + $0x2ec] sm:$0xf0] }
 0x1a1   :  { %v2118_v13 = vadd.f32 %v2117_v42, %v1949_v19  ;;  %1652 = vmatmul.bf16.gmra.mxu1 %v3027_v41  ;;  %1821 = vmatmul.bf16.gmra.mxu2 %v3031_v7  ;;  %v2518_v42 = vsel %vm2390_vm15, %v2326_v39, %v2454_v0  ;;  %v3055_v41 = vor.u32 %v3602_v45, %v3052_v55  ;;  %v3078_v4 = vld [vmem:[%s5505_s0 + $0x2e0] sm:$0xf]  ;;  %v3610_v45 = vld [vmem:[%s5505_s0 + $0x2f0] sm:$0xf0] }
 0x1a2   :  { %1990 = vmatmul.bf16.gmra.mxu3 %v3035_v46  ;;  %v3059_v7 = vor.u32 %v3605_v3, %v3058_v53 }
 0x1a3   :  { %3500 = vmatmul.msk.bf16.gmra.mxu0 %vm1298_vm0, %v3039_v17  ;;  %v2259_v16 = vmul.f32 %v4615_v32, %v2118_v13 }
 0x1a4   :  { %v1782_v61 = vpop.f32.mrf.mxu2 }
 0x1a5   :  { %v2327_v49 = vadd.f32 %v4646_v5, %v2259_v16  ;;  %v1783_v21 = vadd.f32 %v1782_v61, %v1614_v51  ;;  %v1951_v26 = vpop.f32.mrf.mxu3 }
 0x1a6   :  { %v1615_v62 = vpop.f32.mrf.mxu1 }
 0x1a7   :  { %vm2391_vm1 = vcmp.gt.f32.partialorder %v2327_v49, 0.0  ;;  %v2455_v48 = vmul.f32 0.2, %v2327_v49  ;;  %v1952_v47 = vadd.f32 %v1951_v26, %v1783_v21  ;;  %v1616_v12 = vadd.f32 %v1615_v62, %v4291_v20 }
 0x1a8   :  { %v2122_v37 = vpop.f32.mrf.mxu0 }
 0x1a9   :  { %v2519_v25 = vsel %vm2391_vm1, %v2327_v49, %v2455_v48  ;;  %v2121_v23 = vadd.f32 %v2120_v31, %v1952_v47 }
 0x1aa   :  { %v3750_v9 = vpack.c.bf16 %v2519_v25, %v2518_v42  ;;  %v3606_v42 = vld [vmem:[%s5505_s0 + $0x2d4] sm:$0xf] }
 0x1ab   :  { %v2260_v56 = vmul.f32 %v4615_v32, %v2121_v23  ;;  %v3070_v23 = vld [vmem:[%s5505_s0 + $0x2d8] sm:$0xf] }
 0x1ac   :  { %3878 = vst [vmem:[%s5508_s4 + $0x38] sm:$0xff] %v3750_v9   ;;  %v1784_v8 = vpop.f32.mrf.mxu2 }
 0x1ad   :  { %v1785_v20 = vadd.f32 %v1784_v8, %v1616_v12  ;;  %v1953_v29 = vpop.f32.mrf.mxu3  ;;  %v2328_v17 = vadd.f32 %v4646_v5, %v2260_v56  ;;  %v3071_v8 = vor.u32 %v3609_v43, %v3070_v23  ;;  %v3615_v23 = vld [vmem:[%s5505_s0 + $0x318] sm:$0xf0] }
 0x1ae   :  { %v1618_v63 = vpop.f32.mrf.mxu1 }
 0x1af   :  { %v1954_v33 = vadd.f32 %v1953_v29, %v1785_v20  ;;  %v1619_v39 = vadd.f32 %v1618_v63, %v4323_v34  ;;  %v2456_v16 = vmul.f32 0.2, %v2328_v17  ;;  %vm2392_vm2 = vcmp.gt.f32.partialorder %v2328_v17, 0.0  ;;  %v3064_v34 = vld [vmem:[%s5505_s0 + $0x2e4] sm:$0xf0] }
 0x1b0   :  { %v2125_v46 = vpop.f32.mrf.mxu0  ;;  %v3067_v3 = vor.u32 %v3606_v42, %v3064_v34  ;;  %v3075_v20 = vor.u32 %v3607_v14, %v3072_v36  ;;  %v3079_v29 = vor.u32 %v3610_v45, %v3078_v4  ;;  %v3092_v34 = vld [vmem:[%s5505_s0 + $0x314] sm:$0xf0] }
 0x1b1   :  { %v2123_v19 = vadd.f32 %v2122_v37, %v1954_v33  ;;  %1657 = vmatmul.bf16.gmra.mxu1 %v3047_v57  ;;  %1826 = vmatmul.bf16.gmra.mxu2 %v3051_v1  ;;  %v2520_v48 = vsel %vm2392_vm2, %v2328_v17, %v2456_v16 }
 0x1b2   :  { %1995 = vmatmul.bf16.gmra.mxu3 %v3055_v41 }
 0x1b3   :  { %3501 = vmatmul.msk.bf16.gmra.mxu0 %vm1298_vm0, %v3059_v7  ;;  %v2261_v31 = vmul.f32 %v4615_v32, %v2123_v19 }
 0x1b4   :  { %v1787_v13 = vpop.f32.mrf.mxu2 }
 0x1b5   :  { %v2329_v51 = vadd.f32 %v4646_v5, %v2261_v31  ;;  %v1788_v61 = vadd.f32 %v1787_v13, %v1619_v39  ;;  %v1956_v0 = vpop.f32.mrf.mxu3 }
 0x1b6   :  { %v1620_v49 = vpop.f32.mrf.mxu1 }
 0x1b7   :  { %vm2393_vm3 = vcmp.gt.f32.partialorder %v2329_v51, 0.0  ;;  %v2457_v21 = vmul.f32 0.2, %v2329_v51  ;;  %v1957_v26 = vadd.f32 %v1956_v0, %v1788_v61  ;;  %v1621_v9 = vadd.f32 %v1620_v49, %v4332_v40 }
 0x1b8   :  { %v2127_v62 = vpop.f32.mrf.mxu0 }
 0x1b9   :  { %v2521_v47 = vsel %vm2393_vm3, %v2329_v51, %v2457_v21  ;;  %v2126_v37 = vadd.f32 %v2125_v46, %v1957_v26  ;;  %v3611_v26 = vld [vmem:[%s5505_s0 + $0x2fc] sm:$0xf] }
 0x1ba   :  { %v3755_v25 = vpack.c.bf16 %v2521_v47, %v2520_v48  ;;  %v3090_v48 = vld [vmem:[%s5505_s0 + $0x300] sm:$0xf]  ;;  %v3614_v47 = vld [vmem:[%s5505_s0 + $0x310] sm:$0xf0] }
 0x1bb   :  { %v2262_v55 = vmul.f32 %v4615_v32, %v2126_v37  ;;  %v3612_v37 = vld [vmem:[%s5505_s0 + $0x304] sm:$0xf]  ;;  %v3091_v4 = vor.u32 %v3614_v47, %v3090_v48 }
 0x1bc   :  { %3879 = vst [vmem:[%s5508_s4 + $0x40] sm:$0xff] %v3755_v25   ;;  %v1789_v12 = vpop.f32.mrf.mxu2  ;;  %v3098_v25 = vld [vmem:[%s5505_s0 + $0x308] sm:$0xf] }
 0x1bd   :  { %v1790_v40 = vadd.f32 %v1789_v12, %v1621_v9  ;;  %v1958_v53 = vpop.f32.mrf.mxu3  ;;  %v2330_v63 = vadd.f32 %v4646_v5, %v2262_v55  ;;  %v3095_v12 = vor.u32 %v3612_v37, %v3092_v34  ;;  %v3099_v55 = vor.u32 %v3615_v23, %v3098_v25 }
 0x1be   :  { %v1623_v56 = vpop.f32.mrf.mxu1 }
 0x1bf   :  { %v1959_v57 = vadd.f32 %v1958_v53, %v1790_v40  ;;  %v1624_v33 = vadd.f32 %v1623_v56, %v4364_v54  ;;  %v2458_v17 = vmul.f32 0.2, %v2330_v63  ;;  %vm2394_vm4 = vcmp.gt.f32.partialorder %v2330_v63, 0.0  ;;  %v3084_v54 = vld [vmem:[%s5505_s0 + $0x30c] sm:$0xf0] }
 0x1c0   :  { %v2130_v1 = vpop.f32.mrf.mxu0  ;;  %v3087_v36 = vor.u32 %v3611_v26, %v3084_v54  ;;  %v3118_v26 = vld [vmem:[%s5505_s0 + $0x330] sm:$0xf]  ;;  %v3620_v54 = vld [vmem:[%s5505_s0 + $0x340] sm:$0xf0] }
 0x1c1   :  { %v2128_v41 = vadd.f32 %v2127_v62, %v1959_v57  ;;  %1662 = vmatmul.bf16.gmra.mxu1 %v3067_v3  ;;  %1831 = vmatmul.bf16.gmra.mxu2 %v3071_v8  ;;  %v2522_v0 = vsel %vm2394_vm4, %v2330_v63, %v2458_v17  ;;  %v3119_v23 = vor.u32 %v3620_v54, %v3118_v26  ;;  %v5064_v54 = vld [vmem:[%s5507_s3] ss:$0 sm:$0xff] }
 0x1c2   :  { %2000 = vmatmul.bf16.gmra.mxu3 %v3075_v20 }
 0x1c3   :  { %3502 = vmatmul.msk.bf16.gmra.mxu0 %vm1298_vm0, %v3079_v29  ;;  %v2263_v7 = vmul.f32 %v4615_v32, %v2128_v41 }
 0x1c4   :  { %v1792_v46 = vpop.f32.mrf.mxu2 }
 0x1c5   :  { %v2331_v19 = vadd.f32 %v4646_v5, %v2263_v7  ;;  %v1793_v31 = vadd.f32 %v1792_v46, %v1624_v33  ;;  %v1961_v39 = vpop.f32.mrf.mxu3 }
 0x1c6   :  { %v1625_v13 = vpop.f32.mrf.mxu1 }
 0x1c7   :  { %vm2395_vm5 = vcmp.gt.f32.partialorder %v2331_v19, 0.0  ;;  %v2459_v16 = vmul.f32 0.2, %v2331_v19  ;;  %v1962_v51 = vadd.f32 %v1961_v39, %v1793_v31  ;;  %v1626_v42 = vadd.f32 %v1625_v13, %v4373_v60  ;;  %v3616_v13 = vld [vmem:[%s5505_s0 + $0x324] sm:$0xf] }
 0x1c8   :  { %v2132_v61 = vpop.f32.mrf.mxu0 }
 0x1c9   :  { %v2523_v49 = vsel %vm2395_vm5, %v2331_v19, %v2459_v16  ;;  %v2131_v21 = vadd.f32 %v2130_v1, %v1962_v51  ;;  %v3110_v51 = vld [vmem:[%s5505_s0 + $0x328] sm:$0xf] }
 0x1ca   :  { %v3760_v62 = vpack.c.bf16 %v2523_v49, %v2522_v0  ;;  %v3617_v0 = vld [vmem:[%s5505_s0 + $0x32c] sm:$0xf] }
 0x1cb   :  { %v2264_v14 = vmul.f32 %v4615_v32, %v2131_v21  ;;  %v3112_v21 = vld [vmem:[%s5505_s0 + $0x33c] sm:$0xf0] }
 0x1cc   :  { %3880 = vst [vmem:[%s5508_s4 + $0x48] sm:$0xff] %v3760_v62   ;;  %v1794_v43 = vpop.f32.mrf.mxu2  ;;  %v3115_v25 = vor.u32 %v3617_v0, %v3112_v21 }
 0x1cd   :  { %v1795_v60 = vadd.f32 %v1794_v43, %v1626_v42  ;;  %v1963_v9 = vpop.f32.mrf.mxu3  ;;  %v2332_v3 = vadd.f32 %v4646_v5, %v2264_v14 }
 0x1ce   :  { %v1628_v45 = vpop.f32.mrf.mxu1 }
 0x1cf   :  { %v1964_v40 = vadd.f32 %v1963_v9, %v1795_v60  ;;  %v1629_v20 = vadd.f32 %v1628_v45, %v4405_v10  ;;  %v2460_v57 = vmul.f32 0.2, %v2332_v3  ;;  %vm2396_vm6 = vcmp.gt.f32.partialorder %v2332_v3, 0.0  ;;  %v3104_v10 = vld [vmem:[%s5505_s0 + $0x334] sm:$0xf0] }
 0x1d0   :  { %v2135_v53 = vpop.f32.mrf.mxu0  ;;  %v3107_v37 = vor.u32 %v3616_v13, %v3104_v10 }
 0x1d1   :  { %v2133_v8 = vadd.f32 %v2132_v61, %v1964_v40  ;;  %1667 = vmatmul.bf16.gmra.mxu1 %v3087_v36  ;;  %1836 = vmatmul.bf16.gmra.mxu2 %v3091_v4  ;;  %v2524_v19 = vsel %vm2396_vm6, %v2332_v3, %v2460_v57  ;;  %v3619_v61 = vld [vmem:[%s5505_s0 + $0x338] sm:$0xf0] }
 0x1d2   :  { %2005 = vmatmul.bf16.gmra.mxu3 %v3095_v12  ;;  %v3111_v42 = vor.u32 %v3619_v61, %v3110_v51 }
 0x1d3   :  { %3503 = vmatmul.msk.bf16.gmra.mxu0 %vm1298_vm0, %v3099_v55  ;;  %v2265_v56 = vmul.f32 %v4615_v32, %v2133_v8 }
 0x1d4   :  { %v1797_v29 = vpop.f32.mrf.mxu2 }
 0x1d5   :  { %v2333_v1 = vadd.f32 %v4646_v5, %v2265_v56  ;;  %v1798_v63 = vadd.f32 %v1797_v29, %v1629_v20  ;;  %v1966_v41 = vpop.f32.mrf.mxu3 }
 0x1d6   :  { %v1630_v7 = vpop.f32.mrf.mxu1 }
 0x1d7   :  { %vm2397_vm7 = vcmp.gt.f32.partialorder %v2333_v1, 0.0  ;;  %v2461_v33 = vmul.f32 0.2, %v2333_v1  ;;  %v1967_v46 = vadd.f32 %v1966_v41, %v1798_v63  ;;  %v1631_v49 = vadd.f32 %v1630_v7, %v4414_v22  ;;  %v3621_v63 = vld [vmem:[%s5505_s0 + $0x34c] sm:$0xf] }
 0x1d8   :  { %v2137_v17 = vpop.f32.mrf.mxu0  ;;  %v3130_v41 = vld [vmem:[%s5505_s0 + $0x350] sm:$0xf]  ;;  %v3624_v7 = vld [vmem:[%s5505_s0 + $0x360] sm:$0xf0] }
 0x1d9   :  { %v2525_v31 = vsel %vm2397_vm7, %v2333_v1, %v2461_v33  ;;  %v2136_v39 = vadd.f32 %v2135_v53, %v1967_v46  ;;  %v3622_v33 = vld [vmem:[%s5505_s0 + $0x354] sm:$0xf]  ;;  %v3131_v51 = vor.u32 %v3624_v7, %v3130_v41 }
 0x1da   :  { %v3765_v16 = vpack.c.bf16 %v2525_v31, %v2524_v19  ;;  %v3138_v19 = vld [vmem:[%s5505_s0 + $0x358] sm:$0xf]  ;;  %v3625_v31 = vld [vmem:[%s5505_s0 + $0x368] sm:$0xf0] }
 0x1db   :  { %v2266_v48 = vmul.f32 %v4615_v32, %v2136_v39  ;;  %v5027_v32 = vld [vmem:[%s5506_s2] ss:$0 sm:$0xff] }
 0x1dc   :  { %3881 = vst [vmem:[%s5508_s4 + $0x50] sm:$0xff] %v3765_v16   ;;  %v1799_v62 = vpop.f32.mrf.mxu2 }
 0x1dd   :  { %v1800_v22 = vadd.f32 %v1799_v62, %v1631_v49  ;;  %v1968_v47 = vpop.f32.mrf.mxu3  ;;  %v2334_v60 = vadd.f32 %v4646_v5, %v2266_v48  ;;  %v3139_v49 = vor.u32 %v3625_v31, %v3138_v19 }
 0x1de   :  { %v1633_v34 = vpop.f32.mrf.mxu1 }
 0x1df   :  { %v1969_v43 = vadd.f32 %v1968_v47, %v1800_v22  ;;  %v1634_v4 = vadd.f32 %v1633_v34, %v4446_v44  ;;  %v2462_v12 = vmul.f32 0.2, %v2334_v60  ;;  %vm2398_vm8 = vcmp.gt.f32.partialorder %v2334_v60, 0.0  ;;  %v3124_v44 = vld [vmem:[%s5505_s0 + $0x35c] sm:$0xf0] }
 0x1e0   :  { %v2140_v14 = vpop.f32.mrf.mxu0  ;;  %v3127_v16 = vor.u32 %v3621_v63, %v3124_v44 }
 0x1e1   :  { %v2138_v9 = vadd.f32 %v2137_v17, %v1969_v43  ;;  %1672 = vmatmul.bf16.gmra.mxu1 %v3107_v37  ;;  %1841 = vmatmul.bf16.gmra.mxu2 %v3111_v42  ;;  %v2526_v29 = vsel %vm2398_vm8, %v2334_v60, %v2462_v12  ;;  %v3132_v17 = vld [vmem:[%s5505_s0 + $0x364] sm:$0xf0]  ;;  %v3626_v12 = vld [vmem:[%s5505_s0 + $0x374] sm:$0xf] }
 0x1e2   :  { %2010 = vmatmul.bf16.gmra.mxu3 %v3115_v25  ;;  %v3135_v0 = vor.u32 %v3622_v33, %v3132_v17 }
 0x1e3   :  { %3504 = vmatmul.msk.bf16.gmra.mxu0 %vm1298_vm0, %v3119_v23  ;;  %v2267_v36 = vmul.f32 %v5027_v32, %v2138_v9 }
 0x1e4   :  { %v1802_v45 = vpop.f32.mrf.mxu2 }
 0x1e5   :  { %v2335_v55 = vadd.f32 %v4646_v5, %v2267_v36  ;;  %v1803_v40 = vadd.f32 %v1802_v45, %v1634_v4  ;;  %v1971_v53 = vpop.f32.mrf.mxu3 }
 0x1e6   :  { %v1635_v3 = vpop.f32.mrf.mxu1 }
 0x1e7   :  { %vm2399_vm9 = vcmp.gt.f32.partialorder %v2335_v55, 0.0  ;;  %v2463_v8 = vmul.f32 0.2, %v2335_v55  ;;  %v1972_v56 = vadd.f32 %v1971_v53, %v1803_v40  ;;  %v1636_v46 = vadd.f32 %v1635_v3, %v4455_v52  ;;  %v3150_v40 = vld [vmem:[%s5505_s0 + $0x378] sm:$0xf] }
 0x1e8   :  { %v2142_v20 = vpop.f32.mrf.mxu0  ;;  %v3629_v53 = vld [vmem:[%s5505_s0 + $0x388] sm:$0xf0]  ;;  %v3627_v3 = vld [vmem:[%s5505_s0 + $0x37c] sm:$0xf] }
 0x1e9   :  { %v2527_v57 = vsel %vm2399_vm9, %v2335_v55, %v2463_v8  ;;  %v2141_v1 = vadd.f32 %v2140_v14, %v1972_v56  ;;  %v3152_v56 = vld [vmem:[%s5505_s0 + $0x38c] sm:$0xf0] }
 0x1ea   :  { %v3770_v5 = vpack.c.bf16 %v2527_v57, %v2526_v29  ;;  %v3630_v29 = vld [vmem:[%s5505_s0 + $0x390] sm:$0xf0]  ;;  %v3155_v7 = vor.u32 %v3627_v3, %v3152_v56 }
 0x1eb   :  { %v2268_v13 = vmul.f32 %v5027_v32, %v2141_v1 }
 0x1ec   :  { %3882 = vst [vmem:[%s5508_s4 + $0x58] sm:$0xff] %v3770_v5   ;;  %v1804_v39 = vpop.f32.mrf.mxu2  ;;  %v3151_v5 = vor.u32 %v3629_v53, %v3150_v40 }
 0x1ed   :  { %v1805_v52 = vadd.f32 %v1804_v39, %v1636_v46  ;;  %v1973_v10 = vpop.f32.mrf.mxu3  ;;  %v2336_v62 = vadd.f32 %v5064_v54, %v2268_v13 }
 0x1ee   :  { %v1638_v61 = vpop.f32.mrf.mxu1 }
 0x1ef   :  { %v1974_v21 = vadd.f32 %v1973_v10, %v1805_v52  ;;  %v1639_v47 = vadd.f32 %v1638_v61, %v4487_v11  ;;  %v2464_v42 = vmul.f32 0.2, %v2336_v62  ;;  %vm2400_vm10 = vcmp.gt.f32.partialorder %v2336_v62, 0.0  ;;  %v3144_v11 = vld [vmem:[%s5505_s0 + $0x384] sm:$0xf0] }
 0x1f0   :  { %v2145_v26 = vpop.f32.mrf.mxu0  ;;  %v3147_v44 = vor.u32 %v3626_v12, %v3144_v11 }
 0x1f1   :  { %v2143_v48 = vadd.f32 %v2142_v20, %v1974_v21  ;;  %1677 = vmatmul.bf16.gmra.mxu1 %v3127_v16  ;;  %1846 = vmatmul.bf16.gmra.mxu2 %v3131_v51  ;;  %v2528_v36 = vsel %vm2400_vm10, %v2336_v62, %v2464_v42  ;;  %v3158_v20 = vld [vmem:[%s5505_s0 + $0x380] sm:$0xf] }
 0x1f2   :  { %2015 = vmatmul.bf16.gmra.mxu3 %v3135_v0  ;;  %v3159_v33 = vor.u32 %v3630_v29, %v3158_v20  ;;  %v3170_v42 = vld [vmem:[%s5505_s0 + $0x3a0] sm:$0xf] }
 0x1f3   :  { %3505 = vmatmul.msk.bf16.gmra.mxu0 %vm1298_vm0, %v3139_v49  ;;  %v2269_v22 = vmul.f32 %v5027_v32, %v2143_v48 }
 0x1f4   :  { %v1807_v37 = vpop.f32.mrf.mxu2 }
 0x1f5   :  { %v2337_v34 = vadd.f32 %v5064_v54, %v2269_v22  ;;  %v1808_v25 = vadd.f32 %v1807_v37, %v1639_v47  ;;  %v1976_v23 = vpop.f32.mrf.mxu3  ;;  %v3631_v47 = vld [vmem:[%s5505_s0 + $0x39c] sm:$0xf] }
 0x1f6   :  { %v1640_v43 = vpop.f32.mrf.mxu1 }
 0x1f7   :  { %vm2401_vm11 = vcmp.gt.f32.partialorder %v2337_v34, 0.0  ;;  %v2465_v14 = vmul.f32 0.2, %v2337_v34  ;;  %v1977_v60 = vadd.f32 %v1976_v23, %v1808_v25  ;;  %v1641_v8 = vadd.f32 %v1640_v43, %v4496_v28  ;;  %v3632_v25 = vld [vmem:[%s5505_s0 + $0x3a4] sm:$0xf] }
 0x1f8   :  { %v2147_v9 = vpop.f32.mrf.mxu0  ;;  %v3172_v43 = vld [vmem:[%s5505_s0 + $0x3b4] sm:$0xf0] }
 0x1f9   :  { %v2529_v4 = vsel %vm2401_vm11, %v2337_v34, %v2465_v14  ;;  %v2146_v45 = vadd.f32 %v2145_v26, %v1977_v60  ;;  %v3634_v34 = vld [vmem:[%s5505_s0 + $0x3b0] sm:$0xf0]  ;;  %v3178_v14 = vld [vmem:[%s5505_s0 + $0x3a8] sm:$0xf]  ;;  %v3635_v60 = vld [vmem:[%s5505_s0 + $0x3b8] sm:$0xf0] }
 0x1fa   :  { %v3775_v55 = vpack.c.bf16 %v2529_v4, %v2528_v36  ;;  %v3171_v12 = vor.u32 %v3634_v34, %v3170_v42  ;;  %v3179_v40 = vor.u32 %v3635_v60, %v3178_v14 }
 0x1fb   :  { %v2270_v1 = vmul.f32 %v5027_v32, %v2146_v45 }
 0x1fc   :  { %3883 = vst [vmem:[%s5508_s4 + $0x60] sm:$0xff] %v3775_v55   ;;  %v1809_v57 = vpop.f32.mrf.mxu2  ;;  %v3175_v55 = vor.u32 %v3632_v25, %v3172_v43 }
 0x1fd   :  { %v1810_v28 = vadd.f32 %v1809_v57, %v1641_v8  ;;  %v1978_v63 = vpop.f32.mrf.mxu3  ;;  %v2338_v19 = vadd.f32 %v5064_v54, %v2270_v1 }
 0x1fe   :  { %v1643_v41 = vpop.f32.mrf.mxu1 }
 0x1ff   :  { %v1979_v46 = vadd.f32 %v1978_v63, %v1810_v28  ;;  %v1644_v13 = vadd.f32 %v1643_v41, %v4528_v2  ;;  %v2466_v10 = vmul.f32 0.2, %v2338_v19  ;;  %vm2402_vm12 = vcmp.gt.f32.partialorder %v2338_v19, 0.0  ;;  %v3164_v2 = vld [vmem:[%s5505_s0 + $0x3ac] sm:$0xf0] }
 0x200   :  { %v2150_v17 = vpop.f32.mrf.mxu0  ;;  %v3167_v45 = vor.u32 %v3631_v47, %v3164_v2 }
 0x201   :  { %v2148_v31 = vadd.f32 %v2147_v9, %v1979_v46  ;;  %1682 = vmatmul.bf16.gmra.mxu1 %v3147_v44  ;;  %1851 = vmatmul.bf16.gmra.mxu2 %v3151_v5  ;;  %v2530_v62 = vsel %vm2402_vm12, %v2338_v19, %v2466_v10  ;;  %v3637_v10 = vld [vmem:[%s5505_s0 + $0x3cc] sm:$0xf] }
 0x202   :  { %2020 = vmatmul.bf16.gmra.mxu3 %v3155_v7 }
 0x203   :  { %3506 = vmatmul.msk.bf16.gmra.mxu0 %vm1298_vm0, %v3159_v33  ;;  %v2271_v39 = vmul.f32 %v5027_v32, %v2148_v31  ;;  %v3636_v31 = vld [vmem:[%s5505_s0 + $0x3c4] sm:$0xf] }
 0x204   :  { %v1812_v52 = vpop.f32.mrf.mxu2 }
 0x205   :  { %v2339_v16 = vadd.f32 %v5064_v54, %v2271_v39  ;;  %v1813_v51 = vadd.f32 %v1812_v52, %v1644_v13  ;;  %v1981_v61 = vpop.f32.mrf.mxu3  ;;  %v3190_v13 = vld [vmem:[%s5505_s0 + $0x3c8] sm:$0xf]  ;;  %v3639_v52 = vld [vmem:[%s5505_s0 + $0x3d8] sm:$0xf0] }
 0x206   :  { %v1645_v0 = vpop.f32.mrf.mxu1 }
 0x207   :  { %vm2403_vm13 = vcmp.gt.f32.partialorder %v2339_v16, 0.0  ;;  %v2467_v49 = vmul.f32 0.2, %v2339_v16  ;;  %v1982_v21 = vadd.f32 %v1981_v61, %v1813_v51  ;;  %v1646_v23 = vadd.f32 %v1645_v0, %v4537_v27  ;;  %v3192_v51 = vld [vmem:[%s5505_s0 + $0x3dc] sm:$0xf0] }
 0x208   :  { %v2152_v26 = vpop.f32.mrf.mxu0  ;;  %v3198_v61 = vld [vmem:[%s5505_s0 + $0x3d0] sm:$0xf]  ;;  %v3640_v0 = vld [vmem:[%s5505_s0 + $0x3e0] sm:$0xf0]  ;;  %v3195_v47 = vor.u32 %v3637_v10, %v3192_v51 }
 0x209   :  { %v2531_v48 = vsel %vm2403_vm13, %v2339_v16, %v2467_v49  ;;  %v2151_v22 = vadd.f32 %v2150_v17, %v1982_v21  ;;  %v3199_v2 = vor.u32 %v3640_v0, %v3198_v61 }
 0x20a   :  { %v3780_v37 = vpack.c.bf16 %v2531_v48, %v2530_v62  ;;  %v3191_v48 = vor.u32 %v3639_v52, %v3190_v13 }
 0x20b   :  { %v2272_v36 = vmul.f32 %v5027_v32, %v2151_v22 }
 0x20c   :  { %3884 = vst [vmem:[%s5508_s4 + $0x68] sm:$0xff] %v3780_v37   ;;  %v1814_v9 = vpop.f32.mrf.mxu2 }
 0x20d   :  { %v1815_v27 = vadd.f32 %v1814_v9, %v1646_v23  ;;  %v1983_v4 = vpop.f32.mrf.mxu3  ;;  %v2340_v8 = vadd.f32 %v5064_v54, %v2272_v36 }
 0x20e   :  { %v1648_v11 = vpop.f32.mrf.mxu1 }
 0x20f   :  { %v1984_v53 = vadd.f32 %v1983_v4, %v1815_v27  ;;  %v1649_v29 = vadd.f32 %v1648_v11, %v4569_v24  ;;  %v2468_v1 = vmul.f32 0.2, %v2340_v8  ;;  %vm2404_vm14 = vcmp.gt.f32.partialorder %v2340_v8, 0.0  ;;  %v3184_v24 = vld [vmem:[%s5505_s0 + $0x3d4] sm:$0xf0] }
 0x210   :  { %v2155_v3 = vpop.f32.mrf.mxu0  ;;  %v3187_v62 = vor.u32 %v3636_v31, %v3184_v24 }
 0x211   :  { %v2153_v56 = vadd.f32 %v2152_v26, %v1984_v53  ;;  %1687 = vmatmul.bf16.gmra.mxu1 %v3167_v45  ;;  %1856 = vmatmul.bf16.gmra.mxu2 %v3171_v12  ;;  %v2532_v46 = vsel %vm2404_vm14, %v2340_v8, %v2468_v1  ;;  %v3212_v1 = vld [vmem:[%s5505_s0 + $0x404] sm:$0xf0] }
 0x212   :  { %2025 = vmatmul.bf16.gmra.mxu3 %v3175_v55 }
 0x213   :  { %3507 = vmatmul.msk.bf16.gmra.mxu0 %vm1298_vm0, %v3179_v40  ;;  %v2273_v20 = vmul.f32 %v5027_v32, %v2153_v56  ;;  %v3210_v56 = vld [vmem:[%s5505_s0 + $0x3f0] sm:$0xf] }
 0x214   :  { %v1817_v57 = vpop.f32.mrf.mxu2 }
 0x215   :  { %v2341_v28 = vadd.f32 %v5064_v54, %v2273_v20  ;;  %v1818_v63 = vadd.f32 %v1817_v57, %v1649_v29  ;;  %v1986_v44 = vpop.f32.mrf.mxu3  ;;  %v3644_v20 = vld [vmem:[%s5505_s0 + $0x400] sm:$0xf0]  ;;  %v3642_v29 = vld [vmem:[%s5505_s0 + $0x3f4] sm:$0xf] }
 0x216   :  { %v1650_v5 = vpop.f32.mrf.mxu1 }
 0x217   :  { %vm2405_vm15 = vcmp.gt.f32.partialorder %v2341_v28, 0.0  ;;  %v2469_v41 = vmul.f32 0.2, %v2341_v28  ;;  %v1987_v7 = vadd.f32 %v1986_v44, %v1818_v63  ;;  %v1651_v16 = vadd.f32 %v1650_v5, %v4578_v59  ;;  %v3645_v63 = vld [vmem:[%s5505_s0 + $0x408] sm:$0xf0] }
 0x218   :  { %v2157_v33 = vpop.f32.mrf.mxu0 }
 0x219   :  { %v2533_v17 = vsel %vm2405_vm15, %v2341_v28, %v2469_v41  ;;  %v2156_v19 = vadd.f32 %v2155_v3, %v1987_v7  ;;  %v3641_v3 = vld [vmem:[%s5505_s0 + $0x3ec] sm:$0xf]  ;;  %v3218_v28 = vld [vmem:[%s5505_s0 + $0x3f8] sm:$0xf] }
 0x21a   :  { %v3785_v39 = vpack.c.bf16 %v2533_v17, %v2532_v46  ;;  %v3215_v17 = vor.u32 %v3642_v29, %v3212_v1 }
 0x21b   :  { %v2274_v21 = vmul.f32 %v5027_v32, %v2156_v19  ;;  %v3219_v19 = vor.u32 %v3645_v63, %v3218_v28 }
 0x21c   :  { %3885 = vst [vmem:[%s5508_s4 + $0x70] sm:$0xff] %v3785_v39   ;;  %v1819_v49 = vpop.f32.mrf.mxu2 }
 0x21d   :  { %v1820_v59 = vadd.f32 %v1819_v49, %v1651_v16  ;;  %v1988_v26 = vpop.f32.mrf.mxu3  ;;  %v2342_v34 = vadd.f32 %v5064_v54, %v2274_v21 }
 0x21e   :  { %v1653_v22 = vpop.f32.mrf.mxu1 }
 0x21f   :  { %v1989_v37 = vadd.f32 %v1988_v26, %v1820_v59  ;;  %v1654_v43 = vadd.f32 %v1653_v22, %v4287_v18  ;;  %v2470_v60 = vmul.f32 0.2, %v2342_v34  ;;  %vm2406_vm1 = vcmp.gt.f32.partialorder %v2342_v34, 0.0  ;;  %v3204_v18 = vld [vmem:[%s5505_s0 + $0x3fc] sm:$0xf0] }
 0x220   :  { %v2160_v42 = vpop.f32.mrf.mxu0  ;;  %v3207_v7 = vor.u32 %v3641_v3, %v3204_v18 }
 0x221   :  { %v2158_v25 = vadd.f32 %v2157_v33, %v1989_v37  ;;  %1692 = vmatmul.bf16.gmra.mxu1 %v3187_v62  ;;  %1861 = vmatmul.bf16.gmra.mxu2 %v3191_v48  ;;  %v2534_v55 = vsel %vm2406_vm1, %v2342_v34, %v2470_v60  ;;  %v3211_v33 = vor.u32 %v3644_v20, %v3210_v56  ;;  %v3649_v34 = vld [vmem:[%s5505_s0 + $0x428] sm:$0xf0]  ;;  %v3650_v60 = vld [vmem:[%s5505_s0 + $0x430] sm:$0xf0] }
 0x222   :  { %2030 = vmatmul.bf16.gmra.mxu3 %v3195_v47 }
 0x223   :  { %3508 = vmatmul.msk.bf16.gmra.mxu0 %vm1298_vm0, %v3199_v2  ;;  %v2275_v23 = vmul.f32 %v5027_v32, %v2158_v25  ;;  %v3646_v2 = vld [vmem:[%s5505_s0 + $0x414] sm:$0xf]  ;;  %v3647_v25 = vld [vmem:[%s5505_s0 + $0x41c] sm:$0xf] }
 0x224   :  { %v1822_v14 = vpop.f32.mrf.mxu2 }
 0x225   :  { %v2343_v9 = vadd.f32 %v5064_v54, %v2275_v23  ;;  %v1823_v36 = vadd.f32 %v1822_v14, %v1654_v43  ;;  %v1991_v27 = vpop.f32.mrf.mxu3  ;;  %v3232_v43 = vld [vmem:[%s5505_s0 + $0x42c] sm:$0xf0]  ;;  %v3238_v14 = vld [vmem:[%s5505_s0 + $0x420] sm:$0xf] }
 0x226   :  { %v1655_v4 = vpop.f32.mrf.mxu1 }
 0x227   :  { %vm2407_vm2 = vcmp.gt.f32.partialorder %v2343_v9, 0.0  ;;  %v2471_v45 = vmul.f32 0.2, %v2343_v9  ;;  %v1992_v12 = vadd.f32 %v1991_v27, %v1823_v36  ;;  %v1656_v57 = vadd.f32 %v1655_v4, %v4319_v30 }
 0x228   :  { %v2162_v11 = vpop.f32.mrf.mxu0 }
 0x229   :  { %v2535_v40 = vsel %vm2407_vm2, %v2343_v9, %v2471_v45  ;;  %v2161_v53 = vadd.f32 %v2160_v42, %v1992_v12  ;;  %v3230_v42 = vld [vmem:[%s5505_s0 + $0x418] sm:$0xf] }
 0x22a   :  { %v3790_v8 = vpack.c.bf16 %v2535_v40, %v2534_v55  ;;  %v3231_v45 = vor.u32 %v3649_v34, %v3230_v42  ;;  %v3239_v55 = vor.u32 %v3650_v60, %v3238_v14 }
 0x22b   :  { %v2276_v5 = vmul.f32 %v5027_v32, %v2161_v53 }
 0x22c   :  { %3886 = vst [vmem:[%s5508_s4 + $0x78] sm:$0xff] %v3790_v8   ;;  %v1824_v44 = vpop.f32.mrf.mxu2 }
 0x22d   :  { %v1825_v30 = vadd.f32 %v1824_v44, %v1656_v57  ;;  %v1993_v41 = vpop.f32.mrf.mxu3  ;;  %v2344_v39 = vadd.f32 %v5064_v54, %v2276_v5 }
 0x22e   :  { %v1658_v46 = vpop.f32.mrf.mxu1 }
 0x22f   :  { %v1994_v31 = vadd.f32 %v1993_v41, %v1825_v30  ;;  %v1659_v10 = vadd.f32 %v1658_v46, %v4328_v38  ;;  %v2472_v51 = vmul.f32 0.2, %v2344_v39  ;;  %vm2408_vm3 = vcmp.gt.f32.partialorder %v2344_v39, 0.0  ;;  %v3224_v38 = vld [vmem:[%s5505_s0 + $0x424] sm:$0xf0] }
 0x230   :  { %v2165_v24 = vpop.f32.mrf.mxu0  ;;  %v3227_v4 = vor.u32 %v3646_v2, %v3224_v38  ;;  %v3651_v46 = vld [vmem:[%s5505_s0 + $0x43c] sm:$0xf] }
 0x231   :  { %v2163_v13 = vadd.f32 %v2162_v11, %v1994_v31  ;;  %1697 = vmatmul.bf16.gmra.mxu1 %v3207_v7  ;;  %1866 = vmatmul.bf16.gmra.mxu2 %v3211_v33  ;;  %v2536_v48 = vsel %vm2408_vm3, %v2344_v39, %v2472_v51  ;;  %v3235_v11 = vor.u32 %v3647_v25, %v3232_v43  ;;  %v3654_v31 = vld [vmem:[%s5505_s0 + $0x450] sm:$0xf0] }
 0x232   :  { %2035 = vmatmul.bf16.gmra.mxu3 %v3215_v17 }
 0x233   :  { %3509 = vmatmul.msk.bf16.gmra.mxu0 %vm1298_vm0, %v3219_v19  ;;  %v2277_v52 = vmul.f32 %v5027_v32, %v2163_v13  ;;  %v3250_v19 = vld [vmem:[%s5505_s0 + $0x440] sm:$0xf]  ;;  %v3252_v13 = vld [vmem:[%s5505_s0 + $0x454] sm:$0xf0] }
 0x234   :  { %v1827_v16 = vpop.f32.mrf.mxu2 }
 0x235   :  { %v2345_v61 = vadd.f32 %v5064_v54, %v2277_v52  ;;  %v1828_v0 = vadd.f32 %v1827_v16, %v1659_v10  ;;  %v1996_v49 = vpop.f32.mrf.mxu3  ;;  %v3258_v52 = vld [vmem:[%s5505_s0 + $0x448] sm:$0xf]  ;;  %v3655_v10 = vld [vmem:[%s5505_s0 + $0x458] sm:$0xf0] }
 0x236   :  { %v1660_v21 = vpop.f32.mrf.mxu1 }
 0x237   :  { %vm2409_vm4 = vcmp.gt.f32.partialorder %v2345_v61, 0.0  ;;  %v2473_v59 = vmul.f32 0.2, %v2345_v61  ;;  %v1997_v26 = vadd.f32 %v1996_v49, %v1828_v0  ;;  %v1661_v23 = vadd.f32 %v1660_v21, %v4360_v50 }
 0x238   :  { %v2167_v62 = vpop.f32.mrf.mxu0  ;;  %v3251_v49 = vor.u32 %v3654_v31, %v3250_v19 }
 0x239   :  { %v2537_v22 = vsel %vm2409_vm4, %v2345_v61, %v2473_v59  ;;  %v2166_v47 = vadd.f32 %v2165_v24, %v1997_v26  ;;  %v3652_v24 = vld [vmem:[%s5505_s0 + $0x444] sm:$0xf]  ;;  %v3259_v26 = vor.u32 %v3655_v10, %v3258_v52 }
 0x23a   :  { %v3795_v37 = vpack.c.bf16 %v2537_v22, %v2536_v48  ;;  %v3255_v59 = vor.u32 %v3652_v24, %v3252_v13 }
 0x23b   :  { %v2278_v36 = vmul.f32 %v5027_v32, %v2166_v47 }
 0x23c   :  { %3887 = vst [vmem:[%s5508_s4 + $0x80] sm:$0xff] %v3795_v37   ;;  %v1829_v9 = vpop.f32.mrf.mxu2 }
 0x23d   :  { %v1830_v50 = vadd.f32 %v1829_v9, %v1661_v23  ;;  %v1998_v27 = vpop.f32.mrf.mxu3  ;;  %v2346_v3 = vadd.f32 %v5064_v54, %v2278_v36 }
 0x23e   :  { %v1663_v12 = vpop.f32.mrf.mxu1 }
 0x23f   :  { %v1999_v40 = vadd.f32 %v1998_v27, %v1830_v50  ;;  %v1664_v56 = vadd.f32 %v1663_v12, %v4369_v58  ;;  %v2474_v29 = vmul.f32 0.2, %v2346_v3  ;;  %vm2410_vm5 = vcmp.gt.f32.partialorder %v2346_v3, 0.0  ;;  %v3244_v58 = vld [vmem:[%s5505_s0 + $0x44c] sm:$0xf0] }
 0x240   :  { %v2170_v53 = vpop.f32.mrf.mxu0  ;;  %v3247_v0 = vor.u32 %v3651_v46, %v3244_v58  ;;  %v3270_v12 = vld [vmem:[%s5505_s0 + $0x468] sm:$0xf] }
 0x241   :  { %v2168_v18 = vadd.f32 %v2167_v62, %v1999_v40  ;;  %1702 = vmatmul.bf16.gmra.mxu1 %v3227_v4  ;;  %1871 = vmatmul.bf16.gmra.mxu2 %v3231_v45  ;;  %v2538_v41 = vsel %vm2410_vm5, %v2346_v3, %v2474_v29  ;;  %v3656_v4 = vld [vmem:[%s5505_s0 + $0x464] sm:$0xf]  ;;  %v3278_v3 = vld [vmem:[%s5505_s0 + $0x470] sm:$0xf] }
 0x242   :  { %2040 = vmatmul.bf16.gmra.mxu3 %v3235_v11  ;;  %v3659_v11 = vld [vmem:[%s5505_s0 + $0x478] sm:$0xf0] }
 0x243   :  { %3510 = vmatmul.msk.bf16.gmra.mxu0 %vm1298_vm0, %v3239_v55  ;;  %v2279_v8 = vmul.f32 %v5027_v32, %v2168_v18  ;;  %v3657_v55 = vld [vmem:[%s5505_s0 + $0x46c] sm:$0xf]  ;;  %v3660_v18 = vld [vmem:[%s5505_s0 + $0x480] sm:$0xf0] }
 0x244   :  { %v1832_v20 = vpop.f32.mrf.mxu2 }
 0x245   :  { %v2347_v57 = vadd.f32 %v5064_v54, %v2279_v8  ;;  %v1833_v1 = vadd.f32 %v1832_v20, %v1664_v56  ;;  %v2001_v28 = vpop.f32.mrf.mxu3 }
 0x246   :  { %v1665_v63 = vpop.f32.mrf.mxu1 }
 0x247   :  { %vm2411_vm6 = vcmp.gt.f32.partialorder %v2347_v57, 0.0  ;;  %v2475_v44 = vmul.f32 0.2, %v2347_v57  ;;  %v2002_v5 = vadd.f32 %v2001_v28, %v1833_v1  ;;  %v1666_v39 = vadd.f32 %v1665_v63, %v4401_v6 }
 0x248   :  { %v2172_v30 = vpop.f32.mrf.mxu0  ;;  %v3279_v63 = vor.u32 %v3660_v18, %v3278_v3 }
 0x249   :  { %v2539_v7 = vsel %vm2411_vm6, %v2347_v57, %v2475_v44  ;;  %v2171_v33 = vadd.f32 %v2170_v53, %v2002_v5  ;;  %v3272_v53 = vld [vmem:[%s5505_s0 + $0x47c] sm:$0xf0]  ;;  %v3271_v57 = vor.u32 %v3659_v11, %v3270_v12 }
 0x24a   :  { %v3800_v17 = vpack.c.bf16 %v2539_v7, %v2538_v41  ;;  %v3275_v28 = vor.u32 %v3657_v55, %v3272_v53 }
 0x24b   :  { %v2280_v51 = vmul.f32 %v5027_v32, %v2171_v33  ;;  %v5533_v33 = vld [vmem:[#allocation10_spill] sm:$0xff] }
 0x24c   :  { %3888 = vst [vmem:[%s5508_s4 + $0x88] sm:$0xff] %v3800_v17   ;;  %v1834_v16 = vpop.f32.mrf.mxu2 }
 0x24d   :  { %v1835_v6 = vadd.f32 %v1834_v16, %v1666_v39  ;;  %v2003_v61 = vpop.f32.mrf.mxu3  ;;  %v2348_v22 = vadd.f32 %v5064_v54, %v2280_v51 }
 0x24e   :  { %v1668_v21 = vpop.f32.mrf.mxu1 }
 0x24f   :  { %v2004_v62 = vadd.f32 %v2003_v61, %v1835_v6  ;;  %v1669_v38 = vadd.f32 %v1668_v21, %v4410_v15  ;;  %v2476_v42 = vmul.f32 0.2, %v2348_v22  ;;  %vm2412_vm7 = vcmp.gt.f32.partialorder %v2348_v22, 0.0  ;;  %v3264_v15 = vld [vmem:[%s5505_s0 + $0x474] sm:$0xf0] }
 0x250   :  { %v2175_v48 = vpop.f32.mrf.mxu0  ;;  %v3267_v29 = vor.u32 %v3656_v4, %v3264_v15  ;;  %v3661_v61 = vld [vmem:[%s5505_s0 + $0x48c] sm:$0xf]  ;;  %v3290_v21 = vld [vmem:[%s5505_s0 + $0x490] sm:$0xf]  ;;  %v5535_v15 = vld [vmem:[#allocation14_spill] sm:$0xff] }
 0x251   :  { %v2173_v47 = vadd.f32 %v2172_v30, %v2004_v62  ;;  %1707 = vmatmul.bf16.gmra.mxu1 %v3247_v0  ;;  %1876 = vmatmul.bf16.gmra.mxu2 %v3251_v49  ;;  %v2540_v36 = vsel %vm2412_vm7, %v2348_v22, %v2476_v42  ;;  %v3284_v0 = vld [vmem:[%s5505_s0 + $0x49c] sm:$0xf0]  ;;  %v5534_v62 = vld [vmem:[#allocation12_spill] sm:$0xff]  ;;  %v3292_v22 = vld [vmem:[%s5505_s0 + $0x4a4] sm:$0xf0] }
 0x252   :  { %2045 = vmatmul.bf16.gmra.mxu3 %v3255_v59  ;;  %v3664_v59 = vld [vmem:[%s5505_s0 + $0x4a0] sm:$0xf0] }
 0x253   :  { %3511 = vmatmul.msk.bf16.gmra.mxu0 %vm1298_vm0, %v3259_v26  ;;  %v2281_v2 = vmul.f32 %v5027_v32, %v2173_v47  ;;  %v3662_v26 = vld [vmem:[%s5505_s0 + $0x494] sm:$0xf]  ;;  %v3298_v47 = vld [vmem:[%s5505_s0 + $0x498] sm:$0xf] }
 0x254   :  { %v1837_v37 = vpop.f32.mrf.mxu2 }
 0x255   :  { %v2349_v34 = vadd.f32 %v5064_v54, %v2281_v2  ;;  %v1838_v25 = vadd.f32 %v1837_v37, %v1669_v38  ;;  %v2006_v23 = vpop.f32.mrf.mxu3  ;;  %v3665_v2 = vld [vmem:[%s5505_s0 + $0x4a8] sm:$0xf0] }
 0x256   :  { %v1670_v43 = vpop.f32.mrf.mxu1 }
 0x257   :  { %vm2413_vm8 = vcmp.gt.f32.partialorder %v2349_v34, 0.0  ;;  %v2477_v14 = vmul.f32 0.2, %v2349_v34  ;;  %v2007_v60 = vadd.f32 %v2006_v23, %v1838_v25  ;;  %v1671_v40 = vadd.f32 %v1670_v43, %v4442_v35 }
 0x258   :  { %v2177_v9 = vpop.f32.mrf.mxu0  ;;  %v3287_v25 = vor.u32 %v3661_v61, %v3284_v0  ;;  %v3291_v23 = vor.u32 %v3664_v59, %v3290_v21 }
 0x259   :  { %v2541_v50 = vsel %vm2413_vm8, %v2349_v34, %v2477_v14  ;;  %v2176_v27 = vadd.f32 %v2175_v48, %v2007_v60  ;;  %v3295_v14 = vor.u32 %v3662_v26, %v3292_v22  ;;  %v3299_v60 = vor.u32 %v3665_v2, %v3298_v47 }
 0x25a   :  { %v3805_v45 = vpack.c.bf16 %v2541_v50, %v2540_v36 }
 0x25b   :  { %v2282_v56 = vmul.f32 %v5027_v32, %v2176_v27 }
 0x25c   :  { %3889 = vst [vmem:[%s5508_s4 + $0x90] sm:$0xff] %v3805_v45   ;;  %v1839_v8 = vpop.f32.mrf.mxu2 }
 0x25d   :  { %v1840_v35 = vadd.f32 %v1839_v8, %v1671_v40  ;;  %v2008_v20 = vpop.f32.mrf.mxu3  ;;  %v2350_v30 = vadd.f32 %v5064_v54, %v2282_v56 }
 0x25e   :  { %v1673_v1 = vpop.f32.mrf.mxu1 }
 0x25f   :  { %v2009_v44 = vadd.f32 %v2008_v20, %v1840_v35  ;;  %v1674_v46 = vadd.f32 %v1673_v1, %v5533_v33  ;;  %v2478_v17 = vmul.f32 0.2, %v2350_v30  ;;  %vm2414_vm9 = vcmp.gt.f32.partialorder %v2350_v30, 0.0  ;;  %v3304_v1 = vld [vmem:[%s5505_s0 + $0x4c4] sm:$0xf0] }
 0x260   :  { %v2180_v5 = vpop.f32.mrf.mxu0  ;;  %v3318_v33 = vld [vmem:[%s5505_s0 + $0x4c0] sm:$0xf] }
 0x261   :  { %v2178_v41 = vadd.f32 %v2177_v9, %v2009_v44  ;;  %1712 = vmatmul.bf16.gmra.mxu1 %v3267_v29  ;;  %1881 = vmatmul.bf16.gmra.mxu2 %v3271_v57  ;;  %v2542_v16 = vsel %vm2414_vm9, %v2350_v30, %v2478_v17  ;;  %v3666_v57 = vld [vmem:[%s5505_s0 + $0x4b4] sm:$0xf]  ;;  %v3669_v44 = vld [vmem:[%s5505_s0 + $0x4c8] sm:$0xf0] }
 0x262   :  { %2050 = vmatmul.bf16.gmra.mxu3 %v3275_v28  ;;  %v5536_v30 = vld [vmem:[#allocation16_spill] sm:$0xff] }
 0x263   :  { %3512 = vmatmul.msk.bf16.gmra.mxu0 %vm1298_vm0, %v3279_v63  ;;  %v2283_v7 = vmul.f32 %v5027_v32, %v2178_v41  ;;  %v3310_v63 = vld [vmem:[%s5505_s0 + $0x4b8] sm:$0xf] }
 0x264   :  { %v1842_v58 = vpop.f32.mrf.mxu2 }
 0x265   :  { %v2351_v19 = vadd.f32 %v5064_v54, %v2283_v7  ;;  %v1843_v31 = vadd.f32 %v1842_v58, %v1674_v46  ;;  %v2011_v24 = vpop.f32.mrf.mxu3  ;;  %v3312_v7 = vld [vmem:[%s5505_s0 + $0x4cc] sm:$0xf0]  ;;  %v3670_v46 = vld [vmem:[%s5505_s0 + $0x4d0] sm:$0xf0] }
 0x266   :  { %v1675_v39 = vpop.f32.mrf.mxu1 }
 0x267   :  { %vm2415_vm10 = vcmp.gt.f32.partialorder %v2351_v19, 0.0  ;;  %v2479_v13 = vmul.f32 0.2, %v2351_v19  ;;  %v2012_v52 = vadd.f32 %v2011_v24, %v1843_v31  ;;  %v1676_v48 = vadd.f32 %v1675_v39, %v5534_v62 }
 0x268   :  { %v2182_v10 = vpop.f32.mrf.mxu0  ;;  %v3307_v24 = vor.u32 %v3666_v57, %v3304_v1  ;;  %v3311_v39 = vor.u32 %v3669_v44, %v3310_v63 }
 0x269   :  { %v2543_v51 = vsel %vm2415_vm10, %v2351_v19, %v2479_v13  ;;  %v2181_v6 = vadd.f32 %v2180_v5, %v2012_v52  ;;  %v3667_v5 = vld [vmem:[%s5505_s0 + $0x4bc] sm:$0xf] }
 0x26a   :  { %v3810_v49 = vpack.c.bf16 %v2543_v51, %v2542_v16  ;;  %v3315_v52 = vor.u32 %v3667_v5, %v3312_v7 }
 0x26b   :  { %v2284_v37 = vmul.f32 %v5027_v32, %v2181_v6 }
 0x26c   :  { %3890 = vst [vmem:[%s5508_s4 + $0x98] sm:$0xff] %v3810_v49   ;;  %v1844_v38 = vpop.f32.mrf.mxu2  ;;  %v5537_v49 = vld [vmem:[#allocation18_spill] sm:$0xff] }
 0x26d   :  { %v1845_v42 = vadd.f32 %v1844_v38, %v1676_v48  ;;  %v2013_v34 = vpop.f32.mrf.mxu3  ;;  %v2352_v50 = vadd.f32 %v5064_v54, %v2284_v37 }
 0x26e   :  { %v1678_v43 = vpop.f32.mrf.mxu1 }
 0x26f   :  { %v2014_v9 = vadd.f32 %v2013_v34, %v1845_v42  ;;  %v1679_v45 = vadd.f32 %v1678_v43, %v5535_v15  ;;  %v2480_v11 = vmul.f32 0.2, %v2352_v50  ;;  %vm2416_vm11 = vcmp.gt.f32.partialorder %v2352_v50, 0.0  ;;  %v3324_v43 = vld [vmem:[%s5505_s0 + $0x4ec] sm:$0xf0] }
 0x270   :  { %v2185_v36 = vpop.f32.mrf.mxu0  ;;  %v3338_v15 = vld [vmem:[%s5505_s0 + $0x4e8] sm:$0xf] }
 0x271   :  { %v2183_v27 = vadd.f32 %v2182_v10, %v2014_v9  ;;  %1717 = vmatmul.bf16.gmra.mxu1 %v3287_v25  ;;  %1886 = vmatmul.bf16.gmra.mxu2 %v3291_v23  ;;  %v2544_v35 = vsel %vm2416_vm11, %v2352_v50, %v2480_v11  ;;  %v3319_v10 = vor.u32 %v3670_v46, %v3318_v33  ;;  %v3671_v23 = vld [vmem:[%s5505_s0 + $0x4dc] sm:$0xf]  ;;  %v3674_v9 = vld [vmem:[%s5505_s0 + $0x4f0] sm:$0xf0] }
 0x272   :  { %2055 = vmatmul.bf16.gmra.mxu3 %v3295_v14  ;;  %v5538_v50 = vld [vmem:[#allocation20_spill] sm:$0xff] }
 0x273   :  { %3513 = vmatmul.msk.bf16.gmra.mxu0 %vm1298_vm0, %v3299_v60  ;;  %v2285_v4 = vmul.f32 %v5027_v32, %v2183_v27  ;;  %v3330_v60 = vld [vmem:[%s5505_s0 + $0x4e0] sm:$0xf] }
 0x274   :  { %v1847_v12 = vpop.f32.mrf.mxu2 }
 0x275   :  { %v2353_v55 = vadd.f32 %v5064_v54, %v2285_v4  ;;  %v1848_v40 = vadd.f32 %v1847_v12, %v1679_v45  ;;  %v2016_v53 = vpop.f32.mrf.mxu3  ;;  %v3332_v4 = vld [vmem:[%s5505_s0 + $0x4f4] sm:$0xf0]  ;;  %v3675_v45 = vld [vmem:[%s5505_s0 + $0x4f8] sm:$0xf0] }
 0x276   :  { %v1680_v3 = vpop.f32.mrf.mxu1 }
 0x277   :  { %vm2417_vm12 = vcmp.gt.f32.partialorder %v2353_v55, 0.0  ;;  %v2481_v18 = vmul.f32 0.2, %v2353_v55  ;;  %v2017_v8 = vadd.f32 %v2016_v53, %v1848_v40  ;;  %v1681_v41 = vadd.f32 %v1680_v3, %v5536_v30 }
 0x278   :  { %v2187_v56 = vpop.f32.mrf.mxu0  ;;  %v3327_v53 = vor.u32 %v3671_v23, %v3324_v43  ;;  %v3331_v3 = vor.u32 %v3674_v9, %v3330_v60 }
 0x279   :  { %v2545_v20 = vsel %vm2417_vm12, %v2353_v55, %v2481_v18  ;;  %v2186_v29 = vadd.f32 %v2185_v36, %v2017_v8  ;;  %v3672_v36 = vld [vmem:[%s5505_s0 + $0x4e4] sm:$0xf] }
 0x27a   :  { %v3815_v28 = vpack.c.bf16 %v2545_v20, %v2544_v35  ;;  %v3335_v8 = vor.u32 %v3672_v36, %v3332_v4  ;;  %v5542_v36 = vld [vmem:[#allocation3_spill] sm:$0xff] }
 0x27b   :  { %v2286_v17 = vmul.f32 %v5027_v32, %v2186_v29 }
 0x27c   :  { %3891 = vst [vmem:[%s5508_s4 + $0xa0] sm:$0xff] %v3815_v28   ;;  %v1849_v58 = vpop.f32.mrf.mxu2  ;;  %v5539_v28 = vld [vmem:[#allocation22_spill] sm:$0xff] }
 0x27d   :  { %v1850_v19 = vadd.f32 %v1849_v58, %v1681_v41  ;;  %v2018_v31 = vpop.f32.mrf.mxu3  ;;  %v2354_v6 = vadd.f32 %v5064_v54, %v2286_v17 }
 0x27e   :  { %v1683_v13 = vpop.f32.mrf.mxu1 }
 0x27f   :  { %v2019_v16 = vadd.f32 %v2018_v31, %v1850_v19  ;;  %v1684_v21 = vadd.f32 %v1683_v13, %v5537_v49  ;;  %v2482_v26 = vmul.f32 0.2, %v2354_v6  ;;  %vm2418_vm13 = vcmp.gt.f32.partialorder %v2354_v6, 0.0  ;;  %v5540_v13 = vld [vmem:[#allocation24_spill] sm:$0xff] }
 0x280   :  { %v2190_v51 = vpop.f32.mrf.mxu0 }
 0x281   :  { %v2188_v61 = vadd.f32 %v2187_v56, %v2019_v16  ;;  %1722 = vmatmul.bf16.gmra.mxu1 %v3307_v24  ;;  %1891 = vmatmul.bf16.gmra.mxu2 %v3311_v39  ;;  %v2546_v42 = vsel %vm2418_vm13, %v2354_v6, %v2482_v26  ;;  %v3339_v56 = vor.u32 %v3675_v45, %v3338_v15  ;;  %v5420_v26 = vld [vmem:[%s5506_s2] ss:$0 sm:$0xff] }
 0x282   :  { %2060 = vmatmul.bf16.gmra.mxu3 %v3315_v52 }
 0x283   :  { %3514 = vmatmul.msk.bf16.gmra.mxu0 %vm1298_vm0, %v3319_v10  ;;  %v2287_v0 = vmul.f32 %v5027_v32, %v2188_v61 }
 0x284   :  { %v1852_v59 = vpop.f32.mrf.mxu2 }
 0x285   :  { %v2355_v62 = vadd.f32 %v5064_v54, %v2287_v0  ;;  %v1853_v48 = vadd.f32 %v1852_v59, %v1684_v21  ;;  %v2021_v22 = vpop.f32.mrf.mxu3 }
 0x286   :  { %v1685_v47 = vpop.f32.mrf.mxu1 }
 0x287   :  { %vm2419_vm14 = vcmp.gt.f32.partialorder %v2355_v62, 0.0  ;;  %v2483_v2 = vmul.f32 0.2, %v2355_v62  ;;  %v2022_v38 = vadd.f32 %v2021_v22, %v1853_v48  ;;  %v1686_v27 = vadd.f32 %v1685_v47, %v5538_v50  ;;  %v5541_v48 = vld [vmem:[#allocation2_spill] sm:$0xff] }
 0x288   :  { %v2192_v37 = vpop.f32.mrf.mxu0 }
 0x289   :  { %v2547_v34 = vsel %vm2419_vm14, %v2355_v62, %v2483_v2  ;;  %v2191_v25 = vadd.f32 %v2190_v51, %v2022_v38 }
 0x28a   :  { %v3820_v14 = vpack.c.bf16 %v2547_v34, %v2546_v42 }
 0x28b   :  { %v2288_v11 = vmul.f32 %v5027_v32, %v2191_v25 }
 0x28c   :  { %3892 = vst [vmem:[%s5508_s4 + $0xa8] sm:$0xff] %v3820_v14   ;;  %v1854_v12 = vpop.f32.mrf.mxu2 }
 0x28d   :  { %v1855_v55 = vadd.f32 %v1854_v12, %v1686_v27  ;;  %v2023_v40 = vpop.f32.mrf.mxu3  ;;  %v2356_v29 = vadd.f32 %v5064_v54, %v2288_v11 }
 0x28e   :  { %v1688_v18 = vpop.f32.mrf.mxu1 }
 0x28f   :  { %v2024_v35 = vadd.f32 %v2023_v40, %v1855_v55  ;;  %v1689_v63 = vadd.f32 %v1688_v18, %v5539_v28  ;;  %v2484_v5 = vmul.f32 0.2, %v2356_v29  ;;  %vm2420_vm15 = vcmp.gt.f32.partialorder %v2356_v29, 0.0  ;;  %v5543_v18 = vld [vmem:[#allocation4_spill] sm:$0xff] }
 0x290   :  { %v2195_v20 = vpop.f32.mrf.mxu0 }
 0x291   :  { %v2193_v57 = vadd.f32 %v2192_v37, %v2024_v35  ;;  %1727 = vmatmul.bf16.gmra.mxu1 %v3327_v53  ;;  %1896 = vmatmul.bf16.gmra.mxu2 %v3331_v3  ;;  %v2548_v19 = vsel %vm2420_vm15, %v2356_v29, %v2484_v5 }
 0x292   :  { %2065 = vmatmul.bf16.gmra.mxu3 %v3335_v8 }
 0x293   :  { %3515 = vmatmul.msk.bf16.gmra.mxu0 %vm1298_vm0, %v3339_v56  ;;  %v2289_v1 = vmul.f32 %v5027_v32, %v2193_v57 }
 0x294   :  { %v1857_v44 = vpop.f32.mrf.mxu2 }
 0x295   :  { %v2357_v30 = vadd.f32 %v5064_v54, %v2289_v1  ;;  %v1858_v41 = vadd.f32 %v1857_v44, %v1689_v63  ;;  %v2026_v7 = vpop.f32.mrf.mxu3 }
 0x296   :  { %v1690_v33 = vpop.f32.mrf.mxu1 }
 0x297   :  { %vm2421_vm1 = vcmp.gt.f32.partialorder %v2357_v30, 0.0  ;;  %v2485_v46 = vmul.f32 0.2, %v2357_v30  ;;  %v2027_v58 = vadd.f32 %v2026_v7, %v1858_v41  ;;  %v1691_v52 = vadd.f32 %v1690_v33, %v5540_v13  ;;  %v5544_v33 = vld [vmem:[#allocation5_spill] sm:$0xff]  ;;  %v5442_v13 = vld [vmem:[%s5507_s3] ss:$0 sm:$0xff] }
 0x298   :  { %v2197_v17 = vpop.f32.mrf.mxu0 }
 0x299   :  { %v2549_v31 = vsel %vm2421_vm1, %v2357_v30, %v2485_v46  ;;  %v2196_v24 = vadd.f32 %v2195_v20, %v2027_v58 }
 0x29a   :  { %v3825_v39 = vpack.c.bf16 %v2549_v31, %v2548_v19 }
 0x29b   :  { %v2290_v16 = vmul.f32 %v5027_v32, %v2196_v24 }
 0x29c   :  { %3893 = vst [vmem:[%s5508_s4 + $0xb0] sm:$0xff] %v3825_v39   ;;  %v1859_v10 = vpop.f32.mrf.mxu2 }
 0x29d   :  { %v1860_v51 = vadd.f32 %v1859_v10, %v1691_v52  ;;  %v2028_v6 = vpop.f32.mrf.mxu3  ;;  %v2358_v21 = vadd.f32 %v5064_v54, %v2290_v16 }
 0x29e   :  { %v1693_v61 = vpop.f32.mrf.mxu1 }
 0x29f   :  { %v2029_v0 = vadd.f32 %v2028_v6, %v1860_v51  ;;  %v1694_v22 = vadd.f32 %v1693_v61, %v5541_v48  ;;  %v2486_v2 = vmul.f32 0.2, %v2358_v21  ;;  %vm2422_vm0 = vcmp.gt.f32.partialorder %v2358_v21, 0.0  ;;  %v5545_v51 = vld [vmem:[#allocation6_spill] sm:$0xff] }
 0x2a0   :  { %v2200_v49 = vpop.f32.mrf.mxu0 }
 0x2a1   :  { %v2198_v59 = vadd.f32 %v2197_v17, %v2029_v0  ;;  %v2550_v43 = vsel %vm2422_vm0, %v2358_v21, %v2486_v2 }
 0x2a3   :  { %v2291_v62 = vmul.f32 %v5420_v26, %v2198_v59 }
 0x2a4   :  { %v1862_v47 = vpop.f32.mrf.mxu2 }
 0x2a5   :  { %v2359_v32 = vadd.f32 %v5064_v54, %v2291_v62  ;;  %v1863_v38 = vadd.f32 %v1862_v47, %v1694_v22  ;;  %v2031_v37 = vpop.f32.mrf.mxu3 }
 0x2a6   :  { %v1695_v42 = vpop.f32.mrf.mxu1 }
 0x2a7   :  { %vm2423_vm2 = vcmp.gt.f32.partialorder %v2359_v32, 0.0  ;;  %v2487_v34 = vmul.f32 0.2, %v2359_v32  ;;  %v2032_v25 = vadd.f32 %v2031_v37, %v1863_v38  ;;  %v1696_v50 = vadd.f32 %v1695_v42, %v5542_v36  ;;  %v5546_v42 = vld [vmem:[#allocation7_spill] sm:$0xff] }
 0x2a8   :  { %v2202_v23 = vpop.f32.mrf.mxu0 }
 0x2a9   :  { %v2551_v14 = vsel %vm2423_vm2, %v2359_v32, %v2487_v34  ;;  %v2201_v60 = vadd.f32 %v2200_v49, %v2032_v25 }
 0x2aa   :  { %v3830_v9 = vpack.c.bf16 %v2551_v14, %v2550_v43 }
 0x2ab   :  { %v2292_v4 = vmul.f32 %v5420_v26, %v2201_v60 }
 0x2ac   :  { %3894 = vst [vmem:[%s5508_s4 + $0xb8] sm:$0xff] %v3830_v9   ;;  %v1864_v27 = vpop.f32.mrf.mxu2 }
 0x2ad   :  { %v1865_v15 = vadd.f32 %v1864_v27, %v1696_v50  ;;  %v2033_v45 = vpop.f32.mrf.mxu3  ;;  %v2360_v40 = vadd.f32 %v5064_v54, %v2292_v4 }
 0x2ae   :  { %v1698_v12 = vpop.f32.mrf.mxu1 }
 0x2af   :  { %v2034_v11 = vadd.f32 %v2033_v45, %v1865_v15  ;;  %v1699_v8 = vadd.f32 %v1698_v12, %v5543_v18  ;;  %v2488_v35 = vmul.f32 0.2, %v2360_v40  ;;  %vm2424_vm3 = vcmp.gt.f32.partialorder %v2360_v40, 0.0  ;;  %v5547_v15 = vld [vmem:[#allocation8_spill] sm:$0xff] }
 0x2b0   :  { %v2205_v55 = vpop.f32.mrf.mxu0 }
 0x2b1   :  { %v2203_v53 = vadd.f32 %v2202_v23, %v2034_v11  ;;  %v2552_v5 = vsel %vm2424_vm3, %v2360_v40, %v2488_v35 }
 0x2b3   :  { %v2293_v3 = vmul.f32 %v5420_v26, %v2203_v53 }
 0x2b4   :  { %v1867_v56 = vpop.f32.mrf.mxu2 }
 0x2b5   :  { %v2361_v20 = vadd.f32 %v5064_v54, %v2293_v3  ;;  %v1868_v29 = vadd.f32 %v1867_v56, %v1699_v8  ;;  %v2036_v57 = vpop.f32.mrf.mxu3 }
 0x2b6   :  { %v1700_v1 = vpop.f32.mrf.mxu1 }
 0x2b7   :  { %vm2425_vm4 = vcmp.gt.f32.partialorder %v2361_v20, 0.0  ;;  %v2489_v28 = vmul.f32 0.2, %v2361_v20  ;;  %v2037_v63 = vadd.f32 %v2036_v57, %v1868_v29  ;;  %v1701_v46 = vadd.f32 %v1700_v1, %v5544_v33  ;;  %v5548_v1 = vld [vmem:[#allocation9_spill] sm:$0xff] }
 0x2b8   :  { %v2207_v44 = vpop.f32.mrf.mxu0 }
 0x2b9   :  { %v2553_v30 = vsel %vm2425_vm4, %v2361_v20, %v2489_v28  ;;  %v2206_v41 = vadd.f32 %v2205_v55, %v2037_v63 }
 0x2ba   :  { %v3835_v7 = vpack.c.bf16 %v2553_v30, %v2552_v5 }
 0x2bb   :  { %v2294_v54 = vmul.f32 %v5420_v26, %v2206_v41 }
 0x2bc   :  { %3895 = vst [vmem:[%s5508_s4 + $0xc0] sm:$0xff] %v3835_v7   ;;  %v1869_v58 = vpop.f32.mrf.mxu2 }
 0x2bd   :  { %v1870_v17 = vadd.f32 %v1869_v58, %v1701_v46  ;;  %v2038_v19 = vpop.f32.mrf.mxu3  ;;  %v2362_v52 = vadd.f32 %v5442_v13, %v2294_v54 }
 0x2be   :  { %v1703_v31 = vpop.f32.mrf.mxu1 }
 0x2bf   :  { %v2039_v24 = vadd.f32 %v2038_v19, %v1870_v17  ;;  %v1704_v6 = vadd.f32 %v1703_v31, %v5545_v51  ;;  %v2490_v0 = vmul.f32 0.2, %v2362_v52  ;;  %vm2426_vm5 = vcmp.gt.f32.partialorder %v2362_v52, 0.0  ;;  %v5549_v17 = vld [vmem:[#allocation11_spill] sm:$0xff] }
 0x2c0   :  { %v2210_v39 = vpop.f32.mrf.mxu0 }
 0x2c1   :  { %v2208_v10 = vadd.f32 %v2207_v44, %v2039_v24  ;;  %v2554_v2 = vsel %vm2426_vm5, %v2362_v52, %v2490_v0 }
 0x2c3   :  { %v2295_v16 = vmul.f32 %v5420_v26, %v2208_v10 }
 0x2c4   :  { %v1872_v61 = vpop.f32.mrf.mxu2 }
 0x2c5   :  { %v2363_v49 = vadd.f32 %v5442_v13, %v2295_v16  ;;  %v1873_v21 = vadd.f32 %v1872_v61, %v1704_v6  ;;  %v2041_v59 = vpop.f32.mrf.mxu3 }
 0x2c6   :  { %v1705_v62 = vpop.f32.mrf.mxu1 }
 0x2c7   :  { %vm2427_vm6 = vcmp.gt.f32.partialorder %v2363_v49, 0.0  ;;  %v2491_v48 = vmul.f32 0.2, %v2363_v49  ;;  %v2042_v22 = vadd.f32 %v2041_v59, %v1873_v21  ;;  %v1706_v34 = vadd.f32 %v1705_v62, %v5546_v42  ;;  %v5550_v62 = vld [vmem:[#allocation13_spill] sm:$0xff] }
 0x2c8   :  { %v2212_v47 = vpop.f32.mrf.mxu0 }
 0x2c9   :  { %v2555_v32 = vsel %vm2427_vm6, %v2363_v49, %v2491_v48  ;;  %v2211_v38 = vadd.f32 %v2210_v39, %v2042_v22 }
 0x2ca   :  { %v3840_v37 = vpack.c.bf16 %v2555_v32, %v2554_v2 }
 0x2cb   :  { %v2296_v23 = vmul.f32 %v5420_v26, %v2211_v38 }
 0x2cc   :  { %3896 = vst [vmem:[%s5508_s4 + $0xc8] sm:$0xff] %v3840_v37   ;;  %v1874_v25 = vpop.f32.mrf.mxu2 }
 0x2cd   :  { %v1875_v43 = vadd.f32 %v1874_v25, %v1706_v34  ;;  %v2043_v14 = vpop.f32.mrf.mxu3  ;;  %v2364_v50 = vadd.f32 %v5442_v13, %v2296_v23 }
 0x2ce   :  { %v1708_v60 = vpop.f32.mrf.mxu1 }
 0x2cf   :  { %v2044_v9 = vadd.f32 %v2043_v14, %v1875_v43  ;;  %v1709_v45 = vadd.f32 %v1708_v60, %v5547_v15  ;;  %v2492_v11 = vmul.f32 0.2, %v2364_v50  ;;  %vm2428_vm7 = vcmp.gt.f32.partialorder %v2364_v50, 0.0  ;;  %v5551_v43 = vld [vmem:[#allocation15_spill] sm:$0xff] }
 0x2d0   :  { %v2215_v36 = vpop.f32.mrf.mxu0 }
 0x2d1   :  { %v2213_v27 = vadd.f32 %v2212_v47, %v2044_v9  ;;  %v2556_v35 = vsel %vm2428_vm7, %v2364_v50, %v2492_v11 }
 0x2d3   :  { %v2297_v4 = vmul.f32 %v5420_v26, %v2213_v27 }
 0x2d4   :  { %v1877_v12 = vpop.f32.mrf.mxu2 }
 0x2d5   :  { %v2365_v55 = vadd.f32 %v5442_v13, %v2297_v4  ;;  %v1878_v40 = vadd.f32 %v1877_v12, %v1709_v45  ;;  %v2046_v53 = vpop.f32.mrf.mxu3 }
 0x2d6   :  { %v1710_v3 = vpop.f32.mrf.mxu1 }
 0x2d7   :  { %vm2429_vm8 = vcmp.gt.f32.partialorder %v2365_v55, 0.0  ;;  %v2493_v18 = vmul.f32 0.2, %v2365_v55  ;;  %v2047_v8 = vadd.f32 %v2046_v53, %v1878_v40  ;;  %v1711_v28 = vadd.f32 %v1710_v3, %v5548_v1  ;;  %v5552_v3 = vld [vmem:[#allocation17_spill] sm:$0xff] }
 0x2d8   :  { %v2217_v56 = vpop.f32.mrf.mxu0 }
 0x2d9   :  { %v2557_v20 = vsel %vm2429_vm8, %v2365_v55, %v2493_v18  ;;  %v2216_v29 = vadd.f32 %v2215_v36, %v2047_v8 }
 0x2da   :  { %v3845_v57 = vpack.c.bf16 %v2557_v20, %v2556_v35 }
 0x2db   :  { %v2298_v44 = vmul.f32 %v5420_v26, %v2216_v29 }
 0x2dc   :  { %3897 = vst [vmem:[%s5508_s4 + $0xd0] sm:$0xff] %v3845_v57   ;;  %v1879_v63 = vpop.f32.mrf.mxu2 }
 0x2dd   :  { %v1880_v5 = vadd.f32 %v1879_v63, %v1711_v28  ;;  %v2048_v30 = vpop.f32.mrf.mxu3  ;;  %v2366_v46 = vadd.f32 %v5442_v13, %v2298_v44 }
 0x2de   :  { %v1713_v41 = vpop.f32.mrf.mxu1 }
 0x2df   :  { %v2049_v7 = vadd.f32 %v2048_v30, %v1880_v5  ;;  %v1714_v19 = vadd.f32 %v1713_v41, %v5549_v17  ;;  %v2494_v24 = vmul.f32 0.2, %v2366_v46  ;;  %vm2430_vm9 = vcmp.gt.f32.partialorder %v2366_v46, 0.0  ;;  %v5553_v5 = vld [vmem:[#allocation19_spill] sm:$0xff] }
 0x2e0   :  { %v2220_v33 = vpop.f32.mrf.mxu0 }
 0x2e1   :  { %v2218_v58 = vadd.f32 %v2217_v56, %v2049_v7  ;;  %v2558_v0 = vsel %vm2430_vm9, %v2366_v46, %v2494_v24 }
 0x2e3   :  { %v2299_v54 = vmul.f32 %v5420_v26, %v2218_v58 }
 0x2e4   :  { %v1882_v31 = vpop.f32.mrf.mxu2 }
 0x2e5   :  { %v2367_v39 = vadd.f32 %v5442_v13, %v2299_v54  ;;  %v1883_v52 = vadd.f32 %v1882_v31, %v1714_v19  ;;  %v2051_v10 = vpop.f32.mrf.mxu3 }
 0x2e6   :  { %v1715_v16 = vpop.f32.mrf.mxu1 }
 0x2e7   :  { %vm2431_vm10 = vcmp.gt.f32.partialorder %v2367_v39, 0.0  ;;  %v2495_v51 = vmul.f32 0.2, %v2367_v39  ;;  %v2052_v6 = vadd.f32 %v2051_v10, %v1883_v52  ;;  %v1716_v48 = vadd.f32 %v1715_v16, %v5550_v62  ;;  %v5554_v10 = vld [vmem:[#allocation21_spill] sm:$0xff] }
 0x2e8   :  { %v2222_v61 = vpop.f32.mrf.mxu0 }
 0x2e9   :  { %v2559_v49 = vsel %vm2431_vm10, %v2367_v39, %v2495_v51  ;;  %v2221_v21 = vadd.f32 %v2220_v33, %v2052_v6 }
 0x2ea   :  { %v3850_v59 = vpack.c.bf16 %v2559_v49, %v2558_v0 }
 0x2eb   :  { %v2300_v47 = vmul.f32 %v5420_v26, %v2221_v21 }
 0x2ec   :  { %3898 = vst [vmem:[%s5508_s4 + $0xd8] sm:$0xff] %v3850_v59   ;;  %v1884_v22 = vpop.f32.mrf.mxu2 }
 0x2ed   :  { %v1885_v2 = vadd.f32 %v1884_v22, %v1716_v48  ;;  %v2053_v32 = vpop.f32.mrf.mxu3  ;;  %v2368_v34 = vadd.f32 %v5442_v13, %v2300_v47  ;;  %v5555_v47 = vld [vmem:[#allocation23_spill] sm:$0xff] }
 0x2ee   :  { %v1718_v38 = vpop.f32.mrf.mxu1 }
 0x2ef   :  { %v2054_v37 = vadd.f32 %v2053_v32, %v1885_v2  ;;  %v1719_v14 = vadd.f32 %v1718_v38, %v5551_v43  ;;  %v2496_v9 = vmul.f32 0.2, %v2368_v34  ;;  %vm2432_vm11 = vcmp.gt.f32.partialorder %v2368_v34, 0.0 }
 0x2f0   :  { %v2225_v42 = vpop.f32.mrf.mxu0 }
 0x2f1   :  { %v2223_v25 = vadd.f32 %v2222_v61, %v2054_v37  ;;  %v2560_v11 = vsel %vm2432_vm11, %v2368_v34, %v2496_v9 }
 0x2f3   :  { %v2301_v23 = vmul.f32 %v5420_v26, %v2223_v25 }
 0x2f4   :  { %v1887_v60 = vpop.f32.mrf.mxu2 }
 0x2f5   :  { %v2369_v36 = vadd.f32 %v5442_v13, %v2301_v23  ;;  %v1888_v50 = vadd.f32 %v1887_v60, %v1719_v14  ;;  %v2056_v27 = vpop.f32.mrf.mxu3 }
 0x2f6   :  { %v1720_v4 = vpop.f32.mrf.mxu1 }
 0x2f7   :  { %vm2433_vm12 = vcmp.gt.f32.partialorder %v2369_v36, 0.0  ;;  %v2497_v15 = vmul.f32 0.2, %v2369_v36  ;;  %v2057_v45 = vadd.f32 %v2056_v27, %v1888_v50  ;;  %v1721_v18 = vadd.f32 %v1720_v4, %v5552_v3  ;;  %v5556_v27 = vld [vmem:[#allocation25_spill] sm:$0xff] }
 0x2f8   :  { %v2227_v12 = vpop.f32.mrf.mxu0 }
 0x2f9   :  { %v2561_v55 = vsel %vm2433_vm12, %v2369_v36, %v2497_v15  ;;  %v2226_v40 = vadd.f32 %v2225_v42, %v2057_v45 }
 0x2fa   :  { %v3855_v53 = vpack.c.bf16 %v2561_v55, %v2560_v11 }
 0x2fb   :  { %v2302_v56 = vmul.f32 %v5420_v26, %v2226_v40 }
 0x2fc   :  { %3899 = vst [vmem:[%s5508_s4 + $0xe0] sm:$0xff] %v3855_v53   ;;  %v1889_v8 = vpop.f32.mrf.mxu2 }
 0x2fd   :  { %v1890_v35 = vadd.f32 %v1889_v8, %v1721_v18  ;;  %v2058_v20 = vpop.f32.mrf.mxu3  ;;  %v2370_v1 = vadd.f32 %v5442_v13, %v2302_v56 }
 0x2fe   :  { %v1723_v29 = vpop.f32.mrf.mxu1 }
 0x2ff   :  { %v2059_v57 = vadd.f32 %v2058_v20, %v1890_v35  ;;  %v1724_v30 = vadd.f32 %v1723_v29, %v5553_v5  ;;  %v2498_v7 = vmul.f32 0.2, %v2370_v1  ;;  %vm2434_vm13 = vcmp.gt.f32.partialorder %v2370_v1, 0.0 }
 0x300   :  { %v2230_v63 = vpop.f32.mrf.mxu0 }
 0x301   :  { %v2228_v28 = vadd.f32 %v2227_v12, %v2059_v57  ;;  %v2562_v31 = vsel %vm2434_vm13, %v2370_v1, %v2498_v7 }
 0x303   :  { %v2303_v44 = vmul.f32 %v5420_v26, %v2228_v28 }
 0x304   :  { %v1892_v41 = vpop.f32.mrf.mxu2 }
 0x305   :  { %v2371_v33 = vadd.f32 %v5442_v13, %v2303_v44  ;;  %v1893_v46 = vadd.f32 %v1892_v41, %v1724_v30  ;;  %v2061_v58 = vpop.f32.mrf.mxu3 }
 0x306   :  { %v1725_v54 = vpop.f32.mrf.mxu1 }
 0x307   :  { %vm2435_vm14 = vcmp.gt.f32.partialorder %v2371_v33, 0.0  ;;  %v2499_v17 = vmul.f32 0.2, %v2371_v33  ;;  %v2062_v19 = vadd.f32 %v2061_v58, %v1893_v46  ;;  %v1726_v16 = vadd.f32 %v1725_v54, %v5554_v10 }
 0x308   :  { %v2232_v51 = vpop.f32.mrf.mxu0 }
 0x309   :  { %v2563_v24 = vsel %vm2435_vm14, %v2371_v33, %v2499_v17  ;;  %v2231_v39 = vadd.f32 %v2230_v63, %v2062_v19 }
 0x30a   :  { %v3860_v52 = vpack.c.bf16 %v2563_v24, %v2562_v31 }
 0x30b   :  { %v2304_v61 = vmul.f32 %v5420_v26, %v2231_v39 }
 0x30c   :  { %3900 = vst [vmem:[%s5508_s4 + $0xe8] sm:$0xff] %v3860_v52   ;;  %v1894_v6 = vpop.f32.mrf.mxu2 }
 0x30d   :  { %v1895_v0 = vadd.f32 %v1894_v6, %v1726_v16  ;;  %v2063_v49 = vpop.f32.mrf.mxu3  ;;  %v2372_v62 = vadd.f32 %v5442_v13, %v2304_v61 }
 0x30e   :  { %v1728_v21 = vpop.f32.mrf.mxu1 }
 0x30f   :  { %v2064_v59 = vadd.f32 %v2063_v49, %v1895_v0  ;;  %v1729_v2 = vadd.f32 %v1728_v21, %v5555_v47  ;;  %v2500_v38 = vmul.f32 0.2, %v2372_v62  ;;  %vm2436_vm15 = vcmp.gt.f32.partialorder %v2372_v62, 0.0 }
 0x310   :  { %v2235_v25 = vpop.f32.mrf.mxu0 }
 0x311   :  { %v2233_v48 = vadd.f32 %v2232_v51, %v2064_v59  ;;  %v2564_v60 = vsel %vm2436_vm15, %v2372_v62, %v2500_v38 }
 0x313   :  { %v2305_v22 = vmul.f32 %v5420_v26, %v2233_v48 }
 0x314   :  { %v1897_v32 = vpop.f32.mrf.mxu2 }
 0x315   :  { %v2373_v37 = vadd.f32 %v5442_v13, %v2305_v22  ;;  %v1898_v42 = vadd.f32 %v1897_v32, %v1729_v2  ;;  %v2066_v34 = vpop.f32.mrf.mxu3 }
 0x316   :  { %v1730_v14 = vpop.f32.mrf.mxu1 }
 0x317   :  { %vm2437_vm1 = vcmp.gt.f32.partialorder %v2373_v37, 0.0  ;;  %v2501_v23 = vmul.f32 0.2, %v2373_v37  ;;  %v2067_v43 = vadd.f32 %v2066_v34, %v1898_v42  ;;  %v1731_v4 = vadd.f32 %v1730_v14, %v5556_v27 }
 0x318   :  { %v2237_v40 = vpop.f32.mrf.mxu0 }
 0x319   :  { %v2565_v9 = vsel %vm2437_vm1, %v2373_v37, %v2501_v23  ;;  %v2236_v36 = vadd.f32 %v2235_v25, %v2067_v43 }
 0x31a   :  { %v3865_v50 = vpack.c.bf16 %v2565_v9, %v2564_v60 }
 0x31b   :  { %v2306_v45 = vmul.f32 %v5420_v26, %v2236_v36 }
 0x31c   :  { %3901 = vst [vmem:[%s5508_s4 + $0xf0] sm:$0xff] %v3865_v50   ;;  %v1899_v15 = vpop.f32.mrf.mxu2 }
 0x31d   :  { %v1900_v12 = vadd.f32 %v1899_v15, %v1731_v4  ;;  %v2068_v11 = vpop.f32.mrf.mxu3  ;;  %v2374_v53 = vadd.f32 %v5442_v13, %v2306_v45 }
 0x31f   :  { %v2069_v55 = vadd.f32 %v2068_v11, %v1900_v12  ;;  %v2502_v8 = vmul.f32 0.2, %v2374_v53  ;;  %vm2438_vm0 = vcmp.gt.f32.partialorder %v2374_v53, 0.0 }
 0x321   :  { %v2238_v3 = vadd.f32 %v2237_v40, %v2069_v55  ;;  %v2566_v20 = vsel %vm2438_vm0, %v2374_v53, %v2502_v8 }
 0x323   :  { %v2307_v18 = vmul.f32 %v5420_v26, %v2238_v3 }
 0x325   :  { %v2375_v56 = vadd.f32 %v5442_v13, %v2307_v18 }
 0x327   :  { %vm2439_vm2 = vcmp.gt.f32.partialorder %v2375_v56, 0.0  ;;  %v2503_v35 = vmul.f32 0.2, %v2375_v56 }
 0x329   :  { %v2567_v29 = vsel %vm2439_vm2, %v2375_v56, %v2503_v35 }
 0x32a   :  { %v3870_v57 = vpack.c.bf16 %v2567_v29, %v2566_v20 }
 0x32c   :  { %3902 = vst [vmem:[%s5508_s4 + $0xf8] sm:$0xff] %v3870_v57  }

// kernel: mnist_generator_info.10
= control target key start
LH: loop header
LB: loop body
LE: loop exit
PB: predicated region body
PF: predicated region fallthrough
CT: control target
= control target key end

     0   :  { %s2941_s15 = smov 0   ;;  %s3532_s0 = inlined_call_operand.vmem [shape: bf16[2048,288], index: 0, kind: input, shape index: {}]   ;;  %s3533_s1 = inlined_call_operand.vmem [shape: bf16[288,128], index: 1, kind: input, shape index: {}]   ;;  %s3534_s2 = inlined_call_operand.vmem [shape: f32[1,128], index: 2, kind: input, shape index: {}]   ;;  %s3535_s3 = inlined_call_operand.vmem [shape: f32[1,128], index: 3, kind: input, shape index: {}]   ;;  %s3536_s4 = inlined_call_operand.vmem [shape: bf16[2048,128], index: 4, kind: output, shape index: {}]  }
   0x1 LB: > { %s2073_s16 = sadd.s32 4294967295, %s2914_s15   ;;  %p2077_p0 = scmp.ge.s32.totalorder %s2914_s15, 1  ;;  %s2914_s15 = sphi %s2941_s15, %s14_s15  }
   0x2   : > { %p164_p1 = scmp.lt.s32.totalorder %s2914_s15, 5 }
   0x4   : > { %p165_p2 = pnand %p2077_p0, %p164_p1 }
   0x5   : > { %s2078_s23 = sshll.u32 (!%p165_p2), %s2073_s16, 6 }
   0x6   : > { %168 = sbr.rel (%p165_p2) target bundleno = 573 (0x23d), region = 36  ;;  %p192_p3 = scmp.lt.s32.totalorder (!%p165_p2), %s2078_s23, 255 }
   0xb   : > { %v2675_v0 = vld [vmem:[%s3533_s1 + $0x38] sm:$0xff]  ;;  %v2960_v2 = vld [vmem:[%s3533_s1 + $0x88] sm:$0xff]  ;;  %v2674_v3 = vld [vmem:[%s3533_s1 + $0x30] sm:$0xff]  ;;  %s3538_s23 = smov (!%p192_p3, %s2078_s23), 255  ;;  %vm957_vm0 = vcmask 261120  }
   0xc   : > { %v2955_v1 = vld [vmem:[%s3533_s1 + $0x78] sm:$0xff]  ;;  %1054 = vmatpush.bf16.msra.mxu0 %v2675_v0  ;;  %2877 = vmatpush.bf16.msra.mxu3 %v2675_v0  ;;  %v2682_v4 = vld [vmem:[%s3533_s1 + $0x70] sm:$0xff]  ;;  %v2973_v5 = vld [vmem:[%s3533_s1 + $0x80] sm:$0xff]  ;;  %s2895_s30 = smul.u32 12, %s3538_s23  ;;  %s2081_s13 = sshll.u32 %s3538_s23, 2 }
   0xd   : > { %1223 = vmatpush.bf16.msra.mxu1 %v2955_v1  ;;  %1398 = vmatpush.bf16.msra.mxu2 %v2960_v2  ;;  %v2673_v6 = vld [vmem:[%s3533_s1 + $0x28] sm:$0xff]  ;;  %v2672_v11 = vld [vmem:[%s3533_s1 + $0x20] sm:$0xff]  ;;  %v2671_v13 = vld [vmem:[%s3533_s1 + $0x18] sm:$0xff]  ;;  %s3138_s17 = scalar_lea.vmem %s3536_s4, %s2081_s13 }
   0xe   : > { %v2681_v7 = vld [vmem:[%s3533_s1 + $0x68] sm:$0xff]  ;;  %s2988_s11 = scalar_lea.vmem %s3532_s0, %s2895_s30  ;;  %v2680_v12 = vld [vmem:[%s3533_s1 + $0x60] sm:$0xff]  ;;  %v2679_v14 = vld [vmem:[%s3533_s1 + $0x58] sm:$0xff] }
   0xf   : > { %v2092_v8 = vld [vmem:[%s2988_s11 + $0x8] sm:$0xf]  ;;  %v2574_v9 = vld [vmem:[%s2988_s11 + $0x10] sm:$0xf0]  ;;  %v2104_v17 = vld [vmem:[%s2988_s11 + $0x20] sm:$0xf] }
  0x10   : > { %1055 = vmatpush.bf16.msra.mxu0 %v2674_v3  ;;  %2878 = vmatpush.bf16.msra.mxu3 %v2674_v3  ;;  %v2093_v10 = vor.u32 %v2574_v9, %v2092_v8  ;;  %v2670_v15 = vld [vmem:[%s3533_s1 + $0x10] sm:$0xff]  ;;  %v2577_v18 = vld [vmem:[%s2988_s11 + $0x28] sm:$0xf0]  ;;  %v2668_v22 = vld [vmem:[%s3533_s1] sm:$0xff] }
  0x11   : > { %1224 = vmatpush.bf16.msra.mxu1 %v2682_v4  ;;  %1399 = vmatpush.bf16.msra.mxu2 %v2973_v5  ;;  %v2678_v16 = vld [vmem:[%s3533_s1 + $0x50] sm:$0xff]  ;;  %v2669_v19 = vld [vmem:[%s3533_s1 + $0x8] sm:$0xff]  ;;  %v2105_v21 = vor.u32 %v2577_v18, %v2104_v17  ;;  %v2084_v23 = vld [vmem:[%s2988_s11] sm:$0xf] }
  0x12   : > { %v2677_v20 = vld [vmem:[%s3533_s1 + $0x48] sm:$0xff]  ;;  %v2372_v25 = vld [vmem:[%s2988_s11 + $0x240] sm:$0xf]  ;;  %v2572_v28 = vld [vmem:[%s2988_s11 + $0x4] sm:$0xf] }
  0x13   : > { %v2573_v24 = vld [vmem:[%s2988_s11 + $0x8] sm:$0xf0]  ;;  %v2676_v27 = vld [vmem:[%s3533_s1 + $0x40] sm:$0xff]  ;;  %v2086_v29 = vld [vmem:[%s2988_s11 + $0xc] sm:$0xf0] }
  0x14   : > { %1056 = vmatpush.bf16.msra.mxu0 %v2673_v6  ;;  %2879 = vmatpush.bf16.msra.mxu3 %v2673_v6  ;;  %v2645_v26 = vld [vmem:[%s2988_s11 + $0x248] sm:$0xf0]  ;;  %v2085_v30 = vor.u32 %v2573_v24, %v2084_v23  ;;  %v2089_v32 = vor.u32 %v2572_v28, %v2086_v29  ;;  %v2116_v33 = vld [vmem:[%s2988_s11 + $0x38] sm:$0xf]  ;;  %v2580_v34 = vld [vmem:[%s2988_s11 + $0x40] sm:$0xf0] }
  0x15   : > { %1225 = vmatpush.bf16.msra.mxu1 %v2681_v7  ;;  %2538 = vmatmul.msk.bf16.vlgmr.msra.gmra.mxu2 %vm957_vm0, %v2093_v10  ;;  %v2373_v31 = vor.u32 %v2645_v26, %v2372_v25  ;;  %v2117_v35 = vor.u32 %v2580_v34, %v2116_v33  ;;  %v2096_v36 = vld [vmem:[%s2988_s11 + $0x18] sm:$0xf]  ;;  %v2576_v37 = vld [vmem:[%s2988_s11 + $0x20] sm:$0xf0]  ;;  %v2575_v40 = vld [vmem:[%s2988_s11 + $0x1c] sm:$0xf] }
  0x16   : > { %v2384_v38 = vld [vmem:[%s2988_s11 + $0x258] sm:$0xf]  ;;  %v2648_v39 = vld [vmem:[%s2988_s11 + $0x260] sm:$0xf0]  ;;  %v2098_v41 = vld [vmem:[%s2988_s11 + $0x24] sm:$0xf0]  ;;  %v2097_v42 = vor.u32 %v2576_v37, %v2096_v36 }
  0x17   : > { %v2385_v43 = vor.u32 %v2648_v39, %v2384_v38  ;;  %v2101_v44 = vor.u32 %v2575_v40, %v2098_v41  ;;  %v2128_v45 = vld [vmem:[%s2988_s11 + $0x50] sm:$0xf]  ;;  %v2583_v46 = vld [vmem:[%s2988_s11 + $0x58] sm:$0xf0]  ;;  %v2578_v52 = vld [vmem:[%s2988_s11 + $0x34] sm:$0xf] }
  0x18   : > { %1057 = vmatpush.bf16.msra.mxu0 %v2672_v11  ;;  %2880 = vmatpush.bf16.msra.mxu3 %v2672_v11  ;;  %v2129_v47 = vor.u32 %v2583_v46, %v2128_v45  ;;  %v2108_v48 = vld [vmem:[%s2988_s11 + $0x30] sm:$0xf]  ;;  %v2579_v49 = vld [vmem:[%s2988_s11 + $0x38] sm:$0xf0]  ;;  %v2110_v53 = vld [vmem:[%s2988_s11 + $0x3c] sm:$0xf0] }
  0x19   : > { %1226 = vmatpush.bf16.msra.mxu1 %v2680_v12  ;;  %v2396_v50 = vld [vmem:[%s2988_s11 + $0x270] sm:$0xf]  ;;  %v2651_v51 = vld [vmem:[%s2988_s11 + $0x278] sm:$0xf0]  ;;  %v2109_v54 = vor.u32 %v2579_v49, %v2108_v48  ;;  %v2113_v56 = vor.u32 %v2578_v52, %v2110_v53  ;;  %v2140_v57 = vld [vmem:[%s2988_s11 + $0x68] sm:$0xf] }
  0x1a   : > { %v2397_v55 = vor.u32 %v2651_v51, %v2396_v50  ;;  %v2586_v58 = vld [vmem:[%s2988_s11 + $0x70] sm:$0xf0]  ;;  %v2120_v60 = vld [vmem:[%s2988_s11 + $0x48] sm:$0xf]  ;;  %v2581_v0 = vld [vmem:[%s2988_s11 + $0x4c] sm:$0xf] }
  0x1b   : > { %v2141_v59 = vor.u32 %v2586_v58, %v2140_v57  ;;  %v2582_v61 = vld [vmem:[%s2988_s11 + $0x50] sm:$0xf0]  ;;  %v2408_v62 = vld [vmem:[%s2988_s11 + $0x288] sm:$0xf]  ;;  %v2589_v6 = vld [vmem:[%s2988_s11 + $0x88] sm:$0xf0] }
  0x1c   : > { %1058 = vmatpush.bf16.msra.mxu0 %v2671_v13  ;;  %2881 = vmatpush.bf16.msra.mxu3 %v2671_v13  ;;  %v2654_v63 = vld [vmem:[%s2988_s11 + $0x290] sm:$0xf0]  ;;  %v2132_v8 = vld [vmem:[%s2988_s11 + $0x60] sm:$0xf]  ;;  %v2585_v9 = vld [vmem:[%s2988_s11 + $0x68] sm:$0xf0] }
  0x1d   : > { %1227 = vmatpush.bf16.msra.mxu1 %v2679_v14  ;;  %v2409_v3 = vor.u32 %v2654_v63, %v2408_v62  ;;  %v2420_v10 = vld [vmem:[%s2988_s11 + $0x2a0] sm:$0xf]  ;;  %v2657_v11 = vld [vmem:[%s2988_s11 + $0x2a8] sm:$0xf0]  ;;  %v2134_v13 = vld [vmem:[%s2988_s11 + $0x6c] sm:$0xf0] }
  0x1e   : > { %v2164_v17 = vld [vmem:[%s2988_s11 + $0x98] sm:$0xf]  ;;  %v2592_v18 = vld [vmem:[%s2988_s11 + $0xa0] sm:$0xf0]  ;;  %v2587_v24 = vld [vmem:[%s2988_s11 + $0x7c] sm:$0xf] }
  0x1f   : > { %v2660_v23 = vld [vmem:[%s2988_s11 + $0x2c0] sm:$0xf0]  ;;  %v2146_v25 = vld [vmem:[%s2988_s11 + $0x84] sm:$0xf0]  ;;  %v2176_v29 = vld [vmem:[%s2988_s11 + $0xb0] sm:$0xf] }
  0x20   : > { %1059 = vmatpush.bf16.msra.mxu0 %v2670_v15  ;;  %2882 = vmatpush.bf16.msra.mxu3 %v2670_v15  ;;  %v2421_v15 = vor.u32 %v2657_v11, %v2420_v10  ;;  %v2149_v28 = vor.u32 %v2587_v24, %v2146_v25  ;;  %v2591_v33 = vld [vmem:[%s2988_s11 + $0x98] sm:$0xf0]  ;;  %v2444_v34 = vld [vmem:[%s2988_s11 + $0x2d0] sm:$0xf]  ;;  %v2590_v36 = vld [vmem:[%s2988_s11 + $0x94] sm:$0xf] }
  0x21   : > { %1228 = vmatpush.bf16.msra.mxu1 %v2678_v16  ;;  %v2158_v37 = vld [vmem:[%s2988_s11 + $0x9c] sm:$0xf0]  ;;  %v2188_v41 = vld [vmem:[%s2988_s11 + $0xc8] sm:$0xf]  ;;  %v2594_v45 = vld [vmem:[%s2988_s11 + $0xb0] sm:$0xf0] }
  0x22   : > { %v2161_v40 = vor.u32 %v2590_v36, %v2158_v37  ;;  %v2456_v46 = vld [vmem:[%s2988_s11 + $0x2e8] sm:$0xf]  ;;  %v2593_v48 = vld [vmem:[%s2988_s11 + $0xac] sm:$0xf]  ;;  %v2170_v49 = vld [vmem:[%s2988_s11 + $0xb4] sm:$0xf0] }
  0x23   : > { %v2173_v53 = vor.u32 %v2593_v48, %v2170_v49  ;;  %v2180_v58 = vld [vmem:[%s2988_s11 + $0xc0] sm:$0xf]  ;;  %v2596_v62 = vld [vmem:[%s2988_s11 + $0xc4] sm:$0xf]  ;;  %v2182_v63 = vld [vmem:[%s2988_s11 + $0xcc] sm:$0xf0] }
  0x24   : > { %1060 = vmatpush.bf16.msra.mxu0 %v2669_v19  ;;  %2883 = vmatpush.bf16.msra.mxu3 %v2669_v19  ;;  %v2165_v19 = vor.u32 %v2592_v18, %v2164_v17  ;;  %v2212_v10 = vld [vmem:[%s2988_s11 + $0xf8] sm:$0xf]  ;;  %v2604_v11 = vld [vmem:[%s2988_s11 + $0x100] sm:$0xf0]  ;;  %v2386_v24 = vld [vmem:[%s2988_s11 + $0x264] sm:$0xf0] }
  0x25   : > { %1229 = vmatpush.bf16.msra.mxu1 %v2677_v20  ;;  %2539 = vmatmul.msk.bf16.gmra.mxu2 %vm957_vm0, %v2105_v21  ;;  %v2588_v21 = vld [vmem:[%s2988_s11 + $0x80] sm:$0xf0]  ;;  %v2213_v17 = vor.u32 %v2604_v11, %v2212_v10  ;;  %v2599_v25 = vld [vmem:[%s2988_s11 + $0xdc] sm:$0xf] }
  0x28   : > { %1061 = vmatpush.bf16.msra.mxu0 %v2668_v22  ;;  %2884 = vmatpush.bf16.msra.mxu3 %v2668_v22  ;;  %v2432_v22 = vld [vmem:[%s2988_s11 + $0x2b8] sm:$0xf] }
  0x29   : > { %1230 = vmatpush.bf16.msra.mxu1 %v2676_v27 }
  0x2b   : > { %1062 = vmatmul.bf16.vlgmr.msra.gmra.mxu0 %v2085_v30  ;;  %1182 = vmatmul.bf16.vlgmr.msra.gmra.mxu3 %v2373_v31  ;;  %v2595_v30 = vld [vmem:[%s2988_s11 + $0xb8] sm:$0xf0] }
  0x2c   : > { %2885 = vmatpush.bf16.msrb.mxu3 %v2955_v1  ;;  %1231 = vmatmul.bf16.vlgmr.msra.gmra.mxu1 %v2089_v32  ;;  %v2122_v1 = vld [vmem:[%s2988_s11 + $0x54] sm:$0xf0]  ;;  %v2177_v31 = vor.u32 %v2595_v30, %v2176_v29  ;;  %v2156_v32 = vld [vmem:[%s2988_s11 + $0x90] sm:$0xf] }
  0x2d   : > { %v2157_v38 = vor.u32 %v2591_v33, %v2156_v32 }
  0x30   : > { %2886 = vmatpush.bf16.msrb.mxu3 %v2682_v4  ;;  %v2125_v4 = vor.u32 %v2581_v0, %v2122_v1 }
  0x34   : > { %2887 = vmatpush.bf16.msrb.mxu3 %v2681_v7 }
  0x35   : > { %2540 = vmatmul.msk.bf16.gmra.mxu2 %vm957_vm0, %v2117_v35  ;;  %v2663_v35 = vld [vmem:[%s2988_s11 + $0x2d8] sm:$0xf0] }
  0x36   : > { %v2445_v39 = vor.u32 %v2663_v35, %v2444_v34 }
  0x38   : > { %2888 = vmatpush.bf16.msrb.mxu3 %v2680_v12  ;;  %v2584_v12 = vld [vmem:[%s2988_s11 + $0x64] sm:$0xf] }
  0x3b   : > { %1067 = vmatmul.bf16.gmra.mxu0 %v2097_v42  ;;  %1187 = vmatmul.bf16.gmra.mxu3 %v2385_v43  ;;  %v2598_v42 = vld [vmem:[%s2988_s11 + $0xd0] sm:$0xf0] }
  0x3c   : > { %2889 = vmatpush.bf16.msrb.mxu3 %v2679_v14  ;;  %1236 = vmatmul.bf16.gmra.mxu1 %v2101_v44  ;;  %v2133_v14 = vor.u32 %v2585_v9, %v2132_v8  ;;  %v2189_v43 = vor.u32 %v2598_v42, %v2188_v41  ;;  %v2168_v44 = vld [vmem:[%s2988_s11 + $0xa8] sm:$0xf]  ;;  %v3110_v8 = vld [vmem:[%s3534_s2] ss:$0 sm:$0xff] }
  0x3d   : > { %v2169_v50 = vor.u32 %v2594_v45, %v2168_v44  ;;  %v2224_v44 = vld [vmem:[%s2988_s11 + $0x110] sm:$0xf]  ;;  %v2607_v45 = vld [vmem:[%s2988_s11 + $0x118] sm:$0xf0] }
  0x40   : > { %2890 = vmatpush.bf16.msrb.mxu3 %v2678_v16  ;;  %v2137_v16 = vor.u32 %v2584_v12, %v2134_v13  ;;  %v3120_v13 = vld [vmem:[%s3535_s3] ss:$0 sm:$0xff] }
  0x44   : > { %2891 = vmatpush.bf16.msrb.mxu3 %v2677_v20  ;;  %v2144_v20 = vld [vmem:[%s2988_s11 + $0x78] sm:$0xf] }
  0x45   : > { %2541 = vmatmul.msk.bf16.gmra.mxu2 %vm957_vm0, %v2129_v47  ;;  %v2145_v26 = vor.u32 %v2588_v21, %v2144_v20  ;;  %v2666_v47 = vld [vmem:[%s2988_s11 + $0x2f0] sm:$0xf0] }
  0x46   : > { %v2457_v51 = vor.u32 %v2666_v47, %v2456_v46 }
  0x48   : > { %2892 = vmatpush.bf16.msrb.mxu3 %v2676_v27  ;;  %v2433_v27 = vor.u32 %v2660_v23, %v2432_v22  ;;  %v2600_v22 = vld [vmem:[%s2988_s11 + $0xe0] sm:$0xf0]  ;;  %v2647_v23 = vld [vmem:[%s2988_s11 + $0x25c] sm:$0xf] }
  0x49   : > { %v2389_v30 = vor.u32 %v2647_v23, %v2386_v24  ;;  %v2216_v24 = vld [vmem:[%s2988_s11 + $0x108] sm:$0xf] }
  0x4b   : > { %1072 = vmatmul.bf16.gmra.mxu0 %v2109_v54  ;;  %1192 = vmatmul.bf16.gmra.mxu3 %v2397_v55  ;;  %v2200_v54 = vld [vmem:[%s2988_s11 + $0xe0] sm:$0xf]  ;;  %v2601_v55 = vld [vmem:[%s2988_s11 + $0xe8] sm:$0xf0] }
  0x4c   : > { %2893 = vmatpush.bf16.msra.mxu3 %v2960_v2  ;;  %1241 = vmatmul.bf16.gmra.mxu1 %v2113_v56  ;;  %v2121_v2 = vor.u32 %v2582_v61, %v2120_v60  ;;  %v2201_v57 = vor.u32 %v2601_v55, %v2200_v54  ;;  %v2644_v60 = vld [vmem:[%s2988_s11 + $0x244] sm:$0xf]  ;;  %v2374_v61 = vld [vmem:[%s2988_s11 + $0x24c] sm:$0xf0]  ;;  %v2603_v55 = vld [vmem:[%s2988_s11 + $0xf8] sm:$0xf0] }
  0x4d   : > { %v2377_v1 = vor.u32 %v2644_v60, %v2374_v61 }
  0x50   : > { %2894 = vmatpush.bf16.msra.mxu3 %v2973_v5  ;;  %v2152_v5 = vld [vmem:[%s2988_s11 + $0x80] sm:$0xf] }
  0x51   : > { %v2153_v7 = vor.u32 %v2589_v6, %v2152_v5 }
  0x55   : > { %2542 = vmatmul.msk.bf16.gmra.mxu2 %vm957_vm0, %v2141_v59  ;;  %v2597_v59 = vld [vmem:[%s2988_s11 + $0xc8] sm:$0xf0] }
  0x56   : > { %v2181_v0 = vor.u32 %v2597_v59, %v2180_v58  ;;  %v2602_v58 = vld [vmem:[%s2988_s11 + $0xf4] sm:$0xf]  ;;  %v2206_v59 = vld [vmem:[%s2988_s11 + $0xfc] sm:$0xf0] }
  0x5b   : > { %1077 = vmatmul.bf16.gmra.mxu0 %v2121_v2  ;;  %1197 = vmatmul.bf16.gmra.mxu3 %v2409_v3 }
  0x5c   : > { %1246 = vmatmul.bf16.gmra.mxu1 %v2125_v4  ;;  %v2185_v4 = vor.u32 %v2596_v62, %v2182_v63 }
  0x65   : > { %2543 = vmatmul.msk.bf16.gmra.mxu2 %vm957_vm0, %v2153_v7 }
  0x6b   : > { %1082 = vmatmul.bf16.gmra.mxu0 %v2133_v14  ;;  %1202 = vmatmul.bf16.gmra.mxu3 %v2421_v15 }
  0x6c   : > { %1251 = vmatmul.bf16.gmra.mxu1 %v2137_v16 }
  0x75   : > { %2544 = vmatmul.msk.bf16.gmra.mxu2 %vm957_vm0, %v2165_v19  ;;  %v2192_v19 = vld [vmem:[%s2988_s11 + $0xd8] sm:$0xf] }
  0x76   : > { %v2193_v29 = vor.u32 %v2600_v22, %v2192_v19 }
  0x7b   : > { %1087 = vmatmul.bf16.gmra.mxu0 %v2145_v26  ;;  %1207 = vmatmul.bf16.gmra.mxu3 %v2433_v27  ;;  %v2194_v26 = vld [vmem:[%s2988_s11 + $0xe4] sm:$0xf0] }
  0x7c   : > { %1256 = vmatmul.bf16.gmra.mxu1 %v2149_v28  ;;  %v2197_v35 = vor.u32 %v2599_v25, %v2194_v26 }
  0x85   : > { %2545 = vmatmul.msk.bf16.gmra.mxu2 %vm957_vm0, %v2177_v31 }
  0x8b   : > { %1092 = vmatmul.bf16.gmra.mxu0 %v2157_v38  ;;  %1212 = vmatmul.bf16.gmra.mxu3 %v2445_v39 }
  0x8c   : > { %1261 = vmatmul.bf16.gmra.mxu1 %v2161_v40 }
  0x95   : > { %2546 = vmatmul.msk.bf16.gmra.mxu2 %vm957_vm0, %v2189_v43 }
  0x98   : > { %v1401_v52 = vpop.f32.mrf.mxu2 }
  0x9b   : > { %1097 = vmatmul.bf16.gmra.mxu0 %v2169_v50  ;;  %1217 = vmatmul.bf16.gmra.mxu3 %v2457_v51  ;;  %v2225_v50 = vor.u32 %v2607_v45, %v2224_v44 }
  0x9c   : > { %1266 = vmatmul.bf16.gmra.mxu1 %v2173_v53 }
  0xa0   : > { %v1403_v56 = vpop.f32.mrf.mxu2 }
  0xa5   : > { %2547 = vmatmul.msk.bf16.gmra.mxu2 %vm957_vm0, %v2201_v57  ;;  %v2398_v57 = vld [vmem:[%s2988_s11 + $0x27c] sm:$0xf0] }
  0xa8   : > { %v1406_v2 = vpop.f32.mrf.mxu2  ;;  %v1063_v3 = vpop.f32.mrf.mxu0 }
  0xa9   : > { %v1232_v5 = vpop.f32.mrf.mxu1 }
  0xaa   : > { %v1233_v6 = vadd.f32 %v1232_v5, %v1063_v3 }
  0xab   : > { %1102 = vmatmul.bf16.gmra.mxu0 %v2181_v0  ;;  %1351 = vmatmul.bf16.vlgmr.msrb.gmra.mxu3 %v2377_v1 }
  0xac   : > { %v1402_v7 = vadd.f32 %v1401_v52, %v1233_v6  ;;  %1271 = vmatmul.bf16.gmra.mxu1 %v2185_v4  ;;  %v2204_v52 = vld [vmem:[%s2988_s11 + $0xf0] sm:$0xf]  ;;  %v2209_v4 = vor.u32 %v2602_v58, %v2206_v59  ;;  %v2228_v59 = vld [vmem:[%s2988_s11 + $0x120] sm:$0xf] }
  0xad   : > { %v2205_v62 = vor.u32 %v2603_v55, %v2204_v52  ;;  %v2613_v52 = vld [vmem:[%s2988_s11 + $0x148] sm:$0xf0] }
  0xae   : > { %v3112_v9 = vpop.f32.mrf.mxu3  ;;  %v1565_v12 = vmul.f32 %v3110_v8, %v1402_v7 }
  0xb0   : > { %v1408_v14 = vpop.f32.mrf.mxu2  ;;  %v1065_v15 = vpop.f32.mrf.mxu0  ;;  %v1633_v20 = vadd.f32 %v3120_v13, %v1565_v12 }
  0xb1   : > { %v1234_v16 = vpop.f32.mrf.mxu1 }
  0xb2   : > { %v1235_v18 = vadd.f32 %v1234_v16, %v1065_v15  ;;  %v1761_v31 = vmul.f32 0.2, %v1633_v20  ;;  %vm1697_vm1 = vcmp.gt.f32.partialorder %v1633_v20, 0.0  ;;  %v2236_v16 = vld [vmem:[%s2988_s11 + $0x128] sm:$0xf] }
  0xb4   : > { %v1404_v21 = vadd.f32 %v1403_v56, %v1235_v18  ;;  %v1825_v39 = vsel %vm1697_vm1, %v1633_v20, %v1761_v31  ;;  %v2650_v56 = vld [vmem:[%s2988_s11 + $0x274] sm:$0xf]  ;;  %v2605_v31 = vld [vmem:[%s2988_s11 + $0x10c] sm:$0xf] }
  0xb5   : > { %2548 = vmatmul.msk.bf16.gmra.mxu2 %vm957_vm0, %v2213_v17  ;;  %v2401_v63 = vor.u32 %v2650_v56, %v2398_v57  ;;  %v2610_v17 = vld [vmem:[%s2988_s11 + $0x130] sm:$0xf0] }
  0xb6   : > { %v1566_v27 = vmul.f32 %v3110_v8, %v1404_v21  ;;  %v3131_v28 = vpop.f32.mrf.mxu3  ;;  %v2237_v22 = vor.u32 %v2610_v17, %v2236_v16 }
  0xb8   : > { %v1634_v32 = vadd.f32 %v3120_v13, %v1566_v27  ;;  %v1411_v33 = vpop.f32.mrf.mxu2  ;;  %v1068_v34 = vpop.f32.mrf.mxu0  ;;  %v2606_v27 = vld [vmem:[%s2988_s11 + $0x110] sm:$0xf0] }
  0xb9   : > { %v1237_v36 = vpop.f32.mrf.mxu1 }
  0xba   : > { %vm1698_vm2 = vcmp.gt.f32.partialorder %v1634_v32, 0.0  ;;  %v1762_v37 = vmul.f32 0.2, %v1634_v32  ;;  %v1238_v38 = vadd.f32 %v1237_v36, %v1068_v34 }
  0xbb   : > { %1107 = vmatmul.bf16.gmra.mxu0 %v2193_v29  ;;  %1356 = vmatmul.bf16.gmra.mxu3 %v2389_v30  ;;  %v2653_v29 = vld [vmem:[%s2988_s11 + $0x28c] sm:$0xf]  ;;  %v2410_v30 = vld [vmem:[%s2988_s11 + $0x294] sm:$0xf0] }
  0xbc   : > { %v1826_v40 = vsel %vm1698_vm2, %v1634_v32, %v1762_v37  ;;  %v1407_v41 = vadd.f32 %v1406_v2, %v1238_v38  ;;  %1276 = vmatmul.bf16.gmra.mxu1 %v2197_v35  ;;  %v2218_v32 = vld [vmem:[%s2988_s11 + $0x114] sm:$0xf0]  ;;  %v2217_v35 = vor.u32 %v2606_v27, %v2216_v24  ;;  %v2413_v36 = vor.u32 %v2653_v29, %v2410_v30 }
  0xbd   : > { %v2689_v42 = vpack.c.bf16 %v1826_v40, %v1825_v39 }
  0xbe   : > { %v3140_v43 = vpop.f32.mrf.mxu3  ;;  %v1567_v46 = vmul.f32 %v3110_v8, %v1407_v41  ;;  %v2221_v41 = vor.u32 %v2605_v31, %v2218_v32 }
  0xbf   : > { %2690 = vst [vmem:[%s3138_s17] sm:$0xff] %v2689_v42  }
  0xc0   : > { %v1413_v47 = vpop.f32.mrf.mxu2  ;;  %v1070_v48 = vpop.f32.mrf.mxu0  ;;  %v1635_v53 = vadd.f32 %v3120_v13, %v1567_v46 }
  0xc1   : > { %v1239_v49 = vpop.f32.mrf.mxu1 }
  0xc2   : > { %v1240_v51 = vadd.f32 %v1239_v49, %v1070_v48  ;;  %v1763_v0 = vmul.f32 0.2, %v1635_v53  ;;  %vm1699_vm3 = vcmp.gt.f32.partialorder %v1635_v53, 0.0 }
  0xc4   : > { %v1409_v54 = vadd.f32 %v1408_v14, %v1240_v51  ;;  %v1827_v10 = vsel %vm1699_vm3, %v1635_v53, %v1763_v0  ;;  %v2248_v51 = vld [vmem:[%s2988_s11 + $0x140] sm:$0xf]  ;;  %v2656_v0 = vld [vmem:[%s2988_s11 + $0x2a4] sm:$0xf] }
  0xc5   : > { %2549 = vmatmul.msk.bf16.gmra.mxu2 %vm957_vm0, %v2225_v50  ;;  %v2249_v57 = vor.u32 %v2613_v52, %v2248_v51 }
  0xc6   : > { %v1568_v60 = vmul.f32 %v3110_v8, %v1409_v54  ;;  %v3155_v61 = vpop.f32.mrf.mxu3 }
  0xc8   : > { %v1636_v1 = vadd.f32 %v3120_v13, %v1568_v60  ;;  %v1416_v2 = vpop.f32.mrf.mxu2  ;;  %v1073_v3 = vpop.f32.mrf.mxu0 }
  0xc9   : > { %v1242_v5 = vpop.f32.mrf.mxu1 }
  0xca   : > { %vm1700_vm4 = vcmp.gt.f32.partialorder %v1636_v1, 0.0  ;;  %v1764_v6 = vmul.f32 0.2, %v1636_v1  ;;  %v1243_v7 = vadd.f32 %v1242_v5, %v1073_v3  ;;  %v2230_v3 = vld [vmem:[%s2988_s11 + $0x12c] sm:$0xf0] }
  0xcb   : > { %1112 = vmatmul.bf16.gmra.mxu0 %v2205_v62  ;;  %1361 = vmatmul.bf16.gmra.mxu3 %v2401_v63  ;;  %v2609_v63 = vld [vmem:[%s2988_s11 + $0x128] sm:$0xf0] }
  0xcc   : > { %v1828_v11 = vsel %vm1700_vm4, %v1636_v1, %v1764_v6  ;;  %v1412_v12 = vadd.f32 %v1411_v33, %v1243_v7  ;;  %1281 = vmatmul.bf16.gmra.mxu1 %v2209_v4  ;;  %v2422_v1 = vld [vmem:[%s2988_s11 + $0x2ac] sm:$0xf0]  ;;  %v2229_v6 = vor.u32 %v2609_v63, %v2228_v59 }
  0xcd   : > { %v2694_v14 = vpack.c.bf16 %v1828_v11, %v1827_v10  ;;  %v2425_v7 = vor.u32 %v2656_v0, %v2422_v1  ;;  %v2272_v63 = vld [vmem:[%s2988_s11 + $0x170] sm:$0xf]  ;;  %v2619_v0 = vld [vmem:[%s2988_s11 + $0x178] sm:$0xf0] }
  0xce   : > { %v3158_v15 = vpop.f32.mrf.mxu3  ;;  %v1569_v18 = vmul.f32 %v3110_v8, %v1412_v12 }
  0xcf   : > { %2846 = vst [vmem:[%s3138_s17 + $0x8] sm:$0xff] %v2694_v14  }
  0xd0   : > { %v1418_v19 = vpop.f32.mrf.mxu2  ;;  %v1075_v20 = vpop.f32.mrf.mxu0  ;;  %v1637_v25 = vadd.f32 %v3120_v13, %v1569_v18 }
  0xd1   : > { %v1244_v21 = vpop.f32.mrf.mxu1 }
  0xd2   : > { %v1245_v23 = vadd.f32 %v1244_v21, %v1075_v20  ;;  %v1765_v37 = vmul.f32 0.2, %v1637_v25  ;;  %vm1701_vm5 = vcmp.gt.f32.partialorder %v1637_v25, 0.0 }
  0xd4   : > { %v1414_v26 = vadd.f32 %v1413_v47, %v1245_v23  ;;  %v1829_v46 = vsel %vm1701_vm5, %v1637_v25, %v1765_v37  ;;  %v2260_v25 = vld [vmem:[%s2988_s11 + $0x158] sm:$0xf] }
  0xd5   : > { %2550 = vmatmul.msk.bf16.gmra.mxu2 %vm957_vm0, %v2237_v22 }
  0xd6   : > { %v1570_v33 = vmul.f32 %v3110_v8, %v1414_v26  ;;  %v3173_v34 = vpop.f32.mrf.mxu3  ;;  %v2616_v26 = vld [vmem:[%s2988_s11 + $0x160] sm:$0xf0] }
  0xd7   : > { %v2261_v32 = vor.u32 %v2616_v26, %v2260_v25 }
  0xd8   : > { %v1638_v38 = vadd.f32 %v3120_v13, %v1570_v33  ;;  %v1421_v39 = vpop.f32.mrf.mxu2  ;;  %v1078_v40 = vpop.f32.mrf.mxu0 }
  0xd9   : > { %v1247_v42 = vpop.f32.mrf.mxu1 }
  0xda   : > { %vm1702_vm6 = vcmp.gt.f32.partialorder %v1638_v38, 0.0  ;;  %v1766_v44 = vmul.f32 0.2, %v1638_v38  ;;  %v1248_v45 = vadd.f32 %v1247_v42, %v1078_v40  ;;  %v2434_v40 = vld [vmem:[%s2988_s11 + $0x2c4] sm:$0xf0] }
  0xdb   : > { %1117 = vmatmul.bf16.gmra.mxu0 %v2217_v35  ;;  %1366 = vmatmul.bf16.gmra.mxu3 %v2413_v36  ;;  %v2240_v35 = vld [vmem:[%s2988_s11 + $0x138] sm:$0xf]  ;;  %v2242_v42 = vld [vmem:[%s2988_s11 + $0x144] sm:$0xf0] }
  0xdc   : > { %v1830_v47 = vsel %vm1702_vm6, %v1638_v38, %v1766_v44  ;;  %v1417_v48 = vadd.f32 %v1416_v2, %v1248_v45  ;;  %1286 = vmatmul.bf16.gmra.mxu1 %v2221_v41  ;;  %v2608_v2 = vld [vmem:[%s2988_s11 + $0x124] sm:$0xf]  ;;  %v2611_v41 = vld [vmem:[%s2988_s11 + $0x13c] sm:$0xf] }
  0xdd   : > { %v2699_v49 = vpack.c.bf16 %v1830_v47, %v1829_v46  ;;  %v2233_v16 = vor.u32 %v2608_v2, %v2230_v3  ;;  %v2612_v38 = vld [vmem:[%s2988_s11 + $0x140] sm:$0xf0] }
  0xde   : > { %v3176_v50 = vpop.f32.mrf.mxu3  ;;  %v1571_v53 = vmul.f32 %v3110_v8, %v1417_v48  ;;  %v2241_v46 = vor.u32 %v2612_v38, %v2240_v35 }
  0xdf   : > { %2847 = vst [vmem:[%s3138_s17 + $0x10] sm:$0xff] %v2699_v49  }
  0xe0   : > { %v1423_v54 = vpop.f32.mrf.mxu2  ;;  %v1080_v55 = vpop.f32.mrf.mxu0  ;;  %v1639_v60 = vadd.f32 %v3120_v13, %v1571_v53  ;;  %v2245_v53 = vor.u32 %v2611_v41, %v2242_v42  ;;  %v2622_v41 = vld [vmem:[%s2988_s11 + $0x190] sm:$0xf0] }
  0xe1   : > { %v1249_v56 = vpop.f32.mrf.mxu1 }
  0xe2   : > { %v1250_v58 = vadd.f32 %v1249_v56, %v1080_v55  ;;  %v1767_v10 = vmul.f32 0.2, %v1639_v60  ;;  %vm1703_vm7 = vcmp.gt.f32.partialorder %v1639_v60, 0.0 }
  0xe4   : > { %v1419_v62 = vadd.f32 %v1418_v19, %v1250_v58  ;;  %v1831_v20 = vsel %vm1703_vm7, %v1639_v60, %v1767_v10  ;;  %v2252_v10 = vld [vmem:[%s2988_s11 + $0x150] sm:$0xf] }
  0xe5   : > { %2551 = vmatmul.msk.bf16.gmra.mxu2 %vm957_vm0, %v2249_v57 }
  0xe6   : > { %v1572_v4 = vmul.f32 %v3110_v8, %v1419_v62  ;;  %v3191_v5 = vpop.f32.mrf.mxu3 }
  0xe8   : > { %v1640_v11 = vadd.f32 %v3120_v13, %v1572_v4  ;;  %v1426_v12 = vpop.f32.mrf.mxu2  ;;  %v1083_v14 = vpop.f32.mrf.mxu0 }
  0xe9   : > { %v1252_v17 = vpop.f32.mrf.mxu1 }
  0xea   : > { %vm1704_vm8 = vcmp.gt.f32.partialorder %v1640_v11, 0.0  ;;  %v1768_v18 = vmul.f32 0.2, %v1640_v11  ;;  %v1253_v19 = vadd.f32 %v1252_v17, %v1083_v14  ;;  %v2615_v14 = vld [vmem:[%s2988_s11 + $0x158] sm:$0xf0] }
  0xeb   : > { %1122 = vmatmul.bf16.gmra.mxu0 %v2229_v6  ;;  %1371 = vmatmul.bf16.gmra.mxu3 %v2425_v7  ;;  %v2273_v6 = vor.u32 %v2619_v0, %v2272_v63  ;;  %v2446_v17 = vld [vmem:[%s2988_s11 + $0x2dc] sm:$0xf0] }
  0xec   : > { %v1832_v21 = vsel %vm1704_vm8, %v1640_v11, %v1768_v18  ;;  %v1422_v22 = vadd.f32 %v1421_v39, %v1253_v19  ;;  %1291 = vmatmul.bf16.gmra.mxu1 %v2233_v16  ;;  %v2659_v39 = vld [vmem:[%s2988_s11 + $0x2bc] sm:$0xf]  ;;  %v2662_v16 = vld [vmem:[%s2988_s11 + $0x2d4] sm:$0xf]  ;;  %v2254_v19 = vld [vmem:[%s2988_s11 + $0x15c] sm:$0xf0] }
  0xed   : > { %v2704_v23 = vpack.c.bf16 %v1832_v21, %v1831_v20  ;;  %v2437_v47 = vor.u32 %v2659_v39, %v2434_v40  ;;  %v2614_v18 = vld [vmem:[%s2988_s11 + $0x154] sm:$0xf]  ;;  %v2284_v40 = vld [vmem:[%s2988_s11 + $0x188] sm:$0xf] }
  0xee   : > { %v3194_v24 = vpop.f32.mrf.mxu3  ;;  %v1573_v27 = vmul.f32 %v3110_v8, %v1422_v22  ;;  %v2253_v22 = vor.u32 %v2615_v14, %v2252_v10 }
  0xef   : > { %2848 = vst [vmem:[%s3138_s17 + $0x18] sm:$0xff] %v2704_v23   ;;  %v2449_v23 = vor.u32 %v2662_v16, %v2446_v17 }
  0xf0   : > { %v1428_v29 = vpop.f32.mrf.mxu2  ;;  %v1085_v30 = vpop.f32.mrf.mxu0  ;;  %v1641_v36 = vadd.f32 %v3120_v13, %v1573_v27 }
  0xf1   : > { %v1254_v31 = vpop.f32.mrf.mxu1 }
  0xf2   : > { %v1255_v33 = vadd.f32 %v1254_v31, %v1085_v30  ;;  %v1769_v48 = vmul.f32 0.2, %v1641_v36  ;;  %vm1705_vm9 = vcmp.gt.f32.partialorder %v1641_v36, 0.0 }
  0xf4   : > { %v1424_v37 = vadd.f32 %v1423_v54, %v1255_v33  ;;  %v1833_v57 = vsel %vm1705_vm9, %v1641_v36, %v1769_v48  ;;  %v2285_v48 = vor.u32 %v2622_v41, %v2284_v40 }
  0xf5   : > { %2552 = vmatmul.msk.bf16.gmra.mxu2 %vm957_vm0, %v2261_v32 }
  0xf6   : > { %v1574_v44 = vmul.f32 %v3110_v8, %v1424_v37  ;;  %v3209_v45 = vpop.f32.mrf.mxu3 }
  0xf8   : > { %v1642_v49 = vadd.f32 %v3120_v13, %v1574_v44  ;;  %v1431_v51 = vpop.f32.mrf.mxu2  ;;  %v1088_v52 = vpop.f32.mrf.mxu0 }
  0xf9   : > { %v1257_v54 = vpop.f32.mrf.mxu1 }
  0xfa   : > { %vm1706_vm10 = vcmp.gt.f32.partialorder %v1642_v49, 0.0  ;;  %v1770_v55 = vmul.f32 0.2, %v1642_v49  ;;  %v1258_v56 = vadd.f32 %v1257_v54, %v1088_v52  ;;  %v2618_v54 = vld [vmem:[%s2988_s11 + $0x170] sm:$0xf0] }
  0xfb   : > { %1127 = vmatmul.bf16.gmra.mxu0 %v2241_v46  ;;  %1376 = vmatmul.bf16.gmra.mxu3 %v2437_v47 }
  0xfc   : > { %v1834_v58 = vsel %vm1706_vm10, %v1642_v49, %v1770_v55  ;;  %v1427_v59 = vadd.f32 %v1426_v12, %v1258_v56  ;;  %1296 = vmatmul.bf16.gmra.mxu1 %v2245_v53  ;;  %v2665_v55 = vld [vmem:[%s2988_s11 + $0x2ec] sm:$0xf]  ;;  %v2458_v56 = vld [vmem:[%s2988_s11 + $0x2f4] sm:$0xf0] }
  0xfd   : > { %v2709_v60 = vpack.c.bf16 %v1834_v58, %v1833_v57  ;;  %v2617_v57 = vld [vmem:[%s2988_s11 + $0x16c] sm:$0xf]  ;;  %v2266_v58 = vld [vmem:[%s2988_s11 + $0x174] sm:$0xf0]  ;;  %v2461_v0 = vor.u32 %v2665_v55, %v2458_v56 }
  0xfe   : > { %v3212_v62 = vpop.f32.mrf.mxu3  ;;  %v1575_v1 = vmul.f32 %v3110_v8, %v1427_v59 }
  0xff   : > { %2849 = vst [vmem:[%s3138_s17 + $0x20] sm:$0xff] %v2709_v60  }
 0x100   : > { %v1433_v2 = vpop.f32.mrf.mxu2  ;;  %v1090_v3 = vpop.f32.mrf.mxu0  ;;  %v1643_v11 = vadd.f32 %v3120_v13, %v1575_v1 }
 0x101   : > { %v1259_v4 = vpop.f32.mrf.mxu1 }
 0x102   : > { %v1260_v7 = vadd.f32 %v1259_v4, %v1090_v3  ;;  %v1771_v25 = vmul.f32 0.2, %v1643_v11  ;;  %vm1707_vm11 = vcmp.gt.f32.partialorder %v1643_v11, 0.0 }
 0x104   : > { %v1429_v12 = vadd.f32 %v1428_v29, %v1260_v7  ;;  %v2257_v29 = vor.u32 %v2614_v18, %v2254_v19  ;;  %v1835_v35 = vsel %vm1707_vm11, %v1643_v11, %v1771_v25  ;;  %v2296_v19 = vld [vmem:[%s2988_s11 + $0x1a0] sm:$0xf] }
 0x105   : > { %2553 = vmatmul.msk.bf16.gmra.mxu2 %vm957_vm0, %v2273_v6 }
 0x106   : > { %v1576_v20 = vmul.f32 %v3110_v8, %v1429_v12  ;;  %v3227_v21 = vpop.f32.mrf.mxu3 }
 0x108   : > { %v1644_v26 = vadd.f32 %v3120_v13, %v1576_v20  ;;  %v1436_v27 = vpop.f32.mrf.mxu2  ;;  %v1093_v30 = vpop.f32.mrf.mxu0  ;;  %v2625_v20 = vld [vmem:[%s2988_s11 + $0x1a8] sm:$0xf0] }
 0x109   : > { %v1262_v31 = vpop.f32.mrf.mxu1 }
 0x10a   : > { %vm1708_vm12 = vcmp.gt.f32.partialorder %v1644_v26, 0.0  ;;  %v1772_v32 = vmul.f32 0.2, %v1644_v26  ;;  %v1263_v33 = vadd.f32 %v1262_v31, %v1093_v30  ;;  %v2297_v30 = vor.u32 %v2625_v20, %v2296_v19  ;;  %v2623_v19 = vld [vmem:[%s2988_s11 + $0x19c] sm:$0xf] }
 0x10b   : > { %1132 = vmatmul.bf16.gmra.mxu0 %v2253_v22  ;;  %1381 = vmatmul.bf16.gmra.mxu3 %v2449_v23  ;;  %v2290_v20 = vld [vmem:[%s2988_s11 + $0x1a4] sm:$0xf0] }
 0x10c   : > { %v1836_v36 = vsel %vm1708_vm12, %v1644_v26, %v1772_v32  ;;  %v1432_v37 = vadd.f32 %v1431_v51, %v1263_v33  ;;  %1301 = vmatmul.bf16.gmra.mxu1 %v2257_v29  ;;  %v2264_v51 = vld [vmem:[%s2988_s11 + $0x168] sm:$0xf]  ;;  %v2621_v33 = vld [vmem:[%s2988_s11 + $0x188] sm:$0xf0] }
 0x10d   : > { %v2714_v38 = vpack.c.bf16 %v1836_v36, %v1835_v35  ;;  %v2265_v63 = vor.u32 %v2618_v54, %v2264_v51  ;;  %v2404_v35 = vld [vmem:[%s2988_s11 + $0x278] sm:$0xf]  ;;  %v2652_v36 = vld [vmem:[%s2988_s11 + $0x280] sm:$0xf0] }
 0x10e   : > { %v3230_v39 = vpop.f32.mrf.mxu3  ;;  %v1577_v42 = vmul.f32 %v3110_v8, %v1432_v37  ;;  %v2620_v37 = vld [vmem:[%s2988_s11 + $0x184] sm:$0xf] }
 0x10f   : > { %2850 = vst [vmem:[%s3138_s17 + $0x28] sm:$0xff] %v2714_v38   ;;  %v2278_v38 = vld [vmem:[%s2988_s11 + $0x18c] sm:$0xf0] }
 0x110   : > { %v1438_v44 = vpop.f32.mrf.mxu2  ;;  %v1095_v46 = vpop.f32.mrf.mxu0  ;;  %v1645_v52 = vadd.f32 %v3120_v13, %v1577_v42 }
 0x111   : > { %v1264_v47 = vpop.f32.mrf.mxu1 }
 0x112   : > { %v1265_v49 = vadd.f32 %v1264_v47, %v1095_v46  ;;  %v1773_v1 = vmul.f32 0.2, %v1645_v52  ;;  %vm1709_vm13 = vcmp.gt.f32.partialorder %v1645_v52, 0.0  ;;  %v2405_v46 = vor.u32 %v2652_v36, %v2404_v35 }
 0x114   : > { %v1434_v53 = vadd.f32 %v1433_v2, %v1265_v49  ;;  %v2269_v2 = vor.u32 %v2617_v57, %v2266_v58  ;;  %v1837_v12 = vsel %vm1709_vm13, %v1645_v52, %v1773_v1 }
 0x115   : > { %2554 = vmatmul.msk.bf16.gmra.mxu2 %vm957_vm0, %v2285_v48 }
 0x116   : > { %v1578_v59 = vmul.f32 %v3110_v8, %v1434_v53  ;;  %v3245_v60 = vpop.f32.mrf.mxu3 }
 0x118   : > { %v1646_v3 = vadd.f32 %v3120_v13, %v1578_v59  ;;  %v1441_v4 = vpop.f32.mrf.mxu2  ;;  %v1098_v6 = vpop.f32.mrf.mxu0 }
 0x119   : > { %v1267_v7 = vpop.f32.mrf.mxu1 }
 0x11a   : > { %vm1710_vm14 = vcmp.gt.f32.partialorder %v1646_v3, 0.0  ;;  %v1774_v10 = vmul.f32 0.2, %v1646_v3  ;;  %v1268_v11 = vadd.f32 %v1267_v7, %v1098_v6 }
 0x11b   : > { %1137 = vmatmul.bf16.gmra.mxu0 %v2265_v63  ;;  %1386 = vmatmul.bf16.gmra.mxu3 %v2461_v0  ;;  %v2308_v63 = vld [vmem:[%s2988_s11 + $0x1b8] sm:$0xf]  ;;  %v2628_v0 = vld [vmem:[%s2988_s11 + $0x1c0] sm:$0xf0] }
 0x11c   : > { %v1838_v14 = vsel %vm1710_vm14, %v1646_v3, %v1774_v10  ;;  %v1437_v16 = vadd.f32 %v1436_v27, %v1268_v11  ;;  %1306 = vmatmul.bf16.gmra.mxu1 %v2269_v2  ;;  %v2276_v27 = vld [vmem:[%s2988_s11 + $0x180] sm:$0xf]  ;;  %v2309_v7 = vor.u32 %v2628_v0, %v2308_v63  ;;  %v2428_v63 = vld [vmem:[%s2988_s11 + $0x2a8] sm:$0xf]  ;;  %v2658_v0 = vld [vmem:[%s2988_s11 + $0x2b0] sm:$0xf0] }
 0x11d   : > { %v2719_v17 = vpack.c.bf16 %v1838_v14, %v1837_v12  ;;  %v2277_v42 = vor.u32 %v2621_v33, %v2276_v27  ;;  %v2624_v14 = vld [vmem:[%s2988_s11 + $0x1a0] sm:$0xf0] }
 0x11e   : > { %v3248_v18 = vpop.f32.mrf.mxu3  ;;  %v1579_v22 = vmul.f32 %v3110_v8, %v1437_v16  ;;  %v2416_v16 = vld [vmem:[%s2988_s11 + $0x290] sm:$0xf] }
 0x11f   : > { %2851 = vst [vmem:[%s3138_s17 + $0x30] sm:$0xff] %v2719_v17   ;;  %v2655_v17 = vld [vmem:[%s2988_s11 + $0x298] sm:$0xf0] }
 0x120   : > { %v1443_v23 = vpop.f32.mrf.mxu2  ;;  %v1100_v25 = vpop.f32.mrf.mxu0  ;;  %v1647_v31 = vadd.f32 %v3120_v13, %v1579_v22 }
 0x121   : > { %v1269_v26 = vpop.f32.mrf.mxu1 }
 0x122   : > { %v1270_v29 = vadd.f32 %v1269_v26, %v1100_v25  ;;  %v1775_v47 = vmul.f32 0.2, %v1647_v31  ;;  %vm1711_vm15 = vcmp.gt.f32.partialorder %v1647_v31, 0.0 }
 0x124   : > { %v1439_v32 = vadd.f32 %v1438_v44, %v1270_v29  ;;  %v2281_v44 = vor.u32 %v2620_v37, %v2278_v38  ;;  %v1839_v55 = vsel %vm1711_vm15, %v1647_v31, %v1775_v47  ;;  %v2320_v47 = vld [vmem:[%s2988_s11 + $0x1d0] sm:$0xf] }
 0x125   : > { %2555 = vmatmul.msk.bf16.gmra.mxu2 %vm957_vm0, %v2297_v30  ;;  %v2417_v30 = vor.u32 %v2655_v17, %v2416_v16 }
 0x126   : > { %v1580_v40 = vmul.f32 %v3110_v8, %v1439_v32  ;;  %v3263_v41 = vpop.f32.mrf.mxu3 }
 0x128   : > { %v1648_v48 = vadd.f32 %v3120_v13, %v1580_v40  ;;  %v1446_v49 = vpop.f32.mrf.mxu2  ;;  %v1103_v51 = vpop.f32.mrf.mxu0 }
 0x129   : > { %v1272_v52 = vpop.f32.mrf.mxu1 }
 0x12a   : > { %vm1712_vm1 = vcmp.gt.f32.partialorder %v1648_v48, 0.0  ;;  %v1776_v53 = vmul.f32 0.2, %v1648_v48  ;;  %v1273_v54 = vadd.f32 %v1272_v52, %v1103_v51 }
 0x12b   : > { %1142 = vmatmul.bf16.gmra.mxu0 %v2277_v42  ;;  %2564 = vmatmul.msk.bf16.vlgmr.msra.gmra.mxu3 %vm957_vm0, %v2405_v46 }
 0x12c   : > { %v1840_v56 = vsel %vm1712_vm1, %v1648_v48, %v1776_v53  ;;  %v1442_v57 = vadd.f32 %v1441_v4, %v1273_v54  ;;  %1311 = vmatmul.bf16.gmra.mxu1 %v2281_v44  ;;  %v2288_v4 = vld [vmem:[%s2988_s11 + $0x198] sm:$0xf]  ;;  %v2631_v48 = vld [vmem:[%s2988_s11 + $0x1d8] sm:$0xf0] }
 0x12d   : > { %v2724_v58 = vpack.c.bf16 %v1840_v56, %v1839_v55  ;;  %v2289_v26 = vor.u32 %v2624_v14, %v2288_v4  ;;  %v2321_v54 = vor.u32 %v2631_v48, %v2320_v47  ;;  %v2429_v4 = vor.u32 %v2658_v0, %v2428_v63  ;;  %v2630_v48 = vld [vmem:[%s2988_s11 + $0x1d0] sm:$0xf0] }
 0x12e   : > { %v3267_v59 = vpop.f32.mrf.mxu3  ;;  %v1581_v1 = vmul.f32 %v3110_v8, %v1442_v57 }
 0x12f   : > { %2852 = vst [vmem:[%s3138_s17 + $0x38] sm:$0xff] %v2724_v58   ;;  %v2627_v58 = vld [vmem:[%s2988_s11 + $0x1b8] sm:$0xf0] }
 0x130   : > { %v1448_v3 = vpop.f32.mrf.mxu2  ;;  %v1105_v6 = vpop.f32.mrf.mxu0  ;;  %v1649_v11 = vadd.f32 %v3120_v13, %v1581_v1  ;;  %v2626_v1 = vld [vmem:[%s2988_s11 + $0x1b4] sm:$0xf] }
 0x131   : > { %v1274_v2 = vpop.f32.mrf.mxu1 }
 0x132   : > { %v1275_v10 = vadd.f32 %v1274_v2, %v1105_v6  ;;  %v1777_v29 = vmul.f32 0.2, %v1649_v11  ;;  %vm1713_vm2 = vcmp.gt.f32.partialorder %v1649_v11, 0.0  ;;  %v2302_v6 = vld [vmem:[%s2988_s11 + $0x1bc] sm:$0xf0] }
 0x134   : > { %v1444_v12 = vadd.f32 %v1443_v23, %v1275_v10  ;;  %v2293_v23 = vor.u32 %v2623_v19, %v2290_v20  ;;  %v1841_v37 = vsel %vm1713_vm2, %v1649_v11, %v1777_v29 }
 0x135   : > { %2556 = vmatmul.msk.bf16.gmra.mxu2 %vm957_vm0, %v2309_v7 }
 0x136   : > { %v1582_v22 = vmul.f32 %v3110_v8, %v1444_v12  ;;  %v3282_v25 = vpop.f32.mrf.mxu3 }
 0x138   : > { %v1650_v27 = vadd.f32 %v3120_v13, %v1582_v22  ;;  %v1451_v31 = vpop.f32.mrf.mxu2  ;;  %v1108_v32 = vpop.f32.mrf.mxu0 }
 0x139   : > { %v1277_v33 = vpop.f32.mrf.mxu1 }
 0x13a   : > { %vm1714_vm3 = vcmp.gt.f32.partialorder %v1650_v27, 0.0  ;;  %v1778_v35 = vmul.f32 0.2, %v1650_v27  ;;  %v1278_v36 = vadd.f32 %v1277_v33, %v1108_v32  ;;  %v2332_v32 = vld [vmem:[%s2988_s11 + $0x1e8] sm:$0xf] }
 0x13b   : > { %1147 = vmatmul.bf16.gmra.mxu0 %v2289_v26  ;;  %2565 = vmatmul.msk.bf16.gmra.mxu3 %vm957_vm0, %v2417_v30 }
 0x13c   : > { %v1842_v38 = vsel %vm1714_vm3, %v1650_v27, %v1778_v35  ;;  %v1447_v40 = vadd.f32 %v1446_v49, %v1278_v36  ;;  %1316 = vmatmul.bf16.gmra.mxu1 %v2293_v23  ;;  %v2300_v49 = vld [vmem:[%s2988_s11 + $0x1b0] sm:$0xf]  ;;  %v2634_v23 = vld [vmem:[%s2988_s11 + $0x1f0] sm:$0xf0] }
 0x13d   : > { %v2729_v42 = vpack.c.bf16 %v1842_v38, %v1841_v37  ;;  %v2301_v10 = vor.u32 %v2627_v58, %v2300_v49  ;;  %v2333_v38 = vor.u32 %v2634_v23, %v2332_v32 }
 0x13e   : > { %v3286_v46 = vpop.f32.mrf.mxu3  ;;  %v1583_v51 = vmul.f32 %v3110_v8, %v1447_v40 }
 0x13f   : > { %2853 = vst [vmem:[%s3138_s17 + $0x40] sm:$0xff] %v2729_v42  }
 0x140   : > { %v1453_v44 = vpop.f32.mrf.mxu2  ;;  %v1110_v52 = vpop.f32.mrf.mxu0  ;;  %v1651_v56 = vadd.f32 %v3120_v13, %v1583_v51  ;;  %v2440_v51 = vld [vmem:[%s2988_s11 + $0x2c0] sm:$0xf] }
 0x141   : > { %v1279_v53 = vpop.f32.mrf.mxu1 }
 0x142   : > { %v1280_v55 = vadd.f32 %v1279_v53, %v1110_v52  ;;  %v1779_v11 = vmul.f32 0.2, %v1651_v56  ;;  %vm1715_vm4 = vcmp.gt.f32.partialorder %v1651_v56, 0.0  ;;  %v2661_v52 = vld [vmem:[%s2988_s11 + $0x2c8] sm:$0xf0] }
 0x143   : > { %v2629_v53 = vld [vmem:[%s2988_s11 + $0x1cc] sm:$0xf] }
 0x144   : > { %v1449_v57 = vadd.f32 %v1448_v3, %v1280_v55  ;;  %v2305_v3 = vor.u32 %v2626_v1, %v2302_v6  ;;  %v1843_v22 = vsel %vm1715_vm4, %v1651_v56, %v1779_v11 }
 0x145   : > { %2557 = vmatmul.msk.bf16.gmra.mxu2 %vm957_vm0, %v2321_v54  ;;  %v2314_v54 = vld [vmem:[%s2988_s11 + $0x1d4] sm:$0xf0] }
 0x146   : > { %v1584_v2 = vmul.f32 %v3110_v8, %v1449_v57  ;;  %v3301_v7 = vpop.f32.mrf.mxu3  ;;  %v2441_v57 = vor.u32 %v2661_v52, %v2440_v51 }
 0x148   : > { %v1652_v12 = vadd.f32 %v3120_v13, %v1584_v2  ;;  %v1456_v14 = vpop.f32.mrf.mxu2  ;;  %v1113_v16 = vpop.f32.mrf.mxu0 }
 0x149   : > { %v1282_v17 = vpop.f32.mrf.mxu1 }
 0x14a   : > { %vm1716_vm5 = vcmp.gt.f32.partialorder %v1652_v12, 0.0  ;;  %v1780_v19 = vmul.f32 0.2, %v1652_v12  ;;  %v1283_v20 = vadd.f32 %v1282_v17, %v1113_v16  ;;  %v2344_v17 = vld [vmem:[%s2988_s11 + $0x200] sm:$0xf] }
 0x14b   : > { %1152 = vmatmul.bf16.gmra.mxu0 %v2301_v10  ;;  %2566 = vmatmul.msk.bf16.gmra.mxu3 %vm957_vm0, %v2429_v4 }
 0x14c   : > { %v1844_v26 = vsel %vm1716_vm5, %v1652_v12, %v1780_v19  ;;  %v1452_v30 = vadd.f32 %v1451_v31, %v1283_v20  ;;  %1321 = vmatmul.bf16.gmra.mxu1 %v2305_v3  ;;  %v2312_v31 = vld [vmem:[%s2988_s11 + $0x1c8] sm:$0xf]  ;;  %v2637_v19 = vld [vmem:[%s2988_s11 + $0x208] sm:$0xf0] }
 0x14d   : > { %v2734_v29 = vpack.c.bf16 %v1844_v26, %v1843_v22  ;;  %v2313_v56 = vor.u32 %v2630_v48, %v2312_v31  ;;  %v2326_v31 = vld [vmem:[%s2988_s11 + $0x1ec] sm:$0xf0] }
 0x14e   : > { %v3305_v27 = vpop.f32.mrf.mxu3  ;;  %v1585_v33 = vmul.f32 %v3110_v8, %v1452_v30 }
 0x14f   : > { %2854 = vst [vmem:[%s3138_s17 + $0x48] sm:$0xff] %v2734_v29   ;;  %v2345_v29 = vor.u32 %v2637_v19, %v2344_v17 }
 0x150   : > { %v1458_v35 = vpop.f32.mrf.mxu2  ;;  %v1115_v36 = vpop.f32.mrf.mxu0  ;;  %v1653_v42 = vadd.f32 %v3120_v13, %v1585_v33 }
 0x151   : > { %v1284_v37 = vpop.f32.mrf.mxu1 }
 0x152   : > { %v1285_v40 = vadd.f32 %v1284_v37, %v1115_v36  ;;  %v1781_v58 = vmul.f32 0.2, %v1653_v42  ;;  %vm1717_vm6 = vcmp.gt.f32.partialorder %v1653_v42, 0.0  ;;  %v2633_v36 = vld [vmem:[%s2988_s11 + $0x1e8] sm:$0xf0] }
 0x153   : > { %v2452_v37 = vld [vmem:[%s2988_s11 + $0x2d8] sm:$0xf] }
 0x154   : > { %v1454_v47 = vadd.f32 %v1453_v44, %v1285_v40  ;;  %v2317_v44 = vor.u32 %v2629_v53, %v2314_v54  ;;  %v1845_v4 = vsel %vm1717_vm6, %v1653_v42, %v1781_v58  ;;  %v2632_v40 = vld [vmem:[%s2988_s11 + $0x1e4] sm:$0xf] }
 0x155   : > { %2558 = vmatmul.msk.bf16.gmra.mxu2 %vm957_vm0, %v2333_v38  ;;  %v2664_v38 = vld [vmem:[%s2988_s11 + $0x2e0] sm:$0xf0] }
 0x156   : > { %v1586_v55 = vmul.f32 %v3110_v8, %v1454_v47  ;;  %v3320_v49 = vpop.f32.mrf.mxu3  ;;  %v2453_v51 = vor.u32 %v2664_v38, %v2452_v37 }
 0x158   : > { %v1654_v63 = vadd.f32 %v3120_v13, %v1586_v55  ;;  %v1461_v0 = vpop.f32.mrf.mxu2  ;;  %v1118_v1 = vpop.f32.mrf.mxu0 }
 0x159   : > { %v1287_v6 = vpop.f32.mrf.mxu1 }
 0x15a   : > { %vm1718_vm7 = vcmp.gt.f32.partialorder %v1654_v63, 0.0  ;;  %v1782_v2 = vmul.f32 0.2, %v1654_v63  ;;  %v1288_v10 = vadd.f32 %v1287_v6, %v1118_v1 }
 0x15b   : > { %1157 = vmatmul.bf16.gmra.mxu0 %v2313_v56  ;;  %2567 = vmatmul.msk.bf16.gmra.mxu3 %vm957_vm0, %v2441_v57 }
 0x15c   : > { %v1846_v11 = vsel %vm1718_vm7, %v1654_v63, %v1782_v2  ;;  %v1457_v12 = vadd.f32 %v1456_v14, %v1288_v10  ;;  %1326 = vmatmul.bf16.gmra.mxu1 %v2317_v44  ;;  %v2324_v14 = vld [vmem:[%s2988_s11 + $0x1e0] sm:$0xf]  ;;  %v2356_v10 = vld [vmem:[%s2988_s11 + $0x218] sm:$0xf] }
 0x15d   : > { %v2739_v16 = vpack.c.bf16 %v1846_v11, %v1845_v4  ;;  %v2325_v48 = vor.u32 %v2633_v36, %v2324_v14  ;;  %v2640_v4 = vld [vmem:[%s2988_s11 + $0x220] sm:$0xf0]  ;;  %v2667_v14 = vld [vmem:[%s2988_s11 + $0x2f8] sm:$0xf0] }
 0x15e   : > { %v3324_v3 = vpop.f32.mrf.mxu3  ;;  %v1587_v20 = vmul.f32 %v3110_v8, %v1457_v12  ;;  %v2357_v19 = vor.u32 %v2640_v4, %v2356_v10 }
 0x15f   : > { %2855 = vst [vmem:[%s3138_s17 + $0x50] sm:$0xff] %v2739_v16  }
 0x160   : > { %v1463_v22 = vpop.f32.mrf.mxu2  ;;  %v1120_v26 = vpop.f32.mrf.mxu0  ;;  %v1655_v23 = vadd.f32 %v3120_v13, %v1587_v20 }
 0x161   : > { %v1289_v30 = vpop.f32.mrf.mxu1 }
 0x162   : > { %v1290_v32 = vadd.f32 %v1289_v30, %v1120_v26  ;;  %v1783_v52 = vmul.f32 0.2, %v1655_v23  ;;  %vm1719_vm8 = vcmp.gt.f32.partialorder %v1655_v23, 0.0 }
 0x164   : > { %v1459_v33 = vadd.f32 %v1458_v35, %v1290_v32  ;;  %v2329_v35 = vor.u32 %v2632_v40, %v2326_v31  ;;  %v1847_v63 = vsel %vm1719_vm8, %v1655_v23, %v1783_v52  ;;  %v2464_v32 = vld [vmem:[%s2988_s11 + $0x2f0] sm:$0xf]  ;;  %v2635_v23 = vld [vmem:[%s2988_s11 + $0x1fc] sm:$0xf] }
 0x165   : > { %2559 = vmatmul.msk.bf16.gmra.mxu2 %vm957_vm0, %v2345_v29  ;;  %v2636_v29 = vld [vmem:[%s2988_s11 + $0x200] sm:$0xf0]  ;;  %v2465_v40 = vor.u32 %v2667_v14, %v2464_v32 }
 0x166   : > { %v1588_v42 = vmul.f32 %v3110_v8, %v1459_v33  ;;  %v3339_v47 = vpop.f32.mrf.mxu3  ;;  %v2338_v33 = vld [vmem:[%s2988_s11 + $0x204] sm:$0xf0] }
 0x168   : > { %v1656_v53 = vadd.f32 %v3120_v13, %v1588_v42  ;;  %v1466_v54 = vpop.f32.mrf.mxu2  ;;  %v1123_v55 = vpop.f32.mrf.mxu0 }
 0x169   : > { %v1292_v56 = vpop.f32.mrf.mxu1 }
 0x16a   : > { %vm1720_vm9 = vcmp.gt.f32.partialorder %v1656_v53, 0.0  ;;  %v1784_v57 = vmul.f32 0.2, %v1656_v53  ;;  %v1293_v58 = vadd.f32 %v1292_v56, %v1123_v55 }
 0x16b   : > { %1162 = vmatmul.bf16.gmra.mxu0 %v2325_v48  ;;  %2568 = vmatmul.msk.bf16.gmra.mxu3 %vm957_vm0, %v2453_v51 }
 0x16c   : > { %v1848_v1 = vsel %vm1720_vm9, %v1656_v53, %v1784_v57  ;;  %v1462_v44 = vadd.f32 %v1461_v0, %v1293_v58  ;;  %1331 = vmatmul.bf16.gmra.mxu1 %v2329_v35  ;;  %v2336_v0 = vld [vmem:[%s2988_s11 + $0x1f8] sm:$0xf]  ;;  %v2368_v58 = vld [vmem:[%s2988_s11 + $0x230] sm:$0xf] }
 0x16d   : > { %v2744_v6 = vpack.c.bf16 %v1848_v1, %v1847_v63  ;;  %v2337_v38 = vor.u32 %v2636_v29, %v2336_v0  ;;  %v2643_v63 = vld [vmem:[%s2988_s11 + $0x238] sm:$0xf0]  ;;  %v3370_v1 = vld [vmem:[%s3534_s2] ss:$0 sm:$0xff] }
 0x16e   : > { %v3343_v2 = vpop.f32.mrf.mxu3  ;;  %v1589_v11 = vmul.f32 %v3110_v8, %v1462_v44  ;;  %v2369_v4 = vor.u32 %v2643_v63, %v2368_v58  ;;  %v2639_v0 = vld [vmem:[%s2988_s11 + $0x218] sm:$0xf0] }
 0x16f   : > { %2856 = vst [vmem:[%s3138_s17 + $0x58] sm:$0xff] %v2744_v6  }
 0x170   : > { %v1468_v12 = vpop.f32.mrf.mxu2  ;;  %v1125_v16 = vpop.f32.mrf.mxu0  ;;  %v1657_v26 = vadd.f32 %v3120_v13, %v1589_v11 }
 0x171   : > { %v1294_v17 = vpop.f32.mrf.mxu1 }
 0x172   : > { %v1295_v20 = vadd.f32 %v1294_v17, %v1125_v16  ;;  %v1785_v31 = vmul.f32 0.2, %v1657_v26  ;;  %vm1721_vm10 = vcmp.gt.f32.partialorder %v1657_v26, 0.0  ;;  %v3376_v16 = vld [vmem:[%s3535_s3] ss:$0 sm:$0xff] }
 0x174   : > { %v1464_v30 = vadd.f32 %v1463_v22, %v1295_v20  ;;  %v2341_v22 = vor.u32 %v2635_v23, %v2338_v33  ;;  %v2348_v20 = vld [vmem:[%s2988_s11 + $0x210] sm:$0xf] }
 0x175   : > { %2560 = vmatmul.msk.bf16.gmra.mxu2 %vm957_vm0, %v2357_v19  ;;  %v2349_v14 = vor.u32 %v2639_v0, %v2348_v20 }
 0x176   : > { %v1590_v36 = vmul.f32 %v3110_v8, %v1464_v30  ;;  %v3358_v37 = vpop.f32.mrf.mxu3  ;;  %v1849_v8 = vsel %vm1721_vm10, %v1657_v26, %v1785_v31  ;;  %v2638_v26 = vld [vmem:[%s2988_s11 + $0x214] sm:$0xf]  ;;  %v2350_v30 = vld [vmem:[%s2988_s11 + $0x21c] sm:$0xf0] }
 0x178   : > { %v1658_v42 = vadd.f32 %v3120_v13, %v1590_v36  ;;  %v1471_v48 = vpop.f32.mrf.mxu2  ;;  %v1128_v51 = vpop.f32.mrf.mxu0 }
 0x179   : > { %v1297_v52 = vpop.f32.mrf.mxu1 }
 0x17a   : > { %vm1722_vm11 = vcmp.gt.f32.partialorder %v1658_v42, 0.0  ;;  %v1786_v53 = vmul.f32 0.2, %v1658_v42  ;;  %v1298_v55 = vadd.f32 %v1297_v52, %v1128_v51 }
 0x17b   : > { %1167 = vmatmul.bf16.gmra.mxu0 %v2337_v38  ;;  %2569 = vmatmul.msk.bf16.gmra.mxu3 %vm957_vm0, %v2465_v40 }
 0x17c   : > { %v1850_v35 = vsel %vm1722_vm11, %v1658_v42, %v1786_v53  ;;  %v1467_v56 = vadd.f32 %v1466_v54, %v1298_v55  ;;  %1336 = vmatmul.bf16.gmra.mxu1 %v2341_v22 }
 0x17d   : > { %v2749_v13 = vpack.c.bf16 %v1850_v35, %v1849_v8  ;;  %v2380_v8 = vld [vmem:[%s2988_s11 + $0x248] sm:$0xf]  ;;  %v2646_v35 = vld [vmem:[%s2988_s11 + $0x250] sm:$0xf0] }
 0x17e   : > { %v3362_v57 = vpop.f32.mrf.mxu3  ;;  %v1591_v44 = vmul.f32 %v3370_v1, %v1467_v56 }
 0x17f   : > { %2857 = vst [vmem:[%s3138_s17 + $0x60] sm:$0xff] %v2749_v13  }
 0x180   : > { %v1473_v6 = vpop.f32.mrf.mxu2  ;;  %v1130_v54 = vpop.f32.mrf.mxu0  ;;  %v1659_v17 = vadd.f32 %v3376_v16, %v1591_v44  ;;  %v2381_v44 = vor.u32 %v2646_v35, %v2380_v8 }
 0x181   : > { %v1299_v10 = vpop.f32.mrf.mxu1 }
 0x182   : > { %v1300_v11 = vadd.f32 %v1299_v10, %v1130_v54  ;;  %v1787_v23 = vmul.f32 0.2, %v1659_v17  ;;  %vm1723_vm12 = vcmp.gt.f32.partialorder %v1659_v17, 0.0 }
 0x184   : > { %v1469_v19 = vadd.f32 %v1468_v12, %v1300_v11  ;;  %v2353_v12 = vor.u32 %v2638_v26, %v2350_v30  ;;  %v1851_v51 = vsel %vm1723_vm12, %v1659_v17, %v1787_v23  ;;  %v2642_v11 = vld [vmem:[%s2988_s11 + $0x230] sm:$0xf0]  ;;  %v2641_v17 = vld [vmem:[%s2988_s11 + $0x22c] sm:$0xf] }
 0x185   : > { %2561 = vmatmul.msk.bf16.gmra.mxu2 %vm957_vm0, %v2369_v4  ;;  %v2360_v4 = vld [vmem:[%s2988_s11 + $0x228] sm:$0xf] }
 0x186   : > { %v1592_v29 = vmul.f32 %v3370_v1, %v1469_v19  ;;  %v3385_v32 = vpop.f32.mrf.mxu3  ;;  %v2362_v19 = vld [vmem:[%s2988_s11 + $0x234] sm:$0xf0]  ;;  %v2361_v26 = vor.u32 %v2642_v11, %v2360_v4 }
 0x188   : > { %v1660_v33 = vadd.f32 %v3376_v16, %v1592_v29  ;;  %v1476_v36 = vpop.f32.mrf.mxu2  ;;  %v1133_v38 = vpop.f32.mrf.mxu0 }
 0x189   : > { %v1302_v40 = vpop.f32.mrf.mxu1 }
 0x18a   : > { %vm1724_vm13 = vcmp.gt.f32.partialorder %v1660_v33, 0.0  ;;  %v1788_v31 = vmul.f32 0.2, %v1660_v33  ;;  %v1303_v42 = vadd.f32 %v1302_v40, %v1133_v38 }
 0x18b   : > { %1172 = vmatmul.bf16.gmra.mxu0 %v2349_v14 }
 0x18c   : > { %v1852_v22 = vsel %vm1724_vm13, %v1660_v33, %v1788_v31  ;;  %v1472_v52 = vadd.f32 %v1471_v48, %v1303_v42  ;;  %1341 = vmatmul.bf16.gmra.mxu1 %v2353_v12 }
 0x18d   : > { %v2754_v53 = vpack.c.bf16 %v1852_v22, %v1851_v51 }
 0x18e   : > { %v3388_v55 = vpop.f32.mrf.mxu3  ;;  %v1593_v56 = vmul.f32 %v3370_v1, %v1472_v52  ;;  %v2392_v52 = vld [vmem:[%s2988_s11 + $0x260] sm:$0xf] }
 0x18f   : > { %2858 = vst [vmem:[%s3138_s17 + $0x68] sm:$0xff] %v2754_v53   ;;  %v2649_v53 = vld [vmem:[%s2988_s11 + $0x268] sm:$0xf0] }
 0x190   : > { %v1478_v13 = vpop.f32.mrf.mxu2  ;;  %v1135_v58 = vpop.f32.mrf.mxu0  ;;  %v1661_v10 = vadd.f32 %v3376_v16, %v1593_v56 }
 0x191   : > { %v1304_v63 = vpop.f32.mrf.mxu1 }
 0x192   : > { %v1305_v54 = vadd.f32 %v1304_v63, %v1135_v58  ;;  %v1789_v30 = vmul.f32 0.2, %v1661_v10  ;;  %vm1725_vm14 = vcmp.gt.f32.partialorder %v1661_v10, 0.0  ;;  %v2393_v63 = vor.u32 %v2649_v53, %v2392_v52 }
 0x194   : > { %v1474_v48 = vadd.f32 %v1473_v6, %v1305_v54  ;;  %v2365_v6 = vor.u32 %v2641_v17, %v2362_v19  ;;  %v1853_v40 = vsel %vm1725_vm14, %v1661_v10, %v1789_v30 }
 0x195   : > { %2562 = vmatmul.msk.bf16.gmra.mxu2 %vm957_vm0, %v2381_v44 }
 0x196   : > { %v1594_v20 = vmul.f32 %v3370_v1, %v1474_v48  ;;  %v3401_v0 = vpop.f32.mrf.mxu3 }
 0x198   : > { %v1662_v29 = vadd.f32 %v3376_v16, %v1594_v20  ;;  %v1481_v14 = vpop.f32.mrf.mxu2  ;;  %v1138_v23 = vpop.f32.mrf.mxu0 }
 0x199   : > { %v1307_v33 = vpop.f32.mrf.mxu1 }
 0x19a   : > { %vm1726_vm15 = vcmp.gt.f32.partialorder %v1662_v29, 0.0  ;;  %v1790_v38 = vmul.f32 0.2, %v1662_v29  ;;  %v1308_v12 = vadd.f32 %v1307_v33, %v1138_v23 }
 0x19b   : > { %1177 = vmatmul.bf16.gmra.mxu0 %v2361_v26 }
 0x19c   : > { %v1854_v31 = vsel %vm1726_vm15, %v1662_v29, %v1790_v38  ;;  %v1477_v42 = vadd.f32 %v1476_v36, %v1308_v12  ;;  %1346 = vmatmul.bf16.gmra.mxu1 %v2365_v6  ;;  %v1363_v6 = vadd.f32 %v3305_v27, %v3158_v15 }
 0x19d   : > { %v2759_v51 = vpack.c.bf16 %v1854_v31, %v1853_v40 }
 0x19e   : > { %v3404_v22 = vpop.f32.mrf.mxu3  ;;  %v1595_v8 = vmul.f32 %v3370_v1, %v1477_v42 }
 0x19f   : > { %2859 = vst [vmem:[%s3138_s17 + $0x70] sm:$0xff] %v2759_v51  }
 0x1a0   : > { %v1483_v35 = vpop.f32.mrf.mxu2  ;;  %v1140_v56 = vpop.f32.mrf.mxu0  ;;  %v1663_v54 = vadd.f32 %v3376_v16, %v1595_v8 }
 0x1a1   : > { %v1309_v58 = vpop.f32.mrf.mxu1 }
 0x1a2   : > { %v1310_v44 = vadd.f32 %v1309_v58, %v1140_v56  ;;  %v1791_v4 = vmul.f32 0.2, %v1663_v54  ;;  %vm1727_vm1 = vcmp.gt.f32.partialorder %v1663_v54, 0.0 }
 0x1a4   : > { %v1479_v48 = vadd.f32 %v1478_v13, %v1310_v44  ;;  %v1855_v29 = vsel %vm1727_vm1, %v1663_v54, %v1791_v4 }
 0x1a5   : > { %2563 = vmatmul.msk.bf16.gmra.mxu2 %vm957_vm0, %v2393_v63 }
 0x1a6   : > { %v1596_v36 = vmul.f32 %v3370_v1, %v1479_v48  ;;  %v3413_v10 = vpop.f32.mrf.mxu3 }
 0x1a8   : > { %v1664_v11 = vadd.f32 %v3376_v16, %v1596_v36  ;;  %v1486_v17 = vpop.f32.mrf.mxu2  ;;  %v1143_v19 = vpop.f32.mrf.mxu0 }
 0x1a9   : > { %v1312_v20 = vpop.f32.mrf.mxu1 }
 0x1aa   : > { %vm1728_vm2 = vcmp.gt.f32.partialorder %v1664_v11, 0.0  ;;  %v1792_v26 = vmul.f32 0.2, %v1664_v11  ;;  %v1313_v30 = vadd.f32 %v1312_v20, %v1143_v19 }
 0x1ac   : > { %v1856_v23 = vsel %vm1728_vm2, %v1664_v11, %v1792_v26  ;;  %v1482_v13 = vadd.f32 %v1481_v14, %v1313_v30  ;;  %v1365_v14 = vadd.f32 %v3320_v49, %v3173_v34 }
 0x1ad   : > { %v2764_v33 = vpack.c.bf16 %v1856_v23, %v1855_v29  ;;  %v1368_v29 = vadd.f32 %v3324_v3, %v3176_v50 }
 0x1ae   : > { %v1531_v38 = vpop.f32.mrf.mxu3  ;;  %v1597_v40 = vmul.f32 %v3370_v1, %v1482_v13 }
 0x1af   : > { %2860 = vst [vmem:[%s3138_s17 + $0x78] sm:$0xff] %v2764_v33   ;;  %v1532_v12 = vadd.f32 %v1531_v38, %v1363_v6 }
 0x1b0   : > { %v1488_v31 = vpop.f32.mrf.mxu2  ;;  %v1145_v42 = vpop.f32.mrf.mxu0  ;;  %v1665_v8 = vadd.f32 %v3376_v16, %v1597_v40 }
 0x1b1   : > { %v1314_v51 = vpop.f32.mrf.mxu1  ;;  %v1617_v53 = vmul.f32 %v3370_v1, %v1532_v12 }
 0x1b2   : > { %v1315_v52 = vadd.f32 %v1314_v51, %v1145_v42  ;;  %v1793_v44 = vmul.f32 0.2, %v1665_v8  ;;  %vm1729_vm0 = vcmp.gt.f32.partialorder %v1665_v8, 0.0 }
 0x1b3   : > { %v1685_v58 = vadd.f32 %v3376_v16, %v1617_v53 }
 0x1b4   : > { %v1484_v56 = vadd.f32 %v1483_v35, %v1315_v52  ;;  %v1857_v20 = vsel %vm1729_vm0, %v1665_v8, %v1793_v44 }
 0x1b5   : > { %v1813_v34 = vmul.f32 0.2, %v1685_v58  ;;  %vm1749_vm4 = vcmp.gt.f32.partialorder %v1685_v58, 0.0 }
 0x1b6   : > { %v1598_v15 = vmul.f32 %v3370_v1, %v1484_v56  ;;  %v1533_v27 = vpop.f32.mrf.mxu3  ;;  %v1370_v56 = vadd.f32 %v3339_v47, %v3191_v5 }
 0x1b7   : > { %v1534_v63 = vadd.f32 %v1533_v27, %v1365_v14  ;;  %v1877_v33 = vsel %vm1749_vm4, %v1685_v58, %v1813_v34 }
 0x1b8   : > { %v1666_v54 = vadd.f32 %v3376_v16, %v1598_v15  ;;  %v1491_v48 = vpop.f32.mrf.mxu2  ;;  %v1148_v36 = vpop.f32.mrf.mxu0 }
 0x1b9   : > { %v1618_v4 = vmul.f32 %v3370_v1, %v1534_v63  ;;  %v1317_v11 = vpop.f32.mrf.mxu1 }
 0x1ba   : > { %vm1730_vm3 = vcmp.gt.f32.partialorder %v1666_v54, 0.0  ;;  %v1794_v35 = vmul.f32 0.2, %v1666_v54  ;;  %v1318_v19 = vadd.f32 %v1317_v11, %v1148_v36 }
 0x1bb   : > { %v1686_v49 = vadd.f32 %v3376_v16, %v1618_v4 }
 0x1bc   : > { %v1858_v26 = vsel %vm1730_vm3, %v1666_v54, %v1794_v35  ;;  %v1487_v30 = vadd.f32 %v1486_v17, %v1318_v19 }
 0x1bd   : > { %v2769_v23 = vpack.c.bf16 %v1858_v26, %v1857_v20  ;;  %vm1750_vm5 = vcmp.gt.f32.partialorder %v1686_v49, 0.0  ;;  %v1814_v13 = vmul.f32 0.2, %v1686_v49  ;;  %v1373_v20 = vadd.f32 %v3343_v2, %v3194_v24 }
 0x1be   : > { %v1536_v6 = vpop.f32.mrf.mxu3  ;;  %v1599_v42 = vmul.f32 %v3370_v1, %v1487_v30 }
 0x1bf   : > { %2861 = vst [vmem:[%s3138_s17 + $0x80] sm:$0xff] %v2769_v23   ;;  %v1878_v38 = vsel %vm1750_vm5, %v1686_v49, %v1814_v13  ;;  %v1537_v12 = vadd.f32 %v1536_v6, %v1368_v29 }
 0x1c0   : > { %v2819_v40 = vpack.c.bf16 %v1878_v38, %v1877_v33  ;;  %v1493_v51 = vpop.f32.mrf.mxu2  ;;  %v1150_v52 = vpop.f32.mrf.mxu0  ;;  %v1667_v50 = vadd.f32 %v3376_v16, %v1599_v42 }
 0x1c1   : > { %v1319_v53 = vpop.f32.mrf.mxu1  ;;  %v1619_v17 = vmul.f32 %v3370_v1, %v1537_v12 }
 0x1c2   : > { %2871 = vst [vmem:[%s3138_s17 + $0xd0] sm:$0xff] %v2819_v40   ;;  %v1320_v8 = vadd.f32 %v1319_v53, %v1150_v52  ;;  %v1795_v63 = vmul.f32 0.2, %v1667_v50  ;;  %vm1731_vm6 = vcmp.gt.f32.partialorder %v1667_v50, 0.0  ;;  %v1375_v53 = vadd.f32 %v3358_v37, %v3209_v45 }
 0x1c3   : > { %v1687_v27 = vadd.f32 %v3376_v16, %v1619_v17 }
 0x1c4   : > { %v1489_v3 = vadd.f32 %v1488_v31, %v1320_v8  ;;  %v1859_v19 = vsel %vm1731_vm6, %v1667_v50, %v1795_v63 }
 0x1c5   : > { %v1815_v5 = vmul.f32 0.2, %v1687_v27  ;;  %vm1751_vm8 = vcmp.gt.f32.partialorder %v1687_v27, 0.0 }
 0x1c6   : > { %v1600_v14 = vmul.f32 %v3370_v1, %v1489_v3  ;;  %v1538_v15 = vpop.f32.mrf.mxu3 }
 0x1c7   : > { %v1539_v58 = vadd.f32 %v1538_v15, %v1370_v56  ;;  %v1879_v23 = vsel %vm1751_vm8, %v1687_v27, %v1815_v5 }
 0x1c8   : > { %v1668_v44 = vadd.f32 %v3376_v16, %v1600_v14  ;;  %v1496_v54 = vpop.f32.mrf.mxu2  ;;  %v1153_v36 = vpop.f32.mrf.mxu0 }
 0x1c9   : > { %v1620_v4 = vmul.f32 %v3370_v1, %v1539_v58  ;;  %v1322_v11 = vpop.f32.mrf.mxu1 }
 0x1ca   : > { %vm1732_vm7 = vcmp.gt.f32.partialorder %v1668_v44, 0.0  ;;  %v1796_v31 = vmul.f32 0.2, %v1668_v44  ;;  %v1323_v35 = vadd.f32 %v1322_v11, %v1153_v36 }
 0x1cb   : > { %v1688_v47 = vadd.f32 %v3376_v16, %v1620_v4 }
 0x1cc   : > { %v1860_v34 = vsel %vm1732_vm7, %v1668_v44, %v1796_v31  ;;  %v1492_v49 = vadd.f32 %v1491_v48, %v1323_v35  ;;  %v1378_v31 = vadd.f32 %v3362_v57, %v3212_v62 }
 0x1cd   : > { %v2774_v26 = vpack.c.bf16 %v1860_v34, %v1859_v19  ;;  %vm1752_vm9 = vcmp.gt.f32.partialorder %v1688_v47, 0.0  ;;  %v1816_v30 = vmul.f32 0.2, %v1688_v47 }
 0x1ce   : > { %v1541_v29 = vpop.f32.mrf.mxu3  ;;  %v1601_v38 = vmul.f32 %v3370_v1, %v1492_v49 }
 0x1cf   : > { %2862 = vst [vmem:[%s3138_s17 + $0x88] sm:$0xff] %v2774_v26   ;;  %v1880_v13 = vsel %vm1752_vm9, %v1688_v47, %v1816_v30  ;;  %v1542_v6 = vadd.f32 %v1541_v29, %v1373_v20 }
 0x1d0   : > { %v2824_v33 = vpack.c.bf16 %v1880_v13, %v1879_v23  ;;  %v1498_v12 = vpop.f32.mrf.mxu2  ;;  %v1155_v40 = vpop.f32.mrf.mxu0  ;;  %v1669_v24 = vadd.f32 %v3376_v16, %v1601_v38 }
 0x1d1   : > { %v1324_v42 = vpop.f32.mrf.mxu1  ;;  %v1621_v48 = vmul.f32 %v3370_v1, %v1542_v6  ;;  %v1380_v6 = vadd.f32 %v3385_v32, %v3227_v21 }
 0x1d2   : > { %2872 = vst [vmem:[%s3138_s17 + $0xd8] sm:$0xff] %v2824_v33   ;;  %v1325_v52 = vadd.f32 %v1324_v42, %v1155_v40  ;;  %v1797_v56 = vmul.f32 0.2, %v1669_v24  ;;  %vm1733_vm10 = vcmp.gt.f32.partialorder %v1669_v24, 0.0 }
 0x1d3   : > { %v1689_v50 = vadd.f32 %v3376_v16, %v1621_v48 }
 0x1d4   : > { %v1494_v2 = vadd.f32 %v1493_v51, %v1325_v52  ;;  %v1861_v36 = vsel %vm1733_vm10, %v1669_v24, %v1797_v56 }
 0x1d5   : > { %v1817_v45 = vmul.f32 0.2, %v1689_v50  ;;  %vm1753_vm12 = vcmp.gt.f32.partialorder %v1689_v50, 0.0 }
 0x1d6   : > { %v1602_v8 = vmul.f32 %v3370_v1, %v1494_v2  ;;  %v1543_v17 = vpop.f32.mrf.mxu3 }
 0x1d7   : > { %v1544_v3 = vadd.f32 %v1543_v17, %v1375_v53  ;;  %v1881_v19 = vsel %vm1753_vm12, %v1689_v50, %v1817_v45 }
 0x1d8   : > { %v1670_v14 = vadd.f32 %v3376_v16, %v1602_v8  ;;  %v1501_v15 = vpop.f32.mrf.mxu2  ;;  %v1158_v27 = vpop.f32.mrf.mxu0 }
 0x1d9   : > { %v1622_v58 = vmul.f32 %v3370_v1, %v1544_v3  ;;  %v1327_v63 = vpop.f32.mrf.mxu1 }
 0x1da   : > { %vm1734_vm11 = vcmp.gt.f32.partialorder %v1670_v14, 0.0  ;;  %v1798_v51 = vmul.f32 0.2, %v1670_v14  ;;  %v1328_v44 = vadd.f32 %v1327_v63, %v1158_v27 }
 0x1db   : > { %v1690_v37 = vadd.f32 %v3376_v16, %v1622_v58 }
 0x1dc   : > { %v1862_v4 = vsel %vm1734_vm11, %v1670_v14, %v1798_v51  ;;  %v1497_v11 = vadd.f32 %v1496_v54, %v1328_v44  ;;  %v1383_v14 = vadd.f32 %v3388_v55, %v3230_v39 }
 0x1dd   : > { %v2779_v35 = vpack.c.bf16 %v1862_v4, %v1861_v36  ;;  %vm1754_vm13 = vcmp.gt.f32.partialorder %v1690_v37, 0.0  ;;  %v1818_v5 = vmul.f32 0.2, %v1690_v37 }
 0x1de   : > { %v1546_v47 = vpop.f32.mrf.mxu3  ;;  %v1603_v26 = vmul.f32 %v3370_v1, %v1497_v11 }
 0x1df   : > { %2863 = vst [vmem:[%s3138_s17 + $0x90] sm:$0xff] %v2779_v35   ;;  %v1882_v34 = vsel %vm1754_vm13, %v1690_v37, %v1818_v5  ;;  %v1547_v49 = vadd.f32 %v1546_v47, %v1378_v31  ;;  %v1385_v5 = vadd.f32 %v3401_v0, %v3245_v60 }
 0x1e0   : > { %v2829_v20 = vpack.c.bf16 %v1882_v34, %v1881_v19  ;;  %v1503_v30 = vpop.f32.mrf.mxu2  ;;  %v1160_v29 = vpop.f32.mrf.mxu0  ;;  %v1671_v62 = vadd.f32 %v3376_v16, %v1603_v26 }
 0x1e1   : > { %v1329_v23 = vpop.f32.mrf.mxu1  ;;  %v1623_v54 = vmul.f32 %v3370_v1, %v1547_v49 }
 0x1e2   : > { %2873 = vst [vmem:[%s3138_s17 + $0xe0] sm:$0xff] %v2829_v20   ;;  %v1330_v13 = vadd.f32 %v1329_v23, %v1160_v29  ;;  %v1799_v52 = vmul.f32 0.2, %v1671_v62  ;;  %vm1735_vm14 = vcmp.gt.f32.partialorder %v1671_v62, 0.0 }
 0x1e3   : > { %v1691_v40 = vadd.f32 %v3376_v16, %v1623_v54 }
 0x1e4   : > { %v1499_v57 = vadd.f32 %v1498_v12, %v1330_v13  ;;  %v1863_v50 = vsel %vm1735_vm14, %v1671_v62, %v1799_v52 }
 0x1e5   : > { %v1819_v21 = vmul.f32 0.2, %v1691_v40  ;;  %vm1755_vm1 = vcmp.gt.f32.partialorder %v1691_v40, 0.0 }
 0x1e6   : > { %v1604_v33 = vmul.f32 %v3370_v1, %v1499_v57  ;;  %v1548_v38 = vpop.f32.mrf.mxu3 }
 0x1e7   : > { %v1549_v42 = vadd.f32 %v1548_v38, %v1380_v6  ;;  %v1883_v51 = vsel %vm1755_vm1, %v1691_v40, %v1819_v21  ;;  %v1388_v38 = vadd.f32 %v3404_v22, %v3248_v18 }
 0x1e8   : > { %v1672_v48 = vadd.f32 %v3376_v16, %v1604_v33  ;;  %v1506_v24 = vpop.f32.mrf.mxu2  ;;  %v1163_v2 = vpop.f32.mrf.mxu0 }
 0x1e9   : > { %v1624_v53 = vmul.f32 %v3370_v1, %v1549_v42  ;;  %v1332_v8 = vpop.f32.mrf.mxu1 }
 0x1ea   : > { %vm1736_vm15 = vcmp.gt.f32.partialorder %v1672_v48, 0.0  ;;  %v1800_v12 = vmul.f32 0.2, %v1672_v48  ;;  %v1333_v17 = vadd.f32 %v1332_v8, %v1163_v2 }
 0x1eb   : > { %v1692_v32 = vadd.f32 %v3376_v16, %v1624_v53 }
 0x1ec   : > { %v1864_v3 = vsel %vm1736_vm15, %v1672_v48, %v1800_v12  ;;  %v1502_v56 = vadd.f32 %v1501_v15, %v1333_v17 }
 0x1ed   : > { %v2784_v27 = vpack.c.bf16 %v1864_v3, %v1863_v50  ;;  %vm1756_vm2 = vcmp.gt.f32.partialorder %v1692_v32, 0.0  ;;  %v1820_v58 = vmul.f32 0.2, %v1692_v32  ;;  %v1390_v3 = vadd.f32 %v3413_v10, %v3263_v41 }
 0x1ee   : > { %v1551_v63 = vpop.f32.mrf.mxu3  ;;  %v1605_v36 = vmul.f32 %v3370_v1, %v1502_v56 }
 0x1ef   : > { %2864 = vst [vmem:[%s3138_s17 + $0x98] sm:$0xff] %v2784_v27   ;;  %v1884_v44 = vsel %vm1756_vm2, %v1692_v32, %v1820_v58  ;;  %v1552_v45 = vadd.f32 %v1551_v63, %v1383_v14 }
 0x1f0   : > { %v2834_v37 = vpack.c.bf16 %v1884_v44, %v1883_v51  ;;  %v1508_v4 = vpop.f32.mrf.mxu2  ;;  %v1165_v11 = vpop.f32.mrf.mxu0  ;;  %v1673_v39 = vadd.f32 %v3376_v16, %v1605_v36 }
 0x1f1   : > { %v1334_v31 = vpop.f32.mrf.mxu1  ;;  %v1625_v15 = vmul.f32 %v3370_v1, %v1552_v45 }
 0x1f2   : > { %2874 = vst [vmem:[%s3138_s17 + $0xe8] sm:$0xff] %v2834_v37   ;;  %v1335_v35 = vadd.f32 %v1334_v31, %v1165_v11  ;;  %v1801_v20 = vmul.f32 0.2, %v1673_v39  ;;  %vm1737_vm0 = vcmp.gt.f32.partialorder %v1673_v39, 0.0 }
 0x1f3   : > { %v1693_v34 = vadd.f32 %v3376_v16, %v1625_v15 }
 0x1f4   : > { %v1504_v55 = vadd.f32 %v1503_v30, %v1335_v35  ;;  %v1865_v57 = vsel %vm1737_vm0, %v1673_v39, %v1801_v20 }
 0x1f5   : > { %v1821_v60 = vmul.f32 0.2, %v1693_v34  ;;  %vm1757_vm4 = vcmp.gt.f32.partialorder %v1693_v34, 0.0 }
 0x1f6   : > { %v1606_v47 = vmul.f32 %v3370_v1, %v1504_v55  ;;  %v1553_v19 = vpop.f32.mrf.mxu3 }
 0x1f7   : > { %v1554_v49 = vadd.f32 %v1553_v19, %v1385_v5  ;;  %v1885_v48 = vsel %vm1757_vm4, %v1693_v34, %v1821_v60 }
 0x1f8   : > { %v1674_v26 = vadd.f32 %v3376_v16, %v1606_v47  ;;  %v1511_v29 = vpop.f32.mrf.mxu2  ;;  %v1168_v23 = vpop.f32.mrf.mxu0 }
 0x1f9   : > { %v1626_v13 = vmul.f32 %v3370_v1, %v1554_v49  ;;  %v1337_v54 = vpop.f32.mrf.mxu1 }
 0x1fa   : > { %vm1738_vm3 = vcmp.gt.f32.partialorder %v1674_v26, 0.0  ;;  %v1802_v30 = vmul.f32 0.2, %v1674_v26  ;;  %v1338_v62 = vadd.f32 %v1337_v54, %v1168_v23 }
 0x1fb   : > { %v1694_v0 = vadd.f32 %v3376_v16, %v1626_v13 }
 0x1fc   : > { %v1866_v6 = vsel %vm1738_vm3, %v1674_v26, %v1802_v30  ;;  %v1507_v33 = vadd.f32 %v1506_v24, %v1338_v62 }
 0x1fd   : > { %v2789_v40 = vpack.c.bf16 %v1866_v6, %v1865_v57  ;;  %vm1758_vm5 = vcmp.gt.f32.partialorder %v1694_v0, 0.0  ;;  %v1822_v42 = vmul.f32 0.2, %v1694_v0 }
 0x1fe   : > { %v1556_v52 = vpop.f32.mrf.mxu3  ;;  %v1607_v12 = vmul.f32 %v3370_v1, %v1507_v33 }
 0x1ff   : > { %2865 = vst [vmem:[%s3138_s17 + $0xa0] sm:$0xff] %v2789_v40   ;;  %v1886_v2 = vsel %vm1758_vm5, %v1694_v0, %v1822_v42  ;;  %v1557_v53 = vadd.f32 %v1556_v52, %v1388_v38 }
 0x200   : > { %v2839_v8 = vpack.c.bf16 %v1886_v2, %v1885_v48  ;;  %v1513_v17 = vpop.f32.mrf.mxu2  ;;  %v1170_v21 = vpop.f32.mrf.mxu0  ;;  %v1675_v18 = vadd.f32 %v3376_v16, %v1607_v12 }
 0x201   : > { %v1339_v32 = vpop.f32.mrf.mxu1  ;;  %v1627_v24 = vmul.f32 %v3370_v1, %v1557_v53 }
 0x202   : > { %2875 = vst [vmem:[%s3138_s17 + $0xf0] sm:$0xff] %v2839_v8   ;;  %v1340_v50 = vadd.f32 %v1339_v32, %v1170_v21  ;;  %v1803_v63 = vmul.f32 0.2, %v1675_v18  ;;  %vm1739_vm6 = vcmp.gt.f32.partialorder %v1675_v18, 0.0 }
 0x203   : > { %v1695_v27 = vadd.f32 %v3376_v16, %v1627_v24 }
 0x204   : > { %v1509_v22 = vadd.f32 %v1508_v4, %v1340_v50  ;;  %v1867_v31 = vsel %vm1739_vm6, %v1675_v18, %v1803_v63 }
 0x205   : > { %v1823_v41 = vmul.f32 0.2, %v1695_v27  ;;  %vm1759_vm8 = vcmp.gt.f32.partialorder %v1695_v27, 0.0 }
 0x206   : > { %v1608_v56 = vmul.f32 %v3370_v1, %v1509_v22  ;;  %v1558_v14 = vpop.f32.mrf.mxu3 }
 0x207   : > { %v1559_v58 = vadd.f32 %v1558_v14, %v1390_v3  ;;  %v1887_v5 = vsel %vm1759_vm8, %v1695_v27, %v1823_v41 }
 0x208   : > { %v1676_v51 = vadd.f32 %v3376_v16, %v1608_v56  ;;  %v1516_v44 = vpop.f32.mrf.mxu2  ;;  %v1173_v45 = vpop.f32.mrf.mxu0 }
 0x209   : > { %v1628_v37 = vmul.f32 %v3370_v1, %v1559_v58  ;;  %v1342_v36 = vpop.f32.mrf.mxu1 }
 0x20a   : > { %vm1740_vm7 = vcmp.gt.f32.partialorder %v1676_v51, 0.0  ;;  %v1804_v4 = vmul.f32 0.2, %v1676_v51  ;;  %v1343_v11 = vadd.f32 %v1342_v36, %v1173_v45 }
 0x20b   : > { %v1696_v10 = vadd.f32 %v3376_v16, %v1628_v37 }
 0x20c   : > { %v1868_v35 = vsel %vm1740_vm7, %v1676_v51, %v1804_v4  ;;  %v1512_v15 = vadd.f32 %v1511_v29, %v1343_v11  ;;  %v1353_v29 = vadd.f32 %v3267_v59, %v3112_v9  ;;  %v1355_v9 = vadd.f32 %v3282_v25, %v3131_v28 }
 0x20d   : > { %v2794_v39 = vpack.c.bf16 %v1868_v35, %v1867_v31  ;;  %vm1760_vm9 = vcmp.gt.f32.partialorder %v1696_v10, 0.0  ;;  %v1824_v55 = vmul.f32 0.2, %v1696_v10  ;;  %v1358_v25 = vadd.f32 %v3286_v46, %v3140_v43 }
 0x20e   : > { %v1609_v34 = vmul.f32 %v3370_v1, %v1512_v15  ;;  %v1360_v46 = vadd.f32 %v3301_v7, %v3155_v61 }
 0x20f   : > { %2866 = vst [vmem:[%s3138_s17 + $0xa8] sm:$0xff] %v2794_v39   ;;  %v1888_v47 = vsel %vm1760_vm9, %v1696_v10, %v1824_v55 }
 0x210   : > { %v2844_v19 = vpack.c.bf16 %v1888_v47, %v1887_v5  ;;  %v1518_v49 = vpop.f32.mrf.mxu2  ;;  %v1175_v20 = vpop.f32.mrf.mxu0  ;;  %v1677_v13 = vadd.f32 %v3376_v16, %v1609_v34 }
 0x211   : > { %v1344_v26 = vpop.f32.mrf.mxu1 }
 0x212   : > { %2876 = vst [vmem:[%s3138_s17 + $0xf8] sm:$0xff] %v2844_v19   ;;  %v1345_v23 = vadd.f32 %v1344_v26, %v1175_v20  ;;  %v1805_v62 = vmul.f32 0.2, %v1677_v13  ;;  %vm1741_vm10 = vcmp.gt.f32.partialorder %v1677_v13, 0.0 }
 0x214   : > { %v1514_v54 = vadd.f32 %v1513_v17, %v1345_v23  ;;  %v1869_v42 = vsel %vm1741_vm10, %v1677_v13, %v1805_v62 }
 0x216   : > { %v1610_v30 = vmul.f32 %v3370_v1, %v1514_v54 }
 0x218   : > { %v1678_v60 = vadd.f32 %v3376_v16, %v1610_v30  ;;  %v1521_v0 = vpop.f32.mrf.mxu2  ;;  %v1178_v57 = vpop.f32.mrf.mxu0 }
 0x219   : > { %v1522_v6 = vadd.f32 %v1521_v0, %v1353_v29  ;;  %v1347_v33 = vpop.f32.mrf.mxu1 }
 0x21a   : > { %vm1742_vm11 = vcmp.gt.f32.partialorder %v1678_v60, 0.0  ;;  %v1806_v38 = vmul.f32 0.2, %v1678_v60  ;;  %v1348_v40 = vadd.f32 %v1347_v33, %v1178_v57 }
 0x21b   : > { %v1613_v53 = vmul.f32 %v3370_v1, %v1522_v6 }
 0x21c   : > { %v1870_v52 = vsel %vm1742_vm11, %v1678_v60, %v1806_v38  ;;  %v1517_v48 = vadd.f32 %v1516_v44, %v1348_v40 }
 0x21d   : > { %v2799_v2 = vpack.c.bf16 %v1870_v52, %v1869_v42  ;;  %v1681_v17 = vadd.f32 %v3376_v16, %v1613_v53 }
 0x21e   : > { %v1611_v59 = vmul.f32 %v3370_v1, %v1517_v48 }
 0x21f   : > { %2867 = vst [vmem:[%s3138_s17 + $0xb0] sm:$0xff] %v2799_v2   ;;  %v1809_v3 = vmul.f32 0.2, %v1681_v17  ;;  %vm1745_vm12 = vcmp.gt.f32.partialorder %v1681_v17, 0.0 }
 0x220   : > { %v1523_v8 = vpop.f32.mrf.mxu2  ;;  %v1180_v12 = vpop.f32.mrf.mxu0  ;;  %v1679_v18 = vadd.f32 %v3376_v16, %v1611_v59 }
 0x221   : > { %v1524_v21 = vadd.f32 %v1523_v8, %v1355_v9  ;;  %v1349_v32 = vpop.f32.mrf.mxu1  ;;  %v1873_v51 = vsel %vm1745_vm12, %v1681_v17, %v1809_v3 }
 0x222   : > { %v1350_v50 = vadd.f32 %v1349_v32, %v1180_v12  ;;  %v1807_v27 = vmul.f32 0.2, %v1679_v18  ;;  %vm1743_vm14 = vcmp.gt.f32.partialorder %v1679_v18, 0.0 }
 0x223   : > { %v1614_v24 = vmul.f32 %v3370_v1, %v1524_v21 }
 0x224   : > { %v1519_v22 = vadd.f32 %v1518_v49, %v1350_v50  ;;  %v1871_v4 = vsel %vm1743_vm14, %v1679_v18, %v1807_v27 }
 0x225   : > { %v1682_v56 = vadd.f32 %v3376_v16, %v1614_v24 }
 0x226   : > { %v1612_v28 = vmul.f32 %v3370_v1, %v1519_v22 }
 0x227   : > { %vm1746_vm13 = vcmp.gt.f32.partialorder %v1682_v56, 0.0  ;;  %v1810_v14 = vmul.f32 0.2, %v1682_v56 }
 0x228   : > { %v1680_v58 = vadd.f32 %v3376_v16, %v1612_v28  ;;  %v1526_v63 = vpop.f32.mrf.mxu2 }
 0x229   : > { %v1874_v44 = vsel %vm1746_vm13, %v1682_v56, %v1810_v14  ;;  %v1527_v45 = vadd.f32 %v1526_v63, %v1358_v25 }
 0x22a   : > { %v2809_v37 = vpack.c.bf16 %v1874_v44, %v1873_v51  ;;  %vm1744_vm15 = vcmp.gt.f32.partialorder %v1680_v58, 0.0  ;;  %v1808_v36 = vmul.f32 0.2, %v1680_v58 }
 0x22b   : > { %v1615_v43 = vmul.f32 %v3370_v1, %v1527_v45 }
 0x22c   : > { %2869 = vst [vmem:[%s3138_s17 + $0xc0] sm:$0xff] %v2809_v37   ;;  %v1872_v11 = vsel %vm1744_vm15, %v1680_v58, %v1808_v36 }
 0x22d   : > { %v2804_v41 = vpack.c.bf16 %v1872_v11, %v1871_v4  ;;  %v1683_v31 = vadd.f32 %v3376_v16, %v1615_v43 }
 0x22f   : > { %2868 = vst [vmem:[%s3138_s17 + $0xb8] sm:$0xff] %v2804_v41   ;;  %v1811_v39 = vmul.f32 0.2, %v1683_v31  ;;  %vm1747_vm1 = vcmp.gt.f32.partialorder %v1683_v31, 0.0 }
 0x230   : > { %v1528_v10 = vpop.f32.mrf.mxu2 }
 0x231   : > { %v1529_v35 = vadd.f32 %v1528_v10, %v1360_v46  ;;  %v1875_v47 = vsel %vm1747_vm1, %v1683_v31, %v1811_v39 }
 0x233   : > { %v1616_v15 = vmul.f32 %v3370_v1, %v1529_v35 }
 0x235   : > { %v1684_v55 = vadd.f32 %v3376_v16, %v1616_v15 }
 0x237   : > { %vm1748_vm2 = vcmp.gt.f32.partialorder %v1684_v55, 0.0  ;;  %v1812_v5 = vmul.f32 0.2, %v1684_v55 }
 0x239   : > { %v1876_v19 = vsel %vm1748_vm2, %v1684_v55, %v1812_v5 }
 0x23a   : > { %v2814_v34 = vpack.c.bf16 %v1876_v19, %v1875_v47 }
 0x23c   : > { %2870 = vst [vmem:[%s3138_s17 + $0xc8] sm:$0xff] %v2814_v34  }
 0x23d PF: > { %s14_s15 = sadd.s32 1, %s2914_s15  }
 0x23e   : > { %p11_p4 = scmp.ge.s32.totalorder %s14_s15, 6  }
 0x240   :  { %13 = sbr.rel (!%p11_p4) target bundleno = 1 (0x1), region = 66 }

// kernel: mnist_generator_info.11
= control target key start
LH: loop header
LB: loop body
LE: loop exit
PB: predicated region body
PF: predicated region fallthrough
CT: control target
= control target key end

     0   :  { %s2687_s15 = smov 0   ;;  %s3374_s0 = inlined_call_operand.vmem [shape: bf16[8192,288], index: 0, kind: input, shape index: {}]   ;;  %s3375_s1 = inlined_call_operand.vmem [shape: bf16[288,4], index: 1, kind: input, shape index: {}]   ;;  %s3376_s2 = inlined_call_operand.vmem [shape: f32[1,4], index: 2, kind: input, shape index: {}]   ;;  %s3377_s3 = inlined_call_operand.vmem [shape: f32[1,4], index: 3, kind: input, shape index: {}]   ;;  %s3378_s4 = inlined_call_operand.vmem [shape: f32[8192,4], index: 4, kind: output, shape index: {}]  }
   0x1 LB: > { %s1882_s16 = sadd.s32 4294967295, %s2660_s15   ;;  %p1886_p0 = scmp.ge.s32.totalorder %s2660_s15, 1  ;;  %s2660_s15 = sphi %s2687_s15, %s14_s15  }
   0x2   : > { %p164_p1 = scmp.lt.s32.totalorder %s2660_s15, 17 }
   0x4   : > { %p165_p2 = pnand %p1886_p0, %p164_p1 }
   0x5   : > { %s1887_s23 = sshll.u32 (!%p165_p2), %s1882_s16, 6 }
   0x6   : > { %168 = sbr.rel (%p165_p2) target bundleno = 575 (0x23f), region = 36  ;;  %p192_p3 = scmp.lt.s32.totalorder (!%p165_p2), %s1887_s23, 1023 }
   0xb   : > { %v2484_v0 = vld [vmem:[%s3375_s1 + $0x38] sm:$0xff]  ;;  %v2706_v2 = vld [vmem:[%s3375_s1 + $0x88] sm:$0xff]  ;;  %v2483_v3 = vld [vmem:[%s3375_s1 + $0x30] sm:$0xff]  ;;  %s3380_s23 = smov (!%p192_p3, %s1887_s23), 1023  ;;  %vm957_vm0 = vcmask 261120   ;;  %vm1761_vm1 = vcmask 31744  }
   0xc   : > { %v2701_v1 = vld [vmem:[%s3375_s1 + $0x78] sm:$0xff]  ;;  %1054 = vmatpush.bf16.msra.mxu0 %v2484_v0  ;;  %2495 = vmatpush.bf16.msra.mxu3 %v2484_v0  ;;  %v2491_v4 = vld [vmem:[%s3375_s1 + $0x70] sm:$0xff]  ;;  %v2719_v5 = vld [vmem:[%s3375_s1 + $0x80] sm:$0xff]  ;;  %s2513_s30 = smul.u32 12, %s3380_s23  ;;  %s1890_s13 = sshll.u32 %s3380_s23, 3 }
   0xd   : > { %1223 = vmatpush.bf16.msra.mxu1 %v2701_v1  ;;  %1398 = vmatpush.bf16.msra.mxu2 %v2706_v2  ;;  %v2482_v6 = vld [vmem:[%s3375_s1 + $0x28] sm:$0xff]  ;;  %v2481_v11 = vld [vmem:[%s3375_s1 + $0x20] sm:$0xff]  ;;  %v2480_v13 = vld [vmem:[%s3375_s1 + $0x18] sm:$0xff]  ;;  %s2880_s17 = scalar_lea.vmem %s3378_s4, %s1890_s13 }
   0xe   : > { %v2490_v7 = vld [vmem:[%s3375_s1 + $0x68] sm:$0xff]  ;;  %s2734_s11 = scalar_lea.vmem %s3374_s0, %s2513_s30  ;;  %v2489_v12 = vld [vmem:[%s3375_s1 + $0x60] sm:$0xff]  ;;  %v2488_v14 = vld [vmem:[%s3375_s1 + $0x58] sm:$0xff] }
   0xf   : > { %v1901_v8 = vld [vmem:[%s2734_s11 + $0x8] sm:$0xf]  ;;  %v2383_v9 = vld [vmem:[%s2734_s11 + $0x10] sm:$0xf0]  ;;  %v1913_v17 = vld [vmem:[%s2734_s11 + $0x20] sm:$0xf] }
  0x10   : > { %1055 = vmatpush.bf16.msra.mxu0 %v2483_v3  ;;  %2496 = vmatpush.bf16.msra.mxu3 %v2483_v3  ;;  %v1902_v10 = vor.u32 %v2383_v9, %v1901_v8  ;;  %v2479_v15 = vld [vmem:[%s3375_s1 + $0x10] sm:$0xff]  ;;  %v2386_v18 = vld [vmem:[%s2734_s11 + $0x28] sm:$0xf0]  ;;  %v2477_v22 = vld [vmem:[%s3375_s1] sm:$0xff] }
  0x11   : > { %1224 = vmatpush.bf16.msra.mxu1 %v2491_v4  ;;  %1399 = vmatpush.bf16.msra.mxu2 %v2719_v5  ;;  %v2487_v16 = vld [vmem:[%s3375_s1 + $0x50] sm:$0xff]  ;;  %v2478_v19 = vld [vmem:[%s3375_s1 + $0x8] sm:$0xff]  ;;  %v1914_v21 = vor.u32 %v2386_v18, %v1913_v17  ;;  %v1893_v23 = vld [vmem:[%s2734_s11] sm:$0xf] }
  0x12   : > { %v2486_v20 = vld [vmem:[%s3375_s1 + $0x48] sm:$0xff]  ;;  %v2181_v25 = vld [vmem:[%s2734_s11 + $0x240] sm:$0xf]  ;;  %v2381_v28 = vld [vmem:[%s2734_s11 + $0x4] sm:$0xf] }
  0x13   : > { %v2382_v24 = vld [vmem:[%s2734_s11 + $0x8] sm:$0xf0]  ;;  %v2485_v27 = vld [vmem:[%s3375_s1 + $0x40] sm:$0xff]  ;;  %v1895_v29 = vld [vmem:[%s2734_s11 + $0xc] sm:$0xf0] }
  0x14   : > { %1056 = vmatpush.bf16.msra.mxu0 %v2482_v6  ;;  %2497 = vmatpush.bf16.msra.mxu3 %v2482_v6  ;;  %v2454_v26 = vld [vmem:[%s2734_s11 + $0x248] sm:$0xf0]  ;;  %v1894_v30 = vor.u32 %v2382_v24, %v1893_v23  ;;  %v1898_v32 = vor.u32 %v2381_v28, %v1895_v29  ;;  %v1925_v33 = vld [vmem:[%s2734_s11 + $0x38] sm:$0xf]  ;;  %v2389_v34 = vld [vmem:[%s2734_s11 + $0x40] sm:$0xf0] }
  0x15   : > { %1225 = vmatpush.bf16.msra.mxu1 %v2490_v7  ;;  %2347 = vmatmul.msk.bf16.vlgmr.msra.gmra.mxu2 %vm957_vm0, %v1902_v10  ;;  %v2182_v31 = vor.u32 %v2454_v26, %v2181_v25  ;;  %v1926_v35 = vor.u32 %v2389_v34, %v1925_v33  ;;  %v1905_v36 = vld [vmem:[%s2734_s11 + $0x18] sm:$0xf]  ;;  %v2385_v37 = vld [vmem:[%s2734_s11 + $0x20] sm:$0xf0]  ;;  %v2384_v40 = vld [vmem:[%s2734_s11 + $0x1c] sm:$0xf] }
  0x16   : > { %v2193_v38 = vld [vmem:[%s2734_s11 + $0x258] sm:$0xf]  ;;  %v2457_v39 = vld [vmem:[%s2734_s11 + $0x260] sm:$0xf0]  ;;  %v1907_v41 = vld [vmem:[%s2734_s11 + $0x24] sm:$0xf0]  ;;  %v1906_v42 = vor.u32 %v2385_v37, %v1905_v36 }
  0x17   : > { %v2194_v43 = vor.u32 %v2457_v39, %v2193_v38  ;;  %v1910_v44 = vor.u32 %v2384_v40, %v1907_v41  ;;  %v1937_v45 = vld [vmem:[%s2734_s11 + $0x50] sm:$0xf]  ;;  %v2392_v46 = vld [vmem:[%s2734_s11 + $0x58] sm:$0xf0]  ;;  %v2387_v52 = vld [vmem:[%s2734_s11 + $0x34] sm:$0xf] }
  0x18   : > { %1057 = vmatpush.bf16.msra.mxu0 %v2481_v11  ;;  %2498 = vmatpush.bf16.msra.mxu3 %v2481_v11  ;;  %v1938_v47 = vor.u32 %v2392_v46, %v1937_v45  ;;  %v1917_v48 = vld [vmem:[%s2734_s11 + $0x30] sm:$0xf]  ;;  %v2388_v49 = vld [vmem:[%s2734_s11 + $0x38] sm:$0xf0]  ;;  %v1919_v53 = vld [vmem:[%s2734_s11 + $0x3c] sm:$0xf0] }
  0x19   : > { %1226 = vmatpush.bf16.msra.mxu1 %v2489_v12  ;;  %v2205_v50 = vld [vmem:[%s2734_s11 + $0x270] sm:$0xf]  ;;  %v2460_v51 = vld [vmem:[%s2734_s11 + $0x278] sm:$0xf0]  ;;  %v1918_v54 = vor.u32 %v2388_v49, %v1917_v48  ;;  %v1922_v56 = vor.u32 %v2387_v52, %v1919_v53  ;;  %v1949_v57 = vld [vmem:[%s2734_s11 + $0x68] sm:$0xf] }
  0x1a   : > { %v2206_v55 = vor.u32 %v2460_v51, %v2205_v50  ;;  %v2395_v58 = vld [vmem:[%s2734_s11 + $0x70] sm:$0xf0]  ;;  %v1929_v60 = vld [vmem:[%s2734_s11 + $0x48] sm:$0xf]  ;;  %v2390_v0 = vld [vmem:[%s2734_s11 + $0x4c] sm:$0xf] }
  0x1b   : > { %v1950_v59 = vor.u32 %v2395_v58, %v1949_v57  ;;  %v2391_v61 = vld [vmem:[%s2734_s11 + $0x50] sm:$0xf0]  ;;  %v2217_v62 = vld [vmem:[%s2734_s11 + $0x288] sm:$0xf]  ;;  %v2398_v6 = vld [vmem:[%s2734_s11 + $0x88] sm:$0xf0] }
  0x1c   : > { %1058 = vmatpush.bf16.msra.mxu0 %v2480_v13  ;;  %2499 = vmatpush.bf16.msra.mxu3 %v2480_v13  ;;  %v2463_v63 = vld [vmem:[%s2734_s11 + $0x290] sm:$0xf0]  ;;  %v1941_v8 = vld [vmem:[%s2734_s11 + $0x60] sm:$0xf]  ;;  %v2394_v9 = vld [vmem:[%s2734_s11 + $0x68] sm:$0xf0] }
  0x1d   : > { %1227 = vmatpush.bf16.msra.mxu1 %v2488_v14  ;;  %v2218_v3 = vor.u32 %v2463_v63, %v2217_v62  ;;  %v2229_v10 = vld [vmem:[%s2734_s11 + $0x2a0] sm:$0xf]  ;;  %v2466_v11 = vld [vmem:[%s2734_s11 + $0x2a8] sm:$0xf0]  ;;  %v1943_v13 = vld [vmem:[%s2734_s11 + $0x6c] sm:$0xf0] }
  0x1e   : > { %v1973_v17 = vld [vmem:[%s2734_s11 + $0x98] sm:$0xf]  ;;  %v2401_v18 = vld [vmem:[%s2734_s11 + $0xa0] sm:$0xf0]  ;;  %v2396_v24 = vld [vmem:[%s2734_s11 + $0x7c] sm:$0xf] }
  0x1f   : > { %v2469_v23 = vld [vmem:[%s2734_s11 + $0x2c0] sm:$0xf0]  ;;  %v1955_v25 = vld [vmem:[%s2734_s11 + $0x84] sm:$0xf0]  ;;  %v1985_v29 = vld [vmem:[%s2734_s11 + $0xb0] sm:$0xf] }
  0x20   : > { %1059 = vmatpush.bf16.msra.mxu0 %v2479_v15  ;;  %2500 = vmatpush.bf16.msra.mxu3 %v2479_v15  ;;  %v2230_v15 = vor.u32 %v2466_v11, %v2229_v10  ;;  %v1958_v28 = vor.u32 %v2396_v24, %v1955_v25  ;;  %v2400_v33 = vld [vmem:[%s2734_s11 + $0x98] sm:$0xf0]  ;;  %v2253_v34 = vld [vmem:[%s2734_s11 + $0x2d0] sm:$0xf]  ;;  %v2399_v36 = vld [vmem:[%s2734_s11 + $0x94] sm:$0xf] }
  0x21   : > { %1228 = vmatpush.bf16.msra.mxu1 %v2487_v16  ;;  %v1967_v37 = vld [vmem:[%s2734_s11 + $0x9c] sm:$0xf0]  ;;  %v1997_v41 = vld [vmem:[%s2734_s11 + $0xc8] sm:$0xf]  ;;  %v2403_v45 = vld [vmem:[%s2734_s11 + $0xb0] sm:$0xf0] }
  0x22   : > { %v1970_v40 = vor.u32 %v2399_v36, %v1967_v37  ;;  %v2265_v46 = vld [vmem:[%s2734_s11 + $0x2e8] sm:$0xf]  ;;  %v2402_v48 = vld [vmem:[%s2734_s11 + $0xac] sm:$0xf]  ;;  %v1979_v49 = vld [vmem:[%s2734_s11 + $0xb4] sm:$0xf0] }
  0x23   : > { %v1982_v53 = vor.u32 %v2402_v48, %v1979_v49  ;;  %v1989_v58 = vld [vmem:[%s2734_s11 + $0xc0] sm:$0xf]  ;;  %v2405_v62 = vld [vmem:[%s2734_s11 + $0xc4] sm:$0xf]  ;;  %v1991_v63 = vld [vmem:[%s2734_s11 + $0xcc] sm:$0xf0] }
  0x24   : > { %1060 = vmatpush.bf16.msra.mxu0 %v2478_v19  ;;  %2501 = vmatpush.bf16.msra.mxu3 %v2478_v19  ;;  %v1974_v19 = vor.u32 %v2401_v18, %v1973_v17  ;;  %v2195_v24 = vld [vmem:[%s2734_s11 + $0x264] sm:$0xf0]  ;;  %v2408_v25 = vld [vmem:[%s2734_s11 + $0xdc] sm:$0xf] }
  0x25   : > { %1229 = vmatpush.bf16.msra.mxu1 %v2486_v20  ;;  %2348 = vmatmul.msk.bf16.gmra.mxu2 %vm957_vm0, %v1914_v21  ;;  %v2397_v21 = vld [vmem:[%s2734_s11 + $0x80] sm:$0xf0] }
  0x28   : > { %1061 = vmatpush.bf16.msra.mxu0 %v2477_v22  ;;  %2502 = vmatpush.bf16.msra.mxu3 %v2477_v22  ;;  %v2241_v22 = vld [vmem:[%s2734_s11 + $0x2b8] sm:$0xf] }
  0x29   : > { %1230 = vmatpush.bf16.msra.mxu1 %v2485_v27 }
  0x2b   : > { %1062 = vmatmul.bf16.vlgmr.msra.gmra.mxu0 %v1894_v30  ;;  %1182 = vmatmul.bf16.vlgmr.msra.gmra.mxu3 %v2182_v31  ;;  %v2404_v30 = vld [vmem:[%s2734_s11 + $0xb8] sm:$0xf0] }
  0x2c   : > { %2503 = vmatpush.bf16.msrb.mxu3 %v2701_v1  ;;  %1231 = vmatmul.bf16.vlgmr.msra.gmra.mxu1 %v1898_v32  ;;  %v1931_v1 = vld [vmem:[%s2734_s11 + $0x54] sm:$0xf0]  ;;  %v1986_v31 = vor.u32 %v2404_v30, %v1985_v29  ;;  %v1965_v32 = vld [vmem:[%s2734_s11 + $0x90] sm:$0xf] }
  0x2d   : > { %v1966_v38 = vor.u32 %v2400_v33, %v1965_v32 }
  0x30   : > { %2504 = vmatpush.bf16.msrb.mxu3 %v2491_v4  ;;  %v1934_v4 = vor.u32 %v2390_v0, %v1931_v1 }
  0x34   : > { %2505 = vmatpush.bf16.msrb.mxu3 %v2490_v7 }
  0x35   : > { %2349 = vmatmul.msk.bf16.gmra.mxu2 %vm957_vm0, %v1926_v35  ;;  %v2472_v35 = vld [vmem:[%s2734_s11 + $0x2d8] sm:$0xf0] }
  0x36   : > { %v2254_v39 = vor.u32 %v2472_v35, %v2253_v34 }
  0x38   : > { %2506 = vmatpush.bf16.msrb.mxu3 %v2489_v12  ;;  %v2393_v12 = vld [vmem:[%s2734_s11 + $0x64] sm:$0xf] }
  0x3b   : > { %1067 = vmatmul.bf16.gmra.mxu0 %v1906_v42  ;;  %1187 = vmatmul.bf16.gmra.mxu3 %v2194_v43  ;;  %v2407_v42 = vld [vmem:[%s2734_s11 + $0xd0] sm:$0xf0] }
  0x3c   : > { %2507 = vmatpush.bf16.msrb.mxu3 %v2488_v14  ;;  %1236 = vmatmul.bf16.gmra.mxu1 %v1910_v44  ;;  %v1942_v14 = vor.u32 %v2394_v9, %v1941_v8  ;;  %v1998_v43 = vor.u32 %v2407_v42, %v1997_v41  ;;  %v1977_v44 = vld [vmem:[%s2734_s11 + $0xa8] sm:$0xf]  ;;  %v2861_v9 = vld [vmem:[%s3377_s3] ss:$0 sm:$0xff]  ;;  %v2033_v41 = vld [vmem:[%s2734_s11 + $0x110] sm:$0xf] }
  0x3d   : > { %v1978_v50 = vor.u32 %v2403_v45, %v1977_v44  ;;  %v2416_v42 = vld [vmem:[%s2734_s11 + $0x118] sm:$0xf0] }
  0x3e   : > { %v2034_v48 = vor.u32 %v2416_v42, %v2033_v41  ;;  %v2057_v42 = vld [vmem:[%s2734_s11 + $0x140] sm:$0xf] }
  0x40   : > { %2508 = vmatpush.bf16.msrb.mxu3 %v2487_v16  ;;  %v1946_v16 = vor.u32 %v2393_v12, %v1943_v13  ;;  %v2021_v12 = vld [vmem:[%s2734_s11 + $0xf8] sm:$0xf]  ;;  %v2413_v13 = vld [vmem:[%s2734_s11 + $0x100] sm:$0xf0] }
  0x41   : > { %v2022_v18 = vor.u32 %v2413_v13, %v2021_v12 }
  0x44   : > { %2509 = vmatpush.bf16.msrb.mxu3 %v2486_v20  ;;  %v1953_v20 = vld [vmem:[%s2734_s11 + $0x78] sm:$0xf] }
  0x45   : > { %2350 = vmatmul.msk.bf16.gmra.mxu2 %vm957_vm0, %v1938_v47  ;;  %v1954_v26 = vor.u32 %v2397_v21, %v1953_v20  ;;  %v2475_v47 = vld [vmem:[%s2734_s11 + $0x2f0] sm:$0xf0]  ;;  %v2001_v20 = vld [vmem:[%s2734_s11 + $0xd8] sm:$0xf] }
  0x46   : > { %v2266_v51 = vor.u32 %v2475_v47, %v2265_v46 }
  0x48   : > { %2510 = vmatpush.bf16.msrb.mxu3 %v2485_v27  ;;  %v2242_v27 = vor.u32 %v2469_v23, %v2241_v22  ;;  %v2409_v22 = vld [vmem:[%s2734_s11 + $0xe0] sm:$0xf0]  ;;  %v2456_v23 = vld [vmem:[%s2734_s11 + $0x25c] sm:$0xf] }
  0x49   : > { %v2002_v29 = vor.u32 %v2409_v22, %v2001_v20  ;;  %v2198_v30 = vor.u32 %v2456_v23, %v2195_v24  ;;  %v2462_v22 = vld [vmem:[%s2734_s11 + $0x28c] sm:$0xf]  ;;  %v2219_v23 = vld [vmem:[%s2734_s11 + $0x294] sm:$0xf0] }
  0x4a   : > { %v2414_v24 = vld [vmem:[%s2734_s11 + $0x10c] sm:$0xf] }
  0x4b   : > { %1072 = vmatmul.bf16.gmra.mxu0 %v1918_v54  ;;  %1192 = vmatmul.bf16.gmra.mxu3 %v2206_v55  ;;  %v2009_v54 = vld [vmem:[%s2734_s11 + $0xe0] sm:$0xf]  ;;  %v2410_v55 = vld [vmem:[%s2734_s11 + $0xe8] sm:$0xf0] }
  0x4c   : > { %2511 = vmatpush.bf16.msra.mxu3 %v2706_v2  ;;  %1241 = vmatmul.bf16.gmra.mxu1 %v1922_v56  ;;  %v1930_v2 = vor.u32 %v2391_v61, %v1929_v60  ;;  %v2010_v57 = vor.u32 %v2410_v55, %v2009_v54  ;;  %v2453_v60 = vld [vmem:[%s2734_s11 + $0x244] sm:$0xf]  ;;  %v2183_v61 = vld [vmem:[%s2734_s11 + $0x24c] sm:$0xf0]  ;;  %v2207_v54 = vld [vmem:[%s2734_s11 + $0x27c] sm:$0xf0] }
  0x4d   : > { %v2186_v1 = vor.u32 %v2453_v60, %v2183_v61  ;;  %v2411_v55 = vld [vmem:[%s2734_s11 + $0xf4] sm:$0xf] }
  0x50   : > { %2512 = vmatpush.bf16.msra.mxu3 %v2719_v5  ;;  %v1961_v5 = vld [vmem:[%s2734_s11 + $0x80] sm:$0xf] }
  0x51   : > { %v1962_v7 = vor.u32 %v2398_v6, %v1961_v5 }
  0x55   : > { %2351 = vmatmul.msk.bf16.gmra.mxu2 %vm957_vm0, %v1950_v59  ;;  %v2406_v59 = vld [vmem:[%s2734_s11 + $0xc8] sm:$0xf0] }
  0x56   : > { %v1990_v0 = vor.u32 %v2406_v59, %v1989_v58 }
  0x5b   : > { %1077 = vmatmul.bf16.gmra.mxu0 %v1930_v2  ;;  %1197 = vmatmul.bf16.gmra.mxu3 %v2218_v3 }
  0x5c   : > { %1246 = vmatmul.bf16.gmra.mxu1 %v1934_v4  ;;  %v1994_v4 = vor.u32 %v2405_v62, %v1991_v63 }
  0x65   : > { %2352 = vmatmul.msk.bf16.gmra.mxu2 %vm957_vm0, %v1962_v7  ;;  %v2856_v7 = vld [vmem:[%s3376_s2] ss:$0 sm:$0xff] }
  0x6b   : > { %1082 = vmatmul.bf16.gmra.mxu0 %v1942_v14  ;;  %1202 = vmatmul.bf16.gmra.mxu3 %v2230_v15 }
  0x6c   : > { %1251 = vmatmul.bf16.gmra.mxu1 %v1946_v16 }
  0x75   : > { %2353 = vmatmul.msk.bf16.gmra.mxu2 %vm957_vm0, %v1974_v19 }
  0x7b   : > { %1087 = vmatmul.bf16.gmra.mxu0 %v1954_v26  ;;  %1207 = vmatmul.bf16.gmra.mxu3 %v2242_v27  ;;  %v2003_v26 = vld [vmem:[%s2734_s11 + $0xe4] sm:$0xf0] }
  0x7c   : > { %1256 = vmatmul.bf16.gmra.mxu1 %v1958_v28  ;;  %v2006_v35 = vor.u32 %v2408_v25, %v2003_v26  ;;  %v2027_v25 = vld [vmem:[%s2734_s11 + $0x114] sm:$0xf0] }
  0x85   : > { %2354 = vmatmul.msk.bf16.gmra.mxu2 %vm957_vm0, %v1986_v31 }
  0x8b   : > { %1092 = vmatmul.bf16.gmra.mxu0 %v1966_v38  ;;  %1212 = vmatmul.bf16.gmra.mxu3 %v2254_v39 }
  0x8c   : > { %1261 = vmatmul.bf16.gmra.mxu1 %v1970_v40 }
  0x95   : > { %2355 = vmatmul.msk.bf16.gmra.mxu2 %vm957_vm0, %v1998_v43 }
  0x98   : > { %v1401_v52 = vpop.f32.mrf.mxu2 }
  0x9b   : > { %1097 = vmatmul.bf16.gmra.mxu0 %v1978_v50  ;;  %1217 = vmatmul.bf16.gmra.mxu3 %v2266_v51  ;;  %v2013_v50 = vld [vmem:[%s2734_s11 + $0xf0] sm:$0xf] }
  0x9c   : > { %1266 = vmatmul.bf16.gmra.mxu1 %v1982_v53  ;;  %v2459_v53 = vld [vmem:[%s2734_s11 + $0x274] sm:$0xf] }
  0x9d   : > { %v2210_v60 = vor.u32 %v2459_v53, %v2207_v54  ;;  %v2418_v53 = vld [vmem:[%s2734_s11 + $0x128] sm:$0xf0]  ;;  %v2465_v54 = vld [vmem:[%s2734_s11 + $0x2a4] sm:$0xf] }
  0xa0   : > { %v1403_v56 = vpop.f32.mrf.mxu2 }
  0xa5   : > { %2356 = vmatmul.msk.bf16.gmra.mxu2 %vm957_vm0, %v2010_v57 }
  0xa8   : > { %v1406_v2 = vpop.f32.mrf.mxu2  ;;  %v1063_v3 = vpop.f32.mrf.mxu0 }
  0xa9   : > { %v1232_v5 = vpop.f32.mrf.mxu1 }
  0xaa   : > { %v1233_v6 = vadd.f32 %v1232_v5, %v1063_v3 }
  0xab   : > { %1102 = vmatmul.bf16.gmra.mxu0 %v1990_v0  ;;  %1351 = vmatmul.bf16.vlgmr.msrb.gmra.mxu3 %v2186_v1 }
  0xac   : > { %v1402_v8 = vadd.f32 %v1401_v52, %v1233_v6  ;;  %1271 = vmatmul.bf16.gmra.mxu1 %v1994_v4  ;;  %v2412_v52 = vld [vmem:[%s2734_s11 + $0xf8] sm:$0xf0] }
  0xad   : > { %v2014_v59 = vor.u32 %v2412_v52, %v2013_v50 }
  0xae   : > { %v1565_v10 = vmul.f32 %v2856_v7, %v1402_v8  ;;  %v2864_v11 = vpop.f32.mrf.mxu3  ;;  %v2045_v8 = vld [vmem:[%s2734_s11 + $0x128] sm:$0xf] }
  0xb0   : > { %v1633_v14 = vadd.f32 %v2861_v9, %v1565_v10  ;;  %v1408_v15 = vpop.f32.mrf.mxu2  ;;  %v1065_v16 = vpop.f32.mrf.mxu0  ;;  %v2419_v10 = vld [vmem:[%s2734_s11 + $0x130] sm:$0xf0] }
  0xb1   : > { %v1234_v17 = vpop.f32.mrf.mxu1 }
  0xb2   : > { %2524 = vtanh.f32 %v1633_v14  ;;  %v1235_v19 = vadd.f32 %v1234_v17, %v1065_v16  ;;  %v2046_v17 = vor.u32 %v2419_v10, %v2045_v8 }
  0xb4   : > { %v1404_v21 = vadd.f32 %v1403_v56, %v1235_v19  ;;  %v2015_v56 = vld [vmem:[%s2734_s11 + $0xfc] sm:$0xf0]  ;;  %v2025_v19 = vld [vmem:[%s2734_s11 + $0x108] sm:$0xf] }
  0xb5   : > { %2357 = vmatmul.msk.bf16.gmra.mxu2 %vm957_vm0, %v2022_v18  ;;  %v2018_v1 = vor.u32 %v2411_v55, %v2015_v56  ;;  %v2231_v55 = vld [vmem:[%s2734_s11 + $0x2ac] sm:$0xf0]  ;;  %v2417_v56 = vld [vmem:[%s2734_s11 + $0x124] sm:$0xf] }
  0xb6   : > { %v1566_v27 = vmul.f32 %v2856_v7, %v1404_v21  ;;  %v2883_v28 = vpop.f32.mrf.mxu3  ;;  %v2415_v21 = vld [vmem:[%s2734_s11 + $0x110] sm:$0xf0] }
  0xb8   : > { %v2525_v31 = vpop.eup %2524  ;;  %v1634_v32 = vadd.f32 %v2861_v9, %v1566_v27  ;;  %v1411_v33 = vpop.f32.mrf.mxu2 }
  0xb9   : > { %v1068_v34 = vpop.f32.mrf.mxu0  ;;  %1762 = vst.msk [vmem:[%s2880_s17] sm:$0xff] %vm1761_vm1, %v2525_v31  ;;  %v1237_v36 = vpop.f32.mrf.mxu1 }
  0xba   : > { %2526 = vtanh.f32 %v1634_v32  ;;  %v1238_v37 = vadd.f32 %v1237_v36, %v1068_v34 }
  0xbb   : > { %1107 = vmatmul.bf16.gmra.mxu0 %v2002_v29  ;;  %1356 = vmatmul.bf16.gmra.mxu3 %v2198_v30  ;;  %v2026_v29 = vor.u32 %v2415_v21, %v2025_v19  ;;  %v2222_v30 = vor.u32 %v2462_v22, %v2219_v23  ;;  %v2049_v22 = vld [vmem:[%s2734_s11 + $0x138] sm:$0xf] }
  0xbc   : > { %v1407_v38 = vadd.f32 %v1406_v2, %v1238_v37  ;;  %1276 = vmatmul.bf16.gmra.mxu1 %v2006_v35  ;;  %v2030_v35 = vor.u32 %v2414_v24, %v2027_v25  ;;  %v2421_v24 = vld [vmem:[%s2734_s11 + $0x140] sm:$0xf0]  ;;  %v2468_v25 = vld [vmem:[%s2734_s11 + $0x2bc] sm:$0xf] }
  0xbe   : > { %v1567_v39 = vmul.f32 %v2856_v7, %v1407_v38  ;;  %v2889_v40 = vpop.f32.mrf.mxu3 }
  0xc0   : > { %v2527_v43 = vpop.eup %2526  ;;  %v1635_v44 = vadd.f32 %v2861_v9, %v1567_v39  ;;  %v1413_v45 = vpop.f32.mrf.mxu2 }
  0xc1   : > { %v1070_v46 = vpop.f32.mrf.mxu0  ;;  %1763 = vst.msk [vmem:[%s2880_s17 + $0x8] sm:$0xff] %vm1761_vm1, %v2527_v43  ;;  %v1239_v47 = vpop.f32.mrf.mxu1  ;;  %v2422_v43 = vld [vmem:[%s2734_s11 + $0x148] sm:$0xf0] }
  0xc2   : > { %2528 = vtanh.f32 %v1635_v44  ;;  %v1240_v49 = vadd.f32 %v1239_v47, %v1070_v46 }
  0xc4   : > { %v1409_v51 = vadd.f32 %v1408_v15, %v1240_v49  ;;  %v2058_v49 = vor.u32 %v2422_v43, %v2057_v42 }
  0xc5   : > { %2358 = vmatmul.msk.bf16.gmra.mxu2 %vm957_vm0, %v2034_v48 }
  0xc6   : > { %v1568_v57 = vmul.f32 %v2856_v7, %v1409_v51  ;;  %v2904_v58 = vpop.f32.mrf.mxu3  ;;  %v2037_v51 = vld [vmem:[%s2734_s11 + $0x120] sm:$0xf] }
  0xc8   : > { %v2529_v61 = vpop.eup %2528  ;;  %v1636_v62 = vadd.f32 %v2861_v9, %v1568_v57  ;;  %v1416_v63 = vpop.f32.mrf.mxu2  ;;  %v2039_v57 = vld [vmem:[%s2734_s11 + $0x12c] sm:$0xf0] }
  0xc9   : > { %v1073_v0 = vpop.f32.mrf.mxu0  ;;  %1764 = vst.msk [vmem:[%s2880_s17 + $0x10] sm:$0xff] %vm1761_vm1, %v2529_v61  ;;  %v1242_v2 = vpop.f32.mrf.mxu1  ;;  %v2038_v61 = vor.u32 %v2418_v53, %v2037_v51 }
  0xca   : > { %2530 = vtanh.f32 %v1636_v62  ;;  %v1243_v3 = vadd.f32 %v1242_v2, %v1073_v0  ;;  %v2234_v62 = vor.u32 %v2465_v54, %v2231_v55 }
  0xcb   : > { %1112 = vmatmul.bf16.gmra.mxu0 %v2014_v59  ;;  %1361 = vmatmul.bf16.gmra.mxu3 %v2210_v60 }
  0xcc   : > { %v1412_v4 = vadd.f32 %v1411_v33, %v1243_v3  ;;  %1281 = vmatmul.bf16.gmra.mxu1 %v2018_v1  ;;  %v2042_v3 = vor.u32 %v2417_v56, %v2039_v57  ;;  %v2061_v56 = vld [vmem:[%s2734_s11 + $0x150] sm:$0xf] }
  0xce   : > { %v1569_v5 = vmul.f32 %v2856_v7, %v1412_v4  ;;  %v2910_v6 = vpop.f32.mrf.mxu3 }
  0xd0   : > { %v2531_v12 = vpop.eup %2530  ;;  %v1637_v13 = vadd.f32 %v2861_v9, %v1569_v5  ;;  %v1418_v14 = vpop.f32.mrf.mxu2 }
  0xd1   : > { %v1075_v15 = vpop.f32.mrf.mxu0  ;;  %1765 = vst.msk [vmem:[%s2880_s17 + $0x18] sm:$0xff] %vm1761_vm1, %v2531_v12  ;;  %v1244_v16 = vpop.f32.mrf.mxu1 }
  0xd2   : > { %2532 = vtanh.f32 %v1637_v13  ;;  %v1245_v18 = vadd.f32 %v1244_v16, %v1075_v15  ;;  %v2069_v13 = vld [vmem:[%s2734_s11 + $0x158] sm:$0xf] }
  0xd4   : > { %v1414_v20 = vadd.f32 %v1413_v45, %v1245_v18 }
  0xd5   : > { %2359 = vmatmul.msk.bf16.gmra.mxu2 %vm957_vm0, %v2046_v17 }
  0xd6   : > { %v1570_v26 = vmul.f32 %v2856_v7, %v1414_v20  ;;  %v2925_v27 = vpop.f32.mrf.mxu3 }
  0xd8   : > { %v2533_v31 = vpop.eup %2532  ;;  %v1638_v32 = vadd.f32 %v2861_v9, %v1570_v26  ;;  %v1421_v33 = vpop.f32.mrf.mxu2  ;;  %v2243_v26 = vld [vmem:[%s2734_s11 + $0x2c4] sm:$0xf0] }
  0xd9   : > { %v1078_v34 = vpop.f32.mrf.mxu0  ;;  %1766 = vst.msk [vmem:[%s2880_s17 + $0x20] sm:$0xff] %vm1761_vm1, %v2533_v31  ;;  %v1247_v36 = vpop.f32.mrf.mxu1 }
  0xda   : > { %2534 = vtanh.f32 %v1638_v32  ;;  %v1248_v37 = vadd.f32 %v1247_v36, %v1078_v34  ;;  %v2246_v34 = vor.u32 %v2468_v25, %v2243_v26 }
  0xdb   : > { %1117 = vmatmul.bf16.gmra.mxu0 %v2026_v29  ;;  %1366 = vmatmul.bf16.gmra.mxu3 %v2222_v30  ;;  %v2420_v29 = vld [vmem:[%s2734_s11 + $0x13c] sm:$0xf]  ;;  %v2051_v30 = vld [vmem:[%s2734_s11 + $0x144] sm:$0xf0] }
  0xdc   : > { %v1417_v38 = vadd.f32 %v1416_v63, %v1248_v37  ;;  %1286 = vmatmul.bf16.gmra.mxu1 %v2030_v35 }
  0xde   : > { %v1571_v39 = vmul.f32 %v2856_v7, %v1417_v38  ;;  %v2931_v41 = vpop.f32.mrf.mxu3 }
  0xe0   : > { %v2535_v44 = vpop.eup %2534  ;;  %v1639_v45 = vadd.f32 %v2861_v9, %v1571_v39  ;;  %v1423_v46 = vpop.f32.mrf.mxu2  ;;  %v2054_v39 = vor.u32 %v2420_v29, %v2051_v30 }
  0xe1   : > { %v1080_v47 = vpop.f32.mrf.mxu0  ;;  %1767 = vst.msk [vmem:[%s2880_s17 + $0x28] sm:$0xff] %vm1761_vm1, %v2535_v44  ;;  %v1249_v48 = vpop.f32.mrf.mxu1 }
  0xe2   : > { %2536 = vtanh.f32 %v1639_v45  ;;  %v1250_v50 = vadd.f32 %v1249_v48, %v1080_v47  ;;  %v2081_v47 = vld [vmem:[%s2734_s11 + $0x170] sm:$0xf]  ;;  %v2428_v48 = vld [vmem:[%s2734_s11 + $0x178] sm:$0xf0] }
  0xe3   : > { %v2082_v54 = vor.u32 %v2428_v48, %v2081_v47 }
  0xe4   : > { %v1419_v52 = vadd.f32 %v1418_v14, %v1250_v50  ;;  %v2425_v14 = vld [vmem:[%s2734_s11 + $0x160] sm:$0xf0] }
  0xe5   : > { %2360 = vmatmul.msk.bf16.gmra.mxu2 %vm957_vm0, %v2058_v49  ;;  %v2070_v20 = vor.u32 %v2425_v14, %v2069_v13 }
  0xe6   : > { %v1572_v59 = vmul.f32 %v2856_v7, %v1419_v52  ;;  %v2946_v60 = vpop.f32.mrf.mxu3 }
  0xe8   : > { %v2537_v63 = vpop.eup %2536  ;;  %v1640_v0 = vadd.f32 %v2861_v9, %v1572_v59  ;;  %v1426_v1 = vpop.f32.mrf.mxu2  ;;  %v2424_v59 = vld [vmem:[%s2734_s11 + $0x158] sm:$0xf0] }
  0xe9   : > { %v1083_v2 = vpop.f32.mrf.mxu0  ;;  %1768 = vst.msk [vmem:[%s2880_s17 + $0x30] sm:$0xff] %vm1761_vm1, %v2537_v63  ;;  %v1252_v4 = vpop.f32.mrf.mxu1  ;;  %v2423_v63 = vld [vmem:[%s2734_s11 + $0x154] sm:$0xf] }
  0xea   : > { %2538 = vtanh.f32 %v1640_v0  ;;  %v1253_v5 = vadd.f32 %v1252_v4, %v1083_v2  ;;  %v2063_v0 = vld [vmem:[%s2734_s11 + $0x15c] sm:$0xf0] }
  0xeb   : > { %1122 = vmatmul.bf16.gmra.mxu0 %v2038_v61  ;;  %1371 = vmatmul.bf16.gmra.mxu3 %v2234_v62  ;;  %v2471_v61 = vld [vmem:[%s2734_s11 + $0x2d4] sm:$0xf]  ;;  %v2255_v62 = vld [vmem:[%s2734_s11 + $0x2dc] sm:$0xf0]  ;;  %v2066_v14 = vor.u32 %v2423_v63, %v2063_v0 }
  0xec   : > { %v1422_v8 = vadd.f32 %v1421_v33, %v1253_v5  ;;  %1291 = vmatmul.bf16.gmra.mxu1 %v2042_v3  ;;  %v2050_v33 = vor.u32 %v2421_v24, %v2049_v22  ;;  %v2062_v3 = vor.u32 %v2424_v59, %v2061_v56  ;;  %v2258_v4 = vor.u32 %v2471_v61, %v2255_v62  ;;  %v2105_v56 = vld [vmem:[%s2734_s11 + $0x1a0] sm:$0xf] }
  0xee   : > { %v1573_v10 = vmul.f32 %v2856_v7, %v1422_v8  ;;  %v2952_v12 = vpop.f32.mrf.mxu3 }
  0xf0   : > { %v2539_v15 = vpop.eup %2538  ;;  %v1641_v16 = vadd.f32 %v2861_v9, %v1573_v10  ;;  %v1428_v17 = vpop.f32.mrf.mxu2 }
  0xf1   : > { %v1085_v18 = vpop.f32.mrf.mxu0  ;;  %1769 = vst.msk [vmem:[%s2880_s17 + $0x38] sm:$0xff] %vm1761_vm1, %v2539_v15  ;;  %v1254_v19 = vpop.f32.mrf.mxu1 }
  0xf2   : > { %2540 = vtanh.f32 %v1641_v16  ;;  %v1255_v21 = vadd.f32 %v1254_v19, %v1085_v18 }
  0xf4   : > { %v1424_v23 = vadd.f32 %v1423_v46, %v1255_v21  ;;  %v2431_v21 = vld [vmem:[%s2734_s11 + $0x190] sm:$0xf0] }
  0xf5   : > { %2361 = vmatmul.msk.bf16.gmra.mxu2 %vm957_vm0, %v2070_v20  ;;  %v2093_v20 = vld [vmem:[%s2734_s11 + $0x188] sm:$0xf] }
  0xf6   : > { %v1574_v31 = vmul.f32 %v2856_v7, %v1424_v23  ;;  %v2967_v32 = vpop.f32.mrf.mxu3  ;;  %v2094_v29 = vor.u32 %v2431_v21, %v2093_v20 }
  0xf8   : > { %v2541_v35 = vpop.eup %2540  ;;  %v1642_v36 = vadd.f32 %v2861_v9, %v1574_v31  ;;  %v1431_v37 = vpop.f32.mrf.mxu2  ;;  %v2073_v31 = vld [vmem:[%s2734_s11 + $0x168] sm:$0xf] }
  0xf9   : > { %v1088_v38 = vpop.f32.mrf.mxu0  ;;  %1770 = vst.msk [vmem:[%s2880_s17 + $0x40] sm:$0xff] %vm1761_vm1, %v2541_v35  ;;  %v1257_v42 = vpop.f32.mrf.mxu1  ;;  %v2474_v35 = vld [vmem:[%s2734_s11 + $0x2ec] sm:$0xf] }
  0xfa   : > { %2542 = vtanh.f32 %v1642_v36  ;;  %v1258_v43 = vadd.f32 %v1257_v42, %v1088_v38  ;;  %v2267_v36 = vld [vmem:[%s2734_s11 + $0x2f4] sm:$0xf0] }
  0xfb   : > { %1127 = vmatmul.bf16.gmra.mxu0 %v2050_v33  ;;  %1376 = vmatmul.bf16.gmra.mxu3 %v2246_v34  ;;  %v2427_v34 = vld [vmem:[%s2734_s11 + $0x170] sm:$0xf0]  ;;  %v2075_v38 = vld [vmem:[%s2734_s11 + $0x174] sm:$0xf0] }
  0xfc   : > { %v1427_v44 = vadd.f32 %v1426_v1, %v1258_v43  ;;  %1296 = vmatmul.bf16.gmra.mxu1 %v2054_v39  ;;  %v2074_v43 = vor.u32 %v2427_v34, %v2073_v31  ;;  %v2117_v34 = vld [vmem:[%s2734_s11 + $0x1b8] sm:$0xf] }
  0xfe   : > { %v1575_v45 = vmul.f32 %v2856_v7, %v1427_v44  ;;  %v2973_v46 = vpop.f32.mrf.mxu3  ;;  %v2270_v44 = vor.u32 %v2474_v35, %v2267_v36  ;;  %v2437_v35 = vld [vmem:[%s2734_s11 + $0x1c0] sm:$0xf0] }
 0x100   : > { %v2543_v49 = vpop.eup %2542  ;;  %v1643_v50 = vadd.f32 %v2861_v9, %v1575_v45  ;;  %v1433_v51 = vpop.f32.mrf.mxu2 }
 0x101   : > { %v1090_v52 = vpop.f32.mrf.mxu0  ;;  %1771 = vst.msk [vmem:[%s2880_s17 + $0x48] sm:$0xff] %vm1761_vm1, %v2543_v49  ;;  %v1259_v53 = vpop.f32.mrf.mxu1 }
 0x102   : > { %2544 = vtanh.f32 %v1643_v50  ;;  %v1260_v55 = vadd.f32 %v1259_v53, %v1090_v52 }
 0x104   : > { %v1429_v57 = vadd.f32 %v1428_v17, %v1260_v55 }
 0x105   : > { %2362 = vmatmul.msk.bf16.gmra.mxu2 %vm957_vm0, %v2082_v54 }
 0x106   : > { %v1576_v1 = vmul.f32 %v2856_v7, %v1429_v57  ;;  %v2988_v2 = vpop.f32.mrf.mxu3  ;;  %v2434_v57 = vld [vmem:[%s2734_s11 + $0x1a8] sm:$0xf0] }
 0x108   : > { %v2545_v5 = vpop.eup %2544  ;;  %v1644_v8 = vadd.f32 %v2861_v9, %v1576_v1  ;;  %v1436_v10 = vpop.f32.mrf.mxu2  ;;  %v2106_v1 = vor.u32 %v2434_v57, %v2105_v56 }
 0x109   : > { %v1093_v13 = vpop.f32.mrf.mxu0  ;;  %1772 = vst.msk [vmem:[%s2880_s17 + $0x50] sm:$0xff] %vm1761_vm1, %v2545_v5  ;;  %v1262_v15 = vpop.f32.mrf.mxu1 }
 0x10a   : > { %2546 = vtanh.f32 %v1644_v8  ;;  %v1263_v16 = vadd.f32 %v1262_v15, %v1093_v13  ;;  %v2430_v8 = vld [vmem:[%s2734_s11 + $0x188] sm:$0xf0]  ;;  %v2461_v13 = vld [vmem:[%s2734_s11 + $0x280] sm:$0xf0]  ;;  %v2087_v15 = vld [vmem:[%s2734_s11 + $0x18c] sm:$0xf0] }
 0x10b   : > { %1132 = vmatmul.bf16.gmra.mxu0 %v2062_v3  ;;  %1381 = vmatmul.bf16.gmra.mxu3 %v2258_v4  ;;  %v2085_v4 = vld [vmem:[%s2734_s11 + $0x180] sm:$0xf] }
 0x10c   : > { %v1432_v17 = vadd.f32 %v1431_v37, %v1263_v16  ;;  %1301 = vmatmul.bf16.gmra.mxu1 %v2066_v14  ;;  %v2426_v37 = vld [vmem:[%s2734_s11 + $0x16c] sm:$0xf]  ;;  %v2429_v14 = vld [vmem:[%s2734_s11 + $0x184] sm:$0xf] }
 0x10d   : > { %v2078_v50 = vor.u32 %v2426_v37, %v2075_v38 }
 0x10e   : > { %v1577_v18 = vmul.f32 %v2856_v7, %v1432_v17  ;;  %v2994_v19 = vpop.f32.mrf.mxu3 }
 0x110   : > { %v2547_v22 = vpop.eup %2546  ;;  %v1645_v23 = vadd.f32 %v2861_v9, %v1577_v18  ;;  %v1438_v24 = vpop.f32.mrf.mxu2  ;;  %v2086_v18 = vor.u32 %v2430_v8, %v2085_v4 }
 0x111   : > { %v1095_v25 = vpop.f32.mrf.mxu0  ;;  %1773 = vst.msk [vmem:[%s2880_s17 + $0x58] sm:$0xff] %vm1761_vm1, %v2547_v22  ;;  %v1264_v26 = vpop.f32.mrf.mxu1 }
 0x112   : > { %2548 = vtanh.f32 %v1645_v23  ;;  %v1265_v30 = vadd.f32 %v1264_v26, %v1095_v25  ;;  %v2090_v25 = vor.u32 %v2429_v14, %v2087_v15  ;;  %v2440_v14 = vld [vmem:[%s2734_s11 + $0x1d8] sm:$0xf0] }
 0x114   : > { %v1434_v33 = vadd.f32 %v1433_v51, %v1265_v30 }
 0x115   : > { %2363 = vmatmul.msk.bf16.gmra.mxu2 %vm957_vm0, %v2094_v29 }
 0x116   : > { %v1578_v39 = vmul.f32 %v2856_v7, %v1434_v33  ;;  %v3009_v42 = vpop.f32.mrf.mxu3 }
 0x118   : > { %v2549_v45 = vpop.eup %2548  ;;  %v1646_v47 = vadd.f32 %v2861_v9, %v1578_v39  ;;  %v1441_v48 = vpop.f32.mrf.mxu2 }
 0x119   : > { %v1098_v49 = vpop.f32.mrf.mxu0  ;;  %1774 = vst.msk [vmem:[%s2880_s17 + $0x60] sm:$0xff] %vm1761_vm1, %v2549_v45  ;;  %v1267_v51 = vpop.f32.mrf.mxu1 }
 0x11a   : > { %2550 = vtanh.f32 %v1646_v47  ;;  %v1268_v52 = vadd.f32 %v1267_v51, %v1098_v49  ;;  %v2097_v47 = vld [vmem:[%s2734_s11 + $0x198] sm:$0xf]  ;;  %v2433_v49 = vld [vmem:[%s2734_s11 + $0x1a0] sm:$0xf0]  ;;  %v2464_v51 = vld [vmem:[%s2734_s11 + $0x298] sm:$0xf0] }
 0x11b   : > { %1137 = vmatmul.bf16.gmra.mxu0 %v2074_v43  ;;  %1386 = vmatmul.bf16.gmra.mxu3 %v2270_v44  ;;  %v2118_v44 = vor.u32 %v2437_v35, %v2117_v34  ;;  %v2098_v57 = vor.u32 %v2433_v49, %v2097_v47  ;;  %v2111_v34 = vld [vmem:[%s2734_s11 + $0x1bc] sm:$0xf0] }
 0x11c   : > { %v1437_v53 = vadd.f32 %v1436_v10, %v1268_v52  ;;  %1306 = vmatmul.bf16.gmra.mxu1 %v2078_v50  ;;  %v2213_v10 = vld [vmem:[%s2734_s11 + $0x278] sm:$0xf]  ;;  %v2225_v50 = vld [vmem:[%s2734_s11 + $0x290] sm:$0xf]  ;;  %v2432_v52 = vld [vmem:[%s2734_s11 + $0x19c] sm:$0xf] }
 0x11d   : > { %v2214_v20 = vor.u32 %v2461_v13, %v2213_v10  ;;  %v2129_v13 = vld [vmem:[%s2734_s11 + $0x1d0] sm:$0xf] }
 0x11e   : > { %v1579_v54 = vmul.f32 %v2856_v7, %v1437_v53  ;;  %v3015_v55 = vpop.f32.mrf.mxu3  ;;  %v2099_v53 = vld [vmem:[%s2734_s11 + $0x1a4] sm:$0xf0] }
 0x120   : > { %v2551_v59 = vpop.eup %2550  ;;  %v1647_v61 = vadd.f32 %v2861_v9, %v1579_v54  ;;  %v1443_v62 = vpop.f32.mrf.mxu2 }
 0x121   : > { %v1100_v63 = vpop.f32.mrf.mxu0  ;;  %1775 = vst.msk [vmem:[%s2880_s17 + $0x68] sm:$0xff] %vm1761_vm1, %v2551_v59  ;;  %v1269_v0 = vpop.f32.mrf.mxu1  ;;  %v2226_v59 = vor.u32 %v2464_v51, %v2225_v50 }
 0x122   : > { %2552 = vtanh.f32 %v1647_v61  ;;  %v1270_v3 = vadd.f32 %v1269_v0, %v1100_v63 }
 0x124   : > { %v1439_v5 = vadd.f32 %v1438_v24, %v1270_v3 }
 0x125   : > { %2364 = vmatmul.msk.bf16.gmra.mxu2 %vm957_vm0, %v2106_v1  ;;  %v2102_v1 = vor.u32 %v2432_v52, %v2099_v53  ;;  %v2141_v53 = vld [vmem:[%s2734_s11 + $0x1e8] sm:$0xf] }
 0x126   : > { %v1580_v16 = vmul.f32 %v2856_v7, %v1439_v5  ;;  %v3030_v17 = vpop.f32.mrf.mxu3 }
 0x128   : > { %v2553_v21 = vpop.eup %2552  ;;  %v1648_v22 = vadd.f32 %v2861_v9, %v1580_v16  ;;  %v1446_v23 = vpop.f32.mrf.mxu2 }
 0x129   : > { %v1103_v24 = vpop.f32.mrf.mxu0  ;;  %1776 = vst.msk [vmem:[%s2880_s17 + $0x70] sm:$0xff] %vm1761_vm1, %v2553_v21  ;;  %v1272_v26 = vpop.f32.mrf.mxu1 }
 0x12a   : > { %2554 = vtanh.f32 %v1648_v22  ;;  %v1273_v29 = vadd.f32 %v1272_v26, %v1103_v24  ;;  %v2130_v22 = vor.u32 %v2440_v14, %v2129_v13  ;;  %v2109_v24 = vld [vmem:[%s2734_s11 + $0x1b0] sm:$0xf]  ;;  %v2436_v26 = vld [vmem:[%s2734_s11 + $0x1b8] sm:$0xf0]  ;;  %v2470_v13 = vld [vmem:[%s2734_s11 + $0x2c8] sm:$0xf0] }
 0x12b   : > { %1142 = vmatmul.bf16.gmra.mxu0 %v2086_v18  ;;  %2373 = vmatmul.msk.bf16.vlgmr.msra.gmra.mxu3 %vm957_vm0, %v2214_v20  ;;  %v2438_v14 = vld [vmem:[%s2734_s11 + $0x1cc] sm:$0xf] }
 0x12c   : > { %v1442_v30 = vadd.f32 %v1441_v48, %v1273_v29  ;;  %1311 = vmatmul.bf16.gmra.mxu1 %v2090_v25  ;;  %v2237_v29 = vld [vmem:[%s2734_s11 + $0x2a8] sm:$0xf] }
 0x12e   : > { %v1581_v31 = vmul.f32 %v2856_v7, %v1442_v30  ;;  %v3037_v33 = vpop.f32.mrf.mxu3  ;;  %v2467_v30 = vld [vmem:[%s2734_s11 + $0x2b0] sm:$0xf0] }
 0x130   : > { %v2555_v36 = vpop.eup %2554  ;;  %v1649_v37 = vadd.f32 %v2861_v9, %v1581_v31  ;;  %v1448_v38 = vpop.f32.mrf.mxu2  ;;  %v2435_v31 = vld [vmem:[%s2734_s11 + $0x1b4] sm:$0xf] }
 0x131   : > { %v1105_v39 = vpop.f32.mrf.mxu0  ;;  %1777 = vst.msk [vmem:[%s2880_s17 + $0x78] sm:$0xff] %vm1761_vm1, %v2555_v36  ;;  %v1274_v43 = vpop.f32.mrf.mxu1  ;;  %v2114_v47 = vor.u32 %v2435_v31, %v2111_v34 }
 0x132   : > { %2556 = vtanh.f32 %v1649_v37  ;;  %v1275_v45 = vadd.f32 %v1274_v43, %v1105_v39  ;;  %v2110_v37 = vor.u32 %v2436_v26, %v2109_v24  ;;  %v2238_v39 = vor.u32 %v2467_v30, %v2237_v29 }
 0x134   : > { %v1444_v48 = vadd.f32 %v1443_v62, %v1275_v45 }
 0x135   : > { %2365 = vmatmul.msk.bf16.gmra.mxu2 %vm957_vm0, %v2118_v44 }
 0x136   : > { %v1582_v54 = vmul.f32 %v2856_v7, %v1444_v48  ;;  %v3052_v56 = vpop.f32.mrf.mxu3 }
 0x138   : > { %v2557_v61 = vpop.eup %2556  ;;  %v1650_v63 = vadd.f32 %v2861_v9, %v1582_v54  ;;  %v1451_v62 = vpop.f32.mrf.mxu2  ;;  %v2443_v54 = vld [vmem:[%s2734_s11 + $0x1f0] sm:$0xf0] }
 0x139   : > { %v1108_v0 = vpop.f32.mrf.mxu0  ;;  %1778 = vst.msk [vmem:[%s2880_s17 + $0x80] sm:$0xff] %vm1761_vm1, %v2557_v61  ;;  %v1277_v3 = vpop.f32.mrf.mxu1 }
 0x13a   : > { %2558 = vtanh.f32 %v1650_v63  ;;  %v1278_v4 = vadd.f32 %v1277_v3, %v1108_v0  ;;  %v2142_v0 = vor.u32 %v2443_v54, %v2141_v53  ;;  %v2121_v3 = vld [vmem:[%s2734_s11 + $0x1c8] sm:$0xf]  ;;  %v2442_v53 = vld [vmem:[%s2734_s11 + $0x1e8] sm:$0xf0]  ;;  %v2261_v54 = vld [vmem:[%s2734_s11 + $0x2d8] sm:$0xf] }
 0x13b   : > { %1147 = vmatmul.bf16.gmra.mxu0 %v2098_v57  ;;  %2374 = vmatmul.msk.bf16.gmra.mxu3 %vm957_vm0, %v2226_v59 }
 0x13c   : > { %v1447_v5 = vadd.f32 %v1446_v23, %v1278_v4  ;;  %1316 = vmatmul.bf16.gmra.mxu1 %v2102_v1 }
 0x13e   : > { %v1583_v8 = vmul.f32 %v2856_v7, %v1447_v5  ;;  %v3059_v10 = vpop.f32.mrf.mxu3  ;;  %v2439_v5 = vld [vmem:[%s2734_s11 + $0x1d0] sm:$0xf0] }
 0x140   : > { %v2559_v15 = vpop.eup %2558  ;;  %v1651_v16 = vadd.f32 %v2861_v9, %v1583_v8  ;;  %v1453_v18 = vpop.f32.mrf.mxu2  ;;  %v2249_v8 = vld [vmem:[%s2734_s11 + $0x2c0] sm:$0xf] }
 0x141   : > { %v1110_v20 = vpop.f32.mrf.mxu0  ;;  %1779 = vst.msk [vmem:[%s2880_s17 + $0x88] sm:$0xff] %vm1761_vm1, %v2559_v15  ;;  %v1279_v21 = vpop.f32.mrf.mxu1  ;;  %v2123_v15 = vld [vmem:[%s2734_s11 + $0x1d4] sm:$0xf0] }
 0x142   : > { %2560 = vtanh.f32 %v1651_v16  ;;  %v1280_v23 = vadd.f32 %v1279_v21, %v1110_v20  ;;  %v2122_v21 = vor.u32 %v2439_v5, %v2121_v3  ;;  %v2126_v26 = vor.u32 %v2438_v14, %v2123_v15 }
 0x144   : > { %v1449_v25 = vadd.f32 %v1448_v38, %v1280_v23 }
 0x145   : > { %2366 = vmatmul.msk.bf16.gmra.mxu2 %vm957_vm0, %v2130_v22  ;;  %v2250_v22 = vor.u32 %v2470_v13, %v2249_v8 }
 0x146   : > { %v1584_v35 = vmul.f32 %v2856_v7, %v1449_v25  ;;  %v3074_v36 = vpop.f32.mrf.mxu3 }
 0x148   : > { %v2561_v43 = vpop.eup %2560  ;;  %v1652_v44 = vadd.f32 %v2861_v9, %v1584_v35  ;;  %v1456_v38 = vpop.f32.mrf.mxu2 }
 0x149   : > { %v1113_v45 = vpop.f32.mrf.mxu0  ;;  %1780 = vst.msk [vmem:[%s2880_s17 + $0x90] sm:$0xff] %vm1761_vm1, %v2561_v43  ;;  %v1282_v48 = vpop.f32.mrf.mxu1 }
 0x14a   : > { %2562 = vtanh.f32 %v1652_v44  ;;  %v1283_v49 = vadd.f32 %v1282_v48, %v1113_v45 }
 0x14b   : > { %1152 = vmatmul.bf16.gmra.mxu0 %v2110_v37  ;;  %2375 = vmatmul.msk.bf16.gmra.mxu3 %vm957_vm0, %v2238_v39  ;;  %v2153_v37 = vld [vmem:[%s2734_s11 + $0x200] sm:$0xf]  ;;  %v2446_v39 = vld [vmem:[%s2734_s11 + $0x208] sm:$0xf0] }
 0x14c   : > { %v1452_v50 = vadd.f32 %v1451_v62, %v1283_v49  ;;  %1321 = vmatmul.bf16.gmra.mxu1 %v2114_v47  ;;  %v2154_v48 = vor.u32 %v2446_v39, %v2153_v37  ;;  %v2145_v37 = vld [vmem:[%s2734_s11 + $0x1f8] sm:$0xf] }
 0x14e   : > { %v1585_v51 = vmul.f32 %v2856_v7, %v1452_v50  ;;  %v3081_v52 = vpop.f32.mrf.mxu3  ;;  %v2133_v50 = vld [vmem:[%s2734_s11 + $0x1e0] sm:$0xf] }
 0x150   : > { %v2563_v57 = vpop.eup %2562  ;;  %v1653_v59 = vadd.f32 %v2861_v9, %v1585_v51  ;;  %v1458_v61 = vpop.f32.mrf.mxu2 }
 0x151   : > { %v1115_v63 = vpop.f32.mrf.mxu0  ;;  %1781 = vst.msk [vmem:[%s2880_s17 + $0x98] sm:$0xff] %vm1761_vm1, %v2563_v57  ;;  %v1284_v62 = vpop.f32.mrf.mxu1  ;;  %v2473_v57 = vld [vmem:[%s2734_s11 + $0x2e0] sm:$0xf0] }
 0x152   : > { %2564 = vtanh.f32 %v1653_v59  ;;  %v1285_v1 = vadd.f32 %v1284_v62, %v1115_v63  ;;  %v2441_v59 = vld [vmem:[%s2734_s11 + $0x1e4] sm:$0xf]  ;;  %v2135_v63 = vld [vmem:[%s2734_s11 + $0x1ec] sm:$0xf0]  ;;  %v2262_v3 = vor.u32 %v2473_v57, %v2261_v54 }
 0x153   : > { %v2138_v13 = vor.u32 %v2441_v59, %v2135_v63 }
 0x154   : > { %v1454_v4 = vadd.f32 %v1453_v18, %v1285_v1  ;;  %v2134_v1 = vor.u32 %v2442_v53, %v2133_v50 }
 0x155   : > { %2367 = vmatmul.msk.bf16.gmra.mxu2 %vm957_vm0, %v2142_v0 }
 0x156   : > { %v1586_v16 = vmul.f32 %v2856_v7, %v1454_v4  ;;  %v3096_v20 = vpop.f32.mrf.mxu3 }
 0x158   : > { %v2565_v23 = vpop.eup %2564  ;;  %v1654_v24 = vadd.f32 %v2861_v9, %v1586_v16  ;;  %v1461_v18 = vpop.f32.mrf.mxu2 }
 0x159   : > { %v1118_v25 = vpop.f32.mrf.mxu0  ;;  %1782 = vst.msk [vmem:[%s2880_s17 + $0xa0] sm:$0xff] %vm1761_vm1, %v2565_v23  ;;  %v1287_v29 = vpop.f32.mrf.mxu1  ;;  %v2165_v23 = vld [vmem:[%s2734_s11 + $0x218] sm:$0xf] }
 0x15a   : > { %2566 = vtanh.f32 %v1654_v24  ;;  %v1288_v30 = vadd.f32 %v1287_v29, %v1118_v25  ;;  %v2449_v24 = vld [vmem:[%s2734_s11 + $0x220] sm:$0xf0] }
 0x15b   : > { %1157 = vmatmul.bf16.gmra.mxu0 %v2122_v21  ;;  %2376 = vmatmul.msk.bf16.gmra.mxu3 %vm957_vm0, %v2250_v22 }
 0x15c   : > { %v1457_v31 = vadd.f32 %v1456_v38, %v1288_v30  ;;  %1326 = vmatmul.bf16.gmra.mxu1 %v2126_v26 }
 0x15e   : > { %v1587_v34 = vmul.f32 %v2856_v7, %v1457_v31  ;;  %v3103_v35 = vpop.f32.mrf.mxu3  ;;  %v2166_v31 = vor.u32 %v2449_v24, %v2165_v23 }
 0x160   : > { %v2567_v43 = vpop.eup %2566  ;;  %v1655_v44 = vadd.f32 %v2861_v9, %v1587_v34  ;;  %v1463_v45 = vpop.f32.mrf.mxu2 }
 0x161   : > { %v1120_v47 = vpop.f32.mrf.mxu0  ;;  %1783 = vst.msk [vmem:[%s2880_s17 + $0xa8] sm:$0xff] %vm1761_vm1, %v2567_v43  ;;  %v1289_v38 = vpop.f32.mrf.mxu1  ;;  %v2445_v43 = vld [vmem:[%s2734_s11 + $0x200] sm:$0xf0] }
 0x162   : > { %2568 = vtanh.f32 %v1655_v44  ;;  %v1290_v49 = vadd.f32 %v1289_v38, %v1120_v47  ;;  %v2273_v44 = vld [vmem:[%s2734_s11 + $0x2f0] sm:$0xf]  ;;  %v2476_v47 = vld [vmem:[%s2734_s11 + $0x2f8] sm:$0xf0] }
 0x163   : > { %v2444_v38 = vld [vmem:[%s2734_s11 + $0x1fc] sm:$0xf]  ;;  %v2274_v53 = vor.u32 %v2476_v47, %v2273_v44 }
 0x164   : > { %v1459_v51 = vadd.f32 %v1458_v61, %v1290_v49 }
 0x165   : > { %2368 = vmatmul.msk.bf16.gmra.mxu2 %vm957_vm0, %v2154_v48  ;;  %v2147_v48 = vld [vmem:[%s2734_s11 + $0x204] sm:$0xf0] }
 0x166   : > { %v1588_v62 = vmul.f32 %v2856_v7, %v1459_v51  ;;  %v3118_v0 = vpop.f32.mrf.mxu3  ;;  %v2146_v51 = vor.u32 %v2445_v43, %v2145_v37  ;;  %v2150_v63 = vor.u32 %v2444_v38, %v2147_v48 }
 0x168   : > { %v2569_v4 = vpop.eup %2568  ;;  %v1656_v5 = vadd.f32 %v2861_v9, %v1588_v62  ;;  %v1466_v61 = vpop.f32.mrf.mxu2 }
 0x169   : > { %v1123_v8 = vpop.f32.mrf.mxu0  ;;  %1784 = vst.msk [vmem:[%s2880_s17 + $0xb0] sm:$0xff] %vm1761_vm1, %v2569_v4  ;;  %v1292_v14 = vpop.f32.mrf.mxu1 }
 0x16a   : > { %2570 = vtanh.f32 %v1656_v5  ;;  %v1293_v15 = vadd.f32 %v1292_v14, %v1123_v8  ;;  %v2177_v8 = vld [vmem:[%s2734_s11 + $0x230] sm:$0xf] }
 0x16b   : > { %1162 = vmatmul.bf16.gmra.mxu0 %v2134_v1  ;;  %2377 = vmatmul.msk.bf16.gmra.mxu3 %vm957_vm0, %v2262_v3 }
 0x16c   : > { %v1462_v16 = vadd.f32 %v1461_v18, %v1293_v15  ;;  %1331 = vmatmul.bf16.gmra.mxu1 %v2138_v13  ;;  %v2452_v13 = vld [vmem:[%s2734_s11 + $0x238] sm:$0xf0] }
 0x16e   : > { %v1589_v21 = vmul.f32 %v2856_v7, %v1462_v16  ;;  %v3125_v22 = vpop.f32.mrf.mxu3 }
 0x170   : > { %v2571_v25 = vpop.eup %2570  ;;  %v1657_v26 = vadd.f32 %v2861_v9, %v1589_v21  ;;  %v1468_v29 = vpop.f32.mrf.mxu2 }
 0x171   : > { %v1125_v30 = vpop.f32.mrf.mxu0  ;;  %1785 = vst.msk [vmem:[%s2880_s17 + $0xb8] sm:$0xff] %vm1761_vm1, %v2571_v25  ;;  %v1294_v18 = vpop.f32.mrf.mxu1 }
 0x172   : > { %2572 = vtanh.f32 %v1657_v26  ;;  %v1295_v34 = vadd.f32 %v1294_v18, %v1125_v30  ;;  %v2448_v26 = vld [vmem:[%s2734_s11 + $0x218] sm:$0xf0]  ;;  %v2447_v30 = vld [vmem:[%s2734_s11 + $0x214] sm:$0xf]  ;;  %v2159_v18 = vld [vmem:[%s2734_s11 + $0x21c] sm:$0xf0] }
 0x173   : > { %v2162_v38 = vor.u32 %v2447_v30, %v2159_v18 }
 0x174   : > { %v1464_v39 = vadd.f32 %v1463_v45, %v1295_v34 }
 0x175   : > { %2369 = vmatmul.msk.bf16.gmra.mxu2 %vm957_vm0, %v2166_v31 }
 0x176   : > { %v1590_v49 = vmul.f32 %v2856_v7, %v1464_v39  ;;  %v3140_v50 = vpop.f32.mrf.mxu3 }
 0x178   : > { %v2573_v54 = vpop.eup %2572  ;;  %v1658_v57 = vadd.f32 %v2861_v9, %v1590_v49  ;;  %v1471_v45 = vpop.f32.mrf.mxu2 }
 0x179   : > { %v1128_v59 = vpop.f32.mrf.mxu0  ;;  %1786 = vst.msk [vmem:[%s2880_s17 + $0xc0] sm:$0xff] %vm1761_vm1, %v2573_v54  ;;  %v1297_v62 = vpop.f32.mrf.mxu1 }
 0x17a   : > { %2574 = vtanh.f32 %v1658_v57  ;;  %v1298_v1 = vadd.f32 %v1297_v62, %v1128_v59  ;;  %v2189_v57 = vld [vmem:[%s2734_s11 + $0x248] sm:$0xf]  ;;  %v2455_v59 = vld [vmem:[%s2734_s11 + $0x250] sm:$0xf0] }
 0x17b   : > { %1167 = vmatmul.bf16.gmra.mxu0 %v2146_v51  ;;  %2378 = vmatmul.msk.bf16.gmra.mxu3 %vm957_vm0, %v2274_v53 }
 0x17c   : > { %v1467_v3 = vadd.f32 %v1466_v61, %v1298_v1  ;;  %1336 = vmatmul.bf16.gmra.mxu1 %v2150_v63  ;;  %v2178_v61 = vor.u32 %v2452_v13, %v2177_v8 }
 0x17e   : > { %v1591_v4 = vmul.f32 %v2856_v7, %v1467_v3  ;;  %v3147_v5 = vpop.f32.mrf.mxu3  ;;  %v2157_v7 = vld [vmem:[%s2734_s11 + $0x210] sm:$0xf] }
 0x17f   : > { %v2158_v37 = vor.u32 %v2448_v26, %v2157_v7 }
 0x180   : > { %v2575_v14 = vpop.eup %2574  ;;  %v1659_v15 = vadd.f32 %v2861_v9, %v1591_v4  ;;  %v1473_v16 = vpop.f32.mrf.mxu2  ;;  %v3162_v9 = vld [vmem:[%s3376_s2] ss:$0 sm:$0xff] }
 0x181   : > { %v1130_v21 = vpop.f32.mrf.mxu0  ;;  %1787 = vst.msk [vmem:[%s2880_s17 + $0xc8] sm:$0xff] %vm1761_vm1, %v2575_v14  ;;  %v1299_v23 = vpop.f32.mrf.mxu1  ;;  %v2169_v14 = vld [vmem:[%s2734_s11 + $0x228] sm:$0xf] }
 0x182   : > { %2576 = vtanh.f32 %v1659_v15  ;;  %v1300_v24 = vadd.f32 %v1299_v23, %v1130_v21  ;;  %v2451_v15 = vld [vmem:[%s2734_s11 + $0x230] sm:$0xf0]  ;;  %v2450_v21 = vld [vmem:[%s2734_s11 + $0x22c] sm:$0xf]  ;;  %v2171_v23 = vld [vmem:[%s2734_s11 + $0x234] sm:$0xf0] }
 0x184   : > { %v1469_v25 = vadd.f32 %v1468_v29, %v1300_v24  ;;  %v3170_v29 = vld [vmem:[%s3377_s3] ss:$0 sm:$0xff] }
 0x185   : > { %2370 = vmatmul.msk.bf16.gmra.mxu2 %vm957_vm0, %v2178_v61 }
 0x186   : > { %v1592_v31 = vmul.f32 %v3162_v9, %v1469_v25  ;;  %v3165_v34 = vpop.f32.mrf.mxu3  ;;  %v2170_v25 = vor.u32 %v2451_v15, %v2169_v14 }
 0x188   : > { %v2577_v39 = vpop.eup %2576  ;;  %v1660_v43 = vadd.f32 %v3170_v29, %v1592_v31  ;;  %v1476_v44 = vpop.f32.mrf.mxu2  ;;  %v2174_v31 = vor.u32 %v2450_v21, %v2171_v23 }
 0x189   : > { %v1133_v47 = vpop.f32.mrf.mxu0  ;;  %1788 = vst.msk [vmem:[%s2880_s17 + $0xd0] sm:$0xff] %vm1761_vm1, %v2577_v39  ;;  %v1302_v48 = vpop.f32.mrf.mxu1 }
 0x18a   : > { %2578 = vtanh.f32 %v1660_v43  ;;  %v1303_v49 = vadd.f32 %v1302_v48, %v1133_v47  ;;  %v2458_v48 = vld [vmem:[%s2734_s11 + $0x268] sm:$0xf0] }
 0x18b   : > { %1172 = vmatmul.bf16.gmra.mxu0 %v2158_v37 }
 0x18c   : > { %v1472_v51 = vadd.f32 %v1471_v45, %v1303_v49  ;;  %1341 = vmatmul.bf16.gmra.mxu1 %v2162_v38  ;;  %v2190_v45 = vor.u32 %v2455_v59, %v2189_v57  ;;  %v2201_v38 = vld [vmem:[%s2734_s11 + $0x260] sm:$0xf] }
 0x18e   : > { %v1593_v53 = vmul.f32 %v3162_v9, %v1472_v51  ;;  %v3176_v54 = vpop.f32.mrf.mxu3 }
 0x190   : > { %v2579_v63 = vpop.eup %2578  ;;  %v1661_v62 = vadd.f32 %v3170_v29, %v1593_v53  ;;  %v1478_v1 = vpop.f32.mrf.mxu2 }
 0x191   : > { %v1135_v3 = vpop.f32.mrf.mxu0  ;;  %1789 = vst.msk [vmem:[%s2880_s17 + $0xd8] sm:$0xff] %vm1761_vm1, %v2579_v63  ;;  %v1304_v4 = vpop.f32.mrf.mxu1  ;;  %v2202_v63 = vor.u32 %v2458_v48, %v2201_v38 }
 0x192   : > { %2580 = vtanh.f32 %v1661_v62  ;;  %v1305_v8 = vadd.f32 %v1304_v4, %v1135_v3 }
 0x194   : > { %v1474_v13 = vadd.f32 %v1473_v16, %v1305_v8 }
 0x195   : > { %2371 = vmatmul.msk.bf16.gmra.mxu2 %vm957_vm0, %v2190_v45 }
 0x196   : > { %v1594_v61 = vmul.f32 %v3162_v9, %v1474_v13  ;;  %v3189_v24 = vpop.f32.mrf.mxu3 }
 0x198   : > { %v2581_v7 = vpop.eup %2580  ;;  %v1662_v26 = vadd.f32 %v3170_v29, %v1594_v61  ;;  %v1481_v30 = vpop.f32.mrf.mxu2 }
 0x199   : > { %v1138_v18 = vpop.f32.mrf.mxu0  ;;  %1790 = vst.msk [vmem:[%s2880_s17 + $0xe0] sm:$0xff] %vm1761_vm1, %v2581_v7  ;;  %v1307_v16 = vpop.f32.mrf.mxu1 }
 0x19a   : > { %2582 = vtanh.f32 %v1662_v26  ;;  %v1308_v37 = vadd.f32 %v1307_v16, %v1138_v18 }
 0x19b   : > { %1177 = vmatmul.bf16.gmra.mxu0 %v2170_v25 }
 0x19c   : > { %v1477_v39 = vadd.f32 %v1476_v44, %v1308_v37  ;;  %1346 = vmatmul.bf16.gmra.mxu1 %v2174_v31 }
 0x19e   : > { %v1595_v43 = vmul.f32 %v3162_v9, %v1477_v39  ;;  %v3195_v47 = vpop.f32.mrf.mxu3 }
 0x1a0   : > { %v2583_v49 = vpop.eup %2582  ;;  %v1663_v51 = vadd.f32 %v3170_v29, %v1595_v43  ;;  %v1483_v53 = vpop.f32.mrf.mxu2 }
 0x1a1   : > { %v1140_v57 = vpop.f32.mrf.mxu0  ;;  %1791 = vst.msk [vmem:[%s2880_s17 + $0xe8] sm:$0xff] %vm1761_vm1, %v2583_v49  ;;  %v1309_v59 = vpop.f32.mrf.mxu1 }
 0x1a2   : > { %2584 = vtanh.f32 %v1663_v51  ;;  %v1310_v62 = vadd.f32 %v1309_v59, %v1140_v57 }
 0x1a4   : > { %v1479_v44 = vadd.f32 %v1478_v1, %v1310_v62  ;;  %v1363_v1 = vadd.f32 %v3081_v52, %v2910_v6  ;;  %v1365_v52 = vadd.f32 %v3096_v20, %v2925_v27 }
 0x1a5   : > { %2372 = vmatmul.msk.bf16.gmra.mxu2 %vm957_vm0, %v2202_v63 }
 0x1a6   : > { %v1596_v3 = vmul.f32 %v3162_v9, %v1479_v44  ;;  %v3204_v4 = vpop.f32.mrf.mxu3 }
 0x1a8   : > { %v2585_v45 = vpop.eup %2584  ;;  %v1664_v8 = vadd.f32 %v3170_v29, %v1596_v3  ;;  %v1486_v13 = vpop.f32.mrf.mxu2 }
 0x1a9   : > { %v1143_v14 = vpop.f32.mrf.mxu0  ;;  %1792 = vst.msk [vmem:[%s2880_s17 + $0xf0] sm:$0xff] %vm1761_vm1, %v2585_v45  ;;  %v1312_v15 = vpop.f32.mrf.mxu1  ;;  %v1368_v45 = vadd.f32 %v3103_v35, %v2931_v41 }
 0x1aa   : > { %2586 = vtanh.f32 %v1664_v8  ;;  %v1313_v21 = vadd.f32 %v1312_v15, %v1143_v14 }
 0x1ac   : > { %v1482_v23 = vadd.f32 %v1481_v30, %v1313_v21 }
 0x1ae   : > { %v1597_v61 = vmul.f32 %v3162_v9, %v1482_v23  ;;  %v1531_v25 = vpop.f32.mrf.mxu3 }
 0x1af   : > { %v1532_v7 = vadd.f32 %v1531_v25, %v1363_v1 }
 0x1b0   : > { %v2587_v26 = vpop.eup %2586  ;;  %v1665_v18 = vadd.f32 %v3170_v29, %v1597_v61  ;;  %v1488_v31 = vpop.f32.mrf.mxu2 }
 0x1b1   : > { %v1145_v16 = vpop.f32.mrf.mxu0  ;;  %1793 = vst.msk [vmem:[%s2880_s17 + $0xf8] sm:$0xff] %vm1761_vm1, %v2587_v26  ;;  %v1617_v37 = vmul.f32 %v3162_v9, %v1532_v7  ;;  %v1314_v39 = vpop.f32.mrf.mxu1 }
 0x1b2   : > { %2588 = vtanh.f32 %v1665_v18  ;;  %v1315_v30 = vadd.f32 %v1314_v39, %v1145_v16  ;;  %v1370_v18 = vadd.f32 %v3118_v0, %v2946_v60 }
 0x1b3   : > { %v1685_v43 = vadd.f32 %v3170_v29, %v1617_v37 }
 0x1b4   : > { %v1484_v6 = vadd.f32 %v1483_v53, %v1315_v30 }
 0x1b5   : > { %2590 = vtanh.f32 %v1685_v43 }
 0x1b6   : > { %v1598_v38 = vmul.f32 %v3162_v9, %v1484_v6  ;;  %v1533_v48 = vpop.f32.mrf.mxu3 }
 0x1b7   : > { %v1534_v49 = vadd.f32 %v1533_v48, %v1365_v52 }
 0x1b8   : > { %v2589_v51 = vpop.eup %2588  ;;  %v1666_v57 = vadd.f32 %v3170_v29, %v1598_v38  ;;  %v1491_v59 = vpop.f32.mrf.mxu2 }
 0x1b9   : > { %v1148_v63 = vpop.f32.mrf.mxu0  ;;  %1794 = vst.msk [vmem:[%s2880_s17 + $0x100] sm:$0xff] %vm1761_vm1, %v2589_v51  ;;  %v1618_v62 = vmul.f32 %v3162_v9, %v1534_v49  ;;  %v1317_v44 = vpop.f32.mrf.mxu1  ;;  %v1373_v51 = vadd.f32 %v3125_v22, %v2952_v12 }
 0x1ba   : > { %2592 = vtanh.f32 %v1666_v57  ;;  %v1318_v53 = vadd.f32 %v1317_v44, %v1148_v63 }
 0x1bb   : > { %v2591_v27 = vpop.eup %2590  ;;  %v1686_v20 = vadd.f32 %v3170_v29, %v1618_v62 }
 0x1bc   : > { %1814 = vst.msk [vmem:[%s2880_s17 + $0x1a0] sm:$0xff] %vm1761_vm1, %v2591_v27  ;;  %v1487_v3 = vadd.f32 %v1486_v13, %v1318_v53 }
 0x1bd   : > { %2594 = vtanh.f32 %v1686_v20 }
 0x1be   : > { %v1599_v8 = vmul.f32 %v3162_v9, %v1487_v3  ;;  %v1536_v14 = vpop.f32.mrf.mxu3 }
 0x1bf   : > { %v1537_v15 = vadd.f32 %v1536_v14, %v1368_v45  ;;  %v1375_v14 = vadd.f32 %v3140_v50, %v2967_v32 }
 0x1c0   : > { %v2593_v21 = vpop.eup %2592  ;;  %v1667_v23 = vadd.f32 %v3170_v29, %v1599_v8  ;;  %v1493_v1 = vpop.f32.mrf.mxu2 }
 0x1c1   : > { %v1150_v61 = vpop.f32.mrf.mxu0  ;;  %1795 = vst.msk [vmem:[%s2880_s17 + $0x108] sm:$0xff] %vm1761_vm1, %v2593_v21  ;;  %v1619_v25 = vmul.f32 %v3162_v9, %v1537_v15  ;;  %v1319_v7 = vpop.f32.mrf.mxu1 }
 0x1c2   : > { %2596 = vtanh.f32 %v1667_v23  ;;  %v1320_v13 = vadd.f32 %v1319_v7, %v1150_v61 }
 0x1c3   : > { %v2595_v41 = vpop.eup %2594  ;;  %v1687_v35 = vadd.f32 %v3170_v29, %v1619_v25 }
 0x1c4   : > { %1815 = vst.msk [vmem:[%s2880_s17 + $0x1a8] sm:$0xff] %vm1761_vm1, %v2595_v41  ;;  %v1489_v26 = vadd.f32 %v1488_v31, %v1320_v13 }
 0x1c5   : > { %2598 = vtanh.f32 %v1687_v35 }
 0x1c6   : > { %v1600_v16 = vmul.f32 %v3162_v9, %v1489_v26  ;;  %v1538_v37 = vpop.f32.mrf.mxu3 }
 0x1c7   : > { %v1539_v39 = vadd.f32 %v1538_v37, %v1370_v18  ;;  %v1378_v18 = vadd.f32 %v3147_v5, %v2973_v46 }
 0x1c8   : > { %v2597_v30 = vpop.eup %2596  ;;  %v1668_v43 = vadd.f32 %v3170_v29, %v1600_v16  ;;  %v1496_v6 = vpop.f32.mrf.mxu2 }
 0x1c9   : > { %v1153_v52 = vpop.f32.mrf.mxu0  ;;  %1796 = vst.msk [vmem:[%s2880_s17 + $0x110] sm:$0xff] %vm1761_vm1, %v2597_v30  ;;  %v1620_v38 = vmul.f32 %v3162_v9, %v1539_v39  ;;  %v1322_v48 = vpop.f32.mrf.mxu1 }
 0x1ca   : > { %2600 = vtanh.f32 %v1668_v43  ;;  %v1323_v31 = vadd.f32 %v1322_v48, %v1153_v52 }
 0x1cb   : > { %v2599_v60 = vpop.eup %2598  ;;  %v1688_v0 = vadd.f32 %v3170_v29, %v1620_v38 }
 0x1cc   : > { %1816 = vst.msk [vmem:[%s2880_s17 + $0x1b0] sm:$0xff] %vm1761_vm1, %v2599_v60  ;;  %v1492_v49 = vadd.f32 %v1491_v59, %v1323_v31 }
 0x1cd   : > { %2602 = vtanh.f32 %v1688_v0  ;;  %v1380_v0 = vadd.f32 %v3165_v34, %v2988_v2 }
 0x1ce   : > { %v1601_v57 = vmul.f32 %v3162_v9, %v1492_v49  ;;  %v1541_v63 = vpop.f32.mrf.mxu3 }
 0x1cf   : > { %v1542_v62 = vadd.f32 %v1541_v63, %v1373_v51 }
 0x1d0   : > { %v2601_v44 = vpop.eup %2600  ;;  %v1669_v53 = vadd.f32 %v3170_v29, %v1601_v57  ;;  %v1498_v27 = vpop.f32.mrf.mxu2 }
 0x1d1   : > { %v1155_v20 = vpop.f32.mrf.mxu0  ;;  %1797 = vst.msk [vmem:[%s2880_s17 + $0x118] sm:$0xff] %vm1761_vm1, %v2601_v44  ;;  %v1621_v3 = vmul.f32 %v3162_v9, %v1542_v62  ;;  %v1324_v45 = vpop.f32.mrf.mxu1 }
 0x1d2   : > { %2604 = vtanh.f32 %v1669_v53  ;;  %v1325_v59 = vadd.f32 %v1324_v45, %v1155_v20 }
 0x1d3   : > { %v2603_v12 = vpop.eup %2602  ;;  %v1689_v22 = vadd.f32 %v3170_v29, %v1621_v3 }
 0x1d4   : > { %1817 = vst.msk [vmem:[%s2880_s17 + $0x1b8] sm:$0xff] %vm1761_vm1, %v2603_v12  ;;  %v1494_v8 = vadd.f32 %v1493_v1, %v1325_v59  ;;  %v1383_v59 = vadd.f32 %v3176_v54, %v2994_v19 }
 0x1d5   : > { %2606 = vtanh.f32 %v1689_v22 }
 0x1d6   : > { %v1602_v15 = vmul.f32 %v3162_v9, %v1494_v8  ;;  %v1543_v21 = vpop.f32.mrf.mxu3 }
 0x1d7   : > { %v1544_v23 = vadd.f32 %v1543_v21, %v1375_v14 }
 0x1d8   : > { %v2605_v61 = vpop.eup %2604  ;;  %v1670_v25 = vadd.f32 %v3170_v29, %v1602_v15  ;;  %v1501_v7 = vpop.f32.mrf.mxu2 }
 0x1d9   : > { %v1158_v13 = vpop.f32.mrf.mxu0  ;;  %1798 = vst.msk [vmem:[%s2880_s17 + $0x120] sm:$0xff] %vm1761_vm1, %v2605_v61  ;;  %v1622_v41 = vmul.f32 %v3162_v9, %v1544_v23  ;;  %v1327_v35 = vpop.f32.mrf.mxu1 }
 0x1da   : > { %2608 = vtanh.f32 %v1670_v25  ;;  %v1328_v1 = vadd.f32 %v1327_v35, %v1158_v13 }
 0x1db   : > { %v2607_v32 = vpop.eup %2606  ;;  %v1690_v50 = vadd.f32 %v3170_v29, %v1622_v41  ;;  %v1385_v41 = vadd.f32 %v3189_v24, %v3009_v42 }
 0x1dc   : > { %1818 = vst.msk [vmem:[%s2880_s17 + $0x1c0] sm:$0xff] %vm1761_vm1, %v2607_v32  ;;  %v1497_v26 = vadd.f32 %v1496_v6, %v1328_v1 }
 0x1dd   : > { %2610 = vtanh.f32 %v1690_v50 }
 0x1de   : > { %v1603_v16 = vmul.f32 %v3162_v9, %v1497_v26  ;;  %v1546_v37 = vpop.f32.mrf.mxu3 }
 0x1df   : > { %v1547_v39 = vadd.f32 %v1546_v37, %v1378_v18 }
 0x1e0   : > { %v2609_v30 = vpop.eup %2608  ;;  %v1671_v43 = vadd.f32 %v3170_v29, %v1603_v16  ;;  %v1503_v52 = vpop.f32.mrf.mxu2 }
 0x1e1   : > { %v1160_v38 = vpop.f32.mrf.mxu0  ;;  %1799 = vst.msk [vmem:[%s2880_s17 + $0x128] sm:$0xff] %vm1761_vm1, %v2609_v30  ;;  %v1623_v48 = vmul.f32 %v3162_v9, %v1547_v39  ;;  %v1329_v31 = vpop.f32.mrf.mxu1 }
 0x1e2   : > { %2612 = vtanh.f32 %v1671_v43  ;;  %v1330_v6 = vadd.f32 %v1329_v31, %v1160_v38 }
 0x1e3   : > { %v2611_v46 = vpop.eup %2610  ;;  %v1691_v5 = vadd.f32 %v3170_v29, %v1623_v48 }
 0x1e4   : > { %1819 = vst.msk [vmem:[%s2880_s17 + $0x1c8] sm:$0xff] %vm1761_vm1, %v2611_v46  ;;  %v1499_v60 = vadd.f32 %v1498_v27, %v1330_v6 }
 0x1e5   : > { %2614 = vtanh.f32 %v1691_v5 }
 0x1e6   : > { %v1604_v49 = vmul.f32 %v3162_v9, %v1499_v60  ;;  %v1548_v51 = vpop.f32.mrf.mxu3 }
 0x1e7   : > { %v1549_v57 = vadd.f32 %v1548_v51, %v1380_v0 }
 0x1e8   : > { %v2613_v63 = vpop.eup %2612  ;;  %v1672_v62 = vadd.f32 %v3170_v29, %v1604_v49  ;;  %v1506_v44 = vpop.f32.mrf.mxu2 }
 0x1e9   : > { %v1163_v53 = vpop.f32.mrf.mxu0  ;;  %1800 = vst.msk [vmem:[%s2880_s17 + $0x130] sm:$0xff] %vm1761_vm1, %v2613_v63  ;;  %v1624_v20 = vmul.f32 %v3162_v9, %v1549_v57  ;;  %v1332_v3 = vpop.f32.mrf.mxu1  ;;  %v1390_v63 = vadd.f32 %v3204_v4, %v3030_v17 }
 0x1ea   : > { %2616 = vtanh.f32 %v1672_v62  ;;  %v1333_v27 = vadd.f32 %v1332_v3, %v1163_v53 }
 0x1eb   : > { %v2615_v2 = vpop.eup %2614  ;;  %v1692_v34 = vadd.f32 %v3170_v29, %v1624_v20 }
 0x1ec   : > { %1820 = vst.msk [vmem:[%s2880_s17 + $0x1d0] sm:$0xff] %vm1761_vm1, %v2615_v2  ;;  %v1502_v45 = vadd.f32 %v1501_v7, %v1333_v27 }
 0x1ed   : > { %2618 = vtanh.f32 %v1692_v34 }
 0x1ee   : > { %v1605_v12 = vmul.f32 %v3162_v9, %v1502_v45  ;;  %v1551_v22 = vpop.f32.mrf.mxu3 }
 0x1ef   : > { %v1552_v8 = vadd.f32 %v1551_v22, %v1383_v59 }
 0x1f0   : > { %v2617_v14 = vpop.eup %2616  ;;  %v1673_v15 = vadd.f32 %v3170_v29, %v1605_v12  ;;  %v1508_v21 = vpop.f32.mrf.mxu2 }
 0x1f1   : > { %v1165_v23 = vpop.f32.mrf.mxu0  ;;  %1801 = vst.msk [vmem:[%s2880_s17 + $0x138] sm:$0xff] %vm1761_vm1, %v2617_v14  ;;  %v1625_v61 = vmul.f32 %v3162_v9, %v1552_v8  ;;  %v1334_v25 = vpop.f32.mrf.mxu1 }
 0x1f2   : > { %2620 = vtanh.f32 %v1673_v15  ;;  %v1335_v7 = vadd.f32 %v1334_v25, %v1165_v23 }
 0x1f3   : > { %v2619_v19 = vpop.eup %2618  ;;  %v1693_v54 = vadd.f32 %v3170_v29, %v1625_v61 }
 0x1f4   : > { %1821 = vst.msk [vmem:[%s2880_s17 + $0x1d8] sm:$0xff] %vm1761_vm1, %v2619_v19  ;;  %v1504_v13 = vadd.f32 %v1503_v52, %v1335_v7  ;;  %v1388_v52 = vadd.f32 %v3195_v47, %v3015_v55 }
 0x1f5   : > { %2622 = vtanh.f32 %v1693_v54  ;;  %v1353_v54 = vadd.f32 %v3037_v33, %v2864_v11  ;;  %v1355_v11 = vadd.f32 %v3052_v56, %v2883_v28 }
 0x1f6   : > { %v1606_v35 = vmul.f32 %v3162_v9, %v1504_v13  ;;  %v1553_v1 = vpop.f32.mrf.mxu3 }
 0x1f7   : > { %v1554_v32 = vadd.f32 %v1553_v1, %v1385_v41 }
 0x1f8   : > { %v2621_v50 = vpop.eup %2620  ;;  %v1674_v26 = vadd.f32 %v3170_v29, %v1606_v35  ;;  %v1511_v18 = vpop.f32.mrf.mxu2 }
 0x1f9   : > { %v1168_v16 = vpop.f32.mrf.mxu0  ;;  %1802 = vst.msk [vmem:[%s2880_s17 + $0x140] sm:$0xff] %vm1761_vm1, %v2621_v50  ;;  %v1626_v37 = vmul.f32 %v3162_v9, %v1554_v32  ;;  %v1337_v39 = vpop.f32.mrf.mxu1 }
 0x1fa   : > { %2624 = vtanh.f32 %v1674_v26  ;;  %v1338_v30 = vadd.f32 %v1337_v39, %v1168_v16 }
 0x1fb   : > { %v2623_v42 = vpop.eup %2622  ;;  %v1694_v24 = vadd.f32 %v3170_v29, %v1626_v37 }
 0x1fc   : > { %1822 = vst.msk [vmem:[%s2880_s17 + $0x1e0] sm:$0xff] %vm1761_vm1, %v2623_v42  ;;  %v1507_v43 = vadd.f32 %v1506_v44, %v1338_v30 }
 0x1fd   : > { %2626 = vtanh.f32 %v1694_v24 }
 0x1fe   : > { %v1607_v38 = vmul.f32 %v3162_v9, %v1507_v43  ;;  %v1556_v48 = vpop.f32.mrf.mxu3 }
 0x1ff   : > { %v1557_v31 = vadd.f32 %v1556_v48, %v1388_v52 }
 0x200   : > { %v2625_v6 = vpop.eup %2624  ;;  %v1675_v46 = vadd.f32 %v3170_v29, %v1607_v38  ;;  %v1513_v5 = vpop.f32.mrf.mxu2 }
 0x201   : > { %v1170_v60 = vpop.f32.mrf.mxu0  ;;  %1803 = vst.msk [vmem:[%s2880_s17 + $0x148] sm:$0xff] %vm1761_vm1, %v2625_v6  ;;  %v1627_v0 = vmul.f32 %v3162_v9, %v1557_v31  ;;  %v1339_v49 = vpop.f32.mrf.mxu1 }
 0x202   : > { %2628 = vtanh.f32 %v1675_v46  ;;  %v1340_v51 = vadd.f32 %v1339_v49, %v1170_v60  ;;  %v1358_v46 = vadd.f32 %v3059_v10, %v2889_v40  ;;  %v1360_v40 = vadd.f32 %v3074_v36, %v2904_v58 }
 0x203   : > { %v2627_v55 = vpop.eup %2626  ;;  %v1695_v47 = vadd.f32 %v3170_v29, %v1627_v0 }
 0x204   : > { %1823 = vst.msk [vmem:[%s2880_s17 + $0x1e8] sm:$0xff] %vm1761_vm1, %v2627_v55  ;;  %v1509_v57 = vadd.f32 %v1508_v21, %v1340_v51 }
 0x205   : > { %2630 = vtanh.f32 %v1695_v47 }
 0x206   : > { %v1608_v62 = vmul.f32 %v3162_v9, %v1509_v57  ;;  %v1558_v44 = vpop.f32.mrf.mxu3 }
 0x207   : > { %v1559_v53 = vadd.f32 %v1558_v44, %v1390_v63 }
 0x208   : > { %v2629_v20 = vpop.eup %2628  ;;  %v1676_v3 = vadd.f32 %v3170_v29, %v1608_v62  ;;  %v1516_v27 = vpop.f32.mrf.mxu2 }
 0x209   : > { %v1173_v2 = vpop.f32.mrf.mxu0  ;;  %1804 = vst.msk [vmem:[%s2880_s17 + $0x150] sm:$0xff] %vm1761_vm1, %v2629_v20  ;;  %v1628_v34 = vmul.f32 %v3162_v9, %v1559_v53  ;;  %v1342_v45 = vpop.f32.mrf.mxu1 }
 0x20a   : > { %2632 = vtanh.f32 %v1676_v3  ;;  %v1343_v59 = vadd.f32 %v1342_v45, %v1173_v2 }
 0x20b   : > { %v2631_v17 = vpop.eup %2630  ;;  %v1696_v4 = vadd.f32 %v3170_v29, %v1628_v34 }
 0x20c   : > { %1824 = vst.msk [vmem:[%s2880_s17 + $0x1f0] sm:$0xff] %vm1761_vm1, %v2631_v17  ;;  %v1512_v12 = vadd.f32 %v1511_v18, %v1343_v59 }
 0x20d   : > { %2634 = vtanh.f32 %v1696_v4 }
 0x20e   : > { %v1609_v22 = vmul.f32 %v3162_v9, %v1512_v12 }
 0x210   : > { %v2633_v8 = vpop.eup %2632  ;;  %v1677_v14 = vadd.f32 %v3170_v29, %v1609_v22  ;;  %v1518_v15 = vpop.f32.mrf.mxu2 }
 0x211   : > { %v1175_v21 = vpop.f32.mrf.mxu0  ;;  %1805 = vst.msk [vmem:[%s2880_s17 + $0x158] sm:$0xff] %vm1761_vm1, %v2633_v8  ;;  %v1344_v23 = vpop.f32.mrf.mxu1 }
 0x212   : > { %2636 = vtanh.f32 %v1677_v14  ;;  %v1345_v61 = vadd.f32 %v1344_v23, %v1175_v21 }
 0x213   : > { %v2635_v25 = vpop.eup %2634 }
 0x214   : > { %1825 = vst.msk [vmem:[%s2880_s17 + $0x1f8] sm:$0xff] %vm1761_vm1, %v2635_v25  ;;  %v1514_v7 = vadd.f32 %v1513_v5, %v1345_v61 }
 0x216   : > { %v1610_v19 = vmul.f32 %v3162_v9, %v1514_v7 }
 0x218   : > { %v2637_v13 = vpop.eup %2636  ;;  %v1678_v41 = vadd.f32 %v3170_v29, %v1610_v19  ;;  %v1521_v35 = vpop.f32.mrf.mxu2 }
 0x219   : > { %v1178_v1 = vpop.f32.mrf.mxu0  ;;  %1806 = vst.msk [vmem:[%s2880_s17 + $0x160] sm:$0xff] %vm1761_vm1, %v2637_v13  ;;  %v1522_v32 = vadd.f32 %v1521_v35, %v1353_v54  ;;  %v1347_v50 = vpop.f32.mrf.mxu1 }
 0x21a   : > { %2638 = vtanh.f32 %v1678_v41  ;;  %v1348_v26 = vadd.f32 %v1347_v50, %v1178_v1 }
 0x21b   : > { %v1613_v18 = vmul.f32 %v3162_v9, %v1522_v32 }
 0x21c   : > { %v1517_v16 = vadd.f32 %v1516_v27, %v1348_v26 }
 0x21d   : > { %v1681_v37 = vadd.f32 %v3170_v29, %v1613_v18 }
 0x21e   : > { %v1611_v39 = vmul.f32 %v3162_v9, %v1517_v16 }
 0x21f   : > { %2640 = vtanh.f32 %v1681_v37 }
 0x220   : > { %v2639_v33 = vpop.eup %2638  ;;  %v1679_v30 = vadd.f32 %v3170_v29, %v1611_v39  ;;  %v1523_v42 = vpop.f32.mrf.mxu2 }
 0x221   : > { %v1180_v24 = vpop.f32.mrf.mxu0  ;;  %1807 = vst.msk [vmem:[%s2880_s17 + $0x168] sm:$0xff] %vm1761_vm1, %v2639_v33  ;;  %v1524_v43 = vadd.f32 %v1523_v42, %v1355_v11  ;;  %v1349_v52 = vpop.f32.mrf.mxu1 }
 0x222   : > { %2642 = vtanh.f32 %v1679_v30  ;;  %v1350_v38 = vadd.f32 %v1349_v52, %v1180_v24 }
 0x223   : > { %v1614_v48 = vmul.f32 %v3162_v9, %v1524_v43 }
 0x224   : > { %v1519_v31 = vadd.f32 %v1518_v15, %v1350_v38 }
 0x225   : > { %v2641_v6 = vpop.eup %2640  ;;  %v1682_v28 = vadd.f32 %v3170_v29, %v1614_v48 }
 0x226   : > { %1810 = vst.msk [vmem:[%s2880_s17 + $0x180] sm:$0xff] %vm1761_vm1, %v2641_v6  ;;  %v1612_v56 = vmul.f32 %v3162_v9, %v1519_v31 }
 0x227   : > { %2644 = vtanh.f32 %v1682_v28 }
 0x228   : > { %v2643_v5 = vpop.eup %2642  ;;  %v1680_v60 = vadd.f32 %v3170_v29, %v1612_v56  ;;  %v1526_v0 = vpop.f32.mrf.mxu2 }
 0x229   : > { %1808 = vst.msk [vmem:[%s2880_s17 + $0x170] sm:$0xff] %vm1761_vm1, %v2643_v5  ;;  %v1527_v49 = vadd.f32 %v1526_v0, %v1358_v46 }
 0x22a   : > { %2646 = vtanh.f32 %v1680_v60 }
 0x22b   : > { %v1615_v51 = vmul.f32 %v3162_v9, %v1527_v49 }
 0x22d   : > { %v2645_v55 = vpop.eup %2644  ;;  %v1683_v47 = vadd.f32 %v3170_v29, %v1615_v51 }
 0x22e   : > { %1811 = vst.msk [vmem:[%s2880_s17 + $0x188] sm:$0xff] %vm1761_vm1, %v2645_v55 }
 0x22f   : > { %2648 = vtanh.f32 %v1683_v47 }
 0x230   : > { %v2647_v10 = vpop.eup %2646  ;;  %v1528_v57 = vpop.f32.mrf.mxu2 }
 0x231   : > { %1809 = vst.msk [vmem:[%s2880_s17 + $0x178] sm:$0xff] %vm1761_vm1, %v2647_v10  ;;  %v1529_v63 = vadd.f32 %v1528_v57, %v1360_v40 }
 0x233   : > { %v1616_v62 = vmul.f32 %v3162_v9, %v1529_v63 }
 0x235   : > { %v2649_v44 = vpop.eup %2648  ;;  %v1684_v53 = vadd.f32 %v3170_v29, %v1616_v62 }
 0x236   : > { %1812 = vst.msk [vmem:[%s2880_s17 + $0x190] sm:$0xff] %vm1761_vm1, %v2649_v44 }
 0x237   : > { %2650 = vtanh.f32 %v1684_v53 }
 0x23d   : > { %v2651_v20 = vpop.eup %2650 }
 0x23e   : > { %1813 = vst.msk [vmem:[%s2880_s17 + $0x198] sm:$0xff] %vm1761_vm1, %v2651_v20 }
 0x23f PF: > { %s14_s15 = sadd.s32 1, %s2660_s15  }
 0x240   : > { %p11_p4 = scmp.ge.s32.totalorder %s14_s15, 18  }
 0x242   :  { %13 = sbr.rel (!%p11_p4) target bundleno = 1 (0x1), region = 66 }

</bundles_post_ra>
